<compile_context>
chip_gen: v7x
topology: tpu7x:2x2x1
jax: 0.10.0
libtpu: 0.0.40
codegen_flags: <defaults>
</compile_context>

<pallas_src>
import jax
import jax.numpy as jnp
from jax import lax
from jax.experimental import pallas as pl
from jax.experimental.pallas import tpu as pltpu

IN_FEATURES = 96
OUT_FEATURES = 384

# Abramowitz & Stegun 7.1.26 erf coefficients (max abs error ~1.5e-7).
_ERF_P = 0.3275911
_ERF_A1 = 0.254829592
_ERF_A2 = -0.284496736
_ERF_A3 = 1.421413741
_ERF_A4 = -1.453152027
_ERF_A5 = 1.061405429
_INV_SQRT2 = 0.7071067811865476


def linear_gelu_kernel(x_ref, w_ref, b_ref, o_ref):
    # x_ref: (TM, 96), w_ref: (96, 384), b_ref: (1, 384), o_ref: (TM, 384)
    acc = jnp.dot(
        x_ref[...], w_ref[...],
        preferred_element_type=jnp.float32,
        precision=lax.Precision.HIGHEST,   # true-f32 contract vs PyTorch ref
    )
    acc = acc + b_ref[...]                 # bias already f32, broadcasts rows

    # Exact GELU: 0.5 * x * (1 + erf(x / sqrt(2))).
    # erf via A&S 7.1.26 with odd symmetry: EUP exp + exact reciprocal + a
    # short Horner polynomial instead of XLA's long VALU erf polynomial.
    z = acc * jnp.float32(_INV_SQRT2)
    az = jnp.abs(z)
    t = pl.reciprocal(jnp.float32(1.0) + jnp.float32(_ERF_P) * az)
    poly = t * (jnp.float32(_ERF_A1)
                + t * (jnp.float32(_ERF_A2)
                       + t * (jnp.float32(_ERF_A3)
                              + t * (jnp.float32(_ERF_A4)
                                     + t * jnp.float32(_ERF_A5)))))
    erf_abs = jnp.float32(1.0) - poly * jnp.exp(-az * az)
    erf = jnp.where(z >= 0, erf_abs, -erf_abs)

    gelu = jnp.float32(0.5) * acc * (jnp.float32(1.0) + erf)
    o_ref[...] = gelu.astype(o_ref.dtype)


def _pick_tm(m, *, min_steps=8, max_tm=1024):
    """Pick a row tile (multiple of 8).

    Prefer an exact divisor of M (no ragged last block, zero padding) that
    gives >= min_steps grid steps so the double-buffered pipeline fills on
    both TensorCores of megacore parts (>= 4 steps/TC on v7x).  Falls back
    to a ragged final block (masked by Pallas) if M has no suitable divisor.
    """
    cap = min(max_tm, m)
    cap -= cap % 8
    if cap < 8:
        return 8  # tiny problem: single (masked) tile
    divisors = [d for d in range(8, cap + 1, 8) if m % d == 0]
    if divisors:
        deep = [d for d in divisors if m // d >= min_steps]
        return max(deep) if deep else max(divisors)
    return cap  # no exact divisor: ragged final block, Pallas masks stores


def prepare_params(weight, bias):
    """Hoist parameter prep out of the per-call hot path.

    weight: [384, 96] (PyTorch Linear layout); bias: [384].
    Returns (w_t, b2d) with w_t: [96, 384], b2d: [1, 384], both f32.
    """
    w_t = jnp.asarray(weight, jnp.float32).T
    b2d = jnp.asarray(bias, jnp.float32).reshape(1, OUT_FEATURES)
    return w_t, b2d


def linear_gelu(x, w_t, b2d, *, tm=None):
    """x: [B, H, W, 96]; w_t: [96, 384] (pre-transposed); b2d: [1, 384]."""
    b, h, w, c_in = x.shape
    assert c_in == IN_FEATURES
    m = b * h * w
    x2d = x.reshape(m, c_in)

    if tm is None:
        tm = _pick_tm(m)
    n_tiles = pl.cdiv(m, tm)

    out2d = pl.pallas_call(
        linear_gelu_kernel,
        out_shape=jax.ShapeDtypeStruct((m, OUT_FEATURES), x.dtype),
        grid_spec=pltpu.PrefetchScalarGridSpec(
            num_scalar_prefetch=0,
            grid=(n_tiles,),
            in_specs=[
                pl.BlockSpec((tm, IN_FEATURES), lambda i: (i, 0)),
                pl.BlockSpec((IN_FEATURES, OUT_FEATURES), lambda i: (0, 0)),
                pl.BlockSpec((1, OUT_FEATURES), lambda i: (0, 0)),
            ],
            out_specs=pl.BlockSpec((tm, OUT_FEATURES), lambda i: (i, 0)),
        ),
        compiler_params=pltpu.CompilerParams(
            dimension_semantics=("parallel",),
        ),
    )(x2d, w_t, b2d)

    return out2d.reshape(b, h, w, OUT_FEATURES)


if __name__ == "__main__":
    key = jax.random.PRNGKey(0)
    kx, kw, kb = jax.random.split(key, 3)

    # Shape consistent with the module: Linear over last dim (96 -> 384).
    x = jax.random.normal(kx, (1, 56, 56, IN_FEATURES), dtype=jnp.float32)

    # Deterministic parameters (PyTorch Linear shapes: W [384, 96], b [384]).
    bound = 1.0 / (IN_FEATURES ** 0.5)
    weight = jax.random.uniform(
        kw, (OUT_FEATURES, IN_FEATURES), dtype=jnp.float32,
        minval=-bound, maxval=bound)
    bias = jax.random.uniform(
        kb, (OUT_FEATURES,), dtype=jnp.float32, minval=-bound, maxval=bound)

    w_t, b2d = prepare_params(weight, bias)
    out = linear_gelu(x, w_t, b2d)
    jax.block_until_ready(out)

    # Reference in plain JAX: f32 matmul (HIGHEST precision, same contract as
    # the kernel / a true f32 PyTorch reference) + exact GELU with lax.erf.
    ref_lin = jnp.dot(x.reshape(-1, IN_FEATURES), weight.T,
                      precision=lax.Precision.HIGHEST) + bias
    ref = 0.5 * ref_lin * (1.0 + lax.erf(ref_lin * jnp.float32(_INV_SQRT2)))
    ref = ref.reshape(1, 56, 56, OUT_FEATURES)

    assert out.shape == (1, 56, 56, OUT_FEATURES)
    assert jnp.allclose(out, ref, atol=1e-5, rtol=1e-5)

    print("KERNEL_OK")
</pallas_src>

<mosaic_0001>
module attributes {stable_mosaic.version = 11 : i64} {
  func.func @linear_gelu_kernel(%arg0: i32, %arg1: memref<392x96xf32, #tpu.memory_space<vmem>>, %arg2: memref<96x384xf32, #tpu.memory_space<vmem>>, %arg3: memref<1x384xf32, #tpu.memory_space<vmem>>, %arg4: memref<392x384xf32, #tpu.memory_space<vmem>>) attributes {dimension_semantics = [#tpu.dimension_semantics<parallel>], iteration_bounds = array<i64: 8>, scalar_prefetch = 0 : i64, scratch_operands = 0 : i64, tpu.core_type = #tpu.core_type<tc>, window_params = [{transform_indices = @transform_0, window_bounds = array<i64: 392, 96>}, {pipeline_mode = #tpu.pipeline_mode<synchronous>, transform_indices = @transform_1, window_bounds = array<i64: 96, 384>}, {pipeline_mode = #tpu.pipeline_mode<synchronous>, transform_indices = @transform_2, window_bounds = array<i64: 1, 384>}, {transform_indices = @transform_3, window_bounds = array<i64: 392, 384>}]} {
    %c0 = arith.constant 0 : index
    %c0_0 = arith.constant 0 : index
    %0 = vector.load %arg1[%c0, %c0_0] : memref<392x96xf32, #tpu.memory_space<vmem>>, vector<392x96xf32>
    %c0_1 = arith.constant 0 : index
    %c0_2 = arith.constant 0 : index
    %1 = vector.load %arg2[%c0_1, %c0_2] : memref<96x384xf32, #tpu.memory_space<vmem>>, vector<96x384xf32>
    %cst = arith.constant dense<0.000000e+00> : vector<392x384xf32>
    %2 = tpu.matmul %0, %1, %cst {dimension_numbers = #tpu.dot_dimension_numbers<[1], [0], [0], [1], [0, 0, 1, 1], [], []>, precision = #tpu.contract_precision<fp32>} : vector<392x96xf32>, vector<96x384xf32>, vector<392x384xf32> -> vector<392x384xf32>
    %c0_3 = arith.constant 0 : index
    %c0_4 = arith.constant 0 : index
    %3 = vector.load %arg3[%c0_3, %c0_4] : memref<1x384xf32, #tpu.memory_space<vmem>>, vector<1x384xf32>
    %4 = vector.broadcast %3 : vector<1x384xf32> to vector<392x384xf32>
    %5 = arith.addf %2, %4 : vector<392x384xf32>
    %cst_5 = arith.constant 0.707106769 : f32
    %6 = vector.broadcast %cst_5 : f32 to vector<392x384xf32>
    %7 = arith.mulf %5, %6 : vector<392x384xf32>
    %8 = math.absf %7 : vector<392x384xf32>
    %cst_6 = arith.constant 0.327591091 : f32
    %9 = vector.broadcast %cst_6 : f32 to vector<392x384xf32>
    %10 = arith.mulf %9, %8 : vector<392x384xf32>
    %cst_7 = arith.constant 1.000000e+00 : f32
    %11 = vector.broadcast %cst_7 : f32 to vector<392x384xf32>
    %12 = arith.addf %11, %10 : vector<392x384xf32>
    %13 = tpu.reciprocal %12 : vector<392x384xf32> -> vector<392x384xf32>
    %cst_8 = arith.constant 1.06140542 : f32
    %14 = vector.broadcast %cst_8 : f32 to vector<392x384xf32>
    %15 = arith.mulf %13, %14 : vector<392x384xf32>
    %cst_9 = arith.constant -1.45315206 : f32
    %16 = vector.broadcast %cst_9 : f32 to vector<392x384xf32>
    %17 = arith.addf %16, %15 : vector<392x384xf32>
    %18 = arith.mulf %13, %17 : vector<392x384xf32>
    %cst_10 = arith.constant 1.42141378 : f32
    %19 = vector.broadcast %cst_10 : f32 to vector<392x384xf32>
    %20 = arith.addf %19, %18 : vector<392x384xf32>
    %21 = arith.mulf %13, %20 : vector<392x384xf32>
    %cst_11 = arith.constant -0.284496725 : f32
    %22 = vector.broadcast %cst_11 : f32 to vector<392x384xf32>
    %23 = arith.addf %22, %21 : vector<392x384xf32>
    %24 = arith.mulf %13, %23 : vector<392x384xf32>
    %cst_12 = arith.constant 0.254829586 : f32
    %25 = vector.broadcast %cst_12 : f32 to vector<392x384xf32>
    %26 = arith.addf %25, %24 : vector<392x384xf32>
    %27 = arith.mulf %13, %26 : vector<392x384xf32>
    %cst_13 = arith.constant 0.000000e+00 : f32
    %28 = vector.broadcast %cst_13 : f32 to vector<392x384xf32>
    %29 = arith.subf %28, %8 : vector<392x384xf32>
    %30 = arith.mulf %29, %8 : vector<392x384xf32>
    %31 = math.exp %30 : vector<392x384xf32>
    %32 = arith.mulf %27, %31 : vector<392x384xf32>
    %cst_14 = arith.constant 1.000000e+00 : f32
    %33 = vector.broadcast %cst_14 : f32 to vector<392x384xf32>
    %34 = arith.subf %33, %32 : vector<392x384xf32>
    %cst_15 = arith.constant 0.000000e+00 : f32
    %35 = vector.broadcast %cst_15 : f32 to vector<392x384xf32>
    %36 = arith.cmpf oge, %7, %35 : vector<392x384xf32>
    %cst_16 = arith.constant 0.000000e+00 : f32
    %37 = vector.broadcast %cst_16 : f32 to vector<392x384xf32>
    %38 = arith.subf %37, %34 : vector<392x384xf32>
    %39 = arith.select %36, %34, %38 : vector<392x384xi1>, vector<392x384xf32>
    %cst_17 = arith.constant 5.000000e-01 : f32
    %40 = vector.broadcast %cst_17 : f32 to vector<392x384xf32>
    %41 = arith.mulf %40, %5 : vector<392x384xf32>
    %cst_18 = arith.constant 1.000000e+00 : f32
    %42 = vector.broadcast %cst_18 : f32 to vector<392x384xf32>
    %43 = arith.addf %42, %39 : vector<392x384xf32>
    %44 = arith.mulf %41, %43 : vector<392x384xf32>
    %c0_19 = arith.constant 0 : index
    %c0_20 = arith.constant 0 : index
    %45 = vector.load %arg4[%c0_19, %c0_20] : memref<392x384xf32, #tpu.memory_space<vmem>>, vector<392x384xf32>
    tpu.vector_store %arg4[%c0_19, %c0_20], %44 {strides = array<i32>} : memref<392x384xf32, #tpu.memory_space<vmem>>, vector<392x384xf32>,
    return
  }
  func.func @transform_0(%arg0: i32) -> (i32, i32) {
    %c0_i32 = arith.constant 0 : i32
    %c0_i32_0 = arith.constant 0 : i32
    return %arg0, %c0_i32 : i32, i32
  }
  func.func @transform_1(%arg0: i32) -> (i32, i32) {
    %c0_i32 = arith.constant 0 : i32
    %c0_i32_0 = arith.constant 0 : i32
    %c0_i32_1 = arith.constant 0 : i32
    return %c0_i32, %c0_i32_0 : i32, i32
  }
  func.func @transform_2(%arg0: i32) -> (i32, i32) {
    %c0_i32 = arith.constant 0 : i32
    %c0_i32_0 = arith.constant 0 : i32
    %c0_i32_1 = arith.constant 0 : i32
    return %c0_i32, %c0_i32_0 : i32, i32
  }
  func.func @transform_3(%arg0: i32) -> (i32, i32) {
    %c0_i32 = arith.constant 0 : i32
    %c0_i32_0 = arith.constant 0 : i32
    return %arg0, %c0_i32 : i32, i32
  }
}

</mosaic_0001>

<bundles_post_ra>
// kernel: tpu_custom_call.1
= control target key start
LH: loop header
LB: loop body
LE: loop exit
PB: predicated region body
PF: predicated region fallthrough
CT: control target
= control target key end

     0   :  { %8 = vsyncpa [#allocation3], 0  ;;  %s20143_s0 = inlined_call_operand.vmem [shape: f32[3136,96], index: 0, kind: input, shape index: {}]   ;;  %s20144_s1 = inlined_call_operand.vmem [shape: f32[96,384], index: 1, kind: input, shape index: {}]   ;;  %s20145_s2 = inlined_call_operand.vmem [shape: f32[1,384], index: 2, kind: input, shape index: {}]   ;;  %s20146_s3 = inlined_call_operand.hbm [shape: f32[3136,384], index: 3, kind: output, shape index: {}]  }
   0x1   :  { %10 = vsyncpa [#allocation3 + $0x1], 0  ;;  %s13728_s12 = smov 0   ;;  %s13730_s13 = smov 0  }
   0x2   :  { %s13732_s14 = smov 0   ;;  %s13734_s15 = smov 0  }
   0x3 LB: > { %s13749_s16 = sadd.s32 4294967295, %s13700_s15   ;;  %s10224_s17 = sadd.s32 4294967294, %s13700_s15   ;;  %s13700_s15 = sphi %s13734_s15, %s21003_s15   ;;  %s13696_s14 = sphi %s13732_s14, %s21002_s14   ;;  %s13692_s13 = sphi %s13730_s13, %s21001_s13   ;;  %s13688_s12 = sphi %s13728_s12, %s21000_s12  }
   0x4   : > { %s13753_s18 = sadd.s32 1, %s13700_s15   ;;  %s91_s19 = sadd.s32 1, %s13696_s14 }
   0x5   : > { %s88_s20 = ssub.s32 %s13700_s15, %s13753_s18  ;;  %p101_p0 = scmp.ne.s32.totalorder %s13696_s14, %s13692_s13 }
   0x6   : > { %p89_p1 = scmp.eq.s32.totalorder %s88_s20, 0  ;;  %p102_p2 = scmp.eq.s32.totalorder %s13749_s16, 7 }
   0x7   : > { %p107_p3 = scmp.ne.s32.totalorder %s13692_s13, %s13688_s12  ;;  %p108_p4 = scmp.eq.s32.totalorder %s10224_s17, 7 }
   0x8   : > { %s13764_s21 = scalar_select %p89_p1, %s13696_s14, %s91_s19  }
   0x9   : > { %p13766_p5 = por %p102_p2, %p101_p0  ;;  %p13770_p6 = por %p108_p4, %p107_p3 }
   0xa   : > { %p10227_p7 = scmp.ge.s32.totalorder %s13700_s15, 1  ;;  %p141_p8 = scmp.lt.s32.totalorder %s13700_s15, 9 }
   0xc   : > { %p142_p9 = pnand %p10227_p7, %p141_p8 }
   0xe   : > { %145 = sbr.rel (%p142_p9) target bundleno = 2281 (0x8e9), region = 32 }
  0x15   : > { %v13779_v0 = vld [vmem:[%s20144_s1 + $0x8] sm:$0xff]  ;;  %v13784_v1 = vld [vmem:[%s20144_s1 + $0x20] sm:$0xff]  ;;  %v13789_v2 = vld [vmem:[%s20144_s1 + $0x10] sm:$0xff]  ;;  %v20165_v3 = vmov 0.0|0.0   ;;  %vm13703_vm0 = vmmov 0   ;;  %v20161_v10 = vmov 0.0  }
  0x16   : > { %11768 = vmatprep.subr.bf16.mxu1 %v20165_v3  ;;  %v422_v4 = vand.u32 4294901760, %v13779_v0  ;;  %v426_v5 = vand.u32 4294901760, %v13784_v1  ;;  %v13797_v6 = vld [vmem:[%s20144_s1 + $0x28] sm:$0xff]  ;;  %v3526_v7 = vand.u32 4294901760, %v13789_v2  ;;  %v13803_v8 = vld [vmem:[%s20144_s1] sm:$0xff]  ;;  %v13808_v9 = vld [vmem:[%s20144_s1 + $0x18] sm:$0xff]  ;;  %10622 = vmatprep.mubr.msk.f32.mxu1 %vm13703_vm0, %v20161_v10 }
  0x17   : > { %v3529_v11 = vand.u32 4294901760, %v13797_v6  ;;  %v424_v12 = vand.u32 4294901760, %v13803_v8  ;;  %v428_v13 = vand.u32 4294901760, %v13808_v9  ;;  %v13818_v14 = vld [vmem:[%s20144_s1 + $0x38] sm:$0xff]  ;;  %v13823_v15 = vld [vmem:[%s20144_s1 + $0x50] sm:$0xff]  ;;  %v13828_v16 = vld [vmem:[%s20144_s1 + $0x40] sm:$0xff]  ;;  %510 = vmatprep.mubr.f32.mxu0 %v20161_v10 }
  0x18   : > { %v13835_v17 = vpack.c.bf16 %v426_v5, %v422_v4  ;;  %v13840_v18 = vld [vmem:[%s20144_s1 + $0x58] sm:$0xff]  ;;  %v13845_v19 = vld [vmem:[%s20144_s1 + $0x30] sm:$0xff]  ;;  %v13850_v20 = vld [vmem:[%s20144_s1 + $0x48] sm:$0xff]  ;;  %s165_s30 = smul.u32 49, %s13749_s16  ;;  %v20164_v24 = vand.u32 4294901760, %v13818_v14  ;;  %v20163_v25 = vand.u32 4294901760, %v13823_v15  ;;  %v13985_v54 = vsub.f32 %v13779_v0, %v422_v4 }
  0x19   : > { %v13857_v21 = vpack.c.bf16 %v3529_v11, %v3526_v7  ;;  %v13863_v22 = vpack.c.bf16 %v428_v13, %v424_v12  ;;  %v13868_v23 = vld [vmem:[%s20144_s1 + $0x68] sm:$0xff]  ;;  %v20158_v26 = vand.u32 4294901760, %v13828_v16  ;;  %v20157_v27 = vand.u32 4294901760, %v13840_v18  ;;  %v13882_v30 = vld [vmem:[%s20144_s1 + $0x80] sm:$0xff]  ;;  %v13887_v31 = vld [vmem:[%s20144_s1 + $0x70] sm:$0xff]  ;;  %s162_s7 = sand.u32 1, %s13692_s13  }
  0x1a   : > { %20552 = vst [vmem:[#allocation5_spill] sm:$0xff] %v13835_v17  ;;  %11625 = vmatprep.subr.bf16.mxu0 %v13835_v17  ;;  %v20160_v28 = vand.u32 4294901760, %v13845_v19  ;;  %v20159_v29 = vand.u32 4294901760, %v13850_v20  ;;  %v13892_v32 = vld [vmem:[%s20144_s1 + $0x88] sm:$0xff]  ;;  %v13899_v33 = vpack.c.bf16 %v20163_v25, %v20164_v24  ;;  %v20156_v34 = vand.u32 4294901760, %v13868_v23  ;;  %v13905_v35 = vld [vmem:[%s20144_s1 + $0x60] sm:$0xff] }
  0x1b   : > { %20553 = vst [vmem:[#allocation6_spill] sm:$0xff] %v13857_v21  ;;  %20554 = vst [vmem:[#allocation7_spill] sm:$0xff] %v13863_v22  ;;  %11770 = vmatpush3.bf16.msra.mxu1 %v13857_v21  ;;  %11627 = vmatpush1.bf16.msra.mxu0 %v13863_v22  ;;  %v13910_v36 = vld [vmem:[%s20144_s1 + $0x78] sm:$0xff]  ;;  %p13919_p10 = scmp.lt.s32.totalorder %s165_s30, 391  ;;  %v13927_v38 = vpack.c.bf16 %v20157_v27, %v20158_v26  ;;  %v13938_v40 = vld [vmem:[%s20144_s1 + $0xb0] sm:$0xff]  ;;  %v20153_v41 = vand.u32 4294901760, %v13882_v30  ;;  %v14011_v60 = vsub.f32 %v13784_v1, %v426_v5 }
  0x1c   : > { %11771 = vmatprep.subr.bf16.mxu1 %v20165_v3  ;;  %20555 = vst [vmem:[#allocation8_spill] sm:$0xff] %v13899_v33  ;;  %v13915_v37 = vld [vmem:[%s20144_s1 + $0x98] sm:$0xff]  ;;  %v13933_v39 = vpack.c.bf16 %v20159_v29, %v20160_v28  ;;  %11629 = vmatprep.subr.bf16.mxu0 %v13899_v33  ;;  %v20150_v42 = vand.u32 4294901760, %v13887_v31  ;;  %v20149_v43 = vand.u32 4294901760, %v13892_v32  ;;  %v20152_v44 = vand.u32 4294901760, %v13905_v35  ;;  %v241_v47 = vld [vmem:[%s20144_s1 + $0xa0] sm:$0xff] }
  0x1d   : > { %20557 = vst [vmem:[#allocation9_spill] sm:$0xff] %v13927_v38  ;;  %v20151_v45 = vand.u32 4294901760, %v13910_v36  ;;  %v20148_v46 = vand.u32 4294901760, %v13915_v37  ;;  %v244_v48 = vld [vmem:[%s20144_s1 + $0xb8] sm:$0xff]  ;;  %v13960_v49 = vpack.c.bf16 %v20153_v41, %v20156_v34  ;;  %v20147_v50 = vand.u32 4294901760, %v13938_v40  ;;  %v13966_v51 = vld [vmem:[%s20144_s1 + $0x90] sm:$0xff] }
  0x1e   : > { %20558 = vst [vmem:[#allocation10_spill] sm:$0xff] %v13933_v39  ;;  %v13971_v52 = vld [vmem:[%s20144_s1 + $0xa8] sm:$0xff]  ;;  %s21005_s30 = smov (!%p13919_p10, %s165_s30), 391  ;;  %20560 = vst [vmem:[#allocation12_spill] sm:$0xff] %v13985_v54  ;;  %v13991_v55 = vpack.c.bf16 %v20149_v43, %v20150_v42  ;;  %v249_v57 = vld [vmem:[%s20144_s1 + $0xe0] sm:$0xff]  ;;  %v14016_v61 = vsub.f32 %v13789_v2, %v3526_v7  ;;  %v14021_v62 = vsub.f32 %v13797_v6, %v3529_v11  ;;  %v3544_v0 = vand.u32 4294901760, %v241_v47 }
  0x1f   : > { %11773 = vmatpush3.bf16.msra.mxu1 %v13927_v38  ;;  %11631 = vmatpush1.bf16.msra.mxu0 %v13933_v39  ;;  %20559 = vst [vmem:[#allocation11_spill] sm:$0xff] %v13960_v49  ;;  %v246_v53 = vld [vmem:[%s20144_s1 + $0xc8] sm:$0xff]  ;;  %v13997_v56 = vpack.c.bf16 %v20151_v45, %v20152_v44  ;;  %v247_v58 = vld [vmem:[%s20144_s1 + $0xd0] sm:$0xff]  ;;  %20563 = vst [vmem:[#allocation15_spill] sm:$0xff] %v14011_v60  ;;  %v14028_v63 = vpack.c.bf16 %v20147_v50, %v20148_v46  ;;  %v3547_v1 = vand.u32 4294901760, %v244_v48  ;;  %s10228_s5 = sshll.u32 %s21005_s30, 3 }
  0x20   : > { %11774 = vmatprep.subr.bf16.mxu1 %v20165_v3  ;;  %20561 = vst [vmem:[#allocation13_spill] sm:$0xff] %v13991_v55  ;;  %v250_v59 = vld [vmem:[%s20144_s1 + $0xe8] sm:$0xff]  ;;  %11633 = vmatprep.subr.bf16.mxu0 %v13960_v49  ;;  %v20155_v2 = vand.u32 4294901760, %v13966_v51  ;;  %v20154_v4 = vand.u32 4294901760, %v13971_v52  ;;  %v454_v5 = vand.u32 4294901760, %v246_v53  ;;  %v458_v6 = vand.u32 4294901760, %v249_v57  ;;  %s14095_s28 = scalar_lea.vmem %s20143_s0, %s10228_s5 }
  0x21   : > { %20562 = vst [vmem:[#allocation14_spill] sm:$0xff] %v13997_v56  ;;  %20564 = vst [vmem:[#allocation16_spill] sm:$0xff] %v14028_v63  ;;  %v3550_v7 = vand.u32 4294901760, %v247_v58  ;;  %v3553_v11 = vand.u32 4294901760, %v250_v59  ;;  %v245_v50 = vld [vmem:[%s20144_s1 + $0xc0] sm:$0xff]  ;;  %v14040_v46 = vpack.c.bf16 %v3547_v1, %v3544_v0  ;;  %v14042_v43 = vsub.f32 %v241_v47, %v3544_v0  ;;  %v248_v44 = vld [vmem:[%s20144_s1 + $0xd8] sm:$0xff] }
  0x22   : > { %v14044_v42 = vsub.f32 %v244_v48, %v3547_v1  ;;  %v14050_v45 = vpack.c.bf16 %v20154_v4, %v20155_v2  ;;  %v252_v41 = vld [vmem:[%s20144_s1 + $0xf8] sm:$0xff]  ;;  %v255_v47 = vld [vmem:[%s20144_s1 + $0x110] sm:$0xff]  ;;  %v14064_v48 = vsub.f32 %v13803_v8, %v424_v12  ;;  %v14069_v0 = vsub.f32 %v13808_v9, %v428_v13  ;;  %v253_v2 = vld [vmem:[%s20144_s1 + $0x100] sm:$0xff]  ;;  %s16700_s8 = smul.u32 1176, %s162_s7  ;;  %s13705_s24 = smov [#allocation2]  }
  0x23   : > { %11776 = vmatpush3.bf16.msra.mxu1 %v13991_v55  ;;  %11635 = vmatpush1.bf16.msra.mxu0 %v13997_v56  ;;  %20565 = vst [vmem:[#allocation17_spill] sm:$0xff] %v14040_v46  ;;  %v14071_v1 = vpack.c.bf16 %v458_v6, %v454_v5  ;;  %v14073_v4 = vsub.f32 %v246_v53, %v454_v5  ;;  %v256_v34 = vld [vmem:[%s20144_s1 + $0x118] sm:$0xff]  ;;  %v251_v8 = vld [vmem:[%s20144_s1 + $0xf0] sm:$0xff]  ;;  %v456_v53 = vand.u32 4294901760, %v245_v50  ;;  %v460_v27 = vand.u32 4294901760, %v248_v44  ;;  %v254_v29 = vld [vmem:[%s20144_s1 + $0x108] sm:$0xff] }
  0x24   : > { %11777 = vmatprep.subr.bf16.mxu1 %v20165_v3  ;;  %11637 = vmatprep.subr.bf16.mxu0 %v14028_v63  ;;  %20566 = vst [vmem:[#allocation18_spill] sm:$0xff] %v14050_v45  ;;  %v14086_v9 = vsub.f32 %v249_v57, %v458_v6  ;;  %v14088_v12 = vpack.c.bf16 %v3553_v11, %v3550_v7  ;;  %v462_v57 = vand.u32 4294901760, %v252_v41  ;;  %v466_v6 = vand.u32 4294901760, %v255_v47  ;;  %v178_v21 = vld [vmem:[%s14095_s28 + $0x30] sm:$0xff]  ;;  %s16725_s9 = scalar_lea.vmem [#allocation2], %s16700_s8  ;;  %s13011_s30 = smul.u32 18816, %s13749_s16 }
  0x25   : > { %20567 = vst [vmem:[#allocation19_spill] sm:$0xff] %v14071_v1  ;;  %v14090_v13 = vsub.f32 %v247_v58, %v3550_v7  ;;  %v14099_v5 = vsub.f32 %v250_v59, %v3553_v11  ;;  %v14101_v26 = vsub.f32 %v245_v50, %v456_v53  ;;  %v3556_v58 = vand.u32 4294901760, %v253_v2  ;;  %v172_v11 = vld [vmem:[%s14095_s28] sm:$0xff]  ;;  %s10162_s10 = sshll.u32 %s16725_s9, 4  ;;  %s20102_s16 = scalar_lea.sflag [#allocation3], %s162_s7  ;;  %s20097_s10 = int_to_ptr.vmem [resolvable:$true] %s10162_s10 }
  0x26   : > { %20568 = vst [vmem:[#allocation20_spill] sm:$0xff] %v14088_v12  ;;  %v3559_v7 = vand.u32 4294901760, %v256_v34  ;;  %v464_v28 = vand.u32 4294901760, %v251_v8  ;;  %v14106_v10 = vpack.c.bf16 %v460_v27, %v456_v53  ;;  %v14108_v25 = vsub.f32 %v248_v44, %v460_v27  ;;  %s20095_s19 = scalar_lea.hbm %s20146_s3, %s13011_s30  ;;  %s13638_s20 = scalar_lea.vmem %s20097_s10, 18816 }
  0x27   : > { %11779 = vmatpush3.bf16.msra.mxu1 %v14040_v46  ;;  %11639 = vmatpush1.bf16.msra.mxu0 %v14050_v45  ;;  %v14110_v24 = vpack.c.bf16 %v466_v6, %v462_v57  ;;  %v14112_v59 = vsub.f32 %v252_v41, %v462_v57  ;;  %v14116_v50 = vsub.f32 %v255_v47, %v466_v6  ;;  %v20572_v27 = vmov 0.0|0.0   ;;  %v173_v6 = vld [vmem:[%s14095_s28 + $0x8] sm:$0xff]  ;;  %p13639_p11 = scmp.ne.s32.totalorder %s20097_s10, %s13638_s20  ;;  %s13642_s25 = sshll.u32 %s13705_s24, 4  ;;  %s13643_s25 = int_to_ptr.vmem [resolvable:$false] %s13642_s25 }
  0x28   : > { %11780 = vmatprep.subr.bf16.mxu1 %v20165_v3  ;;  %11641 = vmatprep.subr.bf16.mxu0 %v14071_v1  ;;  %20569 = vst [vmem:[#allocation21_spill] sm:$0xff] %v14106_v10  ;;  %v14118_v3 = vpack.c.bf16 %v3559_v7, %v3556_v58  ;;  %v14120_v1 = vsub.f32 %v253_v2, %v3556_v58  ;;  %v468_v44 = vand.u32 4294901760, %v254_v29  ;;  %vm274_vm1 = vcmask 785408   ;;  %s13644_s26 = scalar_lea.vmem %s13643_s25, 37632  ;;  %p13645_p0 = scmp.lt.s32.totalorder %s20097_s10, %s13643_s25 }
  0x29   : > { %20570 = vst [vmem:[#allocation22_spill] sm:$0xff] %v14110_v24  ;;  %v14122_v46 = vsub.f32 %v256_v34, %v3559_v7  ;;  %v14126_v53 = vsub.f32 %v251_v8, %v464_v28  ;;  %v20175_v41 = vand.u32 4294901760, %v13985_v54  ;;  %v276_v47 = vsel %vm274_vm1, %v172_v11, 0  ;;  %p13640_p12 = pnand %p13639_p11, %p13766_p5  ;;  %p13646_p1 = scmp.lt.s32.totalorder %s13644_s26, %s13638_s20 }
  0x2a   : > { %20571 = vst [vmem:[#allocation23_spill] sm:$0xff] %v14118_v3  ;;  %v20178_v2 = vand.u32 4294901760, %v14011_v60  ;;  %v20179_v34 = vand.u32 4294901760, %v14064_v48  ;;  %v20184_v57 = vand.u32 4294901760, %v14069_v0  ;;  %v14135_v58 = vpack.c.bf16 %v468_v44, %v464_v28 }
  0x2b   : > { %11782 = vmatpush3.bf16.msra.mxu1 %v14088_v12  ;;  %11643 = vmatpush1.bf16.msra.mxu0 %v14106_v10  ;;  %v14137_v7 = vsub.f32 %v254_v29, %v468_v44  ;;  %v14139_v8 = vand.u32 4294901760, %v276_v47  ;;  %v1053_v12 = vsub.f32 %v13985_v54, %v20175_v41  ;;  %v20197_v44 = vand.u32 4294901760, %v14016_v61  ;;  %p13641_p13 = pneg %p13640_p12  ;;  %p13647_p2 = por %p13646_p1, %p13645_p0 }
  0x2c   : > { %11783 = vmatprep.subr.bf16.mxu1 %v20572_v27  ;;  %11645 = vmatprep.subr.bf16.mxu0 %v14110_v24  ;;  %20573 = vst [vmem:[#allocation24_spill] sm:$0xff] %v14135_v58  ;;  %v1065_v11 = vsub.f32 %v14011_v60, %v20178_v2  ;;  %v1059_v28 = vsub.f32 %v14064_v48, %v20179_v34  ;;  %v174_v24 = vld [vmem:[%s14095_s28 + $0x10] sm:$0xff]  ;;  %v20202_v2 = vand.u32 4294901760, %v14021_v62  ;;  %v279_v34 = vsel %vm274_vm1, %v173_v6, 0 }
  0x2d   : > { %v1071_v29 = vsub.f32 %v14069_v0, %v20184_v57  ;;  %v14158_v41 = vsub.f32 %v276_v47, %v14139_v8  ;;  %v4096_v63 = vsub.f32 %v14016_v61, %v20197_v44  ;;  %v14173_v47 = vand.u32 4294901760, %v279_v34  ;;  %p13648_p3 = pnand %p13647_p2, %p13641_p13 }
  0x2e   : > { %v1066_v10 = vand.u32 4294901760, %v1065_v11  ;;  %v1060_v45 = vand.u32 4294901760, %v1059_v28  ;;  %v282_v6 = vsel %vm274_vm1, %v174_v24, 0  ;;  %v176_v11 = vld [vmem:[%s14095_s28 + $0x20] sm:$0xff]  ;;  %v177_v28 = vld [vmem:[%s14095_s28 + $0x28] sm:$0xff] }
  0x2f   : > { %11785 = vmatpush3.bf16.msra.mxu1 %v14118_v3  ;;  %11647 = vmatpush1.bf16.msra.mxu0 %v14135_v58  ;;  %20574 = vst [vmem:[#allocation25_spill] sm:$0xff] %v14158_v41  ;;  %v1054_v3 = vand.u32 4294901760, %v1053_v12  ;;  %v1072_v57 = vand.u32 4294901760, %v1071_v29  ;;  %v175_v58 = vld [vmem:[%s14095_s28 + $0x18] sm:$0xff]  ;;  %v14168_v55 = vand.u32 4294901760, %v14158_v41  ;;  %v4103_v12 = vsub.f32 %v14021_v62, %v20202_v2  ;;  %20576 = vst [vmem:[#allocation27_spill] sm:$0xff] %v14173_v47 }
  0x30   : > { %11786 = vmatprep.subr.bf16.mxu1 %v20572_v27  ;;  %v4097_v49 = vand.u32 4294901760, %v4096_v63  ;;  %v14178_v38 = vand.u32 4294901760, %v282_v6  ;;  %v14183_v33 = vsub.f32 %v279_v34, %v14173_v47  ;;  %v285_v2 = vsel %vm274_vm1, %v175_v58, 0 }
  0x31   : > { %20575 = vst [vmem:[#allocation26_spill] sm:$0xff] %v14168_v55  ;;  %v11648_v29 = vpack.c.bf16 %v1066_v10, %v1054_v3  ;;  %v11650_v56 = vpack.c.bf16 %v1072_v57, %v1060_v45  ;;  %v514_v44 = vsub.f32 %v14158_v41, %v14168_v55  ;;  %v4104_v39 = vand.u32 4294901760, %v4103_v12 }
  0x32   : > { %20577 = vst [vmem:[#allocation28_spill] sm:$0xff] %v14178_v38  ;;  %20578 = vst [vmem:[#allocation29_spill] sm:$0xff] %v14183_v33  ;;  %v14188_v24 = vsub.f32 %v282_v6, %v14178_v38  ;;  %v14190_v22 = vand.u32 4294901760, %v285_v2  ;;  %v288_v3 = vsel %vm274_vm1, %v176_v11, 0  ;;  %v291_v10 = vsel %vm274_vm1, %v177_v28, 0 }
  0x33   : > { %11649 = vmatprep.subr.bf16.mxu0 %v11648_v29  ;;  %v515_v45 = vand.u32 4294901760, %v514_v44  ;;  %v11787_v63 = vpack.c.bf16 %v4104_v39, %v4097_v49  ;;  %v14195_v57 = vand.u32 4294901760, %v14183_v33  ;;  %v14197_v34 = vand.u32 4294901760, %v288_v3 }
  0x34   : > { %20579 = vst [vmem:[#allocation30_spill] sm:$0xff] %v14188_v24  ;;  %20580 = vst [vmem:[#allocation31_spill] sm:$0xff] %v14190_v22  ;;  %v14200_v58 = vand.u32 4294901760, %v14188_v24  ;;  %v14203_v12 = vsub.f32 %v285_v2, %v14190_v22  ;;  %v14205_v6 = vand.u32 4294901760, %v291_v10  ;;  %v294_v29 = vsel %vm274_vm1, %v178_v21, 0  ;;  %v179_v2 = vld [vmem:[%s14095_s28 + $0x38] sm:$0xff] }
  0x35   : > { %20581 = vst [vmem:[#allocation32_spill] sm:$0xff] %v14195_v57  ;;  %20582 = vst [vmem:[#allocation33_spill] sm:$0xff] %v14197_v34  ;;  %v20586_v11 = vand.u32 4294901760, %v13818_v14  ;;  %10623 = vmatmul.mubr.f32.vlgmr.msra.gmra.mrb[0].mxu1 %v515_v45  ;;  %516 = vmatmul.mubr.f32.vlgmr.msra.gmra.mrb[0].mxu0 %v515_v45  ;;  %v525_v39 = vsub.f32 %v14183_v33, %v14195_v57  ;;  %v14216_v49 = vsub.f32 %v288_v3, %v14197_v34  ;;  %v20589_v21 = vmov 0.0  }
  0x36   : > { %20583 = vst [vmem:[#allocation34_spill] sm:$0xff] %v14200_v58  ;;  %20584 = vst [vmem:[#allocation35_spill] sm:$0xff] %v14203_v12  ;;  %v20588_v28 = vand.u32 4294901760, %v13823_v15  ;;  %11651 = vmatpush1.bf16.msra.mxu0 %v11650_v56  ;;  %10625 = vmatprep.mubr.msk.f32.mxu1 %vm13703_vm0, %v20589_v21  ;;  %v14229_v45 = vand.u32 4294901760, %v14203_v12  ;;  %v20592_v57 = vand.u32 4294901760, %v13845_v19  ;;  %v20593_v56 = vand.u32 4294901760, %v13850_v20 }
  0x37   : > { %20585 = vst [vmem:[#allocation36_spill] sm:$0xff] %v14205_v6  ;;  %v14211_v44 = vsub.f32 %v13818_v14, %v20586_v11  ;;  %20587 = vst [vmem:[#allocation37_spill] sm:$0xff] %v14216_v49  ;;  %v536_v14 = vsub.f32 %v14188_v24, %v14200_v58  ;;  %11788 = vmatpush3.bf16.msra.mxu1 %v11787_v63  ;;  %521 = vmatprep.mubr.f32.mxu0 %v20589_v21  ;;  %v526_v3 = vand.u32 4294901760, %v525_v39  ;;  %v180_v24 = vld [vmem:[%s14095_s28 + $0x40] sm:$0xff] }
  0x38   : > { %v14222_v55 = vsub.f32 %v13823_v15, %v20588_v28  ;;  %20590 = vst [vmem:[#allocation38_spill] sm:$0xff] %v14229_v45  ;;  %v14232_v11 = vand.u32 4294901760, %v294_v29  ;;  %v14237_v15 = vsub.f32 %v13845_v19, %v20592_v57  ;;  %v14242_v28 = vsub.f32 %v13850_v20, %v20593_v56  ;;  %11789 = vmatprep.subr.bf16.mxu1 %v20572_v27 }
  0x39   : > { %v14245_v58 = vsub.f32 %v291_v10, %v14205_v6  ;;  %v297_v63 = vsel %vm274_vm1, %v179_v2, 0  ;;  %10626 = vmatmul.mubr.f32.gmra.mrb[2].mxu1 %v526_v3  ;;  %527 = vmatmul.mubr.f32.gmra.mrb[2].mxu0 %v526_v3  ;;  %v537_v39 = vand.u32 4294901760, %v536_v14  ;;  %v547_v19 = vsub.f32 %v14203_v12, %v14229_v45 }
  0x3a   : > { %20591 = vst [vmem:[#allocation39_spill] sm:$0xff] %v14232_v11  ;;  %v14253_v57 = vand.u32 4294901760, %v14216_v49  ;;  %v20223_v20 = vand.u32 4294901760, %v14211_v44  ;;  %v20596_v56 = vand.u32 4294901760, %v13828_v16  ;;  %10628 = vmatprep.mubr.msk.f32.mxu1 %vm13703_vm0, %v20589_v21  ;;  %532 = vmatprep.mubr.f32.mxu0 %v20589_v21  ;;  %v20228_v2 = vand.u32 4294901760, %v14222_v55 }
  0x3b   : > { %20594 = vst [vmem:[#allocation40_spill] sm:$0xff] %v14245_v58  ;;  %v14266_v14 = vsub.f32 %v294_v29, %v14232_v11  ;;  %v14268_v3 = vand.u32 4294901760, %v297_v63  ;;  %v300_v45 = vsel %vm274_vm1, %v180_v24, 0  ;;  %v14280_v33 = vand.u32 4294901760, %v14245_v58 }
  0x3c   : > { %20595 = vst [vmem:[#allocation41_spill] sm:$0xff] %v14253_v57  ;;  %v14259_v10 = vsub.f32 %v13828_v16, %v20596_v56  ;;  %v1077_v12 = vsub.f32 %v14211_v44, %v20223_v20  ;;  %v20599_v16 = vand.u32 4294901760, %v13840_v18  ;;  %v1089_v29 = vsub.f32 %v14222_v55, %v20228_v2 }
  0x3d   : > { %20597 = vst [vmem:[#allocation42_spill] sm:$0xff] %v14266_v14  ;;  %20598 = vst [vmem:[#allocation43_spill] sm:$0xff] %v14268_v3  ;;  %v20237_v41 = vand.u32 4294901760, %v14237_v15  ;;  %10629 = vmatmul.mubr.f32.gmra.mrb[4].mxu1 %v537_v39  ;;  %538 = vmatmul.mubr.f32.gmra.mrb[4].mxu0 %v537_v39  ;;  %v548_v24 = vand.u32 4294901760, %v547_v19  ;;  %v558_v20 = vsub.f32 %v14216_v49, %v14253_v57  ;;  %v20242_v11 = vand.u32 4294901760, %v14242_v28  ;;  %v181_v39 = vld [vmem:[%s14095_s28 + $0x48] sm:$0xff] }
  0x3e   : > { %v14277_v56 = vsub.f32 %v13840_v18, %v20599_v16  ;;  %20600 = vst [vmem:[#allocation44_spill] sm:$0xff] %v14280_v33  ;;  %v1078_v17 = vand.u32 4294901760, %v1077_v12  ;;  %10631 = vmatprep.mubr.msk.f32.mxu1 %vm13703_vm0, %v20589_v21  ;;  %543 = vmatprep.mubr.f32.mxu0 %v20589_v21  ;;  %v14292_v18 = vand.u32 4294901760, %v300_v45  ;;  %v1090_v16 = vand.u32 4294901760, %v1089_v29 }
  0x3f   : > { %v1083_v2 = vsub.f32 %v14237_v15, %v20237_v41  ;;  %v14299_v19 = vand.u32 4294901760, %v14266_v14  ;;  %v14302_v12 = vsub.f32 %v297_v63, %v14268_v3  ;;  %v1095_v57 = vsub.f32 %v14242_v28, %v20242_v11 }
  0x40   : > { %20601 = vst [vmem:[#allocation45_spill] sm:$0xff] %v14292_v18  ;;  %v20243_v49 = vand.u32 4294901760, %v14259_v10  ;;  %v569_v29 = vsub.f32 %v14245_v58, %v14280_v33  ;;  %v11652_v6 = vpack.c.bf16 %v1090_v16, %v1078_v17  ;;  %v20248_v41 = vand.u32 4294901760, %v14277_v56 }
  0x41   : > { %20602 = vst [vmem:[#allocation46_spill] sm:$0xff] %v14299_v19  ;;  %20603 = vst [vmem:[#allocation47_spill] sm:$0xff] %v14302_v12  ;;  %v1084_v34 = vand.u32 4294901760, %v1083_v2  ;;  %10632 = vmatmul.mubr.f32.gmra.mrb[6].mxu1 %v548_v24  ;;  %549 = vmatmul.mubr.f32.gmra.mrb[6].mxu0 %v548_v24  ;;  %v559_v22 = vand.u32 4294901760, %v558_v20  ;;  %v1096_v38 = vand.u32 4294901760, %v1095_v57  ;;  %v303_v63 = vsel %vm274_vm1, %v181_v39, 0 }
  0x42   : > { %v4110_v11 = vsub.f32 %v14259_v10, %v20243_v49  ;;  %10634 = vmatprep.mubr.msk.f32.mxu1 %vm13703_vm0, %v20589_v21  ;;  %554 = vmatprep.mubr.f32.mxu0 %v20589_v21  ;;  %v14319_v17 = vsub.f32 %v300_v45, %v14292_v18  ;;  %v4117_v2 = vsub.f32 %v14277_v56, %v20248_v41  ;;  %v182_v24 = vld [vmem:[%s14095_s28 + $0x50] sm:$0xff]  ;;  %v14326_v16 = vand.u32 4294901760, %v14302_v12 }
  0x43   : > { %11653 = vmatprep.subr.bf16.mxu0 %v11652_v6  ;;  %v11654_v57 = vpack.c.bf16 %v1096_v38, %v1084_v34  ;;  %v14328_v39 = vand.u32 4294901760, %v303_v63  ;;  %v20607_v33 = vand.u32 4294901760, %v13868_v23  ;;  %v570_v58 = vand.u32 4294901760, %v569_v29 }
  0x44   : > { %20604 = vst [vmem:[#allocation48_spill] sm:$0xff] %v14319_v17  ;;  %v4111_v20 = vand.u32 4294901760, %v4110_v11  ;;  %20605 = vst [vmem:[#allocation49_spill] sm:$0xff] %v14326_v16  ;;  %v4118_v49 = vand.u32 4294901760, %v4117_v2  ;;  %v580_v38 = vsub.f32 %v14266_v14, %v14299_v19  ;;  %v14341_v34 = vand.u32 4294901760, %v14319_v17 }
  0x45   : > { %20606 = vst [vmem:[#allocation50_spill] sm:$0xff] %v14328_v39  ;;  %v14333_v45 = vsub.f32 %v13868_v23, %v20607_v33  ;;  %10635 = vmatmul.mubr.f32.gmra.mrb[8].mxu1 %v559_v22  ;;  %560 = vmatmul.mubr.f32.gmra.mrb[8].mxu0 %v559_v22  ;;  %v306_v11 = vsel %vm274_vm1, %v182_v24, 0  ;;  %v183_v23 = vld [vmem:[%s14095_s28 + $0x58] sm:$0xff]  ;;  %v20609_v22 = vand.u32 4294901760, %v13882_v30  ;;  %v20610_v29 = vand.u32 4294901760, %v13905_v35 }
  0x46   : > { %10637 = vmatprep.mubr.msk.f32.mxu1 %vm13703_vm0, %v20589_v21  ;;  %565 = vmatprep.mubr.f32.mxu0 %v20589_v21  ;;  %20608 = vst [vmem:[#allocation51_spill] sm:$0xff] %v14341_v34  ;;  %v11790_v6 = vpack.c.bf16 %v4118_v49, %v4111_v20  ;;  %v591_v41 = vsub.f32 %v14302_v12, %v14326_v16  ;;  %v581_v49 = vand.u32 4294901760, %v580_v38  ;;  %v184_v20 = vld [vmem:[%s14095_s28 + $0x60] sm:$0xff]  ;;  %v20617_v16 = vand.u32 4294901760, %v13892_v32 }
  0x47   : > { %11655 = vmatpush1.bf16.msra.mxu0 %v11654_v57  ;;  %v14348_v33 = vsub.f32 %v13882_v30, %v20609_v22  ;;  %v14353_v2 = vsub.f32 %v13905_v35, %v20610_v29  ;;  %v14358_v19 = vsub.f32 %v303_v63, %v14328_v39  ;;  %v14360_v57 = vand.u32 4294901760, %v306_v11  ;;  %v186_v39 = vld [vmem:[%s14095_s28 + $0x70] sm:$0xff] }
  0x48   : > { %11791 = vmatpush3.bf16.msra.mxu1 %v11790_v6  ;;  %v309_v30 = vsel %vm274_vm1, %v183_v23, 0  ;;  %v20255_v24 = vand.u32 4294901760, %v14333_v45  ;;  %v20613_v35 = vand.u32 4294901760, %v13910_v36  ;;  %v20614_v63 = vand.u32 4294901760, %v13887_v31 }
  0x49   : > { %20611 = vst [vmem:[#allocation52_spill] sm:$0xff] %v14358_v19  ;;  %10638 = vmatmul.mubr.f32.gmra.mrb[10].mxu1 %v570_v58  ;;  %571 = vmatmul.mubr.f32.gmra.mrb[10].mxu0 %v570_v58  ;;  %20612 = vst [vmem:[#allocation53_spill] sm:$0xff] %v14360_v57  ;;  %v602_v58 = vsub.f32 %v14319_v17, %v14341_v34  ;;  %v14387_v23 = vand.u32 4294901760, %v309_v30  ;;  %v312_v29 = vsel %vm274_vm1, %v184_v20, 0  ;;  %v20266_v17 = vand.u32 4294901760, %v14353_v2 }
  0x4a   : > { %v14368_v22 = vsub.f32 %v13910_v36, %v20613_v35  ;;  %10640 = vmatprep.mubr.msk.f32.mxu1 %vm13703_vm0, %v20589_v21  ;;  %576 = vmatprep.mubr.f32.mxu0 %v20589_v21  ;;  %v14378_v38 = vsub.f32 %v13887_v31, %v20614_v63  ;;  %v1101_v6 = vsub.f32 %v14333_v45, %v20255_v24  ;;  %v14385_v36 = vand.u32 4294901760, %v14358_v19  ;;  %v185_v35 = vld [vmem:[%s14095_s28 + $0x68] sm:$0xff] }
  0x4b   : > { %11792 = vmatprep.subr.bf16.mxu1 %v20572_v27  ;;  %20616 = vst [vmem:[#allocation55_spill] sm:$0xff] %v14387_v23  ;;  %v14395_v31 = vsub.f32 %v13892_v32, %v20617_v16  ;;  %v592_v63 = vand.u32 4294901760, %v591_v41  ;;  %v14398_v24 = vsub.f32 %v306_v11, %v14360_v57  ;;  %v603_v20 = vand.u32 4294901760, %v602_v58 }
  0x4c   : > { %20615 = vst [vmem:[#allocation54_spill] sm:$0xff] %v14385_v36  ;;  %v1102_v34 = vand.u32 4294901760, %v1101_v6  ;;  %v20619_v12 = vand.u32 4294901760, %v14348_v33  ;;  %v20271_v16 = vand.u32 4294901760, %v14368_v22  ;;  %v14408_v41 = vand.u32 4294901760, %v312_v29 }
  0x4d   : > { %10641 = vmatmul.mubr.f32.gmra.mrb[12].mxu1 %v581_v49  ;;  %582 = vmatmul.mubr.f32.gmra.mrb[12].mxu0 %v581_v49  ;;  %20618 = vst [vmem:[#allocation56_spill] sm:$0xff] %v14398_v24  ;;  %v315_v11 = vsel %vm274_vm1, %v185_v35, 0  ;;  %v1107_v49 = vsub.f32 %v14353_v2, %v20266_v17  ;;  %v20274_v14 = vand.u32 4294901760, %v14378_v38  ;;  %v613_v58 = vsub.f32 %v14358_v19, %v14385_v36 }
  0x4e   : > { %10643 = vmatprep.mubr.msk.f32.mxu1 %vm13703_vm0, %v20589_v21  ;;  %587 = vmatprep.mubr.f32.mxu0 %v20589_v21  ;;  %v1113_v32 = vsub.f32 %v14348_v33, %v20619_v12  ;;  %20620 = vst [vmem:[#allocation57_spill] sm:$0xff] %v14408_v41  ;;  %v14418_v6 = vsub.f32 %v309_v30, %v14387_v23  ;;  %v14424_v35 = vand.u32 4294901760, %v14398_v24  ;;  %v20279_v36 = vand.u32 4294901760, %v14395_v31 }
  0x4f   : > { %v1119_v12 = vsub.f32 %v14368_v22, %v20271_v16  ;;  %v1108_v17 = vand.u32 4294901760, %v1107_v49  ;;  %v4124_v18 = vsub.f32 %v14378_v38, %v20274_v14  ;;  %v14438_v49 = vsub.f32 %v312_v29, %v14408_v41  ;;  %v187_v29 = vld [vmem:[%s14095_s28 + $0x78] sm:$0xff] }
  0x50   : > { %20621 = vst [vmem:[#allocation58_spill] sm:$0xff] %v14418_v6  ;;  %v1114_v57 = vand.u32 4294901760, %v1113_v32  ;;  %20622 = vst [vmem:[#allocation59_spill] sm:$0xff] %v14424_v35  ;;  %v4131_v16 = vsub.f32 %v14395_v31, %v20279_v36  ;;  %v14440_v19 = vand.u32 4294901760, %v315_v11  ;;  %v318_v14 = vsel %vm274_vm1, %v186_v39, 0 }
  0x51   : > { %10644 = vmatmul.mubr.f32.gmra.mrb[14].mxu1 %v592_v63  ;;  %593 = vmatmul.mubr.f32.gmra.mrb[14].mxu0 %v592_v63  ;;  %v1120_v32 = vand.u32 4294901760, %v1119_v12  ;;  %v4125_v63 = vand.u32 4294901760, %v4124_v18  ;;  %20623 = vst [vmem:[#allocation60_spill] sm:$0xff] %v14438_v49  ;;  %v614_v3 = vand.u32 4294901760, %v613_v58  ;;  %v14446_v18 = vand.u32 4294901760, %v14418_v6 }
  0x52   : > { %10646 = vmatprep.mubr.msk.f32.mxu1 %vm13703_vm0, %v20589_v21  ;;  %598 = vmatprep.mubr.f32.mxu0 %v20589_v21  ;;  %v11656_v30 = vpack.c.bf16 %v1114_v57, %v1102_v34  ;;  %20624 = vst [vmem:[#allocation61_spill] sm:$0xff] %v14440_v19  ;;  %v624_v34 = vsub.f32 %v14398_v24, %v14424_v35  ;;  %v4132_v57 = vand.u32 4294901760, %v4131_v16  ;;  %v20626_v39 = vand.u32 4294901760, %v13915_v37 }
  0x53   : > { %v11658_v23 = vpack.c.bf16 %v1120_v32, %v1108_v17  ;;  %20625 = vst [vmem:[#allocation62_spill] sm:$0xff] %v14446_v18  ;;  %v20627_v58 = vand.u32 4294901760, %v13938_v40  ;;  %v14463_v16 = vsub.f32 %v315_v11, %v14440_v19 }
  0x54   : > { %11657 = vmatprep.subr.bf16.mxu0 %v11656_v30  ;;  %v14455_v17 = vsub.f32 %v13915_v37, %v20626_v39  ;;  %v14465_v30 = vand.u32 4294901760, %v318_v14  ;;  %v625_v32 = vand.u32 4294901760, %v624_v34  ;;  %v635_v37 = vsub.f32 %v14418_v6, %v14446_v18  ;;  %v189_v39 = vld [vmem:[%s14095_s28 + $0x88] sm:$0xff] }
  0x55   : > { %10647 = vmatmul.mubr.f32.gmra.mrb[16].mxu1 %v603_v20  ;;  %604 = vmatmul.mubr.f32.gmra.mrb[16].mxu0 %v603_v20  ;;  %v11793_v20 = vpack.c.bf16 %v4132_v57, %v4125_v63  ;;  %v14460_v12 = vsub.f32 %v13938_v40, %v20627_v58  ;;  %20628 = vst [vmem:[#allocation63_spill] sm:$0xff] %v14463_v16  ;;  %v321_v63 = vsel %vm274_vm1, %v187_v29, 0  ;;  %v188_v57 = vld [vmem:[%s14095_s28 + $0x80] sm:$0xff]  ;;  %v20631_v40 = vand.u32 4294901760, %v13966_v51 }
  0x56   : > { %10649 = vmatprep.mubr.msk.f32.mxu1 %vm13703_vm0, %v20589_v21  ;;  %609 = vmatprep.mubr.f32.mxu0 %v20589_v21  ;;  %20629 = vst [vmem:[#allocation64_spill] sm:$0xff] %v14465_v30  ;;  %v20284_v29 = vand.u32 4294901760, %v14455_v17  ;;  %v14490_v58 = vand.u32 4294901760, %v14463_v16  ;;  %v14493_v36 = vsub.f32 %v318_v14, %v14465_v30  ;;  %v14495_v18 = vand.u32 4294901760, %v321_v63 }
  0x57   : > { %11659 = vmatpush1.bf16.msra.mxu0 %v11658_v23  ;;  %v14470_v23 = vand.u32 4294901760, %v14438_v49  ;;  %v14480_v11 = vsub.f32 %v13966_v51, %v20631_v40  ;;  %11794 = vmatpush3.bf16.msra.mxu1 %v11793_v20  ;;  %v324_v51 = vsel %vm274_vm1, %v188_v57, 0  ;;  %v327_v14 = vsel %vm274_vm1, %v189_v39, 0 }
  0x58   : > { %20633 = vst [vmem:[#allocation66_spill] sm:$0xff] %v14490_v58  ;;  %20634 = vst [vmem:[#allocation67_spill] sm:$0xff] %v14493_v36  ;;  %11795 = vmatprep.subr.bf16.mxu1 %v20572_v27  ;;  %v1125_v40 = vsub.f32 %v14455_v17, %v20284_v29  ;;  %v657_v29 = vsub.f32 %v14463_v16, %v14490_v58  ;;  %v14517_v35 = vand.u32 4294901760, %v14493_v36  ;;  %v14522_v39 = vand.u32 4294901760, %v324_v51  ;;  %v190_v16 = vld [vmem:[%s14095_s28 + $0x90] sm:$0xff] }
  0x59   : > { %10650 = vmatmul.mubr.f32.gmra.mrb[18].mxu1 %v614_v3  ;;  %615 = vmatmul.mubr.f32.gmra.mrb[18].mxu0 %v614_v3  ;;  %20630 = vst [vmem:[#allocation65_spill] sm:$0xff] %v14470_v23  ;;  %v20632_v3 = vand.u32 4294901760, %v13971_v52  ;;  %20635 = vst [vmem:[#allocation68_spill] sm:$0xff] %v14495_v18  ;;  %v646_v20 = vsub.f32 %v14438_v49, %v14470_v23  ;;  %v14520_v49 = vsub.f32 %v321_v63, %v14495_v18 }
  0x5a   : > { %10652 = vmatprep.mubr.msk.f32.mxu1 %vm13703_vm0, %v20589_v21  ;;  %620 = vmatprep.mubr.f32.mxu0 %v20589_v21  ;;  %v1126_v57 = vand.u32 4294901760, %v1125_v40  ;;  %20636 = vst [vmem:[#allocation69_spill] sm:$0xff] %v14517_v35  ;;  %20638 = vst [vmem:[#allocation71_spill] sm:$0xff] %v14522_v39  ;;  %v14533_v63 = vand.u32 4294901760, %v327_v14  ;;  %v668_v18 = vsub.f32 %v14493_v36, %v14517_v35  ;;  %v192_v36 = vld [vmem:[%s14095_s28 + $0xa0] sm:$0xff] }
  0x5b   : > { %v14485_v34 = vsub.f32 %v13971_v52, %v20632_v3  ;;  %v636_v52 = vand.u32 4294901760, %v635_v37  ;;  %v20289_v3 = vand.u32 4294901760, %v14460_v12  ;;  %v20298_v37 = vand.u32 4294901760, %v14480_v11  ;;  %20637 = vst [vmem:[#allocation70_spill] sm:$0xff] %v14520_v49 }
  0x5c   : > { %v647_v40 = vand.u32 4294901760, %v646_v20  ;;  %20639 = vst [vmem:[#allocation72_spill] sm:$0xff] %v14533_v63  ;;  %v20307_v20 = vand.u32 4294901760, %v14044_v42 }
  0x5d   : > { %10653 = vmatmul.mubr.f32.gmra.mrb[20].mxu1 %v625_v32  ;;  %626 = vmatmul.mubr.f32.gmra.mrb[20].mxu0 %v625_v32  ;;  %v1137_v32 = vsub.f32 %v14460_v12, %v20289_v3  ;;  %v20301_v23 = vand.u32 4294901760, %v14485_v34  ;;  %v1131_v6 = vsub.f32 %v14480_v11, %v20298_v37 }
  0x5e   : > { %10655 = vmatprep.mubr.msk.f32.mxu1 %vm13703_vm0, %v20589_v21  ;;  %631 = vmatprep.mubr.f32.mxu0 %v20589_v21  ;;  %v4145_v19 = vsub.f32 %v14044_v42, %v20307_v20 }
  0x5f   : > { %v1138_v3 = vand.u32 4294901760, %v1137_v32  ;;  %v1143_v58 = vsub.f32 %v14485_v34, %v20301_v23  ;;  %v1132_v24 = vand.u32 4294901760, %v1131_v6  ;;  %v14541_v23 = vsub.f32 %v324_v51, %v14522_v39 }
  0x60   : > { %v14550_v6 = vand.u32 4294901760, %v14520_v49  ;;  %v14557_v51 = vsub.f32 %v327_v14, %v14533_v63  ;;  %v4146_v35 = vand.u32 4294901760, %v4145_v19 }
  0x61   : > { %10656 = vmatmul.mubr.f32.gmra.mrb[22].mxu1 %v636_v52  ;;  %637 = vmatmul.mubr.f32.gmra.mrb[22].mxu0 %v636_v52  ;;  %v20306_v52 = vand.u32 4294901760, %v14042_v43  ;;  %v11660_v32 = vpack.c.bf16 %v1138_v3, %v1126_v57  ;;  %v1144_v37 = vand.u32 4294901760, %v1143_v58  ;;  %20640 = vst [vmem:[#allocation73_spill] sm:$0xff] %v14541_v23  ;;  %v658_v3 = vand.u32 4294901760, %v657_v29 }
  0x62   : > { %10658 = vmatprep.mubr.msk.f32.mxu1 %vm13703_vm0, %v20589_v21  ;;  %642 = vmatprep.mubr.f32.mxu0 %v20589_v21  ;;  %20641 = vst [vmem:[#allocation74_spill] sm:$0xff] %v14550_v6  ;;  %v330_v58 = vsel %vm274_vm1, %v190_v16, 0  ;;  %20642 = vst [vmem:[#allocation75_spill] sm:$0xff] %v14557_v51  ;;  %v14561_v29 = vand.u32 4294901760, %v14541_v23  ;;  %v669_v16 = vand.u32 4294901760, %v668_v18  ;;  %v14573_v19 = vand.u32 4294901760, %v14557_v51 }
  0x63   : > { %v4138_v30 = vsub.f32 %v14042_v43, %v20306_v52  ;;  %v11662_v57 = vpack.c.bf16 %v1144_v37, %v1132_v24  ;;  %v191_v52 = vld [vmem:[%s14095_s28 + $0x98] sm:$0xff]  ;;  %11661 = vmatprep.subr.bf16.mxu0 %v11660_v32  ;;  %v679_v37 = vsub.f32 %v14520_v49, %v14550_v6  ;;  %v20324_v32 = vand.u32 4294901760, %v14073_v4 }
  0x64   : > { %20643 = vst [vmem:[#allocation76_spill] sm:$0xff] %v14561_v29  ;;  %v333_v14 = vsel %vm274_vm1, %v191_v52, 0  ;;  %20645 = vst [vmem:[#allocation78_spill] sm:$0xff] %v14573_v19  ;;  %v20330_v49 = vand.u32 4294901760, %v14101_v26 }
  0x65   : > { %10659 = vmatmul.mubr.f32.gmra.mrb[24].mxu1 %v647_v40  ;;  %648 = vmatmul.mubr.f32.gmra.mrb[24].mxu0 %v647_v40  ;;  %v4139_v20 = vand.u32 4294901760, %v4138_v30  ;;  %v14563_v40 = vand.u32 4294901760, %v330_v58  ;;  %v336_v30 = vsel %vm274_vm1, %v192_v36, 0  ;;  %v14581_v52 = vand.u32 4294901760, %v333_v14 }
  0x66   : > { %10661 = vmatprep.mubr.msk.f32.mxu1 %vm13703_vm0, %v20589_v21  ;;  %653 = vmatprep.mubr.f32.mxu0 %v20589_v21  ;;  %v701_v36 = vsub.f32 %v14557_v51, %v14573_v19 }
  0x67   : > { %20644 = vst [vmem:[#allocation77_spill] sm:$0xff] %v14563_v40  ;;  %11663 = vmatpush1.bf16.msra.mxu0 %v11662_v57  ;;  %v11796_v24 = vpack.c.bf16 %v4146_v35, %v4139_v20  ;;  %v690_v35 = vsub.f32 %v14541_v23, %v14561_v29  ;;  %v14579_v18 = vsub.f32 %v330_v58, %v14563_v40  ;;  %20647 = vst [vmem:[#allocation80_spill] sm:$0xff] %v14581_v52  ;;  %v193_v58 = vld [vmem:[%s14095_s28 + $0xa8] sm:$0xff] }
  0x68   : > { %v680_v20 = vand.u32 4294901760, %v679_v37  ;;  %v20325_v57 = vand.u32 4294901760, %v14086_v9  ;;  %v14602_v6 = vsub.f32 %v333_v14, %v14581_v52  ;;  %v339_v51 = vsel %vm274_vm1, %v193_v58, 0 }
  0x69   : > { %10662 = vmatmul.mubr.f32.gmra.mrb[26].mxu1 %v658_v3  ;;  %659 = vmatmul.mubr.f32.gmra.mrb[26].mxu0 %v658_v3  ;;  %20646 = vst [vmem:[#allocation79_spill] sm:$0xff] %v14579_v18  ;;  %v14590_v3 = vand.u32 4294901760, %v336_v30  ;;  %v691_v37 = vand.u32 4294901760, %v690_v35  ;;  %v14599_v29 = vand.u32 4294901760, %v14579_v18  ;;  %v702_v14 = vand.u32 4294901760, %v701_v36 }
  0x6a   : > { %10664 = vmatprep.mubr.msk.f32.mxu1 %vm13703_vm0, %v20589_v21  ;;  %664 = vmatprep.mubr.f32.mxu0 %v20589_v21  ;;  %20650 = vst [vmem:[#allocation83_spill] sm:$0xff] %v14602_v6  ;;  %v1161_v19 = vsub.f32 %v14086_v9, %v20325_v57  ;;  %v1155_v58 = vsub.f32 %v14101_v26, %v20330_v49  ;;  %v20338_v52 = vand.u32 4294901760, %v14090_v13  ;;  %v20341_v40 = vand.u32 4294901760, %v14099_v5  ;;  %v195_v49 = vld [vmem:[%s14095_s28 + $0xb8] sm:$0xff] }
  0x6b   : > { %11797 = vmatpush3.bf16.msra.mxu1 %v11796_v24  ;;  %20648 = vst [vmem:[#allocation81_spill] sm:$0xff] %v14590_v3  ;;  %v194_v24 = vld [vmem:[%s14095_s28 + $0xb0] sm:$0xff]  ;;  %20649 = vst [vmem:[#allocation82_spill] sm:$0xff] %v14599_v29  ;;  %v14614_v35 = vsub.f32 %v336_v30, %v14590_v3  ;;  %v712_v36 = vsub.f32 %v14579_v18, %v14599_v29  ;;  %v14628_v30 = vand.u32 4294901760, %v14602_v6 }
  0x6c   : > { %11798 = vmatprep.subr.bf16.mxu1 %v20572_v27  ;;  %v342_v57 = vsel %vm274_vm1, %v194_v24, 0  ;;  %v14630_v24 = vand.u32 4294901760, %v339_v51  ;;  %v1156_v3 = vand.u32 4294901760, %v1155_v58  ;;  %v4159_v29 = vsub.f32 %v14099_v5, %v20341_v40 }
  0x6d   : > { %10665 = vmatmul.mubr.f32.gmra.mrb[28].mxu1 %v669_v16  ;;  %670 = vmatmul.mubr.f32.gmra.mrb[28].mxu0 %v669_v16  ;;  %v1149_v16 = vsub.f32 %v14073_v4, %v20324_v32  ;;  %v20335_v32 = vand.u32 4294901760, %v14108_v25  ;;  %20651 = vst [vmem:[#allocation84_spill] sm:$0xff] %v14614_v35  ;;  %20652 = vst [vmem:[#allocation85_spill] sm:$0xff] %v14628_v30  ;;  %v14643_v58 = vand.u32 4294901760, %v14614_v35  ;;  %v713_v18 = vand.u32 4294901760, %v712_v36 }
  0x6e   : > { %10667 = vmatprep.mubr.msk.f32.mxu1 %vm13703_vm0, %v20589_v21  ;;  %675 = vmatprep.mubr.f32.mxu0 %v20589_v21  ;;  %20653 = vst [vmem:[#allocation86_spill] sm:$0xff] %v14630_v24  ;;  %v723_v40 = vsub.f32 %v14602_v6, %v14628_v30  ;;  %v14651_v39 = vsub.f32 %v339_v51, %v14630_v24  ;;  %v20371_v6 = vand.u32 4294901760, %v14120_v1 }
  0x6f   : > { %v1150_v23 = vand.u32 4294901760, %v1149_v16  ;;  %v1167_v16 = vsub.f32 %v14108_v25, %v20335_v32  ;;  %v4152_v32 = vsub.f32 %v14090_v13, %v20338_v52  ;;  %20654 = vst [vmem:[#allocation87_spill] sm:$0xff] %v14643_v58  ;;  %v345_v52 = vsel %vm274_vm1, %v195_v49, 0 }
  0x70   : > { %20656 = vst [vmem:[#allocation89_spill] sm:$0xff] %v14651_v39  ;;  %v724_v51 = vand.u32 4294901760, %v723_v40 }
  0x71   : > { %10668 = vmatmul.mubr.f32.gmra.mrb[30].mxu1 %v680_v20  ;;  %681 = vmatmul.mubr.f32.gmra.mrb[30].mxu0 %v680_v20  ;;  %v1162_v20 = vand.u32 4294901760, %v1161_v19  ;;  %v1168_v63 = vand.u32 4294901760, %v1167_v16  ;;  %v14645_v16 = vand.u32 4294901760, %v342_v57 }
  0x72   : > { %10670 = vmatprep.mubr.msk.f32.mxu1 %vm13703_vm0, %v20589_v21  ;;  %686 = vmatprep.mubr.f32.mxu0 %v20589_v21 }
  0x73   : > { %v11664_v19 = vpack.c.bf16 %v1162_v20, %v1150_v23  ;;  %v11666_v23 = vpack.c.bf16 %v1168_v63, %v1156_v3  ;;  %v4160_v20 = vand.u32 4294901760, %v4159_v29  ;;  %20655 = vst [vmem:[#allocation88_spill] sm:$0xff] %v14645_v16  ;;  %v14657_v29 = vand.u32 4294901760, %v345_v52 }
  0x74   : > { %v14660_v49 = vsub.f32 %v342_v57, %v14645_v16  ;;  %v734_v3 = vsub.f32 %v14614_v35, %v14643_v58  ;;  %v20361_v58 = vand.u32 4294901760, %v14126_v53 }
  0x75   : > { %10671 = vmatmul.mubr.f32.gmra.mrb[32].mxu1 %v691_v37  ;;  %692 = vmatmul.mubr.f32.gmra.mrb[32].mxu0 %v691_v37  ;;  %v4153_v37 = vand.u32 4294901760, %v4152_v32  ;;  %20657 = vst [vmem:[#allocation90_spill] sm:$0xff] %v14657_v29  ;;  %v14673_v57 = vsub.f32 %v345_v52, %v14657_v29 }
  0x76   : > { %10673 = vmatprep.mubr.msk.f32.mxu1 %vm13703_vm0, %v20589_v21  ;;  %697 = vmatprep.mubr.f32.mxu0 %v20589_v21  ;;  %20658 = vst [vmem:[#allocation91_spill] sm:$0xff] %v14660_v49  ;;  %v14679_v40 = vand.u32 4294901760, %v14660_v49  ;;  %v1179_v35 = vsub.f32 %v14126_v53, %v20361_v58 }
  0x77   : > { %11665 = vmatprep.subr.bf16.mxu0 %v11664_v19  ;;  %v196_v19 = vld [vmem:[%s14095_s28 + $0xc0] sm:$0xff]  ;;  %v11799_v63 = vpack.c.bf16 %v4160_v20, %v4153_v37  ;;  %20660 = vst [vmem:[#allocation93_spill] sm:$0xff] %v14673_v57  ;;  %v735_v37 = vand.u32 4294901760, %v734_v3 }
  0x78   : > { %11667 = vmatpush1.bf16.msra.mxu0 %v11666_v23  ;;  %v348_v32 = vsel %vm274_vm1, %v196_v19, 0  ;;  %v197_v23 = vld [vmem:[%s14095_s28 + $0xc8] sm:$0xff]  ;;  %20662 = vst [vmem:[#allocation95_spill] sm:$0xff] %v14679_v40  ;;  %v198_v19 = vld [vmem:[%s14095_s28 + $0xd0] sm:$0xff]  ;;  %v1180_v58 = vand.u32 4294901760, %v1179_v35 }
  0x79   : > { %10674 = vmatmul.mubr.f32.gmra.mrb[34].mxu1 %v702_v14  ;;  %703 = vmatmul.mubr.f32.gmra.mrb[34].mxu0 %v702_v14  ;;  %v14667_v14 = vand.u32 4294901760, %v14651_v39  ;;  %v14675_v36 = vand.u32 4294901760, %v348_v32  ;;  %v351_v52 = vsel %vm274_vm1, %v197_v23, 0  ;;  %v756_v23 = vsub.f32 %v14660_v49, %v14679_v40  ;;  %v199_v40 = vld [vmem:[%s14095_s28 + $0xd8] sm:$0xff] }
  0x7a   : > { %10676 = vmatprep.mubr.msk.f32.mxu1 %vm13703_vm0, %v20589_v21  ;;  %708 = vmatprep.mubr.f32.mxu0 %v20589_v21 }
  0x7b   : > { %11800 = vmatpush3.bf16.msra.mxu1 %v11799_v63  ;;  %20659 = vst [vmem:[#allocation92_spill] sm:$0xff] %v14667_v14  ;;  %20661 = vst [vmem:[#allocation94_spill] sm:$0xff] %v14675_v36  ;;  %v745_v20 = vsub.f32 %v14651_v39, %v14667_v14  ;;  %v14697_v3 = vsub.f32 %v348_v32, %v14675_v36  ;;  %v20665_v14 = vand.u32 4294901760, %v14116_v50  ;;  %v20366_v39 = vand.u32 4294901760, %v14137_v7 }
  0x7c   : > { %11801 = vmatprep.subr.bf16.mxu1 %v20572_v27  ;;  %v14710_v36 = vand.u32 4294901760, %v351_v52 }
  0x7d   : > { %10677 = vmatmul.mubr.f32.gmra.mrb[36].mxu1 %v713_v18  ;;  %714 = vmatmul.mubr.f32.gmra.mrb[36].mxu0 %v713_v18  ;;  %v20352_v18 = vand.u32 4294901760, %v14112_v59  ;;  %20664 = vst [vmem:[#allocation97_spill] sm:$0xff] %v14697_v3  ;;  %v1185_v30 = vsub.f32 %v14116_v50, %v20665_v14  ;;  %v746_v32 = vand.u32 4294901760, %v745_v20  ;;  %v1191_v14 = vsub.f32 %v14137_v7, %v20366_v39 }
  0x7e   : > { %10679 = vmatprep.mubr.msk.f32.mxu1 %vm13703_vm0, %v20589_v21  ;;  %719 = vmatprep.mubr.f32.mxu0 %v20589_v21  ;;  %20666 = vst [vmem:[#allocation98_spill] sm:$0xff] %v14710_v36  ;;  %v20374_v20 = vand.u32 4294901760, %v14122_v46  ;;  %v14727_v16 = vand.u32 4294901760, %v14697_v3 }
  0x7f   : > { %v1173_v63 = vsub.f32 %v14112_v59, %v20352_v18  ;;  %v1186_v29 = vand.u32 4294901760, %v1185_v30  ;;  %v1192_v49 = vand.u32 4294901760, %v1191_v14  ;;  %v357_v14 = vsel %vm274_vm1, %v199_v40, 0  ;;  %v201_v40 = vld [vmem:[%s14095_s28 + $0xe8] sm:$0xff] }
  0x80   : > { %20667 = vst [vmem:[#allocation99_spill] sm:$0xff] %v14727_v16  ;;  %v4173_v35 = vsub.f32 %v14122_v46, %v20374_v20  ;;  %v14750_v20 = vand.u32 4294901760, %v357_v14 }
  0x81   : > { %10680 = vmatmul.mubr.f32.gmra.mrb[38].mxu1 %v724_v51  ;;  %725 = vmatmul.mubr.f32.gmra.mrb[38].mxu0 %v724_v51  ;;  %v14694_v51 = vand.u32 4294901760, %v14673_v57  ;;  %v1174_v18 = vand.u32 4294901760, %v1173_v63  ;;  %v354_v63 = vsel %vm274_vm1, %v198_v19, 0  ;;  %v757_v19 = vand.u32 4294901760, %v756_v23 }
  0x82   : > { %10682 = vmatprep.mubr.msk.f32.mxu1 %vm13703_vm0, %v20589_v21  ;;  %730 = vmatprep.mubr.f32.mxu0 %v20589_v21  ;;  %v778_v23 = vsub.f32 %v14697_v3, %v14727_v16  ;;  %20672 = vst [vmem:[#allocation104_spill] sm:$0xff] %v14750_v20  ;;  %v206_v3 = vld [vmem:[%s14095_s28 + $0x110] sm:$0xff] }
  0x83   : > { %20663 = vst [vmem:[#allocation96_spill] sm:$0xff] %v14694_v51  ;;  %v11668_v30 = vpack.c.bf16 %v1186_v29, %v1174_v18  ;;  %v767_v39 = vsub.f32 %v14673_v57, %v14694_v51  ;;  %v14735_v29 = vand.u32 4294901760, %v354_v63  ;;  %v11670_v18 = vpack.c.bf16 %v1192_v49, %v1180_v58  ;;  %v200_v51 = vld [vmem:[%s14095_s28 + $0xe0] sm:$0xff] }
  0x85   : > { %10683 = vmatmul.mubr.f32.gmra.mrb[40].mxu1 %v735_v37  ;;  %736 = vmatmul.mubr.f32.gmra.mrb[40].mxu0 %v735_v37  ;;  %v4166_v37 = vsub.f32 %v14120_v1, %v20371_v6  ;;  %v14733_v6 = vsub.f32 %v351_v52, %v14710_v36  ;;  %20669 = vst [vmem:[#allocation101_spill] sm:$0xff] %v14735_v29 }
  0x86   : > { %10685 = vmatprep.mubr.msk.f32.mxu1 %vm13703_vm0, %v20589_v21  ;;  %741 = vmatprep.mubr.f32.mxu0 %v20589_v21  ;;  %v14748_v49 = vsub.f32 %v354_v63, %v14735_v29 }
  0x87   : > { %v4167_v24 = vand.u32 4294901760, %v4166_v37  ;;  %20668 = vst [vmem:[#allocation100_spill] sm:$0xff] %v14733_v6  ;;  %v4174_v37 = vand.u32 4294901760, %v4173_v35  ;;  %11669 = vmatprep.subr.bf16.mxu0 %v11668_v30  ;;  %v14745_v58 = vand.u32 4294901760, %v14733_v6  ;;  %v779_v30 = vand.u32 4294901760, %v778_v23 }
  0x88   : > { %11671 = vmatpush1.bf16.msra.mxu0 %v11670_v18  ;;  %20671 = vst [vmem:[#allocation103_spill] sm:$0xff] %v14748_v49  ;;  %v363_v35 = vsel %vm274_vm1, %v201_v40, 0 }
  0x89   : > { %10686 = vmatmul.mubr.f32.gmra.mrb[42].mxu1 %v746_v32  ;;  %747 = vmatmul.mubr.f32.gmra.mrb[42].mxu0 %v746_v32  ;;  %v11802_v52 = vpack.c.bf16 %v4174_v37, %v4167_v24  ;;  %v768_v32 = vand.u32 4294901760, %v767_v39  ;;  %20670 = vst [vmem:[#allocation102_spill] sm:$0xff] %v14745_v58  ;;  %v360_v24 = vsel %vm274_vm1, %v200_v51, 0  ;;  %v11672_v39 = vpack.c.bf16 %v14011_v60, %v13985_v54  ;;  %v202_v37 = vld [vmem:[%s14095_s28 + $0xf0] sm:$0xff]  ;;  %v208_v60 = vld [vmem:[%s14095_s28 + $0x120] sm:$0xff] }
  0x8a   : > { %10688 = vmatprep.mubr.msk.f32.mxu1 %vm13703_vm0, %v20589_v21  ;;  %752 = vmatprep.mubr.f32.mxu0 %v20589_v21  ;;  %v789_v63 = vsub.f32 %v14733_v6, %v14745_v58  ;;  %v14767_v51 = vsub.f32 %v357_v14, %v14750_v20  ;;  %v14769_v18 = vand.u32 4294901760, %v360_v24  ;;  %v14775_v23 = vand.u32 4294901760, %v363_v35  ;;  %v203_v58 = vld [vmem:[%s14095_s28 + $0xf8] sm:$0xff] }
  0x8b   : > { %11803 = vmatpush3.bf16.msra.mxu1 %v11802_v52  ;;  %11673 = vmatprep.subr.bf16.mxu0 %v11672_v39  ;;  %v366_v52 = vsel %vm274_vm1, %v202_v37, 0  ;;  %v369_v16 = vsel %vm274_vm1, %v203_v58, 0 }
  0x8c   : > { %11804 = vmatprep.subr.bf16.mxu1 %v20572_v27  ;;  %20674 = vst [vmem:[#allocation106_spill] sm:$0xff] %v14767_v51  ;;  %20675 = vst [vmem:[#allocation107_spill] sm:$0xff] %v14769_v18  ;;  %v14781_v14 = vand.u32 4294901760, %v14767_v51  ;;  %v14784_v39 = vsub.f32 %v360_v24, %v14769_v18  ;;  %v14791_v37 = vsub.f32 %v363_v35, %v14775_v23  ;;  %v204_v35 = vld [vmem:[%s14095_s28 + $0x100] sm:$0xff] }
  0x8d   : > { %10689 = vmatmul.mubr.f32.gmra.mrb[44].mxu1 %v757_v19  ;;  %758 = vmatmul.mubr.f32.gmra.mrb[44].mxu0 %v757_v19  ;;  %v14764_v19 = vand.u32 4294901760, %v14748_v49  ;;  %20676 = vst [vmem:[#allocation108_spill] sm:$0xff] %v14775_v23 }
  0x8e   : > { %10691 = vmatprep.mubr.msk.f32.mxu1 %vm13703_vm0, %v20589_v21  ;;  %763 = vmatprep.mubr.f32.mxu0 %v20589_v21  ;;  %20677 = vst [vmem:[#allocation109_spill] sm:$0xff] %v14781_v14  ;;  %20678 = vst [vmem:[#allocation110_spill] sm:$0xff] %v14784_v39  ;;  %v14798_v24 = vand.u32 4294901760, %v14784_v39  ;;  %v14813_v58 = vand.u32 4294901760, %v14791_v37 }
  0x8f   : > { %20673 = vst [vmem:[#allocation105_spill] sm:$0xff] %v14764_v19  ;;  %v800_v40 = vsub.f32 %v14748_v49, %v14764_v19  ;;  %20679 = vst [vmem:[#allocation111_spill] sm:$0xff] %v14791_v37  ;;  %v811_v19 = vsub.f32 %v14767_v51, %v14781_v14  ;;  %v372_v51 = vsel %vm274_vm1, %v204_v35, 0 }
  0x90   : > { %20681 = vst [vmem:[#allocation113_spill] sm:$0xff] %v14798_v24  ;;  %v822_v14 = vsub.f32 %v14784_v39, %v14798_v24  ;;  %20684 = vst [vmem:[#allocation116_spill] sm:$0xff] %v14813_v58  ;;  %v833_v24 = vsub.f32 %v14791_v37, %v14813_v58  ;;  %v207_v58 = vld [vmem:[%s14095_s28 + $0x118] sm:$0xff] }
  0x91   : > { %10692 = vmatmul.mubr.f32.gmra.mrb[46].mxu1 %v768_v32  ;;  %769 = vmatmul.mubr.f32.gmra.mrb[46].mxu0 %v768_v32  ;;  %v790_v32 = vand.u32 4294901760, %v789_v63  ;;  %v801_v63 = vand.u32 4294901760, %v800_v40  ;;  %v812_v40 = vand.u32 4294901760, %v811_v19 }
  0x92   : > { %10694 = vmatprep.mubr.msk.f32.mxu1 %vm13703_vm0, %v20589_v21  ;;  %774 = vmatprep.mubr.f32.mxu0 %v20589_v21  ;;  %v823_v19 = vand.u32 4294901760, %v822_v14  ;;  %v834_v14 = vand.u32 4294901760, %v833_v24 }
  0x95   : > { %10695 = vmatmul.mubr.f32.gmra.mrb[48].mxu1 %v779_v30  ;;  %780 = vmatmul.mubr.f32.gmra.mrb[48].mxu0 %v779_v30  ;;  %v14793_v30 = vand.u32 4294901760, %v366_v52 }
  0x96   : > { %10697 = vmatprep.mubr.msk.f32.mxu1 %vm13703_vm0, %v20589_v21  ;;  %785 = vmatprep.mubr.f32.mxu0 %v20589_v21 }
  0x97   : > { %20680 = vst [vmem:[#allocation112_spill] sm:$0xff] %v14793_v30  ;;  %v14806_v49 = vsub.f32 %v366_v52, %v14793_v30  ;;  %v205_v52 = vld [vmem:[%s14095_s28 + $0x108] sm:$0xff] }
  0x98   : > { %v375_v39 = vsel %vm274_vm1, %v205_v52, 0 }
  0x99   : > { %10698 = vmatmul.mubr.f32.gmra.mrb[50].mxu1 %v790_v32  ;;  %791 = vmatmul.mubr.f32.gmra.mrb[50].mxu0 %v790_v32  ;;  %20682 = vst [vmem:[#allocation114_spill] sm:$0xff] %v14806_v49  ;;  %v14808_v32 = vand.u32 4294901760, %v369_v16  ;;  %v14821_v6 = vand.u32 4294901760, %v14806_v49 }
  0x9a   : > { %10700 = vmatprep.mubr.msk.f32.mxu1 %vm13703_vm0, %v20589_v21  ;;  %796 = vmatprep.mubr.f32.mxu0 %v20589_v21 }
  0x9b   : > { %20683 = vst [vmem:[#allocation115_spill] sm:$0xff] %v14808_v32  ;;  %20685 = vst [vmem:[#allocation117_spill] sm:$0xff] %v14821_v6  ;;  %v14828_v35 = vsub.f32 %v369_v16, %v14808_v32  ;;  %v844_v16 = vsub.f32 %v14806_v49, %v14821_v6 }
  0x9d   : > { %10701 = vmatmul.mubr.f32.gmra.mrb[52].mxu1 %v801_v63  ;;  %802 = vmatmul.mubr.f32.gmra.mrb[52].mxu0 %v801_v63  ;;  %v14823_v63 = vand.u32 4294901760, %v372_v51  ;;  %20687 = vst [vmem:[#allocation119_spill] sm:$0xff] %v14828_v35  ;;  %v14843_v52 = vand.u32 4294901760, %v14828_v35 }
  0x9e   : > { %10703 = vmatprep.mubr.msk.f32.mxu1 %vm13703_vm0, %v20589_v21  ;;  %807 = vmatprep.mubr.f32.mxu0 %v20589_v21 }
  0x9f   : > { %20686 = vst [vmem:[#allocation118_spill] sm:$0xff] %v14823_v63  ;;  %v14836_v57 = vsub.f32 %v372_v51, %v14823_v63  ;;  %20690 = vst [vmem:[#allocation122_spill] sm:$0xff] %v14843_v52  ;;  %v378_v51 = vsel %vm274_vm1, %v206_v3, 0  ;;  %v855_v6 = vsub.f32 %v14828_v35, %v14843_v52  ;;  %v381_v3 = vsel %vm274_vm1, %v207_v58, 0 }
  0xa0   : > { %v14858_v49 = vand.u32 4294901760, %v378_v51  ;;  %v14873_v35 = vand.u32 4294901760, %v381_v3  ;;  %v384_v58 = vsel %vm274_vm1, %v208_v60, 0 }
  0xa1   : > { %10704 = vmatmul.mubr.f32.gmra.mrb[54].mxu1 %v812_v40  ;;  %813 = vmatmul.mubr.f32.gmra.mrb[54].mxu0 %v812_v40  ;;  %20688 = vst [vmem:[#allocation120_spill] sm:$0xff] %v14836_v57  ;;  %v14838_v40 = vand.u32 4294901760, %v375_v39  ;;  %v14851_v37 = vand.u32 4294901760, %v14836_v57 }
  0xa2   : > { %10706 = vmatprep.mubr.msk.f32.mxu1 %vm13703_vm0, %v20589_v21  ;;  %818 = vmatprep.mubr.f32.mxu0 %v20589_v21  ;;  %20693 = vst [vmem:[#allocation125_spill] sm:$0xff] %v14858_v49  ;;  %v14871_v52 = vsub.f32 %v378_v51, %v14858_v49  ;;  %20696 = vst [vmem:[#allocation128_spill] sm:$0xff] %v14873_v35  ;;  %v14886_v51 = vsub.f32 %v381_v3, %v14873_v35  ;;  %v213_v35 = vld [vmem:[%s14095_s28 + $0x148] sm:$0xff] }
  0xa3   : > { %20689 = vst [vmem:[#allocation121_spill] sm:$0xff] %v14838_v40  ;;  %20691 = vst [vmem:[#allocation123_spill] sm:$0xff] %v14851_v37  ;;  %v14854_v24 = vsub.f32 %v375_v39, %v14838_v40  ;;  %v866_v39 = vsub.f32 %v14836_v57, %v14851_v37  ;;  %v209_v37 = vld [vmem:[%s14095_s28 + $0x128] sm:$0xff]  ;;  %v210_v40 = vld [vmem:[%s14095_s28 + $0x130] sm:$0xff] }
  0xa4   : > { %20695 = vst [vmem:[#allocation127_spill] sm:$0xff] %v14871_v52  ;;  %20698 = vst [vmem:[#allocation130_spill] sm:$0xff] %v14886_v51  ;;  %v387_v49 = vsel %vm274_vm1, %v209_v37, 0 }
  0xa5   : > { %10707 = vmatmul.mubr.f32.gmra.mrb[56].mxu1 %v823_v19  ;;  %824 = vmatmul.mubr.f32.gmra.mrb[56].mxu0 %v823_v19  ;;  %20692 = vst [vmem:[#allocation124_spill] sm:$0xff] %v14854_v24  ;;  %v845_v19 = vand.u32 4294901760, %v844_v16  ;;  %v856_v16 = vand.u32 4294901760, %v855_v6  ;;  %v867_v57 = vand.u32 4294901760, %v866_v39  ;;  %v14883_v6 = vand.u32 4294901760, %v14871_v52 }
  0xa6   : > { %10709 = vmatprep.mubr.msk.f32.mxu1 %vm13703_vm0, %v20589_v21  ;;  %829 = vmatprep.mubr.f32.mxu0 %v20589_v21  ;;  %v14895_v60 = vand.u32 4294901760, %v387_v49  ;;  %v390_v39 = vsel %vm274_vm1, %v210_v40, 0 }
  0xa7   : > { %20697 = vst [vmem:[#allocation129_spill] sm:$0xff] %v14883_v6  ;;  %v14910_v40 = vand.u32 4294901760, %v390_v39 }
  0xa8   : > { %20700 = vst [vmem:[#allocation132_spill] sm:$0xff] %v14895_v60 }
  0xa9   : > { %10710 = vmatmul.mubr.f32.gmra.mrb[58].mxu1 %v834_v14  ;;  %835 = vmatmul.mubr.f32.gmra.mrb[58].mxu0 %v834_v14  ;;  %v14868_v14 = vand.u32 4294901760, %v14854_v24  ;;  %20703 = vst [vmem:[#allocation135_spill] sm:$0xff] %v14910_v40 }
  0xaa   : > { %10712 = vmatprep.mubr.msk.f32.mxu1 %vm13703_vm0, %v20589_v21  ;;  %840 = vmatprep.mubr.f32.mxu0 %v20589_v21 }
  0xab   : > { %20694 = vst [vmem:[#allocation126_spill] sm:$0xff] %v14868_v14  ;;  %v877_v54 = vsub.f32 %v14854_v24, %v14868_v14  ;;  %v14901_v14 = vand.u32 4294901760, %v14886_v51  ;;  %v211_v24 = vld [vmem:[%s14095_s28 + $0x138] sm:$0xff] }
  0xad   : > { %10713 = vmatmul.mubr.f32.gmra.mrb[60].mxu1 %v845_v19  ;;  %846 = vmatmul.mubr.f32.gmra.mrb[60].mxu0 %v845_v19  ;;  %v14888_v19 = vand.u32 4294901760, %v384_v58  ;;  %v878_v3 = vand.u32 4294901760, %v877_v54  ;;  %20701 = vst [vmem:[#allocation133_spill] sm:$0xff] %v14901_v14 }
  0xae   : > { %10715 = vmatprep.mubr.msk.f32.mxu1 %vm13703_vm0, %v20589_v21  ;;  %851 = vmatprep.mubr.f32.mxu0 %v20589_v21 }
  0xaf   : > { %20699 = vst [vmem:[#allocation131_spill] sm:$0xff] %v14888_v19  ;;  %v14904_v37 = vsub.f32 %v384_v58, %v14888_v19  ;;  %v14918_v58 = vsub.f32 %v387_v49, %v14895_v60  ;;  %v393_v19 = vsel %vm274_vm1, %v211_v24, 0 }
  0xb0   : > { %v14934_v60 = vand.u32 4294901760, %v393_v19 }
  0xb1   : > { %10716 = vmatmul.mubr.f32.gmra.mrb[62].mxu1 %v856_v16  ;;  %857 = vmatmul.mubr.f32.gmra.mrb[62].mxu0 %v856_v16  ;;  %v888_v16 = vsub.f32 %v14871_v52, %v14883_v6  ;;  %20702 = vst [vmem:[#allocation134_spill] sm:$0xff] %v14904_v37  ;;  %v14915_v6 = vand.u32 4294901760, %v14904_v37  ;;  %20705 = vst [vmem:[#allocation137_spill] sm:$0xff] %v14918_v58  ;;  %v212_v52 = vld [vmem:[%s14095_s28 + $0x140] sm:$0xff] }
  0xb2   : > { %10718 = vmatprep.mubr.msk.f32.mxu1 %vm13703_vm0, %v20589_v21  ;;  %862 = vmatprep.mubr.f32.mxu0 %v20589_v21  ;;  %20708 = vst [vmem:[#allocation140_spill] sm:$0xff] %v14934_v60 }
  0xb3   : > { %v889_v54 = vand.u32 4294901760, %v888_v16  ;;  %20704 = vst [vmem:[#allocation136_spill] sm:$0xff] %v14915_v6  ;;  %v396_v16 = vsel %vm274_vm1, %v212_v52, 0  ;;  %v910_v49 = vsub.f32 %v14904_v37, %v14915_v6  ;;  %v399_v52 = vsel %vm274_vm1, %v213_v35, 0  ;;  %v214_v37 = vld [vmem:[%s14095_s28 + $0x150] sm:$0xff] }
  0xb4   : > { %v14940_v24 = vand.u32 4294901760, %v396_v16  ;;  %v14949_v6 = vsub.f32 %v393_v19, %v14934_v60  ;;  %v14955_v35 = vand.u32 4294901760, %v399_v52  ;;  %v215_v60 = vld [vmem:[%s14095_s28 + $0x158] sm:$0xff] }
  0xb5   : > { %10719 = vmatmul.mubr.f32.gmra.mrb[64].mxu1 %v867_v57  ;;  %868 = vmatmul.mubr.f32.gmra.mrb[64].mxu0 %v867_v57  ;;  %v899_v57 = vsub.f32 %v14886_v51, %v14901_v14  ;;  %v14932_v51 = vand.u32 4294901760, %v14918_v58 }
  0xb6   : > { %10721 = vmatprep.mubr.msk.f32.mxu1 %vm13703_vm0, %v20589_v21  ;;  %873 = vmatprep.mubr.f32.mxu0 %v20589_v21  ;;  %20709 = vst [vmem:[#allocation141_spill] sm:$0xff] %v14940_v24  ;;  %20711 = vst [vmem:[#allocation143_spill] sm:$0xff] %v14949_v6  ;;  %v14963_v19 = vsub.f32 %v396_v16, %v14940_v24  ;;  %v217_v24 = vld [vmem:[%s14095_s28 + $0x168] sm:$0xff] }
  0xb7   : > { %v900_v14 = vand.u32 4294901760, %v899_v57  ;;  %20707 = vst [vmem:[#allocation139_spill] sm:$0xff] %v14932_v51  ;;  %20712 = vst [vmem:[#allocation144_spill] sm:$0xff] %v14955_v35 }
  0xb8   : > { %20714 = vst [vmem:[#allocation146_spill] sm:$0xff] %v14963_v19  ;;  %v14976_v16 = vand.u32 4294901760, %v14963_v19 }
  0xb9   : > { %10722 = vmatmul.mubr.f32.gmra.mrb[66].mxu1 %v878_v3  ;;  %879 = vmatmul.mubr.f32.gmra.mrb[66].mxu0 %v878_v3  ;;  %v14926_v3 = vsub.f32 %v390_v39, %v14910_v40  ;;  %v911_v39 = vand.u32 4294901760, %v910_v49  ;;  %v219_v40 = vld [vmem:[%s14095_s28 + $0x178] sm:$0xff] }
  0xba   : > { %10724 = vmatprep.mubr.msk.f32.mxu1 %vm13703_vm0, %v20589_v21  ;;  %884 = vmatprep.mubr.f32.mxu0 %v20589_v21  ;;  %20716 = vst [vmem:[#allocation148_spill] sm:$0xff] %v14976_v16 }
  0xbb   : > { %20706 = vst [vmem:[#allocation138_spill] sm:$0xff] %v14926_v3  ;;  %v14946_v57 = vand.u32 4294901760, %v14926_v3 }
  0xbd   : > { %10725 = vmatmul.mubr.f32.gmra.mrb[68].mxu1 %v889_v54  ;;  %890 = vmatmul.mubr.f32.gmra.mrb[68].mxu0 %v889_v54  ;;  %v921_v54 = vsub.f32 %v14918_v58, %v14932_v51  ;;  %20710 = vst [vmem:[#allocation142_spill] sm:$0xff] %v14946_v57  ;;  %v932_v49 = vsub.f32 %v14926_v3, %v14946_v57  ;;  %v14960_v51 = vand.u32 4294901760, %v14949_v6  ;;  %v402_v58 = vsel %vm274_vm1, %v214_v37, 0 }
  0xbe   : > { %10727 = vmatprep.mubr.msk.f32.mxu1 %vm13703_vm0, %v20589_v21  ;;  %895 = vmatprep.mubr.f32.mxu0 %v20589_v21  ;;  %v14978_v3 = vand.u32 4294901760, %v402_v58  ;;  %v405_v37 = vsel %vm274_vm1, %v215_v60, 0 }
  0xbf   : > { %20713 = vst [vmem:[#allocation145_spill] sm:$0xff] %v14960_v51  ;;  %v943_v57 = vsub.f32 %v14949_v6, %v14960_v51  ;;  %v954_v51 = vsub.f32 %v14963_v19, %v14976_v16 }
  0xc0   : > { %20717 = vst [vmem:[#allocation149_spill] sm:$0xff] %v14978_v3  ;;  %v14991_v6 = vsub.f32 %v402_v58, %v14978_v3  ;;  %v218_v3 = vld [vmem:[%s14095_s28 + $0x170] sm:$0xff] }
  0xc1   : > { %10728 = vmatmul.mubr.f32.gmra.mrb[70].mxu1 %v900_v14  ;;  %901 = vmatmul.mubr.f32.gmra.mrb[70].mxu0 %v900_v14  ;;  %v922_v14 = vand.u32 4294901760, %v921_v54  ;;  %v933_v54 = vand.u32 4294901760, %v932_v49  ;;  %v944_v49 = vand.u32 4294901760, %v943_v57  ;;  %v955_v57 = vand.u32 4294901760, %v954_v51 }
  0xc2   : > { %10730 = vmatprep.mubr.msk.f32.mxu1 %vm13703_vm0, %v20589_v21  ;;  %906 = vmatprep.mubr.f32.mxu0 %v20589_v21  ;;  %20719 = vst [vmem:[#allocation151_spill] sm:$0xff] %v14991_v6  ;;  %v15003_v58 = vand.u32 4294901760, %v14991_v6  ;;  %v414_v51 = vsel %vm274_vm1, %v218_v3, 0 }
  0xc3   : > { %v15030_v3 = vand.u32 4294901760, %v414_v51 }
  0xc4   : > { %20721 = vst [vmem:[#allocation153_spill] sm:$0xff] %v15003_v58 }
  0xc5   : > { %10731 = vmatmul.mubr.f32.gmra.mrb[72].mxu1 %v911_v39  ;;  %912 = vmatmul.mubr.f32.gmra.mrb[72].mxu0 %v911_v39  ;;  %v14971_v39 = vsub.f32 %v399_v52, %v14955_v35  ;;  %v216_v52 = vld [vmem:[%s14095_s28 + $0x160] sm:$0xff]  ;;  %v14993_v35 = vand.u32 4294901760, %v405_v37  ;;  %20726 = vst [vmem:[#allocation158_spill] sm:$0xff] %v15030_v3 }
  0xc6   : > { %10733 = vmatprep.mubr.msk.f32.mxu1 %vm13703_vm0, %v20589_v21  ;;  %917 = vmatprep.mubr.f32.mxu0 %v20589_v21  ;;  %v408_v60 = vsel %vm274_vm1, %v216_v52, 0  ;;  %v411_v52 = vsel %vm274_vm1, %v217_v24, 0  ;;  %v417_v24 = vsel %vm274_vm1, %v219_v40, 0 }
  0xc7   : > { %20715 = vst [vmem:[#allocation147_spill] sm:$0xff] %v14971_v39  ;;  %20720 = vst [vmem:[#allocation152_spill] sm:$0xff] %v14993_v35  ;;  %v15006_v16 = vsub.f32 %v405_v37, %v14993_v35  ;;  %v15008_v19 = vand.u32 4294901760, %v408_v60  ;;  %v15024_v35 = vand.u32 4294901760, %v411_v52 }
  0xc9   : > { %10734 = vmatmul.mubr.f32.gmra.mrb[74].mxu1 %v922_v14  ;;  %923 = vmatmul.mubr.f32.gmra.mrb[74].mxu0 %v922_v14  ;;  %v14986_v14 = vand.u32 4294901760, %v14971_v39  ;;  %20722 = vst [vmem:[#allocation154_spill] sm:$0xff] %v15006_v16  ;;  %20723 = vst [vmem:[#allocation155_spill] sm:$0xff] %v15008_v19  ;;  %v15019_v37 = vand.u32 4294901760, %v15006_v16 }
  0xca   : > { %10736 = vmatprep.mubr.msk.f32.mxu1 %vm13703_vm0, %v20589_v21  ;;  %928 = vmatprep.mubr.f32.mxu0 %v20589_v21  ;;  %20725 = vst [vmem:[#allocation157_spill] sm:$0xff] %v15024_v35 }
  0xcb   : > { %20718 = vst [vmem:[#allocation150_spill] sm:$0xff] %v14986_v14  ;;  %20724 = vst [vmem:[#allocation156_spill] sm:$0xff] %v15019_v37 }
  0xcd   : > { %10737 = vmatmul.mubr.f32.gmra.mrb[76].mxu1 %v933_v54  ;;  %934 = vmatmul.mubr.f32.gmra.mrb[76].mxu0 %v933_v54  ;;  %v965_v54 = vsub.f32 %v14971_v39, %v14986_v14  ;;  %v15022_v39 = vsub.f32 %v408_v60, %v15008_v19  ;;  %v15045_v19 = vand.u32 4294901760, %v417_v24 }
  0xce   : > { %10739 = vmatprep.mubr.msk.f32.mxu1 %vm13703_vm0, %v20589_v21  ;;  %939 = vmatprep.mubr.f32.mxu0 %v20589_v21 }
  0xcf   : > { %v966_v14 = vand.u32 4294901760, %v965_v54  ;;  %v15036_v60 = vand.u32 4294901760, %v15022_v39  ;;  %20728 = vst [vmem:[#allocation160_spill] sm:$0xff] %v15045_v19 }
  0xd1   : > { %10740 = vmatmul.mubr.f32.gmra.mrb[78].mxu1 %v944_v49  ;;  %945 = vmatmul.mubr.f32.gmra.mrb[78].mxu0 %v944_v49  ;;  %v976_v49 = vsub.f32 %v14991_v6, %v15003_v58  ;;  %20727 = vst [vmem:[#allocation159_spill] sm:$0xff] %v15036_v60  ;;  %v15039_v58 = vsub.f32 %v411_v52, %v15024_v35  ;;  %v220_v6 = vld [vmem:[%s14095_s28 + $0x180] sm:$0xff] }
  0xd2   : > { %10742 = vmatprep.mubr.msk.f32.mxu1 %vm13703_vm0, %v20589_v21  ;;  %950 = vmatprep.mubr.f32.mxu0 %v20589_v21  ;;  %v15053_v52 = vsub.f32 %v414_v51, %v15030_v3 }
  0xd3   : > { %v977_v54 = vand.u32 4294901760, %v976_v49  ;;  %v15050_v49 = vand.u32 4294901760, %v15039_v58 }
  0xd5   : > { %10743 = vmatmul.mubr.f32.gmra.mrb[80].mxu1 %v955_v57  ;;  %956 = vmatmul.mubr.f32.gmra.mrb[80].mxu0 %v955_v57  ;;  %v987_v57 = vsub.f32 %v15006_v16, %v15019_v37  ;;  %20729 = vst [vmem:[#allocation161_spill] sm:$0xff] %v15050_v49  ;;  %v420_v37 = vsel %vm274_vm1, %v220_v6, 0  ;;  %v15060_v16 = vsub.f32 %v417_v24, %v15045_v19 }
  0xd6   : > { %10745 = vmatprep.mubr.msk.f32.mxu1 %vm13703_vm0, %v20589_v21  ;;  %961 = vmatprep.mubr.f32.mxu0 %v20589_v21  ;;  %v15067_v51 = vand.u32 4294901760, %v420_v37 }
  0xd7   : > { %v988_v40 = vand.u32 4294901760, %v987_v57  ;;  %v1009_v57 = vsub.f32 %v15039_v58, %v15050_v49 }
  0xd8   : > { %20731 = vst [vmem:[#allocation163_spill] sm:$0xff] %v15067_v51 }
  0xd9   : > { %10746 = vmatmul.mubr.f32.gmra.mrb[82].mxu1 %v966_v14  ;;  %967 = vmatmul.mubr.f32.gmra.mrb[82].mxu0 %v966_v14  ;;  %v998_v14 = vsub.f32 %v15022_v39, %v15036_v60  ;;  %v15065_v60 = vand.u32 4294901760, %v15053_v52  ;;  %v1010_v6 = vand.u32 4294901760, %v1009_v57 }
  0xda   : > { %10748 = vmatprep.mubr.msk.f32.mxu1 %vm13703_vm0, %v20589_v21  ;;  %972 = vmatprep.mubr.f32.mxu0 %v20589_v21 }
  0xdb   : > { %20730 = vst [vmem:[#allocation162_spill] sm:$0xff] %v15065_v60  ;;  %v1020_v24 = vsub.f32 %v15053_v52, %v15065_v60 }
  0xdd   : > { %10749 = vmatmul.mubr.f32.gmra.mrb[84].mxu1 %v977_v54  ;;  %978 = vmatmul.mubr.f32.gmra.mrb[84].mxu0 %v977_v54  ;;  %v999_v54 = vand.u32 4294901760, %v998_v14  ;;  %v15078_v14 = vsub.f32 %v420_v37, %v15067_v51  ;;  %v1021_v49 = vand.u32 4294901760, %v1020_v24  ;;  %v11805_v24 = vpack.c.bf16 %v14021_v62, %v14016_v61 }
  0xde   : > { %10751 = vmatprep.mubr.msk.f32.mxu1 %vm13703_vm0, %v20589_v21  ;;  %983 = vmatprep.mubr.f32.mxu0 %v20589_v21 }
  0xdf   : > { %v15086_v57 = vand.u32 4294901760, %v15078_v14 }
  0xe1   : > { %10752 = vmatmul.mubr.f32.gmra.mrb[86].mxu1 %v988_v40  ;;  %989 = vmatmul.mubr.f32.gmra.mrb[86].mxu0 %v988_v40  ;;  %v15075_v40 = vand.u32 4294901760, %v15060_v16  ;;  %v1042_v60 = vsub.f32 %v15078_v14, %v15086_v57 }
  0xe2   : > { %10754 = vmatprep.mubr.msk.f32.mxu1 %vm13703_vm0, %v20589_v21  ;;  %994 = vmatprep.mubr.f32.mxu0 %v20589_v21 }
  0xe5   : > { %10755 = vmatmul.mubr.f32.gmra.mrb[88].mxu1 %v999_v54  ;;  %1000 = vmatmul.mubr.f32.gmra.mrb[88].mxu0 %v999_v54  ;;  %v1031_v54 = vsub.f32 %v15060_v16, %v15075_v40 }
  0xe6   : > { %10757 = vmatprep.mubr.msk.f32.mxu1 %vm13703_vm0, %v20589_v21  ;;  %1005 = vmatprep.mubr.f32.mxu0 %v20589_v21 }
  0xe7   : > { %v1032_v37 = vand.u32 4294901760, %v1031_v54  ;;  %v11678_v54 = vpack.c.bf16 %v14242_v28, %v14237_v15 }
  0xe9   : > { %10758 = vmatmul.mubr.f32.gmra.mrb[90].mxu1 %v1010_v6  ;;  %1011 = vmatmul.mubr.f32.gmra.mrb[90].mxu0 %v1010_v6  ;;  %v1043_v6 = vand.u32 4294901760, %v1042_v60  ;;  %v11676_v60 = vpack.c.bf16 %v14222_v55, %v14211_v44 }
  0xea   : > { %10760 = vmatprep.mubr.msk.f32.mxu1 %vm13703_vm0, %v20589_v21  ;;  %1016 = vmatprep.mubr.f32.mxu0 %v20589_v21 }
  0xed   : > { %10761 = vmatmul.mubr.f32.gmra.mrb[92].mxu1 %v1021_v49  ;;  %1022 = vmatmul.mubr.f32.gmra.mrb[92].mxu0 %v1021_v49  ;;  %v11674_v49 = vpack.c.bf16 %v14069_v0, %v14064_v48 }
  0xee   : > { %10763 = vmatprep.mubr.msk.f32.mxu1 %vm13703_vm0, %v20589_v21  ;;  %1027 = vmatprep.mubr.f32.mxu0 %v20589_v21 }
  0xf1   : > { %10764 = vmatmul.mubr.f32.gmra.mrb[94].mxu1 %v1032_v37  ;;  %1033 = vmatmul.mubr.f32.gmra.mrb[94].mxu0 %v1032_v37  ;;  %v11808_v37 = vpack.c.bf16 %v14277_v56, %v14259_v10 }
  0xf2   : > { %10766 = vmatprep.mubr.msk.f32.mxu1 %vm13703_vm0, %v20589_v21  ;;  %1038 = vmatprep.mubr.f32.mxu0 %v20589_v21 }
  0xf5   : > { %10767 = vmatmul.mubr.f32.gmra.mrb[96].mxu1 %v1043_v6  ;;  %1044 = vmatmul.mubr.f32.gmra.mrb[96].mxu0 %v1043_v6  ;;  %v11680_v6 = vpack.c.bf16 %v14348_v33, %v14333_v45 }
  0xf6   : > { %10793 = vmatprep.mubr.msk.f32.mxu1 %vm13703_vm0, %v20589_v21  ;;  %1234 = vmatprep.mubr.f32.mxu0 %v20589_v21 }
  0xf9   : > { %10794 = vmatmul.mubr.f32.vlgmr.msra.gmra.mrb[0].mxu1 %v14139_v8  ;;  %1236 = vmatmul.mubr.f32.vlgmr.msra.gmra.mrb[0].mxu0 %v14139_v8 }
  0xfa   : > { %11675 = vmatpush1.bf16.msra.mxu0 %v11674_v49  ;;  %10796 = vmatprep.mubr.msk.f32.mxu1 %vm13703_vm0, %v20589_v21  ;;  %v11682_v49 = vpack.c.bf16 %v14368_v22, %v14353_v2 }
  0xfb   : > { %11806 = vmatpush3.bf16.msra.mxu1 %v11805_v24  ;;  %1241 = vmatprep.mubr.f32.mxu0 %v20589_v21  ;;  %v11811_v24 = vpack.c.bf16 %v14395_v31, %v14378_v38 }
  0xfc   : > { %11677 = vmatprep.subr.bf16.mxu0 %v11676_v60  ;;  %11807 = vmatprep.subr.bf16.mxu1 %v20572_v27  ;;  %v11684_v60 = vpack.c.bf16 %v14460_v12, %v14455_v17 }
  0xfd   : > { %10797 = vmatmul.mubr.f32.gmra.mrb[2].mxu1 %v14173_v47  ;;  %1243 = vmatmul.mubr.f32.gmra.mrb[2].mxu0 %v14173_v47  ;;  %v20732_v47 = vld [vmem:[#allocation28_spill] sm:$0xff] }
  0xfe   : > { %10799 = vmatprep.mubr.msk.f32.mxu1 %vm13703_vm0, %v20589_v21  ;;  %1248 = vmatprep.mubr.f32.mxu0 %v20589_v21 }
  0xff   : > { %11679 = vmatpush1.bf16.msra.mxu0 %v11678_v54  ;;  %11809 = vmatpush3.bf16.msra.mxu1 %v11808_v37  ;;  %v11686_v54 = vpack.c.bf16 %v14485_v34, %v14480_v11  ;;  %v11814_v37 = vpack.c.bf16 %v14044_v42, %v14042_v43 }
 0x100   : > { %11681 = vmatprep.subr.bf16.mxu0 %v11680_v6  ;;  %11810 = vmatprep.subr.bf16.mxu1 %v20572_v27  ;;  %v11688_v6 = vpack.c.bf16 %v14086_v9, %v14073_v4 }
 0x101   : > { %10800 = vmatmul.mubr.f32.gmra.mrb[4].mxu1 %v20732_v47  ;;  %1250 = vmatmul.mubr.f32.gmra.mrb[4].mxu0 %v20732_v47  ;;  %v20733_v47 = vld [vmem:[#allocation31_spill] sm:$0xff] }
 0x102   : > { %10802 = vmatprep.mubr.msk.f32.mxu1 %vm13703_vm0, %v20589_v21  ;;  %1255 = vmatprep.mubr.f32.mxu0 %v20589_v21 }
 0x103   : > { %11683 = vmatpush1.bf16.msra.mxu0 %v11682_v49  ;;  %11812 = vmatpush3.bf16.msra.mxu1 %v11811_v24  ;;  %v11690_v49 = vpack.c.bf16 %v14108_v25, %v14101_v26  ;;  %v11817_v24 = vpack.c.bf16 %v14099_v5, %v14090_v13 }
 0x104   : > { %11685 = vmatprep.subr.bf16.mxu0 %v11684_v60  ;;  %11813 = vmatprep.subr.bf16.mxu1 %v20572_v27  ;;  %v20734_v60 = vld [vmem:[#allocation33_spill] sm:$0xff] }
 0x105   : > { %10803 = vmatmul.mubr.f32.gmra.mrb[6].mxu1 %v20733_v47  ;;  %1257 = vmatmul.mubr.f32.gmra.mrb[6].mxu0 %v20733_v47 }
 0x106   : > { %10805 = vmatprep.mubr.msk.f32.mxu1 %vm13703_vm0, %v20589_v21  ;;  %1262 = vmatprep.mubr.f32.mxu0 %v20589_v21 }
 0x107   : > { %11687 = vmatpush1.bf16.msra.mxu0 %v11686_v54  ;;  %11815 = vmatpush3.bf16.msra.mxu1 %v11814_v37  ;;  %v20735_v54 = vld [vmem:[#allocation36_spill] sm:$0xff]  ;;  %v20736_v37 = vld [vmem:[#allocation39_spill] sm:$0xff] }
 0x108   : > { %11689 = vmatprep.subr.bf16.mxu0 %v11688_v6  ;;  %11816 = vmatprep.subr.bf16.mxu1 %v20572_v27  ;;  %v20737_v6 = vld [vmem:[#allocation43_spill] sm:$0xff] }
 0x109   : > { %10806 = vmatmul.mubr.f32.gmra.mrb[8].mxu1 %v20734_v60  ;;  %1264 = vmatmul.mubr.f32.gmra.mrb[8].mxu0 %v20734_v60  ;;  %v20742_v60 = vld [vmem:[#allocation55_spill] sm:$0xff] }
 0x10a   : > { %10808 = vmatprep.mubr.msk.f32.mxu1 %vm13703_vm0, %v20589_v21  ;;  %1269 = vmatprep.mubr.f32.mxu0 %v20589_v21 }
 0x10b   : > { %11691 = vmatpush1.bf16.msra.mxu0 %v11690_v49  ;;  %11818 = vmatpush3.bf16.msra.mxu1 %v11817_v24  ;;  %v20738_v49 = vld [vmem:[#allocation45_spill] sm:$0xff]  ;;  %v20739_v24 = vld [vmem:[#allocation50_spill] sm:$0xff] }
 0x10c   : > { %11819 = vmatprep.subr.bf16.mxu1 %v20572_v27 }
 0x10d   : > { %10809 = vmatmul.mubr.f32.gmra.mrb[10].mxu1 %v20735_v54  ;;  %1271 = vmatmul.mubr.f32.gmra.mrb[10].mxu0 %v20735_v54  ;;  %v20740_v54 = vld [vmem:[#allocation53_spill] sm:$0xff] }
 0x10e   : > { %10811 = vmatprep.mubr.msk.f32.mxu1 %vm13703_vm0, %v20589_v21  ;;  %1276 = vmatprep.mubr.f32.mxu0 %v20589_v21 }
 0x111   : > { %10812 = vmatmul.mubr.f32.gmra.mrb[12].mxu1 %v20736_v37  ;;  %1278 = vmatmul.mubr.f32.gmra.mrb[12].mxu0 %v20736_v37  ;;  %v11694_v37 = vpack.c.bf16 %v14137_v7, %v14126_v53 }
 0x112   : > { %10814 = vmatprep.mubr.msk.f32.mxu1 %vm13703_vm0, %v20589_v21  ;;  %1283 = vmatprep.mubr.f32.mxu0 %v20589_v21 }
 0x115   : > { %10815 = vmatmul.mubr.f32.gmra.mrb[14].mxu1 %v20737_v6  ;;  %1285 = vmatmul.mubr.f32.gmra.mrb[14].mxu0 %v20737_v6  ;;  %v11692_v6 = vpack.c.bf16 %v14116_v50, %v14112_v59 }
 0x116   : > { %10817 = vmatprep.mubr.msk.f32.mxu1 %vm13703_vm0, %v20589_v21  ;;  %1290 = vmatprep.mubr.f32.mxu0 %v20589_v21 }
 0x117   : > { %11693 = vmatprep.subr.bf16.mxu0 %v11692_v6  ;;  %v20744_v6 = vld [vmem:[#allocation64_spill] sm:$0xff] }
 0x118   : > { %11695 = vmatpush1.bf16.msra.mxu0 %v11694_v37  ;;  %v20743_v37 = vld [vmem:[#allocation61_spill] sm:$0xff] }
 0x119   : > { %10818 = vmatmul.mubr.f32.gmra.mrb[16].mxu1 %v20738_v49  ;;  %1292 = vmatmul.mubr.f32.gmra.mrb[16].mxu0 %v20738_v49  ;;  %v11820_v49 = vpack.c.bf16 %v14122_v46, %v14120_v1 }
 0x11a   : > { %10820 = vmatprep.mubr.msk.f32.mxu1 %vm13703_vm0, %v20589_v21  ;;  %1297 = vmatprep.mubr.f32.mxu0 %v20589_v21 }
 0x11b   : > { %11821 = vmatpush3.bf16.msra.mxu1 %v11820_v49  ;;  %v20745_v49 = vld [vmem:[#allocation68_spill] sm:$0xff] }
 0x11c   : > { %11822 = vmatprep.subr.bf16.mxu1 %v20572_v27 }
 0x11d   : > { %10821 = vmatmul.mubr.f32.gmra.mrb[18].mxu1 %v20739_v24  ;;  %1299 = vmatmul.mubr.f32.gmra.mrb[18].mxu0 %v20739_v24  ;;  %v20741_v24 = vld [vmem:[#allocation5_spill] sm:$0xff] }
 0x11e   : > { %10823 = vmatprep.mubr.msk.f32.mxu1 %vm13703_vm0, %v20589_v21  ;;  %1304 = vmatprep.mubr.f32.mxu0 %v20589_v21 }
 0x11f   : > { %11697 = vmatprep.subr.bf16.mxu0 %v20741_v24 }
 0x121   : > { %10824 = vmatmul.mubr.f32.gmra.mrb[20].mxu1 %v20740_v54  ;;  %1306 = vmatmul.mubr.f32.gmra.mrb[20].mxu0 %v20740_v54  ;;  %v20789_v54 = vld [vmem:[#allocation23_spill] sm:$0xff] }
 0x122   : > { %10826 = vmatprep.mubr.msk.f32.mxu1 %vm13703_vm0, %v20589_v21  ;;  %1311 = vmatprep.mubr.f32.mxu0 %v20589_v21 }
 0x125   : > { %10827 = vmatmul.mubr.f32.gmra.mrb[22].mxu1 %v20742_v60  ;;  %1313 = vmatmul.mubr.f32.gmra.mrb[22].mxu0 %v20742_v60  ;;  %v20787_v60 = vld [vmem:[#allocation40_spill] sm:$0xff] }
 0x126   : > { %10829 = vmatprep.mubr.msk.f32.mxu1 %vm13703_vm0, %v20589_v21  ;;  %1318 = vmatprep.mubr.f32.mxu0 %v20589_v21 }
 0x129   : > { %10830 = vmatmul.mubr.f32.gmra.mrb[24].mxu1 %v14408_v41  ;;  %1320 = vmatmul.mubr.f32.gmra.mrb[24].mxu0 %v14408_v41  ;;  %v20786_v41 = vld [vmem:[#allocation22_spill] sm:$0xff] }
 0x12a   : > { %10832 = vmatprep.mubr.msk.f32.mxu1 %vm13703_vm0, %v20589_v21  ;;  %1325 = vmatprep.mubr.f32.mxu0 %v20589_v21 }
 0x12d   : > { %10833 = vmatmul.mubr.f32.gmra.mrb[26].mxu1 %v20743_v37  ;;  %1327 = vmatmul.mubr.f32.gmra.mrb[26].mxu0 %v20743_v37  ;;  %v20746_v37 = vld [vmem:[#allocation71_spill] sm:$0xff] }
 0x12e   : > { %10835 = vmatprep.mubr.msk.f32.mxu1 %vm13703_vm0, %v20589_v21  ;;  %1332 = vmatprep.mubr.f32.mxu0 %v20589_v21 }
 0x131   : > { %10836 = vmatmul.mubr.f32.gmra.mrb[28].mxu1 %v20744_v6  ;;  %1334 = vmatmul.mubr.f32.gmra.mrb[28].mxu0 %v20744_v6  ;;  %v20747_v6 = vld [vmem:[#allocation72_spill] sm:$0xff] }
 0x132   : > { %10838 = vmatprep.mubr.msk.f32.mxu1 %vm13703_vm0, %v20589_v21  ;;  %1339 = vmatprep.mubr.f32.mxu0 %v20589_v21 }
 0x135   : > { %10839 = vmatmul.mubr.f32.gmra.mrb[30].mxu1 %v20745_v49  ;;  %1341 = vmatmul.mubr.f32.gmra.mrb[30].mxu0 %v20745_v49  ;;  %v20748_v49 = vld [vmem:[#allocation77_spill] sm:$0xff] }
 0x136   : > { %10841 = vmatprep.mubr.msk.f32.mxu1 %vm13703_vm0, %v20589_v21  ;;  %1346 = vmatprep.mubr.f32.mxu0 %v20589_v21 }
 0x139   : > { %10842 = vmatmul.mubr.f32.gmra.mrb[32].mxu1 %v20746_v37  ;;  %1348 = vmatmul.mubr.f32.gmra.mrb[32].mxu0 %v20746_v37  ;;  %v20749_v37 = vld [vmem:[#allocation80_spill] sm:$0xff] }
 0x13a   : > { %10844 = vmatprep.mubr.msk.f32.mxu1 %vm13703_vm0, %v20589_v21  ;;  %1353 = vmatprep.mubr.f32.mxu0 %v20589_v21 }
 0x13d   : > { %10845 = vmatmul.mubr.f32.gmra.mrb[34].mxu1 %v20747_v6  ;;  %1355 = vmatmul.mubr.f32.gmra.mrb[34].mxu0 %v20747_v6  ;;  %v20750_v6 = vld [vmem:[#allocation81_spill] sm:$0xff] }
 0x13e   : > { %10847 = vmatprep.mubr.msk.f32.mxu1 %vm13703_vm0, %v20589_v21  ;;  %1360 = vmatprep.mubr.f32.mxu0 %v20589_v21 }
 0x141   : > { %10848 = vmatmul.mubr.f32.gmra.mrb[36].mxu1 %v20748_v49  ;;  %1362 = vmatmul.mubr.f32.gmra.mrb[36].mxu0 %v20748_v49  ;;  %v20751_v49 = vld [vmem:[#allocation86_spill] sm:$0xff] }
 0x142   : > { %10850 = vmatprep.mubr.msk.f32.mxu1 %vm13703_vm0, %v20589_v21  ;;  %1367 = vmatprep.mubr.f32.mxu0 %v20589_v21 }
 0x145   : > { %10851 = vmatmul.mubr.f32.gmra.mrb[38].mxu1 %v20749_v37  ;;  %1369 = vmatmul.mubr.f32.gmra.mrb[38].mxu0 %v20749_v37  ;;  %v20752_v37 = vld [vmem:[#allocation88_spill] sm:$0xff] }
 0x146   : > { %10853 = vmatprep.mubr.msk.f32.mxu1 %vm13703_vm0, %v20589_v21  ;;  %1374 = vmatprep.mubr.f32.mxu0 %v20589_v21 }
 0x149   : > { %10854 = vmatmul.mubr.f32.gmra.mrb[40].mxu1 %v20750_v6  ;;  %1376 = vmatmul.mubr.f32.gmra.mrb[40].mxu0 %v20750_v6  ;;  %v20753_v6 = vld [vmem:[#allocation90_spill] sm:$0xff] }
 0x14a   : > { %10856 = vmatprep.mubr.msk.f32.mxu1 %vm13703_vm0, %v20589_v21  ;;  %1381 = vmatprep.mubr.f32.mxu0 %v20589_v21 }
 0x14d   : > { %10857 = vmatmul.mubr.f32.gmra.mrb[42].mxu1 %v20751_v49  ;;  %1383 = vmatmul.mubr.f32.gmra.mrb[42].mxu0 %v20751_v49  ;;  %v20754_v49 = vld [vmem:[#allocation94_spill] sm:$0xff] }
 0x14e   : > { %10859 = vmatprep.mubr.msk.f32.mxu1 %vm13703_vm0, %v20589_v21  ;;  %1388 = vmatprep.mubr.f32.mxu0 %v20589_v21 }
 0x151   : > { %10860 = vmatmul.mubr.f32.gmra.mrb[44].mxu1 %v20752_v37  ;;  %1390 = vmatmul.mubr.f32.gmra.mrb[44].mxu0 %v20752_v37  ;;  %v20785_v37 = vld [vmem:[#allocation20_spill] sm:$0xff] }
 0x152   : > { %10862 = vmatprep.mubr.msk.f32.mxu1 %vm13703_vm0, %v20589_v21  ;;  %1395 = vmatprep.mubr.f32.mxu0 %v20589_v21 }
 0x155   : > { %10863 = vmatmul.mubr.f32.gmra.mrb[46].mxu1 %v20753_v6  ;;  %1397 = vmatmul.mubr.f32.gmra.mrb[46].mxu0 %v20753_v6  ;;  %v20783_v6 = vld [vmem:[#allocation37_spill] sm:$0xff] }
 0x156   : > { %10865 = vmatprep.mubr.msk.f32.mxu1 %vm13703_vm0, %v20589_v21  ;;  %1402 = vmatprep.mubr.f32.mxu0 %v20589_v21 }
 0x159   : > { %10866 = vmatmul.mubr.f32.gmra.mrb[48].mxu1 %v20754_v49  ;;  %1404 = vmatmul.mubr.f32.gmra.mrb[48].mxu0 %v20754_v49  ;;  %v20782_v49 = vld [vmem:[#allocation19_spill] sm:$0xff] }
 0x15a   : > { %10868 = vmatprep.mubr.msk.f32.mxu1 %vm13703_vm0, %v20589_v21  ;;  %1409 = vmatprep.mubr.f32.mxu0 %v20589_v21 }
 0x15d   : > { %10869 = vmatmul.mubr.f32.gmra.mrb[50].mxu1 %v14710_v36  ;;  %1411 = vmatmul.mubr.f32.gmra.mrb[50].mxu0 %v14710_v36  ;;  %v20781_v36 = vld [vmem:[#allocation17_spill] sm:$0xff] }
 0x15e   : > { %10871 = vmatprep.mubr.msk.f32.mxu1 %vm13703_vm0, %v20589_v21  ;;  %1416 = vmatprep.mubr.f32.mxu0 %v20589_v21 }
 0x161   : > { %10872 = vmatmul.mubr.f32.gmra.mrb[52].mxu1 %v14735_v29  ;;  %1418 = vmatmul.mubr.f32.gmra.mrb[52].mxu0 %v14735_v29  ;;  %v20779_v29 = vld [vmem:[#allocation35_spill] sm:$0xff] }
 0x162   : > { %10874 = vmatprep.mubr.msk.f32.mxu1 %vm13703_vm0, %v20589_v21  ;;  %1423 = vmatprep.mubr.f32.mxu0 %v20589_v21 }
 0x165   : > { %10875 = vmatmul.mubr.f32.gmra.mrb[54].mxu1 %v14750_v20  ;;  %1425 = vmatmul.mubr.f32.gmra.mrb[54].mxu0 %v14750_v20  ;;  %v20778_v20 = vld [vmem:[#allocation16_spill] sm:$0xff] }
 0x166   : > { %10877 = vmatprep.mubr.msk.f32.mxu1 %vm13703_vm0, %v20589_v21  ;;  %1430 = vmatprep.mubr.f32.mxu0 %v20589_v21 }
 0x169   : > { %10878 = vmatmul.mubr.f32.gmra.mrb[56].mxu1 %v14769_v18  ;;  %1432 = vmatmul.mubr.f32.gmra.mrb[56].mxu0 %v14769_v18  ;;  %v20777_v18 = vld [vmem:[#allocation13_spill] sm:$0xff] }
 0x16a   : > { %10880 = vmatprep.mubr.msk.f32.mxu1 %vm13703_vm0, %v20589_v21  ;;  %1437 = vmatprep.mubr.f32.mxu0 %v20589_v21 }
 0x16d   : > { %10881 = vmatmul.mubr.f32.gmra.mrb[58].mxu1 %v14775_v23  ;;  %1439 = vmatmul.mubr.f32.gmra.mrb[58].mxu0 %v14775_v23  ;;  %v20775_v23 = vld [vmem:[#allocation30_spill] sm:$0xff] }
 0x16e   : > { %10883 = vmatprep.mubr.msk.f32.mxu1 %vm13703_vm0, %v20589_v21  ;;  %1444 = vmatprep.mubr.f32.mxu0 %v20589_v21 }
 0x171   : > { %10884 = vmatmul.mubr.f32.gmra.mrb[60].mxu1 %v14793_v30  ;;  %1446 = vmatmul.mubr.f32.gmra.mrb[60].mxu0 %v14793_v30  ;;  %v20755_v30 = vld [vmem:[#allocation121_spill] sm:$0xff] }
 0x172   : > { %10886 = vmatprep.mubr.msk.f32.mxu1 %vm13703_vm0, %v20589_v21  ;;  %1451 = vmatprep.mubr.f32.mxu0 %v20589_v21 }
 0x175   : > { %10887 = vmatmul.mubr.f32.gmra.mrb[62].mxu1 %v14808_v32  ;;  %1453 = vmatmul.mubr.f32.gmra.mrb[62].mxu0 %v14808_v32  ;;  %v20756_v32 = vld [vmem:[#allocation125_spill] sm:$0xff] }
 0x176   : > { %10889 = vmatprep.mubr.msk.f32.mxu1 %vm13703_vm0, %v20589_v21  ;;  %1458 = vmatprep.mubr.f32.mxu0 %v20589_v21 }
 0x179   : > { %10890 = vmatmul.mubr.f32.gmra.mrb[64].mxu1 %v14823_v63  ;;  %1460 = vmatmul.mubr.f32.gmra.mrb[64].mxu0 %v14823_v63  ;;  %v20757_v63 = vld [vmem:[#allocation128_spill] sm:$0xff] }
 0x17a   : > { %10892 = vmatprep.mubr.msk.f32.mxu1 %vm13703_vm0, %v20589_v21  ;;  %1465 = vmatprep.mubr.f32.mxu0 %v20589_v21 }
 0x17d   : > { %10893 = vmatmul.mubr.f32.gmra.mrb[66].mxu1 %v20755_v30  ;;  %1467 = vmatmul.mubr.f32.gmra.mrb[66].mxu0 %v20755_v30  ;;  %v20758_v30 = vld [vmem:[#allocation131_spill] sm:$0xff] }
 0x17e   : > { %10895 = vmatprep.mubr.msk.f32.mxu1 %vm13703_vm0, %v20589_v21  ;;  %1472 = vmatprep.mubr.f32.mxu0 %v20589_v21 }
 0x181   : > { %10896 = vmatmul.mubr.f32.gmra.mrb[68].mxu1 %v20756_v32  ;;  %1474 = vmatmul.mubr.f32.gmra.mrb[68].mxu0 %v20756_v32  ;;  %v20759_v32 = vld [vmem:[#allocation132_spill] sm:$0xff] }
 0x182   : > { %10898 = vmatprep.mubr.msk.f32.mxu1 %vm13703_vm0, %v20589_v21  ;;  %1479 = vmatprep.mubr.f32.mxu0 %v20589_v21 }
 0x185   : > { %10899 = vmatmul.mubr.f32.gmra.mrb[70].mxu1 %v20757_v63  ;;  %1481 = vmatmul.mubr.f32.gmra.mrb[70].mxu0 %v20757_v63  ;;  %v20760_v63 = vld [vmem:[#allocation135_spill] sm:$0xff] }
 0x186   : > { %10901 = vmatprep.mubr.msk.f32.mxu1 %vm13703_vm0, %v20589_v21  ;;  %1486 = vmatprep.mubr.f32.mxu0 %v20589_v21 }
 0x189   : > { %10902 = vmatmul.mubr.f32.gmra.mrb[72].mxu1 %v20758_v30  ;;  %1488 = vmatmul.mubr.f32.gmra.mrb[72].mxu0 %v20758_v30  ;;  %v20761_v30 = vld [vmem:[#allocation140_spill] sm:$0xff] }
 0x18a   : > { %10904 = vmatprep.mubr.msk.f32.mxu1 %vm13703_vm0, %v20589_v21  ;;  %1493 = vmatprep.mubr.f32.mxu0 %v20589_v21 }
 0x18d   : > { %10905 = vmatmul.mubr.f32.gmra.mrb[74].mxu1 %v20759_v32  ;;  %1495 = vmatmul.mubr.f32.gmra.mrb[74].mxu0 %v20759_v32  ;;  %v20762_v32 = vld [vmem:[#allocation141_spill] sm:$0xff] }
 0x18e   : > { %10907 = vmatprep.mubr.msk.f32.mxu1 %vm13703_vm0, %v20589_v21  ;;  %1500 = vmatprep.mubr.f32.mxu0 %v20589_v21 }
 0x191   : > { %10908 = vmatmul.mubr.f32.gmra.mrb[76].mxu1 %v20760_v63  ;;  %1502 = vmatmul.mubr.f32.gmra.mrb[76].mxu0 %v20760_v63  ;;  %v20763_v63 = vld [vmem:[#allocation144_spill] sm:$0xff] }
 0x192   : > { %10910 = vmatprep.mubr.msk.f32.mxu1 %vm13703_vm0, %v20589_v21  ;;  %1507 = vmatprep.mubr.f32.mxu0 %v20589_v21 }
 0x195   : > { %10911 = vmatmul.mubr.f32.gmra.mrb[78].mxu1 %v20761_v30  ;;  %1509 = vmatmul.mubr.f32.gmra.mrb[78].mxu0 %v20761_v30  ;;  %v20764_v30 = vld [vmem:[#allocation149_spill] sm:$0xff] }
 0x196   : > { %10913 = vmatprep.mubr.msk.f32.mxu1 %vm13703_vm0, %v20589_v21  ;;  %1514 = vmatprep.mubr.f32.mxu0 %v20589_v21 }
 0x199   : > { %10914 = vmatmul.mubr.f32.gmra.mrb[80].mxu1 %v20762_v32  ;;  %1516 = vmatmul.mubr.f32.gmra.mrb[80].mxu0 %v20762_v32  ;;  %v20765_v32 = vld [vmem:[#allocation152_spill] sm:$0xff] }
 0x19a   : > { %10916 = vmatprep.mubr.msk.f32.mxu1 %vm13703_vm0, %v20589_v21  ;;  %1521 = vmatprep.mubr.f32.mxu0 %v20589_v21 }
 0x19d   : > { %10917 = vmatmul.mubr.f32.gmra.mrb[82].mxu1 %v20763_v63  ;;  %1523 = vmatmul.mubr.f32.gmra.mrb[82].mxu0 %v20763_v63  ;;  %v20766_v63 = vld [vmem:[#allocation155_spill] sm:$0xff] }
 0x19e   : > { %10919 = vmatprep.mubr.msk.f32.mxu1 %vm13703_vm0, %v20589_v21  ;;  %1528 = vmatprep.mubr.f32.mxu0 %v20589_v21 }
 0x1a1   : > { %10920 = vmatmul.mubr.f32.gmra.mrb[84].mxu1 %v20764_v30  ;;  %1530 = vmatmul.mubr.f32.gmra.mrb[84].mxu0 %v20764_v30  ;;  %v20774_v30 = vld [vmem:[#allocation11_spill] sm:$0xff] }
 0x1a2   : > { %10922 = vmatprep.mubr.msk.f32.mxu1 %vm13703_vm0, %v20589_v21  ;;  %1535 = vmatprep.mubr.f32.mxu0 %v20589_v21 }
 0x1a5   : > { %10923 = vmatmul.mubr.f32.gmra.mrb[86].mxu1 %v20765_v32  ;;  %1537 = vmatmul.mubr.f32.gmra.mrb[86].mxu0 %v20765_v32  ;;  %v20773_v32 = vld [vmem:[#allocation9_spill] sm:$0xff] }
 0x1a6   : > { %10925 = vmatprep.mubr.msk.f32.mxu1 %vm13703_vm0, %v20589_v21  ;;  %1542 = vmatprep.mubr.f32.mxu0 %v20589_v21 }
 0x1a9   : > { %10926 = vmatmul.mubr.f32.gmra.mrb[88].mxu1 %v20766_v63  ;;  %1544 = vmatmul.mubr.f32.gmra.mrb[88].mxu0 %v20766_v63  ;;  %v20770_v63 = vld [vmem:[#allocation8_spill] sm:$0xff] }
 0x1aa   : > { %10928 = vmatprep.mubr.msk.f32.mxu1 %vm13703_vm0, %v20589_v21  ;;  %1549 = vmatprep.mubr.f32.mxu0 %v20589_v21 }
 0x1ad   : > { %10929 = vmatmul.mubr.f32.gmra.mrb[90].mxu1 %v15024_v35  ;;  %1551 = vmatmul.mubr.f32.gmra.mrb[90].mxu0 %v15024_v35  ;;  %v20768_v35 = vld [vmem:[#allocation7_spill] sm:$0xff] }
 0x1ae   : > { %10931 = vmatprep.mubr.msk.f32.mxu1 %vm13703_vm0, %v20589_v21  ;;  %1556 = vmatprep.mubr.f32.mxu0 %v20589_v21 }
 0x1b1   : > { %10932 = vmatmul.mubr.f32.gmra.mrb[92].mxu1 %v15030_v3  ;;  %1558 = vmatmul.mubr.f32.gmra.mrb[92].mxu0 %v15030_v3  ;;  %v20767_v3 = vld [vmem:[#allocation25_spill] sm:$0xff] }
 0x1b2   : > { %10934 = vmatprep.mubr.msk.f32.mxu1 %vm13703_vm0, %v20589_v21  ;;  %1563 = vmatprep.mubr.f32.mxu0 %v20589_v21 }
 0x1b5   : > { %10935 = vmatmul.mubr.f32.gmra.mrb[94].mxu1 %v15045_v19  ;;  %1565 = vmatmul.mubr.f32.gmra.mrb[94].mxu0 %v15045_v19  ;;  %v20769_v19 = vld [vmem:[#allocation6_spill] sm:$0xff] }
 0x1b6   : > { %10937 = vmatprep.mubr.msk.f32.mxu1 %vm13703_vm0, %v20589_v21  ;;  %1570 = vmatprep.mubr.f32.mxu0 %v20589_v21 }
 0x1b9   : > { %10938 = vmatmul.mubr.f32.gmra.mrb[96].mxu1 %v15067_v51  ;;  %1572 = vmatmul.mubr.f32.gmra.mrb[96].mxu0 %v15067_v51  ;;  %v20771_v51 = vld [vmem:[#allocation29_spill] sm:$0xff] }
 0x1ba   : > { %10964 = vmatprep.mubr.msk.f32.mxu1 %vm13703_vm0, %v20589_v21  ;;  %1690 = vmatprep.mubr.f32.mxu0 %v20589_v21 }
 0x1bd   : > { %10965 = vmatmul.mubr.f32.vlgmr.msra.gmra.mrb[0].mxu1 %v20767_v3  ;;  %1693 = vmatmul.mubr.f32.vlgmr.msra.gmra.mrb[0].mxu0 %v20767_v3  ;;  %v20772_v3 = vld [vmem:[#allocation10_spill] sm:$0xff] }
 0x1be   : > { %11699 = vmatpush1.bf16.msra.mxu0 %v20768_v35  ;;  %10967 = vmatprep.mubr.msk.f32.mxu1 %vm13703_vm0, %v20589_v21 }
 0x1bf   : > { %11824 = vmatpush3.bf16.msra.mxu1 %v20769_v19  ;;  %1698 = vmatprep.mubr.f32.mxu0 %v20589_v21 }
 0x1c0   : > { %11701 = vmatprep.subr.bf16.mxu0 %v20770_v63  ;;  %11825 = vmatprep.subr.bf16.mxu1 %v20572_v27 }
 0x1c1   : > { %10968 = vmatmul.mubr.f32.gmra.mrb[2].mxu1 %v20771_v51  ;;  %1701 = vmatmul.mubr.f32.gmra.mrb[2].mxu0 %v20771_v51  ;;  %v20776_v51 = vld [vmem:[#allocation14_spill] sm:$0xff] }
 0x1c2   : > { %10970 = vmatprep.mubr.msk.f32.mxu1 %vm13703_vm0, %v20589_v21  ;;  %1706 = vmatprep.mubr.f32.mxu0 %v20589_v21 }
 0x1c3   : > { %11703 = vmatpush1.bf16.msra.mxu0 %v20772_v3  ;;  %11827 = vmatpush3.bf16.msra.mxu1 %v20773_v32 }
 0x1c4   : > { %11705 = vmatprep.subr.bf16.mxu0 %v20774_v30  ;;  %11828 = vmatprep.subr.bf16.mxu1 %v20572_v27 }
 0x1c5   : > { %10971 = vmatmul.mubr.f32.gmra.mrb[4].mxu1 %v20775_v23  ;;  %1709 = vmatmul.mubr.f32.gmra.mrb[4].mxu0 %v20775_v23  ;;  %v20780_v23 = vld [vmem:[#allocation18_spill] sm:$0xff] }
 0x1c6   : > { %10973 = vmatprep.mubr.msk.f32.mxu1 %vm13703_vm0, %v20589_v21  ;;  %1714 = vmatprep.mubr.f32.mxu0 %v20589_v21 }
 0x1c7   : > { %11707 = vmatpush1.bf16.msra.mxu0 %v20776_v51  ;;  %11830 = vmatpush3.bf16.msra.mxu1 %v20777_v18 }
 0x1c8   : > { %11709 = vmatprep.subr.bf16.mxu0 %v20778_v20  ;;  %11831 = vmatprep.subr.bf16.mxu1 %v20572_v27 }
 0x1c9   : > { %10974 = vmatmul.mubr.f32.gmra.mrb[6].mxu1 %v20779_v29  ;;  %1717 = vmatmul.mubr.f32.gmra.mrb[6].mxu0 %v20779_v29  ;;  %v20784_v29 = vld [vmem:[#allocation21_spill] sm:$0xff] }
 0x1ca   : > { %10976 = vmatprep.mubr.msk.f32.mxu1 %vm13703_vm0, %v20589_v21  ;;  %1722 = vmatprep.mubr.f32.mxu0 %v20589_v21 }
 0x1cb   : > { %11711 = vmatpush1.bf16.msra.mxu0 %v20780_v23  ;;  %11833 = vmatpush3.bf16.msra.mxu1 %v20781_v36 }
 0x1cc   : > { %11713 = vmatprep.subr.bf16.mxu0 %v20782_v49  ;;  %11834 = vmatprep.subr.bf16.mxu1 %v20572_v27 }
 0x1cd   : > { %10977 = vmatmul.mubr.f32.gmra.mrb[8].mxu1 %v20783_v6  ;;  %1725 = vmatmul.mubr.f32.gmra.mrb[8].mxu0 %v20783_v6  ;;  %v20788_v6 = vld [vmem:[#allocation24_spill] sm:$0xff] }
 0x1ce   : > { %10979 = vmatprep.mubr.msk.f32.mxu1 %vm13703_vm0, %v20589_v21  ;;  %1730 = vmatprep.mubr.f32.mxu0 %v20589_v21 }
 0x1cf   : > { %11715 = vmatpush1.bf16.msra.mxu0 %v20784_v29  ;;  %11836 = vmatpush3.bf16.msra.mxu1 %v20785_v37  ;;  %v20790_v37 = vld [vmem:[#allocation42_spill] sm:$0xff] }
 0x1d0   : > { %11717 = vmatprep.subr.bf16.mxu0 %v20786_v41  ;;  %11837 = vmatprep.subr.bf16.mxu1 %v20572_v27  ;;  %v20804_v41 = vld [vmem:[#allocation15_spill] sm:$0xff] }
 0x1d1   : > { %10980 = vmatmul.mubr.f32.gmra.mrb[10].mxu1 %v20787_v60  ;;  %1733 = vmatmul.mubr.f32.gmra.mrb[10].mxu0 %v20787_v60  ;;  %v20791_v60 = vld [vmem:[#allocation47_spill] sm:$0xff]  ;;  %v20805_v29 = vand.u32 4294901760, %v20804_v41  ;;  %v20808_v41 = vld [vmem:[#allocation84_spill] sm:$0xff] }
 0x1d2   : > { %10982 = vmatprep.mubr.msk.f32.mxu1 %vm13703_vm0, %v20589_v21  ;;  %1738 = vmatprep.mubr.f32.mxu0 %v20589_v21 }
 0x1d3   : > { %11719 = vmatpush1.bf16.msra.mxu0 %v20788_v6  ;;  %11839 = vmatpush3.bf16.msra.mxu1 %v20789_v54  ;;  %v20792_v54 = vld [vmem:[#allocation48_spill] sm:$0xff] }
 0x1d4   : > { %11840 = vmatprep.subr.bf16.mxu1 %v20572_v27  ;;  %v20802_v6 = vld [vmem:[#allocation12_spill] sm:$0xff] }
 0x1d5   : > { %10983 = vmatmul.mubr.f32.gmra.mrb[12].mxu1 %v20790_v37  ;;  %1741 = vmatmul.mubr.f32.gmra.mrb[12].mxu0 %v20790_v37  ;;  %v20793_v37 = vld [vmem:[#allocation52_spill] sm:$0xff] }
 0x1d6   : > { %10985 = vmatprep.mubr.msk.f32.mxu1 %vm13703_vm0, %v20589_v21  ;;  %1746 = vmatprep.mubr.f32.mxu0 %v20589_v21 }
 0x1d9   : > { %10986 = vmatmul.mubr.f32.gmra.mrb[14].mxu1 %v20791_v60  ;;  %1749 = vmatmul.mubr.f32.gmra.mrb[14].mxu0 %v20791_v60  ;;  %v20794_v60 = vld [vmem:[#allocation56_spill] sm:$0xff] }
 0x1da   : > { %10988 = vmatprep.mubr.msk.f32.mxu1 %vm13703_vm0, %v20589_v21  ;;  %1754 = vmatprep.mubr.f32.mxu0 %v20589_v21 }
 0x1dd   : > { %10989 = vmatmul.mubr.f32.gmra.mrb[16].mxu1 %v20792_v54  ;;  %1757 = vmatmul.mubr.f32.gmra.mrb[16].mxu0 %v20792_v54  ;;  %v20795_v54 = vld [vmem:[#allocation58_spill] sm:$0xff] }
 0x1de   : > { %10991 = vmatprep.mubr.msk.f32.mxu1 %vm13703_vm0, %v20589_v21  ;;  %1762 = vmatprep.mubr.f32.mxu0 %v20589_v21 }
 0x1e1   : > { %10992 = vmatmul.mubr.f32.gmra.mrb[18].mxu1 %v20793_v37  ;;  %1765 = vmatmul.mubr.f32.gmra.mrb[18].mxu0 %v20793_v37  ;;  %v20796_v37 = vld [vmem:[#allocation60_spill] sm:$0xff] }
 0x1e2   : > { %10994 = vmatprep.mubr.msk.f32.mxu1 %vm13703_vm0, %v20589_v21  ;;  %1770 = vmatprep.mubr.f32.mxu0 %v20589_v21 }
 0x1e5   : > { %10995 = vmatmul.mubr.f32.gmra.mrb[20].mxu1 %v20794_v60  ;;  %1773 = vmatmul.mubr.f32.gmra.mrb[20].mxu0 %v20794_v60  ;;  %v20797_v60 = vld [vmem:[#allocation63_spill] sm:$0xff] }
 0x1e6   : > { %10997 = vmatprep.mubr.msk.f32.mxu1 %vm13703_vm0, %v20589_v21  ;;  %1778 = vmatprep.mubr.f32.mxu0 %v20589_v21 }
 0x1e9   : > { %10998 = vmatmul.mubr.f32.gmra.mrb[22].mxu1 %v20795_v54  ;;  %1781 = vmatmul.mubr.f32.gmra.mrb[22].mxu0 %v20795_v54  ;;  %v20798_v54 = vld [vmem:[#allocation67_spill] sm:$0xff] }
 0x1ea   : > { %11000 = vmatprep.mubr.msk.f32.mxu1 %vm13703_vm0, %v20589_v21  ;;  %1786 = vmatprep.mubr.f32.mxu0 %v20589_v21 }
 0x1ed   : > { %11001 = vmatmul.mubr.f32.gmra.mrb[24].mxu1 %v20796_v37  ;;  %1789 = vmatmul.mubr.f32.gmra.mrb[24].mxu0 %v20796_v37  ;;  %v20799_v37 = vld [vmem:[#allocation70_spill] sm:$0xff] }
 0x1ee   : > { %11003 = vmatprep.mubr.msk.f32.mxu1 %vm13703_vm0, %v20589_v21  ;;  %1794 = vmatprep.mubr.f32.mxu0 %v20589_v21 }
 0x1f1   : > { %11004 = vmatmul.mubr.f32.gmra.mrb[26].mxu1 %v20797_v60  ;;  %1797 = vmatmul.mubr.f32.gmra.mrb[26].mxu0 %v20797_v60  ;;  %v20800_v60 = vld [vmem:[#allocation73_spill] sm:$0xff] }
 0x1f2   : > { %11006 = vmatprep.mubr.msk.f32.mxu1 %vm13703_vm0, %v20589_v21  ;;  %1802 = vmatprep.mubr.f32.mxu0 %v20589_v21 }
 0x1f5   : > { %11007 = vmatmul.mubr.f32.gmra.mrb[28].mxu1 %v20798_v54  ;;  %1805 = vmatmul.mubr.f32.gmra.mrb[28].mxu0 %v20798_v54  ;;  %v20801_v54 = vld [vmem:[#allocation75_spill] sm:$0xff] }
 0x1f6   : > { %11009 = vmatprep.mubr.msk.f32.mxu1 %vm13703_vm0, %v20589_v21  ;;  %1810 = vmatprep.mubr.f32.mxu0 %v20589_v21 }
 0x1f9   : > { %11010 = vmatmul.mubr.f32.gmra.mrb[30].mxu1 %v20799_v37  ;;  %1813 = vmatmul.mubr.f32.gmra.mrb[30].mxu0 %v20799_v37  ;;  %v20803_v37 = vand.u32 4294901760, %v20802_v6  ;;  %v20811_v6 = vld [vmem:[#allocation93_spill] sm:$0xff] }
 0x1fa   : > { %11012 = vmatprep.mubr.msk.f32.mxu1 %vm13703_vm0, %v20589_v21  ;;  %1818 = vmatprep.mubr.f32.mxu0 %v20589_v21 }
 0x1fb   : > { %v11720_v49 = vpack.c.bf16 %v20805_v29, %v20803_v37  ;;  %v20810_v29 = vld [vmem:[#allocation91_spill] sm:$0xff]  ;;  %v20812_v37 = vld [vmem:[#allocation97_spill] sm:$0xff] }
 0x1fd   : > { %11013 = vmatmul.mubr.f32.gmra.mrb[32].mxu1 %v20800_v60  ;;  %1821 = vmatmul.mubr.f32.gmra.mrb[32].mxu0 %v20800_v60  ;;  %v20806_v60 = vld [vmem:[#allocation79_spill] sm:$0xff] }
 0x1fe   : > { %11015 = vmatprep.mubr.msk.f32.mxu1 %vm13703_vm0, %v20589_v21  ;;  %1826 = vmatprep.mubr.f32.mxu0 %v20589_v21 }
 0x1ff   : > { %11721 = vmatprep.subr.bf16.mxu0 %v11720_v49  ;;  %v20809_v49 = vld [vmem:[#allocation89_spill] sm:$0xff] }
 0x201   : > { %11016 = vmatmul.mubr.f32.gmra.mrb[34].mxu1 %v20801_v54  ;;  %1829 = vmatmul.mubr.f32.gmra.mrb[34].mxu0 %v20801_v54  ;;  %v20807_v54 = vld [vmem:[#allocation83_spill] sm:$0xff] }
 0x202   : > { %11018 = vmatprep.mubr.msk.f32.mxu1 %vm13703_vm0, %v20589_v21  ;;  %1834 = vmatprep.mubr.f32.mxu0 %v20589_v21 }
 0x205   : > { %11019 = vmatmul.mubr.f32.gmra.mrb[36].mxu1 %v20806_v60  ;;  %1837 = vmatmul.mubr.f32.gmra.mrb[36].mxu0 %v20806_v60  ;;  %v20813_v60 = vld [vmem:[#allocation100_spill] sm:$0xff] }
 0x206   : > { %11021 = vmatprep.mubr.msk.f32.mxu1 %vm13703_vm0, %v20589_v21  ;;  %1842 = vmatprep.mubr.f32.mxu0 %v20589_v21 }
 0x209   : > { %11022 = vmatmul.mubr.f32.gmra.mrb[38].mxu1 %v20807_v54  ;;  %1845 = vmatmul.mubr.f32.gmra.mrb[38].mxu0 %v20807_v54  ;;  %v20814_v54 = vld [vmem:[#allocation103_spill] sm:$0xff] }
 0x20a   : > { %11024 = vmatprep.mubr.msk.f32.mxu1 %vm13703_vm0, %v20589_v21  ;;  %1850 = vmatprep.mubr.f32.mxu0 %v20589_v21 }
 0x20d   : > { %11025 = vmatmul.mubr.f32.gmra.mrb[40].mxu1 %v20808_v41  ;;  %1853 = vmatmul.mubr.f32.gmra.mrb[40].mxu0 %v20808_v41  ;;  %v20815_v41 = vld [vmem:[#allocation106_spill] sm:$0xff] }
 0x20e   : > { %11027 = vmatprep.mubr.msk.f32.mxu1 %vm13703_vm0, %v20589_v21  ;;  %1858 = vmatprep.mubr.f32.mxu0 %v20589_v21 }
 0x211   : > { %11028 = vmatmul.mubr.f32.gmra.mrb[42].mxu1 %v20809_v49  ;;  %1861 = vmatmul.mubr.f32.gmra.mrb[42].mxu0 %v20809_v49  ;;  %v20816_v49 = vld [vmem:[#allocation110_spill] sm:$0xff] }
 0x212   : > { %11030 = vmatprep.mubr.msk.f32.mxu1 %vm13703_vm0, %v20589_v21  ;;  %1866 = vmatprep.mubr.f32.mxu0 %v20589_v21 }
 0x215   : > { %11031 = vmatmul.mubr.f32.gmra.mrb[44].mxu1 %v20810_v29  ;;  %1869 = vmatmul.mubr.f32.gmra.mrb[44].mxu0 %v20810_v29  ;;  %v20817_v29 = vld [vmem:[#allocation111_spill] sm:$0xff] }
 0x216   : > { %11033 = vmatprep.mubr.msk.f32.mxu1 %vm13703_vm0, %v20589_v21  ;;  %1874 = vmatprep.mubr.f32.mxu0 %v20589_v21 }
 0x219   : > { %11034 = vmatmul.mubr.f32.gmra.mrb[46].mxu1 %v20811_v6  ;;  %1877 = vmatmul.mubr.f32.gmra.mrb[46].mxu0 %v20811_v6  ;;  %v20818_v6 = vld [vmem:[#allocation114_spill] sm:$0xff] }
 0x21a   : > { %11036 = vmatprep.mubr.msk.f32.mxu1 %vm13703_vm0, %v20589_v21  ;;  %1882 = vmatprep.mubr.f32.mxu0 %v20589_v21 }
 0x21d   : > { %11037 = vmatmul.mubr.f32.gmra.mrb[48].mxu1 %v20812_v37  ;;  %1885 = vmatmul.mubr.f32.gmra.mrb[48].mxu0 %v20812_v37  ;;  %v20819_v37 = vld [vmem:[#allocation119_spill] sm:$0xff] }
 0x21e   : > { %11039 = vmatprep.mubr.msk.f32.mxu1 %vm13703_vm0, %v20589_v21  ;;  %1890 = vmatprep.mubr.f32.mxu0 %v20589_v21 }
 0x221   : > { %11040 = vmatmul.mubr.f32.gmra.mrb[50].mxu1 %v20813_v60  ;;  %1893 = vmatmul.mubr.f32.gmra.mrb[50].mxu0 %v20813_v60  ;;  %v20820_v60 = vld [vmem:[#allocation120_spill] sm:$0xff] }
 0x222   : > { %11042 = vmatprep.mubr.msk.f32.mxu1 %vm13703_vm0, %v20589_v21  ;;  %1898 = vmatprep.mubr.f32.mxu0 %v20589_v21 }
 0x225   : > { %11043 = vmatmul.mubr.f32.gmra.mrb[52].mxu1 %v20814_v54  ;;  %1901 = vmatmul.mubr.f32.gmra.mrb[52].mxu0 %v20814_v54  ;;  %v20821_v54 = vld [vmem:[#allocation124_spill] sm:$0xff] }
 0x226   : > { %11045 = vmatprep.mubr.msk.f32.mxu1 %vm13703_vm0, %v20589_v21  ;;  %1906 = vmatprep.mubr.f32.mxu0 %v20589_v21 }
 0x229   : > { %11046 = vmatmul.mubr.f32.gmra.mrb[54].mxu1 %v20815_v41  ;;  %1909 = vmatmul.mubr.f32.gmra.mrb[54].mxu0 %v20815_v41  ;;  %v20822_v41 = vld [vmem:[#allocation127_spill] sm:$0xff] }
 0x22a   : > { %11048 = vmatprep.mubr.msk.f32.mxu1 %vm13703_vm0, %v20589_v21  ;;  %1914 = vmatprep.mubr.f32.mxu0 %v20589_v21 }
 0x22d   : > { %11049 = vmatmul.mubr.f32.gmra.mrb[56].mxu1 %v20816_v49  ;;  %1917 = vmatmul.mubr.f32.gmra.mrb[56].mxu0 %v20816_v49  ;;  %v20823_v49 = vld [vmem:[#allocation130_spill] sm:$0xff] }
 0x22e   : > { %11051 = vmatprep.mubr.msk.f32.mxu1 %vm13703_vm0, %v20589_v21  ;;  %1922 = vmatprep.mubr.f32.mxu0 %v20589_v21 }
 0x231   : > { %11052 = vmatmul.mubr.f32.gmra.mrb[58].mxu1 %v20817_v29  ;;  %1925 = vmatmul.mubr.f32.gmra.mrb[58].mxu0 %v20817_v29  ;;  %v20824_v29 = vld [vmem:[#allocation134_spill] sm:$0xff] }
 0x232   : > { %11054 = vmatprep.mubr.msk.f32.mxu1 %vm13703_vm0, %v20589_v21  ;;  %1930 = vmatprep.mubr.f32.mxu0 %v20589_v21 }
 0x235   : > { %11055 = vmatmul.mubr.f32.gmra.mrb[60].mxu1 %v20818_v6  ;;  %1933 = vmatmul.mubr.f32.gmra.mrb[60].mxu0 %v20818_v6  ;;  %v20825_v6 = vld [vmem:[#allocation137_spill] sm:$0xff] }
 0x236   : > { %11057 = vmatprep.mubr.msk.f32.mxu1 %vm13703_vm0, %v20589_v21  ;;  %1938 = vmatprep.mubr.f32.mxu0 %v20589_v21 }
 0x239   : > { %11058 = vmatmul.mubr.f32.gmra.mrb[62].mxu1 %v20819_v37  ;;  %1941 = vmatmul.mubr.f32.gmra.mrb[62].mxu0 %v20819_v37  ;;  %v20826_v37 = vld [vmem:[#allocation138_spill] sm:$0xff] }
 0x23a   : > { %11060 = vmatprep.mubr.msk.f32.mxu1 %vm13703_vm0, %v20589_v21  ;;  %1946 = vmatprep.mubr.f32.mxu0 %v20589_v21 }
 0x23d   : > { %11061 = vmatmul.mubr.f32.gmra.mrb[64].mxu1 %v20820_v60  ;;  %1949 = vmatmul.mubr.f32.gmra.mrb[64].mxu0 %v20820_v60  ;;  %v20827_v60 = vld [vmem:[#allocation143_spill] sm:$0xff] }
 0x23e   : > { %11063 = vmatprep.mubr.msk.f32.mxu1 %vm13703_vm0, %v20589_v21  ;;  %1954 = vmatprep.mubr.f32.mxu0 %v20589_v21 }
 0x241   : > { %11064 = vmatmul.mubr.f32.gmra.mrb[66].mxu1 %v20821_v54  ;;  %1957 = vmatmul.mubr.f32.gmra.mrb[66].mxu0 %v20821_v54  ;;  %v20828_v54 = vld [vmem:[#allocation146_spill] sm:$0xff] }
 0x242   : > { %11066 = vmatprep.mubr.msk.f32.mxu1 %vm13703_vm0, %v20589_v21  ;;  %1962 = vmatprep.mubr.f32.mxu0 %v20589_v21 }
 0x245   : > { %11067 = vmatmul.mubr.f32.gmra.mrb[68].mxu1 %v20822_v41  ;;  %1965 = vmatmul.mubr.f32.gmra.mrb[68].mxu0 %v20822_v41  ;;  %v20829_v41 = vld [vmem:[#allocation147_spill] sm:$0xff] }
 0x246   : > { %11069 = vmatprep.mubr.msk.f32.mxu1 %vm13703_vm0, %v20589_v21  ;;  %1970 = vmatprep.mubr.f32.mxu0 %v20589_v21 }
 0x249   : > { %11070 = vmatmul.mubr.f32.gmra.mrb[70].mxu1 %v20823_v49  ;;  %1973 = vmatmul.mubr.f32.gmra.mrb[70].mxu0 %v20823_v49  ;;  %v20830_v49 = vld [vmem:[#allocation151_spill] sm:$0xff] }
 0x24a   : > { %11072 = vmatprep.mubr.msk.f32.mxu1 %vm13703_vm0, %v20589_v21  ;;  %1978 = vmatprep.mubr.f32.mxu0 %v20589_v21 }
 0x24d   : > { %11073 = vmatmul.mubr.f32.gmra.mrb[72].mxu1 %v20824_v29  ;;  %1981 = vmatmul.mubr.f32.gmra.mrb[72].mxu0 %v20824_v29  ;;  %v20831_v29 = vld [vmem:[#allocation154_spill] sm:$0xff] }
 0x24e   : > { %11075 = vmatprep.mubr.msk.f32.mxu1 %vm13703_vm0, %v20589_v21  ;;  %1986 = vmatprep.mubr.f32.mxu0 %v20589_v21 }
 0x251   : > { %11076 = vmatmul.mubr.f32.gmra.mrb[74].mxu1 %v20825_v6  ;;  %1989 = vmatmul.mubr.f32.gmra.mrb[74].mxu0 %v20825_v6  ;;  %v20835_v6 = vand.u32 4294901760, %v14021_v62  ;;  %v20840_v62 = vand.u32 4294901760, %v14242_v28  ;;  %v20847_v28 = vand.u32 4294901760, %v14368_v22  ;;  %v20854_v22 = vand.u32 4294901760, %v14485_v34 }
 0x252   : > { %11078 = vmatprep.mubr.msk.f32.mxu1 %vm13703_vm0, %v20589_v21  ;;  %1994 = vmatprep.mubr.f32.mxu0 %v20589_v21 }
 0x255   : > { %11079 = vmatmul.mubr.f32.gmra.mrb[76].mxu1 %v20826_v37  ;;  %1997 = vmatmul.mubr.f32.gmra.mrb[76].mxu0 %v20826_v37 }
 0x256   : > { %11081 = vmatprep.mubr.msk.f32.mxu1 %vm13703_vm0, %v20589_v21  ;;  %2002 = vmatprep.mubr.f32.mxu0 %v20589_v21 }
 0x259   : > { %11082 = vmatmul.mubr.f32.gmra.mrb[78].mxu1 %v20827_v60  ;;  %2005 = vmatmul.mubr.f32.gmra.mrb[78].mxu0 %v20827_v60  ;;  %v20836_v60 = vand.u32 4294901760, %v14211_v44 }
 0x25a   : > { %11084 = vmatprep.mubr.msk.f32.mxu1 %vm13703_vm0, %v20589_v21  ;;  %2010 = vmatprep.mubr.f32.mxu0 %v20589_v21 }
 0x25d   : > { %11085 = vmatmul.mubr.f32.gmra.mrb[80].mxu1 %v20828_v54  ;;  %2013 = vmatmul.mubr.f32.gmra.mrb[80].mxu0 %v20828_v54  ;;  %v20837_v54 = vand.u32 4294901760, %v14222_v55  ;;  %v20842_v55 = vand.u32 4294901760, %v14277_v56  ;;  %v20848_v56 = vand.u32 4294901760, %v14378_v38 }
 0x25e   : > { %11087 = vmatprep.mubr.msk.f32.mxu1 %vm13703_vm0, %v20589_v21  ;;  %2018 = vmatprep.mubr.f32.mxu0 %v20589_v21 }
 0x261   : > { %11088 = vmatmul.mubr.f32.gmra.mrb[82].mxu1 %v20829_v41  ;;  %2021 = vmatmul.mubr.f32.gmra.mrb[82].mxu0 %v20829_v41  ;;  %v20838_v41 = vld [vmem:[#allocation26_spill] sm:$0xff] }
 0x262   : > { %11090 = vmatprep.mubr.msk.f32.mxu1 %vm13703_vm0, %v20589_v21  ;;  %2026 = vmatprep.mubr.f32.mxu0 %v20589_v21 }
 0x265   : > { %11091 = vmatmul.mubr.f32.gmra.mrb[84].mxu1 %v20830_v49  ;;  %2029 = vmatmul.mubr.f32.gmra.mrb[84].mxu0 %v20830_v49  ;;  %v20843_v49 = vand.u32 4294901760, %v14333_v45  ;;  %v20849_v45 = vand.u32 4294901760, %v14395_v31  ;;  %v20855_v31 = vand.u32 4294901760, %v14042_v43  ;;  %v20861_v43 = vand.u32 4294901760, %v14108_v25  ;;  %v20865_v25 = vld [vmem:[#allocation44_spill] sm:$0xff] }
 0x266   : > { %11093 = vmatprep.mubr.msk.f32.mxu1 %vm13703_vm0, %v20589_v21  ;;  %2034 = vmatprep.mubr.f32.mxu0 %v20589_v21 }
 0x269   : > { %11094 = vmatmul.mubr.f32.gmra.mrb[86].mxu1 %v20831_v29  ;;  %2037 = vmatmul.mubr.f32.gmra.mrb[86].mxu0 %v20831_v29  ;;  %v20844_v29 = vand.u32 4294901760, %v14348_v33  ;;  %v11847_v33 = vpack.c.bf16 %v20849_v45, %v20848_v56  ;;  %v20885_v56 = vld [vmem:[#allocation85_spill] sm:$0xff]  ;;  %v20886_v45 = vld [vmem:[#allocation87_spill] sm:$0xff] }
 0x26a   : > { %11096 = vmatprep.mubr.msk.f32.mxu1 %vm13703_vm0, %v20589_v21  ;;  %2042 = vmatprep.mubr.f32.mxu0 %v20589_v21 }
 0x26d   : > { %11097 = vmatmul.mubr.f32.gmra.mrb[88].mxu1 %v15022_v39  ;;  %2045 = vmatmul.mubr.f32.gmra.mrb[88].mxu0 %v15022_v39  ;;  %v20832_v39 = vand.u32 4294901760, %v14064_v48 }
 0x26e   : > { %11099 = vmatprep.mubr.msk.f32.mxu1 %vm13703_vm0, %v20589_v21  ;;  %2050 = vmatprep.mubr.f32.mxu0 %v20589_v21 }
 0x271   : > { %11100 = vmatmul.mubr.f32.gmra.mrb[90].mxu1 %v15039_v58  ;;  %2053 = vmatmul.mubr.f32.gmra.mrb[90].mxu0 %v15039_v58  ;;  %v20833_v58 = vand.u32 4294901760, %v14069_v0  ;;  %v20841_v0 = vand.u32 4294901760, %v14259_v10 }
 0x272   : > { %11102 = vmatprep.mubr.msk.f32.mxu1 %vm13703_vm0, %v20589_v21  ;;  %2058 = vmatprep.mubr.f32.mxu0 %v20589_v21 }
 0x273   : > { %v11844_v44 = vpack.c.bf16 %v20842_v55, %v20841_v0  ;;  %v20871_v0 = vand.u32 4294901760, %v14116_v50  ;;  %v20879_v50 = vld [vmem:[#allocation66_spill] sm:$0xff] }
 0x275   : > { %11103 = vmatmul.mubr.f32.gmra.mrb[92].mxu1 %v15053_v52  ;;  %2061 = vmatmul.mubr.f32.gmra.mrb[92].mxu0 %v15053_v52  ;;  %v11722_v52 = vpack.c.bf16 %v20833_v58, %v20832_v39  ;;  %v11728_v39 = vpack.c.bf16 %v20844_v29, %v20843_v49  ;;  %v20845_v58 = vld [vmem:[#allocation32_spill] sm:$0xff]  ;;  %v20873_v49 = vand.u32 4294901760, %v14137_v7  ;;  %v20881_v7 = vld [vmem:[#allocation74_spill] sm:$0xff] }
 0x276   : > { %11105 = vmatprep.mubr.msk.f32.mxu1 %vm13703_vm0, %v20589_v21  ;;  %2066 = vmatprep.mubr.f32.mxu0 %v20589_v21 }
 0x279   : > { %11106 = vmatmul.mubr.f32.gmra.mrb[94].mxu1 %v15060_v16  ;;  %2069 = vmatmul.mubr.f32.gmra.mrb[94].mxu0 %v15060_v16  ;;  %v20834_v16 = vand.u32 4294901760, %v14016_v61  ;;  %v20839_v61 = vand.u32 4294901760, %v14237_v15  ;;  %v20846_v15 = vand.u32 4294901760, %v14353_v2  ;;  %v20853_v2 = vand.u32 4294901760, %v14480_v11 }
 0x27a   : > { %11108 = vmatprep.mubr.msk.f32.mxu1 %vm13703_vm0, %v20589_v21  ;;  %2074 = vmatprep.mubr.f32.mxu0 %v20589_v21 }
 0x27b   : > { %v11841_v37 = vpack.c.bf16 %v20835_v6, %v20834_v16  ;;  %v11726_v48 = vpack.c.bf16 %v20840_v62, %v20839_v61  ;;  %v11730_v10 = vpack.c.bf16 %v20847_v28, %v20846_v15  ;;  %v20851_v16 = vand.u32 4294901760, %v14460_v12  ;;  %v20864_v61 = vld [vmem:[#allocation41_spill] sm:$0xff]  ;;  %v20869_v62 = vld [vmem:[#allocation54_spill] sm:$0xff] }
 0x27c   : > { %v11734_v38 = vpack.c.bf16 %v20854_v22, %v20853_v2  ;;  %v20883_v28 = vld [vmem:[#allocation78_spill] sm:$0xff]  ;;  %v20892_v2 = vld [vmem:[#allocation105_spill] sm:$0xff] }
 0x27d   : > { %11109 = vmatmul.mubr.f32.gmra.mrb[96].mxu1 %v15078_v14  ;;  %2077 = vmatmul.mubr.f32.gmra.mrb[96].mxu0 %v15078_v14  ;;  %v11724_v14 = vpack.c.bf16 %v20837_v54, %v20836_v60  ;;  %v20857_v60 = vand.u32 4294901760, %v14073_v4  ;;  %v20858_v54 = vand.u32 4294901760, %v14086_v9  ;;  %v20862_v4 = vand.u32 4294901760, %v14090_v13  ;;  %v20867_v13 = vld [vmem:[#allocation49_spill] sm:$0xff] }
 0x27e   : > { %11135 = vmatprep.mubr.msk.f32.mxu1 %vm13703_vm0, %v20589_v21  ;;  %2171 = vmatprep.mubr.f32.mxu0 %v20589_v21  ;;  %v20863_v9 = vand.u32 4294901760, %v14099_v5  ;;  %v20868_v5 = vld [vmem:[#allocation51_spill] sm:$0xff]  ;;  %v20893_v22 = vld [vmem:[#allocation109_spill] sm:$0xff] }
 0x280   : > { %v11853_v34 = vpack.c.bf16 %v20863_v9, %v20862_v4  ;;  %v20905_v4 = vld [vmem:[#allocation145_spill] sm:$0xff]  ;;  %v20906_v9 = vld [vmem:[#allocation148_spill] sm:$0xff] }
 0x281   : > { %11136 = vmatmul.mubr.f32.vlgmr.msra.gmra.mrb[0].mxu1 %v20838_v41  ;;  %2175 = vmatmul.mubr.f32.vlgmr.msra.gmra.mrb[0].mxu0 %v20838_v41  ;;  %v20859_v41 = vld [vmem:[#allocation38_spill] sm:$0xff] }
 0x282   : > { %11723 = vmatpush1.bf16.msra.mxu0 %v11722_v52  ;;  %11138 = vmatprep.mubr.msk.f32.mxu1 %vm13703_vm0, %v20589_v21  ;;  %v20850_v52 = vand.u32 4294901760, %v14455_v17  ;;  %v20856_v17 = vand.u32 4294901760, %v14044_v42  ;;  %v20860_v42 = vand.u32 4294901760, %v14101_v26  ;;  %v20866_v26 = vld [vmem:[#allocation46_spill] sm:$0xff] }
 0x283   : > { %11842 = vmatpush3.bf16.msra.mxu1 %v11841_v37  ;;  %2180 = vmatprep.mubr.f32.mxu0 %v20589_v21  ;;  %v20852_v37 = vld [vmem:[#allocation34_spill] sm:$0xff] }
 0x284   : > { %11725 = vmatprep.subr.bf16.mxu0 %v11724_v14  ;;  %11843 = vmatprep.subr.bf16.mxu1 %v20572_v27  ;;  %v11732_v6 = vpack.c.bf16 %v20851_v16, %v20850_v52  ;;  %v11850_v12 = vpack.c.bf16 %v20856_v17, %v20855_v31  ;;  %v11736_v14 = vpack.c.bf16 %v20858_v54, %v20857_v60  ;;  %v20888_v52 = vld [vmem:[#allocation95_spill] sm:$0xff]  ;;  %v20889_v16 = vld [vmem:[#allocation96_spill] sm:$0xff]  ;;  %v20896_v17 = vld [vmem:[#allocation117_spill] sm:$0xff] }
 0x285   : > { %11139 = vmatmul.mubr.f32.gmra.mrb[2].mxu1 %v20845_v58  ;;  %2184 = vmatmul.mubr.f32.gmra.mrb[2].mxu0 %v20845_v58  ;;  %v11738_v11 = vpack.c.bf16 %v20861_v43, %v20860_v42  ;;  %v20875_v58 = vand.u32 4294901760, %v14122_v46  ;;  %v20878_v46 = vld [vmem:[#allocation65_spill] sm:$0xff]  ;;  %v20895_v31 = vld [vmem:[#allocation116_spill] sm:$0xff]  ;;  %v20898_v60 = vld [vmem:[#allocation123_spill] sm:$0xff] }
 0x286   : > { %11141 = vmatprep.mubr.msk.f32.mxu1 %vm13703_vm0, %v20589_v21  ;;  %2189 = vmatprep.mubr.f32.mxu0 %v20589_v21  ;;  %v20899_v54 = vld [vmem:[#allocation126_spill] sm:$0xff]  ;;  %v20902_v42 = vld [vmem:[#allocation136_spill] sm:$0xff]  ;;  %v20903_v43 = vld [vmem:[#allocation139_spill] sm:$0xff] }
 0x287   : > { %11727 = vmatpush1.bf16.msra.mxu0 %v11726_v48  ;;  %11845 = vmatpush3.bf16.msra.mxu1 %v11844_v44  ;;  %v20870_v48 = vand.u32 4294901760, %v14112_v59  ;;  %v20872_v44 = vand.u32 4294901760, %v14126_v53  ;;  %v20876_v59 = vld [vmem:[#allocation59_spill] sm:$0xff]  ;;  %v20880_v53 = vld [vmem:[#allocation69_spill] sm:$0xff] }
 0x288   : > { %11729 = vmatprep.subr.bf16.mxu0 %v11728_v39  ;;  %11846 = vmatprep.subr.bf16.mxu1 %v20572_v27  ;;  %v20874_v39 = vand.u32 4294901760, %v14120_v1  ;;  %v20877_v1 = vld [vmem:[#allocation62_spill] sm:$0xff] }
 0x289   : > { %11142 = vmatmul.mubr.f32.gmra.mrb[4].mxu1 %v20852_v37  ;;  %2193 = vmatmul.mubr.f32.gmra.mrb[4].mxu0 %v20852_v37  ;;  %v11740_v55 = vpack.c.bf16 %v20871_v0, %v20870_v48  ;;  %v11742_v29 = vpack.c.bf16 %v20873_v49, %v20872_v44  ;;  %v20891_v37 = vld [vmem:[#allocation102_spill] sm:$0xff]  ;;  %v20928_v48 = vld [vmem:[#allocation55_spill] sm:$0xff]  ;;  %v20929_v0 = vld [vmem:[#allocation57_spill] sm:$0xff] }
 0x28a   : > { %11144 = vmatprep.mubr.msk.f32.mxu1 %vm13703_vm0, %v20589_v21  ;;  %2198 = vmatprep.mubr.f32.mxu0 %v20589_v21  ;;  %v11856_v15 = vpack.c.bf16 %v20875_v58, %v20874_v39  ;;  %v20931_v44 = vld [vmem:[#allocation64_spill] sm:$0xff]  ;;  %v20935_v58 = vld [vmem:[#allocation77_spill] sm:$0xff] }
 0x28b   : > { %11731 = vmatpush1.bf16.msra.mxu0 %v11730_v10  ;;  %11848 = vmatpush3.bf16.msra.mxu1 %v11847_v33  ;;  %v20884_v10 = vld [vmem:[#allocation82_spill] sm:$0xff]  ;;  %v20887_v33 = vld [vmem:[#allocation92_spill] sm:$0xff] }
 0x28c   : > { %11733 = vmatprep.subr.bf16.mxu0 %v11732_v6  ;;  %11849 = vmatprep.subr.bf16.mxu1 %v20572_v27  ;;  %v20890_v6 = vld [vmem:[#allocation99_spill] sm:$0xff]  ;;  %v20932_v49 = vld [vmem:[#allocation68_spill] sm:$0xff] }
 0x28d   : > { %11145 = vmatmul.mubr.f32.gmra.mrb[6].mxu1 %v20859_v41  ;;  %2202 = vmatmul.mubr.f32.gmra.mrb[6].mxu0 %v20859_v41  ;;  %v20901_v41 = vld [vmem:[#allocation133_spill] sm:$0xff]  ;;  %v20934_v39 = vld [vmem:[#allocation72_spill] sm:$0xff] }
 0x28e   : > { %11147 = vmatprep.mubr.msk.f32.mxu1 %vm13703_vm0, %v20589_v21  ;;  %2207 = vmatprep.mubr.f32.mxu0 %v20589_v21 }
 0x28f   : > { %11735 = vmatpush1.bf16.msra.mxu0 %v11734_v38  ;;  %11851 = vmatpush3.bf16.msra.mxu1 %v11850_v12  ;;  %v20894_v38 = vld [vmem:[#allocation113_spill] sm:$0xff]  ;;  %v20897_v12 = vld [vmem:[#allocation122_spill] sm:$0xff] }
 0x290   : > { %11737 = vmatprep.subr.bf16.mxu0 %v11736_v14  ;;  %11852 = vmatprep.subr.bf16.mxu1 %v20572_v27  ;;  %v20900_v14 = vld [vmem:[#allocation129_spill] sm:$0xff] }
 0x291   : > { %11148 = vmatmul.mubr.f32.gmra.mrb[8].mxu1 %v20864_v61  ;;  %2211 = vmatmul.mubr.f32.gmra.mrb[8].mxu0 %v20864_v61  ;;  %v20908_v61 = vld [vmem:[#allocation153_spill] sm:$0xff] }
 0x292   : > { %11150 = vmatprep.mubr.msk.f32.mxu1 %vm13703_vm0, %v20589_v21  ;;  %2216 = vmatprep.mubr.f32.mxu0 %v20589_v21 }
 0x293   : > { %11739 = vmatpush1.bf16.msra.mxu0 %v11738_v11  ;;  %11854 = vmatpush3.bf16.msra.mxu1 %v11853_v34  ;;  %v20904_v11 = vld [vmem:[#allocation142_spill] sm:$0xff] }
 0x294   : > { %11855 = vmatprep.subr.bf16.mxu1 %v20572_v27  ;;  %11741 = vmatprep.subr.bf16.mxu0 %v11740_v55  ;;  %v20907_v34 = vld [vmem:[#allocation150_spill] sm:$0xff]  ;;  %v20930_v55 = vld [vmem:[#allocation61_spill] sm:$0xff] }
 0x295   : > { %11151 = vmatmul.mubr.f32.gmra.mrb[10].mxu1 %v20865_v25  ;;  %2220 = vmatmul.mubr.f32.gmra.mrb[10].mxu0 %v20865_v25  ;;  %v20909_v25 = vld [vmem:[#allocation156_spill] sm:$0xff] }
 0x296   : > { %11153 = vmatprep.mubr.msk.f32.mxu1 %vm13703_vm0, %v20589_v21  ;;  %2225 = vmatprep.mubr.f32.mxu0 %v20589_v21 }
 0x297   : > { %11743 = vmatpush1.bf16.msra.mxu0 %v11742_v29  ;;  %11857 = vmatpush3.bf16.msra.mxu1 %v11856_v15  ;;  %v20933_v29 = vld [vmem:[#allocation71_spill] sm:$0xff]  ;;  %v20936_v15 = vld [vmem:[#allocation80_spill] sm:$0xff] }
 0x298   : > { %11745 = vmatprep.subr.bf16.mxu0 %v20741_v24  ;;  %11858 = vmatprep.subr.bf16.mxu1 %v20572_v27  ;;  %v20882_v24 = vld [vmem:[#allocation76_spill] sm:$0xff] }
 0x299   : > { %11154 = vmatmul.mubr.f32.gmra.mrb[12].mxu1 %v20866_v26  ;;  %2229 = vmatmul.mubr.f32.gmra.mrb[12].mxu0 %v20866_v26  ;;  %v20910_v26 = vld [vmem:[#allocation159_spill] sm:$0xff] }
 0x29a   : > { %11156 = vmatprep.mubr.msk.f32.mxu1 %vm13703_vm0, %v20589_v21  ;;  %2234 = vmatprep.mubr.f32.mxu0 %v20589_v21 }
 0x29d   : > { %11157 = vmatmul.mubr.f32.gmra.mrb[14].mxu1 %v20867_v13  ;;  %2238 = vmatmul.mubr.f32.gmra.mrb[14].mxu0 %v20867_v13  ;;  %v20911_v13 = vld [vmem:[#allocation161_spill] sm:$0xff] }
 0x29e   : > { %11159 = vmatprep.mubr.msk.f32.mxu1 %vm13703_vm0, %v20589_v21  ;;  %2243 = vmatprep.mubr.f32.mxu0 %v20589_v21 }
 0x2a1   : > { %11160 = vmatmul.mubr.f32.gmra.mrb[16].mxu1 %v20868_v5  ;;  %2247 = vmatmul.mubr.f32.gmra.mrb[16].mxu0 %v20868_v5  ;;  %v20912_v5 = vld [vmem:[#allocation162_spill] sm:$0xff] }
 0x2a2   : > { %11162 = vmatprep.mubr.msk.f32.mxu1 %vm13703_vm0, %v20589_v21  ;;  %2252 = vmatprep.mubr.f32.mxu0 %v20589_v21 }
 0x2a5   : > { %11163 = vmatmul.mubr.f32.gmra.mrb[18].mxu1 %v20869_v62  ;;  %2256 = vmatmul.mubr.f32.gmra.mrb[18].mxu0 %v20869_v62  ;;  %v20927_v62 = vld [vmem:[#allocation53_spill] sm:$0xff] }
 0x2a6   : > { %11165 = vmatprep.mubr.msk.f32.mxu1 %vm13703_vm0, %v20589_v21  ;;  %2261 = vmatprep.mubr.f32.mxu0 %v20589_v21 }
 0x2a9   : > { %11166 = vmatmul.mubr.f32.gmra.mrb[20].mxu1 %v20876_v59  ;;  %2265 = vmatmul.mubr.f32.gmra.mrb[20].mxu0 %v20876_v59  ;;  %v20937_v59 = vld [vmem:[#allocation81_spill] sm:$0xff] }
 0x2aa   : > { %11168 = vmatprep.mubr.msk.f32.mxu1 %vm13703_vm0, %v20589_v21  ;;  %2270 = vmatprep.mubr.f32.mxu0 %v20589_v21 }
 0x2ad   : > { %11169 = vmatmul.mubr.f32.gmra.mrb[22].mxu1 %v20877_v1  ;;  %2274 = vmatmul.mubr.f32.gmra.mrb[22].mxu0 %v20877_v1  ;;  %v20938_v1 = vld [vmem:[#allocation86_spill] sm:$0xff] }
 0x2ae   : > { %11171 = vmatprep.mubr.msk.f32.mxu1 %vm13703_vm0, %v20589_v21  ;;  %2279 = vmatprep.mubr.f32.mxu0 %v20589_v21 }
 0x2b1   : > { %11172 = vmatmul.mubr.f32.gmra.mrb[24].mxu1 %v20878_v46  ;;  %2283 = vmatmul.mubr.f32.gmra.mrb[24].mxu0 %v20878_v46  ;;  %v20939_v46 = vld [vmem:[#allocation88_spill] sm:$0xff] }
 0x2b2   : > { %11174 = vmatprep.mubr.msk.f32.mxu1 %vm13703_vm0, %v20589_v21  ;;  %2288 = vmatprep.mubr.f32.mxu0 %v20589_v21 }
 0x2b5   : > { %11175 = vmatmul.mubr.f32.gmra.mrb[26].mxu1 %v20879_v50  ;;  %2292 = vmatmul.mubr.f32.gmra.mrb[26].mxu0 %v20879_v50  ;;  %v20940_v50 = vld [vmem:[#allocation90_spill] sm:$0xff] }
 0x2b6   : > { %11177 = vmatprep.mubr.msk.f32.mxu1 %vm13703_vm0, %v20589_v21  ;;  %2297 = vmatprep.mubr.f32.mxu0 %v20589_v21 }
 0x2b9   : > { %11178 = vmatmul.mubr.f32.gmra.mrb[28].mxu1 %v20880_v53  ;;  %2301 = vmatmul.mubr.f32.gmra.mrb[28].mxu0 %v20880_v53  ;;  %v20941_v53 = vld [vmem:[#allocation94_spill] sm:$0xff] }
 0x2ba   : > { %11180 = vmatprep.mubr.msk.f32.mxu1 %vm13703_vm0, %v20589_v21  ;;  %2306 = vmatprep.mubr.f32.mxu0 %v20589_v21 }
 0x2bd   : > { %11181 = vmatmul.mubr.f32.gmra.mrb[30].mxu1 %v20881_v7  ;;  %2310 = vmatmul.mubr.f32.gmra.mrb[30].mxu0 %v20881_v7  ;;  %v20942_v7 = vld [vmem:[#allocation98_spill] sm:$0xff] }
 0x2be   : > { %11183 = vmatprep.mubr.msk.f32.mxu1 %vm13703_vm0, %v20589_v21  ;;  %2315 = vmatprep.mubr.f32.mxu0 %v20589_v21 }
 0x2c1   : > { %11184 = vmatmul.mubr.f32.gmra.mrb[32].mxu1 %v20882_v24  ;;  %2319 = vmatmul.mubr.f32.gmra.mrb[32].mxu0 %v20882_v24  ;;  %v20943_v24 = vld [vmem:[#allocation101_spill] sm:$0xff] }
 0x2c2   : > { %11186 = vmatprep.mubr.msk.f32.mxu1 %vm13703_vm0, %v20589_v21  ;;  %2324 = vmatprep.mubr.f32.mxu0 %v20589_v21 }
 0x2c5   : > { %11187 = vmatmul.mubr.f32.gmra.mrb[34].mxu1 %v20883_v28  ;;  %2328 = vmatmul.mubr.f32.gmra.mrb[34].mxu0 %v20883_v28  ;;  %v20944_v28 = vld [vmem:[#allocation104_spill] sm:$0xff] }
 0x2c6   : > { %11189 = vmatprep.mubr.msk.f32.mxu1 %vm13703_vm0, %v20589_v21  ;;  %2333 = vmatprep.mubr.f32.mxu0 %v20589_v21 }
 0x2c9   : > { %11190 = vmatmul.mubr.f32.gmra.mrb[36].mxu1 %v20884_v10  ;;  %2337 = vmatmul.mubr.f32.gmra.mrb[36].mxu0 %v20884_v10  ;;  %v20945_v10 = vld [vmem:[#allocation107_spill] sm:$0xff] }
 0x2ca   : > { %11192 = vmatprep.mubr.msk.f32.mxu1 %vm13703_vm0, %v20589_v21  ;;  %2342 = vmatprep.mubr.f32.mxu0 %v20589_v21 }
 0x2cd   : > { %11193 = vmatmul.mubr.f32.gmra.mrb[38].mxu1 %v20885_v56  ;;  %2346 = vmatmul.mubr.f32.gmra.mrb[38].mxu0 %v20885_v56  ;;  %v20946_v56 = vld [vmem:[#allocation108_spill] sm:$0xff] }
 0x2ce   : > { %11195 = vmatprep.mubr.msk.f32.mxu1 %vm13703_vm0, %v20589_v21  ;;  %2351 = vmatprep.mubr.f32.mxu0 %v20589_v21 }
 0x2d1   : > { %11196 = vmatmul.mubr.f32.gmra.mrb[40].mxu1 %v20886_v45  ;;  %2355 = vmatmul.mubr.f32.gmra.mrb[40].mxu0 %v20886_v45  ;;  %v20947_v45 = vld [vmem:[#allocation112_spill] sm:$0xff] }
 0x2d2   : > { %11198 = vmatprep.mubr.msk.f32.mxu1 %vm13703_vm0, %v20589_v21  ;;  %2360 = vmatprep.mubr.f32.mxu0 %v20589_v21 }
 0x2d5   : > { %11199 = vmatmul.mubr.f32.gmra.mrb[42].mxu1 %v20887_v33  ;;  %2364 = vmatmul.mubr.f32.gmra.mrb[42].mxu0 %v20887_v33  ;;  %v20948_v33 = vld [vmem:[#allocation115_spill] sm:$0xff] }
 0x2d6   : > { %11201 = vmatprep.mubr.msk.f32.mxu1 %vm13703_vm0, %v20589_v21  ;;  %2369 = vmatprep.mubr.f32.mxu0 %v20589_v21 }
 0x2d9   : > { %11202 = vmatmul.mubr.f32.gmra.mrb[44].mxu1 %v20888_v52  ;;  %2373 = vmatmul.mubr.f32.gmra.mrb[44].mxu0 %v20888_v52  ;;  %v20949_v52 = vld [vmem:[#allocation118_spill] sm:$0xff] }
 0x2da   : > { %11204 = vmatprep.mubr.msk.f32.mxu1 %vm13703_vm0, %v20589_v21  ;;  %2378 = vmatprep.mubr.f32.mxu0 %v20589_v21 }
 0x2dd   : > { %11205 = vmatmul.mubr.f32.gmra.mrb[46].mxu1 %v20889_v16  ;;  %2382 = vmatmul.mubr.f32.gmra.mrb[46].mxu0 %v20889_v16  ;;  %v20950_v16 = vld [vmem:[#allocation121_spill] sm:$0xff] }
 0x2de   : > { %11207 = vmatprep.mubr.msk.f32.mxu1 %vm13703_vm0, %v20589_v21  ;;  %2387 = vmatprep.mubr.f32.mxu0 %v20589_v21 }
 0x2e1   : > { %11208 = vmatmul.mubr.f32.gmra.mrb[48].mxu1 %v20890_v6  ;;  %2391 = vmatmul.mubr.f32.gmra.mrb[48].mxu0 %v20890_v6  ;;  %v20951_v6 = vld [vmem:[#allocation125_spill] sm:$0xff] }
 0x2e2   : > { %11210 = vmatprep.mubr.msk.f32.mxu1 %vm13703_vm0, %v20589_v21  ;;  %2396 = vmatprep.mubr.f32.mxu0 %v20589_v21 }
 0x2e5   : > { %11211 = vmatmul.mubr.f32.gmra.mrb[50].mxu1 %v20891_v37  ;;  %2400 = vmatmul.mubr.f32.gmra.mrb[50].mxu0 %v20891_v37  ;;  %v20952_v37 = vld [vmem:[#allocation128_spill] sm:$0xff] }
 0x2e6   : > { %11213 = vmatprep.mubr.msk.f32.mxu1 %vm13703_vm0, %v20589_v21  ;;  %2405 = vmatprep.mubr.f32.mxu0 %v20589_v21 }
 0x2e9   : > { %11214 = vmatmul.mubr.f32.gmra.mrb[52].mxu1 %v20892_v2  ;;  %2409 = vmatmul.mubr.f32.gmra.mrb[52].mxu0 %v20892_v2  ;;  %v20953_v2 = vld [vmem:[#allocation131_spill] sm:$0xff] }
 0x2ea   : > { %11216 = vmatprep.mubr.msk.f32.mxu1 %vm13703_vm0, %v20589_v21  ;;  %2414 = vmatprep.mubr.f32.mxu0 %v20589_v21 }
 0x2ed   : > { %11217 = vmatmul.mubr.f32.gmra.mrb[54].mxu1 %v20893_v22  ;;  %2418 = vmatmul.mubr.f32.gmra.mrb[54].mxu0 %v20893_v22  ;;  %v20954_v22 = vld [vmem:[#allocation132_spill] sm:$0xff] }
 0x2ee   : > { %11219 = vmatprep.mubr.msk.f32.mxu1 %vm13703_vm0, %v20589_v21  ;;  %2423 = vmatprep.mubr.f32.mxu0 %v20589_v21 }
 0x2f1   : > { %11220 = vmatmul.mubr.f32.gmra.mrb[56].mxu1 %v20894_v38  ;;  %2427 = vmatmul.mubr.f32.gmra.mrb[56].mxu0 %v20894_v38  ;;  %v20955_v38 = vld [vmem:[#allocation135_spill] sm:$0xff] }
 0x2f2   : > { %11222 = vmatprep.mubr.msk.f32.mxu1 %vm13703_vm0, %v20589_v21  ;;  %2432 = vmatprep.mubr.f32.mxu0 %v20589_v21 }
 0x2f5   : > { %11223 = vmatmul.mubr.f32.gmra.mrb[58].mxu1 %v20895_v31  ;;  %2436 = vmatmul.mubr.f32.gmra.mrb[58].mxu0 %v20895_v31  ;;  %v20956_v31 = vld [vmem:[#allocation140_spill] sm:$0xff] }
 0x2f6   : > { %11225 = vmatprep.mubr.msk.f32.mxu1 %vm13703_vm0, %v20589_v21  ;;  %2441 = vmatprep.mubr.f32.mxu0 %v20589_v21 }
 0x2f9   : > { %11226 = vmatmul.mubr.f32.gmra.mrb[60].mxu1 %v20896_v17  ;;  %2445 = vmatmul.mubr.f32.gmra.mrb[60].mxu0 %v20896_v17  ;;  %v20957_v17 = vld [vmem:[#allocation141_spill] sm:$0xff] }
 0x2fa   : > { %11228 = vmatprep.mubr.msk.f32.mxu1 %vm13703_vm0, %v20589_v21  ;;  %2450 = vmatprep.mubr.f32.mxu0 %v20589_v21 }
 0x2fd   : > { %11229 = vmatmul.mubr.f32.gmra.mrb[62].mxu1 %v20897_v12  ;;  %2454 = vmatmul.mubr.f32.gmra.mrb[62].mxu0 %v20897_v12  ;;  %v20958_v12 = vld [vmem:[#allocation144_spill] sm:$0xff] }
 0x2fe   : > { %11231 = vmatprep.mubr.msk.f32.mxu1 %vm13703_vm0, %v20589_v21  ;;  %2459 = vmatprep.mubr.f32.mxu0 %v20589_v21 }
 0x301   : > { %11232 = vmatmul.mubr.f32.gmra.mrb[64].mxu1 %v20898_v60  ;;  %2463 = vmatmul.mubr.f32.gmra.mrb[64].mxu0 %v20898_v60  ;;  %v20959_v60 = vld [vmem:[#allocation149_spill] sm:$0xff] }
 0x302   : > { %11234 = vmatprep.mubr.msk.f32.mxu1 %vm13703_vm0, %v20589_v21  ;;  %2468 = vmatprep.mubr.f32.mxu0 %v20589_v21 }
 0x305   : > { %11235 = vmatmul.mubr.f32.gmra.mrb[66].mxu1 %v20899_v54  ;;  %2472 = vmatmul.mubr.f32.gmra.mrb[66].mxu0 %v20899_v54  ;;  %v20960_v54 = vld [vmem:[#allocation152_spill] sm:$0xff] }
 0x306   : > { %11237 = vmatprep.mubr.msk.f32.mxu1 %vm13703_vm0, %v20589_v21  ;;  %2477 = vmatprep.mubr.f32.mxu0 %v20589_v21 }
 0x309   : > { %11238 = vmatmul.mubr.f32.gmra.mrb[68].mxu1 %v20900_v14  ;;  %2481 = vmatmul.mubr.f32.gmra.mrb[68].mxu0 %v20900_v14  ;;  %v20961_v14 = vld [vmem:[#allocation155_spill] sm:$0xff] }
 0x30a   : > { %11240 = vmatprep.mubr.msk.f32.mxu1 %vm13703_vm0, %v20589_v21  ;;  %2486 = vmatprep.mubr.f32.mxu0 %v20589_v21 }
 0x30d   : > { %11241 = vmatmul.mubr.f32.gmra.mrb[70].mxu1 %v20901_v41  ;;  %2490 = vmatmul.mubr.f32.gmra.mrb[70].mxu0 %v20901_v41  ;;  %v20962_v41 = vld [vmem:[#allocation157_spill] sm:$0xff] }
 0x30e   : > { %11243 = vmatprep.mubr.msk.f32.mxu1 %vm13703_vm0, %v20589_v21  ;;  %2495 = vmatprep.mubr.f32.mxu0 %v20589_v21 }
 0x311   : > { %11244 = vmatmul.mubr.f32.gmra.mrb[72].mxu1 %v20902_v42  ;;  %2499 = vmatmul.mubr.f32.gmra.mrb[72].mxu0 %v20902_v42  ;;  %v20963_v42 = vld [vmem:[#allocation158_spill] sm:$0xff] }
 0x312   : > { %11246 = vmatprep.mubr.msk.f32.mxu1 %vm13703_vm0, %v20589_v21  ;;  %2504 = vmatprep.mubr.f32.mxu0 %v20589_v21 }
 0x315   : > { %11247 = vmatmul.mubr.f32.gmra.mrb[74].mxu1 %v20903_v43  ;;  %2508 = vmatmul.mubr.f32.gmra.mrb[74].mxu0 %v20903_v43  ;;  %v20964_v43 = vld [vmem:[#allocation160_spill] sm:$0xff] }
 0x316   : > { %11249 = vmatprep.mubr.msk.f32.mxu1 %vm13703_vm0, %v20589_v21  ;;  %2513 = vmatprep.mubr.f32.mxu0 %v20589_v21 }
 0x319   : > { %11250 = vmatmul.mubr.f32.gmra.mrb[76].mxu1 %v20904_v11  ;;  %2517 = vmatmul.mubr.f32.gmra.mrb[76].mxu0 %v20904_v11  ;;  %v20965_v11 = vld [vmem:[#allocation163_spill] sm:$0xff] }
 0x31a   : > { %11252 = vmatprep.mubr.msk.f32.mxu1 %vm13703_vm0, %v20589_v21  ;;  %2522 = vmatprep.mubr.f32.mxu0 %v20589_v21 }
 0x31d   : > { %11253 = vmatmul.mubr.f32.gmra.mrb[78].mxu1 %v20905_v4  ;;  %2526 = vmatmul.mubr.f32.gmra.mrb[78].mxu0 %v20905_v4 }
 0x31e   : > { %11255 = vmatprep.mubr.msk.f32.mxu1 %vm13703_vm0, %v20589_v21  ;;  %2531 = vmatprep.mubr.f32.mxu0 %v20589_v21 }
 0x321   : > { %11256 = vmatmul.mubr.f32.gmra.mrb[80].mxu1 %v20906_v9  ;;  %2535 = vmatmul.mubr.f32.gmra.mrb[80].mxu0 %v20906_v9 }
 0x322   : > { %11258 = vmatprep.mubr.msk.f32.mxu1 %vm13703_vm0, %v20589_v21  ;;  %2540 = vmatprep.mubr.f32.mxu0 %v20589_v21 }
 0x325   : > { %11259 = vmatmul.mubr.f32.gmra.mrb[82].mxu1 %v20907_v34  ;;  %2544 = vmatmul.mubr.f32.gmra.mrb[82].mxu0 %v20907_v34  ;;  %v257_v34 = vld [vmem:[%s20145_s2] sm:$0x7] }
 0x326   : > { %11261 = vmatprep.mubr.msk.f32.mxu1 %vm13703_vm0, %v20589_v21  ;;  %2549 = vmatprep.mubr.f32.mxu0 %v20589_v21 }
 0x329   : > { %11262 = vmatmul.mubr.f32.gmra.mrb[84].mxu1 %v20908_v61  ;;  %2553 = vmatmul.mubr.f32.gmra.mrb[84].mxu0 %v20908_v61 }
 0x32a   : > { %11264 = vmatprep.mubr.msk.f32.mxu1 %vm13703_vm0, %v20589_v21  ;;  %2558 = vmatprep.mubr.f32.mxu0 %v20589_v21 }
 0x32d   : > { %11265 = vmatmul.mubr.f32.gmra.mrb[86].mxu1 %v20909_v25  ;;  %2562 = vmatmul.mubr.f32.gmra.mrb[86].mxu0 %v20909_v25 }
 0x32e   : > { %11267 = vmatprep.mubr.msk.f32.mxu1 %vm13703_vm0, %v20589_v21  ;;  %2567 = vmatprep.mubr.f32.mxu0 %v20589_v21 }
 0x331   : > { %11268 = vmatmul.mubr.f32.gmra.mrb[88].mxu1 %v20910_v26  ;;  %2571 = vmatmul.mubr.f32.gmra.mrb[88].mxu0 %v20910_v26 }
 0x332   : > { %11270 = vmatprep.mubr.msk.f32.mxu1 %vm13703_vm0, %v20589_v21  ;;  %2576 = vmatprep.mubr.f32.mxu0 %v20589_v21 }
 0x335   : > { %11271 = vmatmul.mubr.f32.gmra.mrb[90].mxu1 %v20911_v13  ;;  %2580 = vmatmul.mubr.f32.gmra.mrb[90].mxu0 %v20911_v13 }
 0x336   : > { %11273 = vmatprep.mubr.msk.f32.mxu1 %vm13703_vm0, %v20589_v21  ;;  %2585 = vmatprep.mubr.f32.mxu0 %v20589_v21 }
 0x339   : > { %11274 = vmatmul.mubr.f32.gmra.mrb[92].mxu1 %v20912_v5  ;;  %2589 = vmatmul.mubr.f32.gmra.mrb[92].mxu0 %v20912_v5 }
 0x33a   : > { %11276 = vmatprep.mubr.msk.f32.mxu1 %vm13703_vm0, %v20589_v21  ;;  %2594 = vmatprep.mubr.f32.mxu0 %v20589_v21 }
 0x33d   : > { %11277 = vmatmul.mubr.f32.gmra.mrb[94].mxu1 %v15075_v40  ;;  %2598 = vmatmul.mubr.f32.gmra.mrb[94].mxu0 %v15075_v40  ;;  %v20913_v40 = vld [vmem:[#allocation27_spill] sm:$0xff] }
 0x33e   : > { %11279 = vmatprep.mubr.msk.f32.mxu1 %vm13703_vm0, %v20589_v21  ;;  %2603 = vmatprep.mubr.f32.mxu0 %v20589_v21 }
 0x341   : > { %11280 = vmatmul.mubr.f32.gmra.mrb[96].mxu1 %v15086_v57  ;;  %2607 = vmatmul.mubr.f32.gmra.mrb[96].mxu0 %v15086_v57  ;;  %v20922_v57 = vld [vmem:[#allocation23_spill] sm:$0xff] }
 0x342   : > { %11306 = vmatprep.mubr.msk.f32.mxu1 %vm13703_vm0, %v20589_v21  ;;  %2749 = vmatprep.mubr.f32.mxu0 %v20589_v21 }
 0x345   : > { %11307 = vmatmul.mubr.f32.vlgmr.msra.gmra.mrb[0].mxu1 %v14139_v8  ;;  %2751 = vmatmul.mubr.f32.vlgmr.msra.gmra.mrb[0].mxu0 %v14139_v8 }
 0x346   : > { %11747 = vmatpush1.bf16.msra.mxu0 %v20768_v35  ;;  %11309 = vmatprep.mubr.msk.f32.mxu1 %vm13703_vm0, %v20589_v21  ;;  %v20919_v35 = vld [vmem:[#allocation22_spill] sm:$0xff] }
 0x347   : > { %11860 = vmatpush3.bf16.msra.mxu1 %v20769_v19  ;;  %2756 = vmatprep.mubr.f32.mxu0 %v20589_v21  ;;  %v20921_v19 = vld [vmem:[#allocation24_spill] sm:$0xff] }
 0x348   : > { %11749 = vmatprep.subr.bf16.mxu0 %v20770_v63  ;;  %11861 = vmatprep.subr.bf16.mxu1 %v20572_v27  ;;  %v20914_v63 = vld [vmem:[#allocation28_spill] sm:$0xff] }
 0x349   : > { %11310 = vmatmul.mubr.f32.gmra.mrb[2].mxu1 %v20913_v40  ;;  %2758 = vmatmul.mubr.f32.gmra.mrb[2].mxu0 %v20913_v40 }
 0x34a   : > { %11312 = vmatprep.mubr.msk.f32.mxu1 %vm13703_vm0, %v20589_v21  ;;  %2763 = vmatprep.mubr.f32.mxu0 %v20589_v21 }
 0x34b   : > { %11751 = vmatpush1.bf16.msra.mxu0 %v20772_v3  ;;  %11863 = vmatpush3.bf16.msra.mxu1 %v20773_v32  ;;  %v20918_v32 = vld [vmem:[#allocation20_spill] sm:$0xff]  ;;  %v20923_v3 = vld [vmem:[#allocation39_spill] sm:$0xff] }
 0x34c   : > { %11753 = vmatprep.subr.bf16.mxu0 %v20774_v30  ;;  %11864 = vmatprep.subr.bf16.mxu1 %v20572_v27  ;;  %v20915_v30 = vld [vmem:[#allocation19_spill] sm:$0xff] }
 0x34d   : > { %11313 = vmatmul.mubr.f32.gmra.mrb[4].mxu1 %v20914_v63  ;;  %2765 = vmatmul.mubr.f32.gmra.mrb[4].mxu0 %v20914_v63 }
 0x34e   : > { %11315 = vmatprep.mubr.msk.f32.mxu1 %vm13703_vm0, %v20589_v21  ;;  %2770 = vmatprep.mubr.f32.mxu0 %v20589_v21 }
 0x34f   : > { %11755 = vmatpush1.bf16.msra.mxu0 %v20776_v51  ;;  %11866 = vmatpush3.bf16.msra.mxu1 %v20777_v18  ;;  %v20917_v18 = vld [vmem:[#allocation21_spill] sm:$0xff] }
 0x350   : > { %11757 = vmatprep.subr.bf16.mxu0 %v20778_v20  ;;  %11867 = vmatprep.subr.bf16.mxu1 %v20572_v27  ;;  %v20916_v20 = vld [vmem:[#allocation33_spill] sm:$0xff] }
 0x351   : > { %11316 = vmatmul.mubr.f32.gmra.mrb[6].mxu1 %v20733_v47  ;;  %2772 = vmatmul.mubr.f32.gmra.mrb[6].mxu0 %v20733_v47  ;;  %v20925_v51 = vld [vmem:[#allocation45_spill] sm:$0xff] }
 0x352   : > { %11318 = vmatprep.mubr.msk.f32.mxu1 %vm13703_vm0, %v20589_v21  ;;  %2777 = vmatprep.mubr.f32.mxu0 %v20589_v21 }
 0x353   : > { %11759 = vmatpush1.bf16.msra.mxu0 %v20780_v23  ;;  %11869 = vmatpush3.bf16.msra.mxu1 %v20781_v36  ;;  %v20920_v36 = vld [vmem:[#allocation36_spill] sm:$0xff]  ;;  %v20926_v23 = vld [vmem:[#allocation50_spill] sm:$0xff] }
 0x354   : > { %11761 = vmatprep.subr.bf16.mxu0 %v20915_v30  ;;  %11870 = vmatprep.subr.bf16.mxu1 %v20572_v27 }
 0x355   : > { %11319 = vmatmul.mubr.f32.gmra.mrb[8].mxu1 %v20916_v20  ;;  %2779 = vmatmul.mubr.f32.gmra.mrb[8].mxu0 %v20916_v20 }
 0x356   : > { %11321 = vmatprep.mubr.msk.f32.mxu1 %vm13703_vm0, %v20589_v21  ;;  %2784 = vmatprep.mubr.f32.mxu0 %v20589_v21 }
 0x357   : > { %11763 = vmatpush1.bf16.msra.mxu0 %v20917_v18  ;;  %11872 = vmatpush3.bf16.msra.mxu1 %v20918_v32 }
 0x358   : > { %11765 = vmatprep.subr.bf16.mxu0 %v20919_v35  ;;  %11873 = vmatprep.subr.bf16.mxu1 %v20572_v27  ;;  %v20924_v27 = vld [vmem:[#allocation43_spill] sm:$0xff] }
 0x359   : > { %11322 = vmatmul.mubr.f32.gmra.mrb[10].mxu1 %v20920_v36  ;;  %2786 = vmatmul.mubr.f32.gmra.mrb[10].mxu0 %v20920_v36 }
 0x35a   : > { %11324 = vmatprep.mubr.msk.f32.mxu1 %vm13703_vm0, %v20589_v21  ;;  %2791 = vmatprep.mubr.f32.mxu0 %v20589_v21 }
 0x35b   : > { %11767 = vmatpush1.bf16.msra.mxu0 %v20921_v19  ;;  %11875 = vmatpush3.bf16.msra.mxu1 %v20922_v57 }
 0x35d   : > { %11325 = vmatmul.mubr.f32.gmra.mrb[12].mxu1 %v20923_v3  ;;  %2793 = vmatmul.mubr.f32.gmra.mrb[12].mxu0 %v20923_v3 }
 0x35e   : > { %11327 = vmatprep.mubr.msk.f32.mxu1 %vm13703_vm0, %v20589_v21  ;;  %2798 = vmatprep.mubr.f32.mxu0 %v20589_v21 }
 0x361   : > { %11328 = vmatmul.mubr.f32.gmra.mrb[14].mxu1 %v20924_v27  ;;  %2800 = vmatmul.mubr.f32.gmra.mrb[14].mxu0 %v20924_v27 }
 0x362   : > { %11330 = vmatprep.mubr.msk.f32.mxu1 %vm13703_vm0, %v20589_v21  ;;  %2805 = vmatprep.mubr.f32.mxu0 %v20589_v21 }
 0x365   : > { %11331 = vmatmul.mubr.f32.gmra.mrb[16].mxu1 %v20925_v51  ;;  %2807 = vmatmul.mubr.f32.gmra.mrb[16].mxu0 %v20925_v51 }
 0x366   : > { %11333 = vmatprep.mubr.msk.f32.mxu1 %vm13703_vm0, %v20589_v21  ;;  %2812 = vmatprep.mubr.f32.mxu0 %v20589_v21 }
 0x369   : > { %11334 = vmatmul.mubr.f32.gmra.mrb[18].mxu1 %v20926_v23  ;;  %2814 = vmatmul.mubr.f32.gmra.mrb[18].mxu0 %v20926_v23 }
 0x36a   : > { %11336 = vmatprep.mubr.msk.f32.mxu1 %vm13703_vm0, %v20589_v21  ;;  %2819 = vmatprep.mubr.f32.mxu0 %v20589_v21 }
 0x36d   : > { %11337 = vmatmul.mubr.f32.gmra.mrb[20].mxu1 %v20927_v62  ;;  %2821 = vmatmul.mubr.f32.gmra.mrb[20].mxu0 %v20927_v62 }
 0x36e   : > { %11339 = vmatprep.mubr.msk.f32.mxu1 %vm13703_vm0, %v20589_v21  ;;  %2826 = vmatprep.mubr.f32.mxu0 %v20589_v21 }
 0x371   : > { %11340 = vmatmul.mubr.f32.gmra.mrb[22].mxu1 %v20928_v48  ;;  %2828 = vmatmul.mubr.f32.gmra.mrb[22].mxu0 %v20928_v48 }
 0x372   : > { %11342 = vmatprep.mubr.msk.f32.mxu1 %vm13703_vm0, %v20589_v21  ;;  %2833 = vmatprep.mubr.f32.mxu0 %v20589_v21 }
 0x375   : > { %11343 = vmatmul.mubr.f32.gmra.mrb[24].mxu1 %v20929_v0  ;;  %2835 = vmatmul.mubr.f32.gmra.mrb[24].mxu0 %v20929_v0 }
 0x376   : > { %11345 = vmatprep.mubr.msk.f32.mxu1 %vm13703_vm0, %v20589_v21  ;;  %2840 = vmatprep.mubr.f32.mxu0 %v20589_v21 }
 0x379   : > { %11346 = vmatmul.mubr.f32.gmra.mrb[26].mxu1 %v20930_v55  ;;  %2842 = vmatmul.mubr.f32.gmra.mrb[26].mxu0 %v20930_v55 }
 0x37a   : > { %11348 = vmatprep.mubr.msk.f32.mxu1 %vm13703_vm0, %v20589_v21  ;;  %2847 = vmatprep.mubr.f32.mxu0 %v20589_v21 }
 0x37d   : > { %11349 = vmatmul.mubr.f32.gmra.mrb[28].mxu1 %v20931_v44  ;;  %2849 = vmatmul.mubr.f32.gmra.mrb[28].mxu0 %v20931_v44 }
 0x37e   : > { %11351 = vmatprep.mubr.msk.f32.mxu1 %vm13703_vm0, %v20589_v21  ;;  %2854 = vmatprep.mubr.f32.mxu0 %v20589_v21 }
 0x381   : > { %11352 = vmatmul.mubr.f32.gmra.mrb[30].mxu1 %v20932_v49  ;;  %2856 = vmatmul.mubr.f32.gmra.mrb[30].mxu0 %v20932_v49 }
 0x382   : > { %11354 = vmatprep.mubr.msk.f32.mxu1 %vm13703_vm0, %v20589_v21  ;;  %2861 = vmatprep.mubr.f32.mxu0 %v20589_v21 }
 0x385   : > { %11355 = vmatmul.mubr.f32.gmra.mrb[32].mxu1 %v20933_v29  ;;  %2863 = vmatmul.mubr.f32.gmra.mrb[32].mxu0 %v20933_v29 }
 0x386   : > { %11357 = vmatprep.mubr.msk.f32.mxu1 %vm13703_vm0, %v20589_v21  ;;  %2868 = vmatprep.mubr.f32.mxu0 %v20589_v21 }
 0x389   : > { %11358 = vmatmul.mubr.f32.gmra.mrb[34].mxu1 %v20934_v39  ;;  %2870 = vmatmul.mubr.f32.gmra.mrb[34].mxu0 %v20934_v39 }
 0x38a   : > { %11360 = vmatprep.mubr.msk.f32.mxu1 %vm13703_vm0, %v20589_v21  ;;  %2875 = vmatprep.mubr.f32.mxu0 %v20589_v21 }
 0x38d   : > { %11361 = vmatmul.mubr.f32.gmra.mrb[36].mxu1 %v20935_v58  ;;  %2877 = vmatmul.mubr.f32.gmra.mrb[36].mxu0 %v20935_v58 }
 0x38e   : > { %11363 = vmatprep.mubr.msk.f32.mxu1 %vm13703_vm0, %v20589_v21  ;;  %2882 = vmatprep.mubr.f32.mxu0 %v20589_v21 }
 0x391   : > { %11364 = vmatmul.mubr.f32.gmra.mrb[38].mxu1 %v20936_v15  ;;  %2884 = vmatmul.mubr.f32.gmra.mrb[38].mxu0 %v20936_v15 }
 0x392   : > { %11366 = vmatprep.mubr.msk.f32.mxu1 %vm13703_vm0, %v20589_v21  ;;  %2889 = vmatprep.mubr.f32.mxu0 %v20589_v21 }
 0x395   : > { %11367 = vmatmul.mubr.f32.gmra.mrb[40].mxu1 %v20937_v59  ;;  %2891 = vmatmul.mubr.f32.gmra.mrb[40].mxu0 %v20937_v59 }
 0x396   : > { %11369 = vmatprep.mubr.msk.f32.mxu1 %vm13703_vm0, %v20589_v21  ;;  %2896 = vmatprep.mubr.f32.mxu0 %v20589_v21 }
 0x399   : > { %11370 = vmatmul.mubr.f32.gmra.mrb[42].mxu1 %v20938_v1  ;;  %2898 = vmatmul.mubr.f32.gmra.mrb[42].mxu0 %v20938_v1 }
 0x39a   : > { %11372 = vmatprep.mubr.msk.f32.mxu1 %vm13703_vm0, %v20589_v21  ;;  %2903 = vmatprep.mubr.f32.mxu0 %v20589_v21 }
 0x39d   : > { %11373 = vmatmul.mubr.f32.gmra.mrb[44].mxu1 %v20939_v46  ;;  %2905 = vmatmul.mubr.f32.gmra.mrb[44].mxu0 %v20939_v46 }
 0x39e   : > { %11375 = vmatprep.mubr.msk.f32.mxu1 %vm13703_vm0, %v20589_v21  ;;  %2910 = vmatprep.mubr.f32.mxu0 %v20589_v21 }
 0x3a1   : > { %11376 = vmatmul.mubr.f32.gmra.mrb[46].mxu1 %v20940_v50  ;;  %2912 = vmatmul.mubr.f32.gmra.mrb[46].mxu0 %v20940_v50 }
 0x3a2   : > { %11378 = vmatprep.mubr.msk.f32.mxu1 %vm13703_vm0, %v20589_v21  ;;  %2917 = vmatprep.mubr.f32.mxu0 %v20589_v21 }
 0x3a5   : > { %11379 = vmatmul.mubr.f32.gmra.mrb[48].mxu1 %v20941_v53  ;;  %2919 = vmatmul.mubr.f32.gmra.mrb[48].mxu0 %v20941_v53 }
 0x3a6   : > { %11381 = vmatprep.mubr.msk.f32.mxu1 %vm13703_vm0, %v20589_v21  ;;  %2924 = vmatprep.mubr.f32.mxu0 %v20589_v21 }
 0x3a9   : > { %11382 = vmatmul.mubr.f32.gmra.mrb[50].mxu1 %v20942_v7  ;;  %2926 = vmatmul.mubr.f32.gmra.mrb[50].mxu0 %v20942_v7 }
 0x3aa   : > { %11384 = vmatprep.mubr.msk.f32.mxu1 %vm13703_vm0, %v20589_v21  ;;  %2931 = vmatprep.mubr.f32.mxu0 %v20589_v21 }
 0x3ad   : > { %11385 = vmatmul.mubr.f32.gmra.mrb[52].mxu1 %v20943_v24  ;;  %2933 = vmatmul.mubr.f32.gmra.mrb[52].mxu0 %v20943_v24 }
 0x3ae   : > { %11387 = vmatprep.mubr.msk.f32.mxu1 %vm13703_vm0, %v20589_v21  ;;  %2938 = vmatprep.mubr.f32.mxu0 %v20589_v21 }
 0x3b1   : > { %11388 = vmatmul.mubr.f32.gmra.mrb[54].mxu1 %v20944_v28  ;;  %2940 = vmatmul.mubr.f32.gmra.mrb[54].mxu0 %v20944_v28 }
 0x3b2   : > { %11390 = vmatprep.mubr.msk.f32.mxu1 %vm13703_vm0, %v20589_v21  ;;  %2945 = vmatprep.mubr.f32.mxu0 %v20589_v21 }
 0x3b5   : > { %11391 = vmatmul.mubr.f32.gmra.mrb[56].mxu1 %v20945_v10  ;;  %2947 = vmatmul.mubr.f32.gmra.mrb[56].mxu0 %v20945_v10 }
 0x3b6   : > { %11393 = vmatprep.mubr.msk.f32.mxu1 %vm13703_vm0, %v20589_v21  ;;  %2952 = vmatprep.mubr.f32.mxu0 %v20589_v21 }
 0x3b9   : > { %11394 = vmatmul.mubr.f32.gmra.mrb[58].mxu1 %v20946_v56  ;;  %2954 = vmatmul.mubr.f32.gmra.mrb[58].mxu0 %v20946_v56 }
 0x3ba   : > { %11396 = vmatprep.mubr.msk.f32.mxu1 %vm13703_vm0, %v20589_v21  ;;  %2959 = vmatprep.mubr.f32.mxu0 %v20589_v21 }
 0x3bd   : > { %11397 = vmatmul.mubr.f32.gmra.mrb[60].mxu1 %v20947_v45  ;;  %2961 = vmatmul.mubr.f32.gmra.mrb[60].mxu0 %v20947_v45 }
 0x3be   : > { %11399 = vmatprep.mubr.msk.f32.mxu1 %vm13703_vm0, %v20589_v21  ;;  %2966 = vmatprep.mubr.f32.mxu0 %v20589_v21 }
 0x3c1   : > { %11400 = vmatmul.mubr.f32.gmra.mrb[62].mxu1 %v20948_v33  ;;  %2968 = vmatmul.mubr.f32.gmra.mrb[62].mxu0 %v20948_v33 }
 0x3c2   : > { %11402 = vmatprep.mubr.msk.f32.mxu1 %vm13703_vm0, %v20589_v21  ;;  %2973 = vmatprep.mubr.f32.mxu0 %v20589_v21 }
 0x3c5   : > { %11403 = vmatmul.mubr.f32.gmra.mrb[64].mxu1 %v20949_v52  ;;  %2975 = vmatmul.mubr.f32.gmra.mrb[64].mxu0 %v20949_v52 }
 0x3c6   : > { %11405 = vmatprep.mubr.msk.f32.mxu1 %vm13703_vm0, %v20589_v21  ;;  %2980 = vmatprep.mubr.f32.mxu0 %v20589_v21 }
 0x3c9   : > { %11406 = vmatmul.mubr.f32.gmra.mrb[66].mxu1 %v20950_v16  ;;  %2982 = vmatmul.mubr.f32.gmra.mrb[66].mxu0 %v20950_v16 }
 0x3ca   : > { %11408 = vmatprep.mubr.msk.f32.mxu1 %vm13703_vm0, %v20589_v21  ;;  %2987 = vmatprep.mubr.f32.mxu0 %v20589_v21 }
 0x3cd   : > { %11409 = vmatmul.mubr.f32.gmra.mrb[68].mxu1 %v20951_v6  ;;  %2989 = vmatmul.mubr.f32.gmra.mrb[68].mxu0 %v20951_v6 }
 0x3ce   : > { %11411 = vmatprep.mubr.msk.f32.mxu1 %vm13703_vm0, %v20589_v21  ;;  %2994 = vmatprep.mubr.f32.mxu0 %v20589_v21 }
 0x3d1   : > { %11412 = vmatmul.mubr.f32.gmra.mrb[70].mxu1 %v20952_v37  ;;  %2996 = vmatmul.mubr.f32.gmra.mrb[70].mxu0 %v20952_v37 }
 0x3d2   : > { %11414 = vmatprep.mubr.msk.f32.mxu1 %vm13703_vm0, %v20589_v21  ;;  %3001 = vmatprep.mubr.f32.mxu0 %v20589_v21 }
 0x3d5   : > { %11415 = vmatmul.mubr.f32.gmra.mrb[72].mxu1 %v20953_v2  ;;  %3003 = vmatmul.mubr.f32.gmra.mrb[72].mxu0 %v20953_v2 }
 0x3d6   : > { %11417 = vmatprep.mubr.msk.f32.mxu1 %vm13703_vm0, %v20589_v21  ;;  %3008 = vmatprep.mubr.f32.mxu0 %v20589_v21 }
 0x3d9   : > { %11418 = vmatmul.mubr.f32.gmra.mrb[74].mxu1 %v20954_v22  ;;  %3010 = vmatmul.mubr.f32.gmra.mrb[74].mxu0 %v20954_v22 }
 0x3da   : > { %11420 = vmatprep.mubr.msk.f32.mxu1 %vm13703_vm0, %v20589_v21  ;;  %3015 = vmatprep.mubr.f32.mxu0 %v20589_v21 }
 0x3dd   : > { %11421 = vmatmul.mubr.f32.gmra.mrb[76].mxu1 %v20955_v38  ;;  %3017 = vmatmul.mubr.f32.gmra.mrb[76].mxu0 %v20955_v38 }
 0x3de   : > { %11423 = vmatprep.mubr.msk.f32.mxu1 %vm13703_vm0, %v20589_v21  ;;  %3022 = vmatprep.mubr.f32.mxu0 %v20589_v21 }
 0x3e1   : > { %11424 = vmatmul.mubr.f32.gmra.mrb[78].mxu1 %v20956_v31  ;;  %3024 = vmatmul.mubr.f32.gmra.mrb[78].mxu0 %v20956_v31 }
 0x3e2   : > { %11426 = vmatprep.mubr.msk.f32.mxu1 %vm13703_vm0, %v20589_v21  ;;  %3029 = vmatprep.mubr.f32.mxu0 %v20589_v21 }
 0x3e5   : > { %11427 = vmatmul.mubr.f32.gmra.mrb[80].mxu1 %v20957_v17  ;;  %3031 = vmatmul.mubr.f32.gmra.mrb[80].mxu0 %v20957_v17 }
 0x3e6   : > { %11429 = vmatprep.mubr.msk.f32.mxu1 %vm13703_vm0, %v20589_v21  ;;  %3036 = vmatprep.mubr.f32.mxu0 %v20589_v21 }
 0x3e9   : > { %11430 = vmatmul.mubr.f32.gmra.mrb[82].mxu1 %v20958_v12  ;;  %3038 = vmatmul.mubr.f32.gmra.mrb[82].mxu0 %v20958_v12 }
 0x3ea   : > { %11432 = vmatprep.mubr.msk.f32.mxu1 %vm13703_vm0, %v20589_v21  ;;  %3043 = vmatprep.mubr.f32.mxu0 %v20589_v21 }
 0x3ed   : > { %11433 = vmatmul.mubr.f32.gmra.mrb[84].mxu1 %v20959_v60  ;;  %3045 = vmatmul.mubr.f32.gmra.mrb[84].mxu0 %v20959_v60 }
 0x3ee   : > { %11435 = vmatprep.mubr.msk.f32.mxu1 %vm13703_vm0, %v20589_v21  ;;  %3050 = vmatprep.mubr.f32.mxu0 %v20589_v21 }
 0x3f1   : > { %11436 = vmatmul.mubr.f32.gmra.mrb[86].mxu1 %v20960_v54  ;;  %3052 = vmatmul.mubr.f32.gmra.mrb[86].mxu0 %v20960_v54 }
 0x3f2   : > { %11438 = vmatprep.mubr.msk.f32.mxu1 %vm13703_vm0, %v20589_v21  ;;  %3057 = vmatprep.mubr.f32.mxu0 %v20589_v21 }
 0x3f5   : > { %11439 = vmatmul.mubr.f32.gmra.mrb[88].mxu1 %v20961_v14  ;;  %3059 = vmatmul.mubr.f32.gmra.mrb[88].mxu0 %v20961_v14 }
 0x3f6   : > { %11441 = vmatprep.mubr.msk.f32.mxu1 %vm13703_vm0, %v20589_v21  ;;  %3064 = vmatprep.mubr.f32.mxu0 %v20589_v21 }
 0x3f9   : > { %11442 = vmatmul.mubr.f32.gmra.mrb[90].mxu1 %v20962_v41  ;;  %3066 = vmatmul.mubr.f32.gmra.mrb[90].mxu0 %v20962_v41 }
 0x3fa   : > { %11444 = vmatprep.mubr.msk.f32.mxu1 %vm13703_vm0, %v20589_v21  ;;  %3071 = vmatprep.mubr.f32.mxu0 %v20589_v21 }
 0x3fd   : > { %11445 = vmatmul.mubr.f32.gmra.mrb[92].mxu1 %v20963_v42  ;;  %3073 = vmatmul.mubr.f32.gmra.mrb[92].mxu0 %v20963_v42 }
 0x3fe   : > { %11447 = vmatprep.mubr.msk.f32.mxu1 %vm13703_vm0, %v20589_v21  ;;  %3078 = vmatprep.mubr.f32.mxu0 %v20589_v21 }
 0x401   : > { %11448 = vmatmul.mubr.f32.gmra.mrb[94].mxu1 %v20964_v43  ;;  %3080 = vmatmul.mubr.f32.gmra.mrb[94].mxu0 %v20964_v43 }
 0x402   : > { %11450 = vmatprep.mubr.msk.f32.mxu1 %vm13703_vm0, %v20589_v21  ;;  %3085 = vmatprep.mubr.f32.mxu0 %v20589_v21 }
 0x405   : > { %11451 = vmatmul.mubr.f32.gmra.mrb[96].mxu1 %v20965_v11  ;;  %3087 = vmatmul.mubr.f32.gmra.mrb[96].mxu0 %v20965_v11 }
 0x406   : > { %11477 = vmatprep.mubr.msk.f32.mxu1 %vm13703_vm0, %v20589_v21  ;;  %3181 = vmatprep.mubr.f32.mxu0 %v20589_v21 }
 0x409   : > { %11478 = vmatmul.mubr.f32.vlgmr.msra.gmra.mrb[0].mxu1 %v14139_v8  ;;  %3183 = vmatmul.mubr.f32.vlgmr.msra.gmra.mrb[0].mxu0 %v14139_v8  ;;  %v259_v8 = vlaneseq }
 0x40a   : > { %11480 = vmatprep.mubr.msk.f32.mxu1 %vm13703_vm0, %v20589_v21  ;;  %3188 = vmatprep.mubr.f32.mxu0 %v20589_v21 }
 0x40d   : > { %11481 = vmatmul.mubr.f32.gmra.mrb[2].mxu1 %v20913_v40  ;;  %3190 = vmatmul.mubr.f32.gmra.mrb[2].mxu0 %v20913_v40 }
 0x40e   : > { %11483 = vmatprep.mubr.msk.f32.mxu1 %vm13703_vm0, %v20589_v21  ;;  %3195 = vmatprep.mubr.f32.mxu0 %v20589_v21 }
 0x411   : > { %11484 = vmatmul.mubr.f32.gmra.mrb[4].mxu1 %v20914_v63  ;;  %3197 = vmatmul.mubr.f32.gmra.mrb[4].mxu0 %v20914_v63 }
 0x412   : > { %11486 = vmatprep.mubr.msk.f32.mxu1 %vm13703_vm0, %v20589_v21  ;;  %3202 = vmatprep.mubr.f32.mxu0 %v20589_v21 }
 0x415   : > { %11487 = vmatmul.mubr.f32.gmra.mrb[6].mxu1 %v20733_v47  ;;  %3204 = vmatmul.mubr.f32.gmra.mrb[6].mxu0 %v20733_v47  ;;  %v260_v47 = vshrl.u32 %v259_v8, 7 }
 0x416   : > { %11489 = vmatprep.mubr.msk.f32.mxu1 %vm13703_vm0, %v20589_v21  ;;  %3209 = vmatprep.mubr.f32.mxu0 %v20589_v21 }
 0x417   : > { %v269_v4 = vsub.s32 2, %v260_v47  ;;  %v261_v9 = vsub.s32 0, %v260_v47  ;;  %v265_v61 = vsub.s32 1, %v260_v47 }
 0x419   : > { %11490 = vmatmul.mubr.f32.gmra.mrb[8].mxu1 %v20916_v20  ;;  %3211 = vmatmul.mubr.f32.gmra.mrb[8].mxu0 %v20916_v20  ;;  %v16492_v25 = vrot.slane %v257_v34, %v269_v4  ;;  %v16494_v26 = vrot.slane %v257_v34, %v261_v9  ;;  %v16496_v13 = vrot.slane %v257_v34, %v265_v61 }
 0x41a   : > { %11492 = vmatprep.mubr.msk.f32.mxu1 %vm13703_vm0, %v20589_v21  ;;  %3216 = vmatprep.mubr.f32.mxu0 %v20589_v21 }
 0x41d   : > { %11493 = vmatmul.mubr.f32.gmra.mrb[10].mxu1 %v20920_v36  ;;  %3218 = vmatmul.mubr.f32.gmra.mrb[10].mxu0 %v20920_v36 }
 0x41e   : > { %11495 = vmatprep.mubr.msk.f32.mxu1 %vm13703_vm0, %v20589_v21  ;;  %3223 = vmatprep.mubr.f32.mxu0 %v20589_v21 }
 0x421   : > { %11496 = vmatmul.mubr.f32.gmra.mrb[12].mxu1 %v20923_v3  ;;  %3225 = vmatmul.mubr.f32.gmra.mrb[12].mxu0 %v20923_v3 }
 0x422   : > { %11498 = vmatprep.mubr.msk.f32.mxu1 %vm13703_vm0, %v20589_v21  ;;  %3230 = vmatprep.mubr.f32.mxu0 %v20589_v21 }
 0x425   : > { %11499 = vmatmul.mubr.f32.gmra.mrb[14].mxu1 %v20924_v27  ;;  %3232 = vmatmul.mubr.f32.gmra.mrb[14].mxu0 %v20924_v27 }
 0x426   : > { %11501 = vmatprep.mubr.msk.f32.mxu1 %vm13703_vm0, %v20589_v21  ;;  %3237 = vmatprep.mubr.f32.mxu0 %v20589_v21 }
 0x429   : > { %11502 = vmatmul.mubr.f32.gmra.mrb[16].mxu1 %v20925_v51  ;;  %3239 = vmatmul.mubr.f32.gmra.mrb[16].mxu0 %v20925_v51 }
 0x42a   : > { %11504 = vmatprep.mubr.msk.f32.mxu1 %vm13703_vm0, %v20589_v21  ;;  %3244 = vmatprep.mubr.f32.mxu0 %v20589_v21 }
 0x42d   : > { %11505 = vmatmul.mubr.f32.gmra.mrb[18].mxu1 %v20926_v23  ;;  %3246 = vmatmul.mubr.f32.gmra.mrb[18].mxu0 %v20926_v23 }
 0x42e   : > { %11507 = vmatprep.mubr.msk.f32.mxu1 %vm13703_vm0, %v20589_v21  ;;  %3251 = vmatprep.mubr.f32.mxu0 %v20589_v21 }
 0x431   : > { %11508 = vmatmul.mubr.f32.gmra.mrb[20].mxu1 %v20927_v62  ;;  %3253 = vmatmul.mubr.f32.gmra.mrb[20].mxu0 %v20927_v62 }
 0x432   : > { %11510 = vmatprep.mubr.msk.f32.mxu1 %vm13703_vm0, %v20589_v21  ;;  %3258 = vmatprep.mubr.f32.mxu0 %v20589_v21 }
 0x435   : > { %11511 = vmatmul.mubr.f32.gmra.mrb[22].mxu1 %v20928_v48  ;;  %3260 = vmatmul.mubr.f32.gmra.mrb[22].mxu0 %v20928_v48 }
 0x436   : > { %11513 = vmatprep.mubr.msk.f32.mxu1 %vm13703_vm0, %v20589_v21  ;;  %3265 = vmatprep.mubr.f32.mxu0 %v20589_v21 }
 0x439   : > { %11514 = vmatmul.mubr.f32.gmra.mrb[24].mxu1 %v20929_v0  ;;  %3267 = vmatmul.mubr.f32.gmra.mrb[24].mxu0 %v20929_v0 }
 0x43a   : > { %11516 = vmatprep.mubr.msk.f32.mxu1 %vm13703_vm0, %v20589_v21  ;;  %3272 = vmatprep.mubr.f32.mxu0 %v20589_v21 }
 0x43d   : > { %11517 = vmatmul.mubr.f32.gmra.mrb[26].mxu1 %v20930_v55  ;;  %3274 = vmatmul.mubr.f32.gmra.mrb[26].mxu0 %v20930_v55 }
 0x43e   : > { %11519 = vmatprep.mubr.msk.f32.mxu1 %vm13703_vm0, %v20589_v21  ;;  %3279 = vmatprep.mubr.f32.mxu0 %v20589_v21 }
 0x441   : > { %11520 = vmatmul.mubr.f32.gmra.mrb[28].mxu1 %v20931_v44  ;;  %3281 = vmatmul.mubr.f32.gmra.mrb[28].mxu0 %v20931_v44 }
 0x442   : > { %11522 = vmatprep.mubr.msk.f32.mxu1 %vm13703_vm0, %v20589_v21  ;;  %3286 = vmatprep.mubr.f32.mxu0 %v20589_v21 }
 0x445   : > { %11523 = vmatmul.mubr.f32.gmra.mrb[30].mxu1 %v20932_v49  ;;  %3288 = vmatmul.mubr.f32.gmra.mrb[30].mxu0 %v20932_v49 }
 0x446   : > { %11525 = vmatprep.mubr.msk.f32.mxu1 %vm13703_vm0, %v20589_v21  ;;  %3293 = vmatprep.mubr.f32.mxu0 %v20589_v21 }
 0x449   : > { %11526 = vmatmul.mubr.f32.gmra.mrb[32].mxu1 %v20933_v29  ;;  %3295 = vmatmul.mubr.f32.gmra.mrb[32].mxu0 %v20933_v29 }
 0x44a   : > { %11528 = vmatprep.mubr.msk.f32.mxu1 %vm13703_vm0, %v20589_v21  ;;  %3300 = vmatprep.mubr.f32.mxu0 %v20589_v21 }
 0x44d   : > { %11529 = vmatmul.mubr.f32.gmra.mrb[34].mxu1 %v20934_v39  ;;  %3302 = vmatmul.mubr.f32.gmra.mrb[34].mxu0 %v20934_v39 }
 0x44e   : > { %11531 = vmatprep.mubr.msk.f32.mxu1 %vm13703_vm0, %v20589_v21  ;;  %3307 = vmatprep.mubr.f32.mxu0 %v20589_v21 }
 0x451   : > { %11532 = vmatmul.mubr.f32.gmra.mrb[36].mxu1 %v20935_v58  ;;  %3309 = vmatmul.mubr.f32.gmra.mrb[36].mxu0 %v20935_v58 }
 0x452   : > { %11534 = vmatprep.mubr.msk.f32.mxu1 %vm13703_vm0, %v20589_v21  ;;  %3314 = vmatprep.mubr.f32.mxu0 %v20589_v21 }
 0x455   : > { %11535 = vmatmul.mubr.f32.gmra.mrb[38].mxu1 %v20936_v15  ;;  %3316 = vmatmul.mubr.f32.gmra.mrb[38].mxu0 %v20936_v15 }
 0x456   : > { %11537 = vmatprep.mubr.msk.f32.mxu1 %vm13703_vm0, %v20589_v21  ;;  %3321 = vmatprep.mubr.f32.mxu0 %v20589_v21 }
 0x459   : > { %11538 = vmatmul.mubr.f32.gmra.mrb[40].mxu1 %v20937_v59  ;;  %3323 = vmatmul.mubr.f32.gmra.mrb[40].mxu0 %v20937_v59 }
 0x45a   : > { %11540 = vmatprep.mubr.msk.f32.mxu1 %vm13703_vm0, %v20589_v21  ;;  %3328 = vmatprep.mubr.f32.mxu0 %v20589_v21 }
 0x45d   : > { %11541 = vmatmul.mubr.f32.gmra.mrb[42].mxu1 %v20938_v1  ;;  %3330 = vmatmul.mubr.f32.gmra.mrb[42].mxu0 %v20938_v1 }
 0x45e   : > { %11543 = vmatprep.mubr.msk.f32.mxu1 %vm13703_vm0, %v20589_v21  ;;  %3335 = vmatprep.mubr.f32.mxu0 %v20589_v21 }
 0x461   : > { %11544 = vmatmul.mubr.f32.gmra.mrb[44].mxu1 %v20939_v46  ;;  %3337 = vmatmul.mubr.f32.gmra.mrb[44].mxu0 %v20939_v46 }
 0x462   : > { %11546 = vmatprep.mubr.msk.f32.mxu1 %vm13703_vm0, %v20589_v21  ;;  %3342 = vmatprep.mubr.f32.mxu0 %v20589_v21 }
 0x465   : > { %11547 = vmatmul.mubr.f32.gmra.mrb[46].mxu1 %v20940_v50  ;;  %3344 = vmatmul.mubr.f32.gmra.mrb[46].mxu0 %v20940_v50 }
 0x466   : > { %11549 = vmatprep.mubr.msk.f32.mxu1 %vm13703_vm0, %v20589_v21  ;;  %3349 = vmatprep.mubr.f32.mxu0 %v20589_v21 }
 0x469   : > { %11550 = vmatmul.mubr.f32.gmra.mrb[48].mxu1 %v20941_v53  ;;  %3351 = vmatmul.mubr.f32.gmra.mrb[48].mxu0 %v20941_v53 }
 0x46a   : > { %11552 = vmatprep.mubr.msk.f32.mxu1 %vm13703_vm0, %v20589_v21  ;;  %3356 = vmatprep.mubr.f32.mxu0 %v20589_v21 }
 0x46d   : > { %11553 = vmatmul.mubr.f32.gmra.mrb[50].mxu1 %v20942_v7  ;;  %3358 = vmatmul.mubr.f32.gmra.mrb[50].mxu0 %v20942_v7 }
 0x46e   : > { %11555 = vmatprep.mubr.msk.f32.mxu1 %vm13703_vm0, %v20589_v21  ;;  %3363 = vmatprep.mubr.f32.mxu0 %v20589_v21 }
 0x471   : > { %11556 = vmatmul.mubr.f32.gmra.mrb[52].mxu1 %v20943_v24  ;;  %3365 = vmatmul.mubr.f32.gmra.mrb[52].mxu0 %v20943_v24 }
 0x472   : > { %11558 = vmatprep.mubr.msk.f32.mxu1 %vm13703_vm0, %v20589_v21  ;;  %3370 = vmatprep.mubr.f32.mxu0 %v20589_v21 }
 0x475   : > { %11559 = vmatmul.mubr.f32.gmra.mrb[54].mxu1 %v20944_v28  ;;  %3372 = vmatmul.mubr.f32.gmra.mrb[54].mxu0 %v20944_v28 }
 0x476   : > { %11561 = vmatprep.mubr.msk.f32.mxu1 %vm13703_vm0, %v20589_v21  ;;  %3377 = vmatprep.mubr.f32.mxu0 %v20589_v21 }
 0x479   : > { %11562 = vmatmul.mubr.f32.gmra.mrb[56].mxu1 %v20945_v10  ;;  %3379 = vmatmul.mubr.f32.gmra.mrb[56].mxu0 %v20945_v10 }
 0x47a   : > { %11564 = vmatprep.mubr.msk.f32.mxu1 %vm13703_vm0, %v20589_v21  ;;  %3384 = vmatprep.mubr.f32.mxu0 %v20589_v21 }
 0x47d   : > { %11565 = vmatmul.mubr.f32.gmra.mrb[58].mxu1 %v20946_v56  ;;  %3386 = vmatmul.mubr.f32.gmra.mrb[58].mxu0 %v20946_v56 }
 0x47e   : > { %11567 = vmatprep.mubr.msk.f32.mxu1 %vm13703_vm0, %v20589_v21  ;;  %3391 = vmatprep.mubr.f32.mxu0 %v20589_v21 }
 0x481   : > { %11568 = vmatmul.mubr.f32.gmra.mrb[60].mxu1 %v20947_v45  ;;  %3393 = vmatmul.mubr.f32.gmra.mrb[60].mxu0 %v20947_v45 }
 0x482   : > { %11570 = vmatprep.mubr.msk.f32.mxu1 %vm13703_vm0, %v20589_v21  ;;  %3398 = vmatprep.mubr.f32.mxu0 %v20589_v21 }
 0x485   : > { %11571 = vmatmul.mubr.f32.gmra.mrb[62].mxu1 %v20948_v33  ;;  %3400 = vmatmul.mubr.f32.gmra.mrb[62].mxu0 %v20948_v33 }
 0x486   : > { %11573 = vmatprep.mubr.msk.f32.mxu1 %vm13703_vm0, %v20589_v21  ;;  %3405 = vmatprep.mubr.f32.mxu0 %v20589_v21 }
 0x489   : > { %11574 = vmatmul.mubr.f32.gmra.mrb[64].mxu1 %v20949_v52  ;;  %3407 = vmatmul.mubr.f32.gmra.mrb[64].mxu0 %v20949_v52 }
 0x48a   : > { %11576 = vmatprep.mubr.msk.f32.mxu1 %vm13703_vm0, %v20589_v21  ;;  %3412 = vmatprep.mubr.f32.mxu0 %v20589_v21 }
 0x48d   : > { %11577 = vmatmul.mubr.f32.gmra.mrb[66].mxu1 %v20950_v16  ;;  %3414 = vmatmul.mubr.f32.gmra.mrb[66].mxu0 %v20950_v16 }
 0x48e   : > { %11579 = vmatprep.mubr.msk.f32.mxu1 %vm13703_vm0, %v20589_v21  ;;  %3419 = vmatprep.mubr.f32.mxu0 %v20589_v21 }
 0x491   : > { %11580 = vmatmul.mubr.f32.gmra.mrb[68].mxu1 %v20951_v6  ;;  %3421 = vmatmul.mubr.f32.gmra.mrb[68].mxu0 %v20951_v6 }
 0x492   : > { %11582 = vmatprep.mubr.msk.f32.mxu1 %vm13703_vm0, %v20589_v21  ;;  %3426 = vmatprep.mubr.f32.mxu0 %v20589_v21 }
 0x495   : > { %11583 = vmatmul.mubr.f32.gmra.mrb[70].mxu1 %v20952_v37  ;;  %3428 = vmatmul.mubr.f32.gmra.mrb[70].mxu0 %v20952_v37 }
 0x496   : > { %11585 = vmatprep.mubr.msk.f32.mxu1 %vm13703_vm0, %v20589_v21  ;;  %3433 = vmatprep.mubr.f32.mxu0 %v20589_v21 }
 0x499   : > { %11586 = vmatmul.mubr.f32.gmra.mrb[72].mxu1 %v20953_v2  ;;  %3435 = vmatmul.mubr.f32.gmra.mrb[72].mxu0 %v20953_v2 }
 0x49a   : > { %11588 = vmatprep.mubr.msk.f32.mxu1 %vm13703_vm0, %v20589_v21  ;;  %3440 = vmatprep.mubr.f32.mxu0 %v20589_v21 }
 0x49d   : > { %11589 = vmatmul.mubr.f32.gmra.mrb[74].mxu1 %v20954_v22  ;;  %3442 = vmatmul.mubr.f32.gmra.mrb[74].mxu0 %v20954_v22 }
 0x49e   : > { %11591 = vmatprep.mubr.msk.f32.mxu1 %vm13703_vm0, %v20589_v21  ;;  %3447 = vmatprep.mubr.f32.mxu0 %v20589_v21 }
 0x4a1   : > { %11592 = vmatmul.mubr.f32.gmra.mrb[76].mxu1 %v20955_v38  ;;  %3449 = vmatmul.mubr.f32.gmra.mrb[76].mxu0 %v20955_v38 }
 0x4a2   : > { %11594 = vmatprep.mubr.msk.f32.mxu1 %vm13703_vm0, %v20589_v21  ;;  %3454 = vmatprep.mubr.f32.mxu0 %v20589_v21 }
 0x4a5   : > { %11595 = vmatmul.mubr.f32.gmra.mrb[78].mxu1 %v20956_v31  ;;  %3456 = vmatmul.mubr.f32.gmra.mrb[78].mxu0 %v20956_v31 }
 0x4a6   : > { %11597 = vmatprep.mubr.msk.f32.mxu1 %vm13703_vm0, %v20589_v21  ;;  %3461 = vmatprep.mubr.f32.mxu0 %v20589_v21 }
 0x4a9   : > { %11598 = vmatmul.mubr.f32.gmra.mrb[80].mxu1 %v20957_v17  ;;  %3463 = vmatmul.mubr.f32.gmra.mrb[80].mxu0 %v20957_v17 }
 0x4aa   : > { %11600 = vmatprep.mubr.msk.f32.mxu1 %vm13703_vm0, %v20589_v21  ;;  %3468 = vmatprep.mubr.f32.mxu0 %v20589_v21 }
 0x4ad   : > { %11601 = vmatmul.mubr.f32.gmra.mrb[82].mxu1 %v20958_v12  ;;  %3470 = vmatmul.mubr.f32.gmra.mrb[82].mxu0 %v20958_v12 }
 0x4ae   : > { %11603 = vmatprep.mubr.msk.f32.mxu1 %vm13703_vm0, %v20589_v21  ;;  %3475 = vmatprep.mubr.f32.mxu0 %v20589_v21 }
 0x4b1   : > { %11604 = vmatmul.mubr.f32.gmra.mrb[84].mxu1 %v20959_v60  ;;  %3477 = vmatmul.mubr.f32.gmra.mrb[84].mxu0 %v20959_v60 }
 0x4b2   : > { %11606 = vmatprep.mubr.msk.f32.mxu1 %vm13703_vm0, %v20589_v21  ;;  %3482 = vmatprep.mubr.f32.mxu0 %v20589_v21 }
 0x4b5   : > { %11607 = vmatmul.mubr.f32.gmra.mrb[86].mxu1 %v20960_v54  ;;  %3484 = vmatmul.mubr.f32.gmra.mrb[86].mxu0 %v20960_v54 }
 0x4b6   : > { %11609 = vmatprep.mubr.msk.f32.mxu1 %vm13703_vm0, %v20589_v21  ;;  %3489 = vmatprep.mubr.f32.mxu0 %v20589_v21 }
 0x4b9   : > { %11610 = vmatmul.mubr.f32.gmra.mrb[88].mxu1 %v20961_v14  ;;  %3491 = vmatmul.mubr.f32.gmra.mrb[88].mxu0 %v20961_v14 }
 0x4ba   : > { %11612 = vmatprep.mubr.msk.f32.mxu1 %vm13703_vm0, %v20589_v21  ;;  %3496 = vmatprep.mubr.f32.mxu0 %v20589_v21 }
 0x4bd   : > { %11613 = vmatmul.mubr.f32.gmra.mrb[90].mxu1 %v20962_v41  ;;  %3498 = vmatmul.mubr.f32.gmra.mrb[90].mxu0 %v20962_v41 }
 0x4be   : > { %11615 = vmatprep.mubr.msk.f32.mxu1 %vm13703_vm0, %v20589_v21  ;;  %3503 = vmatprep.mubr.f32.mxu0 %v20589_v21 }
 0x4c1   : > { %11616 = vmatmul.mubr.f32.gmra.mrb[92].mxu1 %v20963_v42  ;;  %3505 = vmatmul.mubr.f32.gmra.mrb[92].mxu0 %v20963_v42 }
 0x4c2   : > { %11618 = vmatprep.mubr.msk.f32.mxu1 %vm13703_vm0, %v20589_v21  ;;  %3510 = vmatprep.mubr.f32.mxu0 %v20589_v21 }
 0x4c5   : > { %11619 = vmatmul.mubr.f32.gmra.mrb[94].mxu1 %v20964_v43  ;;  %3512 = vmatmul.mubr.f32.gmra.mrb[94].mxu0 %v20964_v43 }
 0x4c6   : > { %11621 = vmatprep.mubr.msk.f32.mxu1 %vm13703_vm0, %v20589_v21  ;;  %3517 = vmatprep.mubr.f32.mxu0 %v20589_v21 }
 0x4c9   : > { %11622 = vmatmul.mubr.f32.gmra.mrb[96].mxu1 %v20965_v11  ;;  %3519 = vmatmul.mubr.f32.gmra.mrb[96].mxu0 %v20965_v11 }
 0x4dc   : > { %v5886_v21 = vpop.f32.mrb[0].mxu1  ;;  %v3184_v5 = vpop.f32.mrb[0].mxu0 }
 0x4dd   : > { %v16499_v40 = vadd.f32 %v5886_v21, %v16492_v25  ;;  %v16502_v63 = vadd.f32 %v3184_v5, %v16494_v26  ;;  %v11479_v30 = vpop.f32.mrb[1].mxu1  ;;  %v3186_v20 = vpop.f32.mrb[1].mxu0 }
 0x4de   : > { %v16505_v18 = vadd.f32 %v3186_v20, %v16496_v13 }
 0x4df   : > { %v16508_v32 = vmul.f32 0.70710677, %v16499_v40  ;;  %v16511_v35 = vmul.f32 0.70710677, %v16502_v63  ;;  %v16556_v5 = vmul.f32 0.5, %v16499_v40 }
 0x4e0   : > { %v16514_v36 = vmul.f32 0.70710677, %v16505_v18  ;;  %v5892_v19 = vpop.f32.mrb[2].mxu1  ;;  %v3191_v57 = vpop.f32.mrb[2].mxu0 }
 0x4e1   : > { %v6327_v3 = vand.u32 2147483647, %v16508_v32  ;;  %v6325_v27 = vand.u32 2147483647, %v16511_v35  ;;  %v16520_v23 = vadd.f32 %v5892_v19, %v16492_v25  ;;  %v16523_v62 = vadd.f32 %v3191_v57, %v16494_v26  ;;  %v11482_v48 = vpop.f32.mrb[3].mxu1  ;;  %v3193_v0 = vpop.f32.mrb[3].mxu0 }
 0x4e2   : > { %v6326_v51 = vand.u32 2147483647, %v16514_v36  ;;  %v16538_v54 = vadd.f32 %v3193_v0, %v16496_v13  ;;  %v16562_v19 = vmul.f32 0.5, %v16502_v63  ;;  %vm9120_vm2 = vcmp.ge.f32.partialorder %v16508_v32, 0.0 }
 0x4e3   : > { %v6474_v55 = vmul.f32 0.3275911, %v6327_v3  ;;  %v8238_v44 = vsub.f32 0.0, %v6327_v3  ;;  %v6472_v49 = vmul.f32 0.3275911, %v6325_v27  ;;  %v8236_v29 = vsub.f32 0.0, %v6325_v27 }
 0x4e4   : > { %v6473_v39 = vmul.f32 0.3275911, %v6326_v51  ;;  %v8237_v58 = vsub.f32 0.0, %v6326_v51  ;;  %v16526_v15 = vmul.f32 0.70710677, %v16520_v23  ;;  %v5898_v53 = vpop.f32.mrb[4].mxu1 }
 0x4e5   : > { %v6621_v59 = vadd.f32 1.0, %v6474_v55  ;;  %v8385_v1 = vmul.f32 %v8238_v44, %v6327_v3  ;;  %v6619_v46 = vadd.f32 1.0, %v6472_v49  ;;  %v8383_v50 = vmul.f32 %v8236_v29, %v6325_v27  ;;  %v3198_v7 = vpop.f32.mrb[4].mxu0  ;;  %v11485_v10 = vpop.f32.mrb[5].mxu1 }
 0x4e6   : > { %v8384_v24 = vmul.f32 %v8237_v58, %v6326_v51  ;;  %v6330_v28 = vand.u32 2147483647, %v16526_v15  ;;  %v3200_v56 = vpop.f32.mrb[5].mxu0  ;;  %v6620_v45 = vadd.f32 1.0, %v6473_v39  ;;  %v16530_v33 = vmul.f32 0.70710677, %v16523_v62 }
 0x4e7   : > { %13050 = vrcp.f32 %v6621_v59  ;;  %v8534_v52 = vmul.f32 1.442695, %v8385_v1  ;;  %v8530_v2 = vmul.f32 1.442695, %v8383_v50  ;;  %v16543_v43 = vadd.f32 %v5898_v53, %v16492_v25 }
 0x4e8   : > { %13052 = vrcp.f32 %v6619_v46  ;;  %v6477_v16 = vmul.f32 0.3275911, %v6330_v28  ;;  %v8241_v6 = vsub.f32 0.0, %v6330_v28  ;;  %v16532_v37 = vpop.f32.mrb[6].mxu1  ;;  %v6328_v22 = vand.u32 2147483647, %v16530_v33 }
 0x4e9   : > { %v16535_v38 = vpop.f32.mrb[6].mxu0  ;;  %v11488_v31 = vpop.f32.mrb[7].mxu1  ;;  %v8532_v17 = vmul.f32 1.442695, %v8384_v24  ;;  %13054 = vrcp.f32 %v6620_v45  ;;  %v16546_v8 = vmul.f32 0.70710677, %v16538_v54  ;;  %v16566_v48 = vadd.f32 %v3198_v7, %v16494_v26 }
 0x4ea   : > { %v6624_v12 = vadd.f32 1.0, %v6477_v16  ;;  %v8388_v60 = vmul.f32 %v8241_v6, %v6330_v28  ;;  %v16540_v14 = vpop.f32.mrb[7].mxu0  ;;  %v6475_v41 = vmul.f32 0.3275911, %v6328_v22  ;;  %v8239_v42 = vsub.f32 0.0, %v6328_v22 }
 0x4eb   : > { %13056 = vpow2.f32 %v8534_v52  ;;  %v16551_v34 = vmul.f32 0.70710677, %v16543_v43  ;;  %v6329_v30 = vand.u32 2147483647, %v16546_v8  ;;  %v16575_v44 = vmul.f32 0.5, %v16505_v18 }
 0x4ec   : > { %v8540_v11 = vmul.f32 1.442695, %v8388_v60  ;;  %v16548_v47 = vpop.f32.mrb[8].mxu1  ;;  %13058 = vrcp.f32 %v6624_v12  ;;  %v6622_v4 = vadd.f32 1.0, %v6475_v41  ;;  %v8386_v9 = vmul.f32 %v8239_v42, %v6328_v22  ;;  %v16553_v61 = vpop.f32.mrb[8].mxu0 }
 0x4ed   : > { %v11491_v21 = vpop.f32.mrb[9].mxu1  ;;  %13060 = vpow2.f32 %v8530_v2  ;;  %v16559_v20 = vpop.f32.mrb[9].mxu0  ;;  %v6333_v3 = vand.u32 2147483647, %v16551_v34  ;;  %v6476_v27 = vmul.f32 0.3275911, %v6329_v30  ;;  %v16587_v24 = vadd.f32 %v3200_v56, %v16496_v13 }
 0x4ee   : > { %13062 = vrcp.f32 %v6622_v4  ;;  %v8536_v57 = vmul.f32 1.442695, %v8386_v9  ;;  %v8240_v51 = vsub.f32 0.0, %v6329_v30  ;;  %v16583_v50 = vmul.f32 0.70710677, %v16566_v48 }
 0x4ef   : > { %13064 = vpow2.f32 %v8532_v17  ;;  %v6480_v63 = vmul.f32 0.3275911, %v6333_v3  ;;  %v8244_v49 = vsub.f32 0.0, %v6333_v3  ;;  %v6623_v1 = vadd.f32 1.0, %v6476_v27 }
 0x4f0   : > { %v16568_v40 = vpop.f32.mrb[10].mxu1  ;;  %v16570_v0 = vpop.f32.mrb[10].mxu0  ;;  %13066 = vpow2.f32 %v8540_v11  ;;  %v8387_v46 = vmul.f32 %v8240_v51, %v6329_v30  ;;  %v6331_v45 = vand.u32 2147483647, %v16583_v50  ;;  %v16593_v6 = vmul.f32 0.5, %v16520_v23 }
 0x4f1   : > { %20966 = vst [vmem:[#allocation31_spill] sm:$0xff] %v16570_v0  ;;  %v16572_v55 = vpop.eup %13050  ;;  %v11494_v29 = vpop.f32.mrb[11].mxu1  ;;  %v6627_v7 = vadd.f32 1.0, %v6480_v63  ;;  %v8391_v18 = vmul.f32 %v8244_v49, %v6333_v3  ;;  %13068 = vrcp.f32 %v6623_v1  ;;  %v16596_v2 = vmul.f32 0.5, %v16523_v62 }
 0x4f2   : > { %v16577_v39 = vpop.f32.mrb[11].mxu0  ;;  %v16579_v58 = vpop.eup %13052  ;;  %v6915_v59 = vmul.f32 1.0614054, %v16572_v55  ;;  %v8538_v10 = vmul.f32 1.442695, %v8387_v46  ;;  %v8242_v11 = vsub.f32 0.0, %v6331_v45 }
 0x4f3   : > { %20967 = vst [vmem:[#allocation5_spill] sm:$0xff] %v16577_v39  ;;  %v6913_v53 = vmul.f32 1.0614054, %v16579_v58  ;;  %v16590_v52 = vpop.eup %13054  ;;  %13070 = vrcp.f32 %v6627_v7  ;;  %v6478_v12 = vmul.f32 0.3275911, %v6331_v45  ;;  %vm9118_vm3 = vcmp.ge.f32.partialorder %v16511_v35, 0.0 }
 0x4f4   : > { %v7062_v28 = vadd.f32 -1.4531521, %v6915_v59  ;;  %v16598_v22 = vpop.f32.mrb[12].mxu1  ;;  %v6914_v17 = vmul.f32 1.0614054, %v16590_v52  ;;  %13072 = vpow2.f32 %v8536_v57  ;;  %v16604_v60 = vpop.f32.mrb[12].mxu0  ;;  %v8389_v49 = vmul.f32 %v8242_v11, %v6331_v45 }
 0x4f5   : > { %v7060_v16 = vadd.f32 -1.4531521, %v6913_v53  ;;  %20968 = vst [vmem:[#allocation25_spill] sm:$0xff] %v16598_v22  ;;  %v16600_v31 = vpop.eup %13056  ;;  %20969 = vst [vmem:[#allocation7_spill] sm:$0xff] %v16604_v60  ;;  %v11497_v41 = vpop.f32.mrb[13].mxu1  ;;  %13074 = vpow2.f32 %v8538_v10  ;;  %v6625_v63 = vadd.f32 1.0, %v6478_v12 }
 0x4f6   : > { %v7209_v56 = vmul.f32 %v16572_v55, %v7062_v28  ;;  %v16606_v42 = vpop.eup %13058  ;;  %v8546_v62 = vmul.f32 1.442695, %v8391_v18  ;;  %v16610_v4 = vmul.f32 0.70710677, %v16587_v24  ;;  %v16612_v9 = vpop.f32.mrb[13].mxu0  ;;  %vm9119_vm4 = vcmp.ge.f32.partialorder %v16514_v36, 0.0 }
 0x4f7   : > { %v7207_v23 = vmul.f32 %v16579_v58, %v7060_v16  ;;  %20970 = vst [vmem:[#allocation6_spill] sm:$0xff] %v16612_v9  ;;  %v16614_v21 = vpop.eup %13060  ;;  %v7061_v3 = vadd.f32 -1.4531521, %v6914_v17  ;;  %v6918_v57 = vmul.f32 1.0614054, %v16606_v42  ;;  %13076 = vrcp.f32 %v6625_v63 }
 0x4f8   : > { %v7356_v30 = vadd.f32 1.4214138, %v7209_v56  ;;  %v16617_v27 = vpop.eup %13062  ;;  %v16620_v29 = vand.u32 2147483647, %v16610_v4  ;;  %v16622_v59 = vpop.f32.mrb[14].mxu1  ;;  %v16635_v56 = vmul.f32 0.5, %v16538_v54  ;;  %13078 = vpow2.f32 %v8546_v62 }
 0x4f9   : > { %v7354_v51 = vadd.f32 1.4214138, %v7207_v23  ;;  %20971 = vst [vmem:[#allocation8_spill] sm:$0xff] %v16622_v59  ;;  %v16624_v1 = vpop.eup %13064  ;;  %v7208_v53 = vmul.f32 %v16590_v52, %v7061_v3  ;;  %v7065_v7 = vadd.f32 -1.4531521, %v6918_v57  ;;  %v16629_v28 = vpop.f32.mrb[14].mxu0 }
 0x4fa   : > { %v7503_v46 = vmul.f32 %v16572_v55, %v7356_v30  ;;  %v6916_v18 = vmul.f32 1.0614054, %v16617_v27  ;;  %20972 = vst [vmem:[#allocation29_spill] sm:$0xff] %v16629_v28  ;;  %v11500_v10 = vpop.f32.mrb[15].mxu1  ;;  %v16631_v16 = vpop.eup %13066  ;;  %v6479_v17 = vmul.f32 0.3275911, %v16620_v29 }
 0x4fb   : > { %v7501_v45 = vmul.f32 %v16579_v58, %v7354_v51  ;;  %v16638_v12 = vpop.f32.mrb[15].mxu0  ;;  %v7355_v23 = vadd.f32 1.4214138, %v7208_v53  ;;  %v7212_v11 = vmul.f32 %v16606_v42, %v7065_v7  ;;  %v16641_v57 = vmul.f32 1.442695, %v8389_v49  ;;  %v16651_v10 = vpop.eup %13068 }
 0x4fc   : > { %20973 = vst [vmem:[#allocation10_spill] sm:$0xff] %v16638_v12  ;;  %v7650_v41 = vadd.f32 -0.28449672, %v7503_v46  ;;  %v7063_v30 = vadd.f32 -1.4531521, %v6916_v18  ;;  %v16645_v51 = vadd.f32 %v16532_v37, %v16492_v25  ;;  %v16647_v54 = vpop.f32.mrb[16].mxu1 }
 0x4fd   : > { %v7648_v3 = vadd.f32 -0.28449672, %v7501_v45  ;;  %20974 = vst [vmem:[#allocation9_spill] sm:$0xff] %v16647_v54  ;;  %v16649_v63 = vpop.f32.mrb[16].mxu0  ;;  %v7502_v53 = vmul.f32 %v16590_v52, %v7355_v23  ;;  %v7359_v7 = vadd.f32 1.4214138, %v7212_v11  ;;  %v16658_v45 = vpop.eup %13070 }
 0x4fe   : > { %20975 = vst [vmem:[#allocation11_spill] sm:$0xff] %v16649_v63  ;;  %v7797_v46 = vmul.f32 %v16572_v55, %v7650_v41  ;;  %v7210_v18 = vmul.f32 %v16617_v27, %v7063_v30  ;;  %v11503_v62 = vpop.f32.mrb[17].mxu1  ;;  %v16656_v49 = vpop.f32.mrb[17].mxu0  ;;  %v6917_v54 = vmul.f32 1.0614054, %v16651_v10  ;;  %v6626_v12 = vadd.f32 1.0, %v6479_v17 }
 0x4ff   : > { %20976 = vst [vmem:[#allocation30_spill] sm:$0xff] %v16656_v49  ;;  %v7795_v37 = vmul.f32 %v16579_v58, %v7648_v3  ;;  %v8243_v63 = vsub.f32 0.0, %v16620_v29  ;;  %v16663_v28 = vpop.eup %13072  ;;  %v7649_v59 = vadd.f32 -0.28449672, %v7502_v53  ;;  %v7506_v23 = vmul.f32 %v16606_v42, %v7359_v7 }
 0x500   : > { %v7944_v41 = vadd.f32 0.2548296, %v7797_v46  ;;  %v7357_v11 = vadd.f32 1.4214138, %v7210_v18  ;;  %v7064_v62 = vadd.f32 -1.4531521, %v6917_v54  ;;  %v16670_v3 = vadd.f32 %v16535_v38, %v16494_v26  ;;  %v16672_v17 = vpop.eup %13074 }
 0x501   : > { %v7942_v30 = vadd.f32 0.2548296, %v7795_v37  ;;  %v6921_v49 = vmul.f32 1.0614054, %v16658_v45  ;;  %v7796_v46 = vmul.f32 %v16590_v52, %v7649_v59  ;;  %v7653_v53 = vadd.f32 -0.28449672, %v7506_v23  ;;  %v16684_v0 = vpop.eup %13076 }
 0x502   : > { %v8091_v9 = vmul.f32 %v16572_v55, %v7944_v41  ;;  %v7504_v7 = vmul.f32 %v16617_v27, %v7357_v11  ;;  %v16678_v18 = vpop.f32.mrb[18].mxu1  ;;  %v7211_v37 = vmul.f32 %v16651_v10, %v7064_v62  ;;  %13080 = vrcp.f32 %v6626_v12  ;;  %v13079_v11 = vpop.eup %13078 }
 0x503   : > { %v8089_v54 = vmul.f32 %v16579_v58, %v7942_v30  ;;  %v7068_v38 = vadd.f32 -1.4531521, %v6921_v49  ;;  %v11506_v60 = vpop.f32.mrb[19].mxu1  ;;  %v7943_v55 = vadd.f32 0.2548296, %v7796_v46  ;;  %v7800_v41 = vmul.f32 %v16606_v42, %v7653_v53  ;;  %v16696_v53 = vpop.f32.mrb[18].mxu0 }
 0x504   : > { %v8826_v22 = vmul.f32 %v16600_v31, %v8091_v9  ;;  %v7651_v39 = vadd.f32 -0.28449672, %v7504_v7  ;;  %v7358_v58 = vadd.f32 1.4214138, %v7211_v37  ;;  %v8390_v12 = vmul.f32 %v8243_v63, %v16620_v29 }
 0x505   : > { %v8824_v59 = vmul.f32 %v16614_v21, %v8089_v54  ;;  %v7215_v23 = vmul.f32 %v16658_v45, %v7068_v38  ;;  %v8090_v31 = vmul.f32 %v16590_v52, %v7943_v55  ;;  %v7947_v9 = vadd.f32 0.2548296, %v7800_v41 }
 0x506   : > { %v8973_v60 = vsub.f32 1.0, %v8826_v22  ;;  %v7798_v49 = vmul.f32 %v16617_v27, %v7651_v39  ;;  %vm9123_vm5 = vcmp.ge.f32.partialorder %v16526_v15, 0.0  ;;  %v7505_v21 = vmul.f32 %v16651_v10, %v7358_v58 }
 0x507   : > { %v8971_v30 = vsub.f32 1.0, %v8824_v59  ;;  %v7362_v62 = vadd.f32 1.4214138, %v7215_v23  ;;  %v6919_v46 = vmul.f32 1.0614054, %v16684_v0  ;;  %v8825_v52 = vmul.f32 %v16624_v1, %v8090_v31 }
 0x508   : > { %v9267_v22 = vsub.f32 0.0, %v8973_v60  ;;  %v8094_v29 = vmul.f32 %v16606_v42, %v7947_v9  ;;  %v7945_v39 = vadd.f32 0.2548296, %v7798_v49  ;;  %vm9121_vm6 = vcmp.ge.f32.partialorder %v16530_v33, 0.0  ;;  %v16747_v33 = vpop.f32.mrb[20].mxu1 }
 0x509   : > { %v9265_v63 = vsub.f32 0.0, %v8971_v30  ;;  %v7652_v7 = vadd.f32 -0.28449672, %v7505_v21  ;;  %v7509_v54 = vmul.f32 %v16658_v45, %v7362_v62  ;;  %v7066_v37 = vadd.f32 -1.4531521, %v6919_v46 }
 0x50a   : > { %v9414_v38 = vsel %vm9120_vm2, %v8973_v60, %v9267_v22  ;;  %v8972_v55 = vsub.f32 1.0, %v8825_v52  ;;  %v8829_v41 = vmul.f32 %v16631_v16, %v8094_v29  ;;  %v8092_v59 = vmul.f32 %v16617_v27, %v7945_v39  ;;  %v16722_v52 = vpop.f32.mrb[19].mxu0 }
 0x50b   : > { %v9708_v58 = vadd.f32 1.0, %v9414_v38  ;;  %v9412_v42 = vsel %vm9118_vm3, %v8971_v30, %v9265_v63  ;;  %v7799_v1 = vmul.f32 %v16651_v10, %v7652_v7  ;;  %v7656_v23 = vadd.f32 -0.28449672, %v7509_v54 }
 0x50c   : > { %v9706_v31 = vadd.f32 1.0, %v9412_v42  ;;  %v9266_v9 = vsub.f32 0.0, %v8972_v55  ;;  %v8976_v49 = vsub.f32 1.0, %v8829_v41  ;;  %v8827_v21 = vmul.f32 %v16663_v28, %v8092_v59  ;;  %v16714_v32 = vpop.eup %13080 }
 0x50d   : > { %v9855_v60 = vmul.f32 %v9708_v58, %v16556_v5  ;;  %v7946_v16 = vadd.f32 0.2548296, %v7799_v1  ;;  %v7803_v27 = vmul.f32 %v16658_v45, %v7656_v23  ;;  %v7213_v62 = vmul.f32 %v16684_v0, %v7066_v37 }
 0x50e   : > { %v9853_v35 = vmul.f32 %v9706_v31, %v16562_v19  ;;  %v9413_v30 = vsel %vm9119_vm4, %v8972_v55, %v9266_v9  ;;  %v9270_v46 = vsub.f32 0.0, %v8976_v49  ;;  %v8974_v22 = vsub.f32 1.0, %v8827_v21  ;;  %v16757_v21 = vpop.f32.mrb[20].mxu0 }
 0x50f   : > { %10002 = vst [vmem:[%s16725_s9 + $0x10] sm:$0xff] %v9855_v60  ;;  %v9707_v5 = vadd.f32 1.0, %v9413_v30  ;;  %v8093_v28 = vmul.f32 %v16651_v10, %v7946_v16  ;;  %v7950_v29 = vadd.f32 0.2548296, %v7803_v27  ;;  %v7360_v39 = vadd.f32 1.4214138, %v7213_v62 }
 0x510   : > { %10000 = vst [vmem:[%s16725_s9] sm:$0xff] %v9853_v35  ;;  %v9417_v36 = vsel %vm9123_vm5, %v8976_v49, %v9270_v46  ;;  %v9268_v19 = vsub.f32 0.0, %v8974_v22  ;;  %13082 = vpow2.f32 %v16641_v57  ;;  %v6920_v63 = vmul.f32 1.0614054, %v16714_v32 }
 0x511   : > { %v9854_v7 = vmul.f32 %v9707_v5, %v16575_v44  ;;  %v9711_v54 = vadd.f32 1.0, %v9417_v36  ;;  %v8828_v37 = vmul.f32 %v16672_v17, %v8093_v28  ;;  %v8097_v10 = vmul.f32 %v16658_v45, %v7950_v29 }
 0x512   : > { %v9415_v38 = vsel %vm9121_vm6, %v8974_v22, %v9268_v19  ;;  %v7507_v55 = vmul.f32 %v16684_v0, %v7360_v39  ;;  %v7067_v15 = vadd.f32 -1.4531521, %v6920_v63  ;;  %v8544_v41 = vmul.f32 1.442695, %v8390_v12 }
 0x513   : > { %10001 = vst [vmem:[%s16725_s9 + $0x8] sm:$0xff] %v9854_v7  ;;  %v9858_v57 = vmul.f32 %v9711_v54, %v16593_v6  ;;  %v9709_v59 = vadd.f32 1.0, %v9415_v38  ;;  %v8975_v58 = vsub.f32 1.0, %v8828_v37  ;;  %v8832_v42 = vmul.f32 %v13079_v11, %v8097_v10  ;;  %v11509_v11 = vpop.f32.mrb[21].mxu1 }
 0x514   : > { %vm9122_vm7 = vcmp.ge.f32.partialorder %v16546_v8, 0.0  ;;  %v7654_v44 = vadd.f32 -0.28449672, %v7507_v55  ;;  %v7214_v17 = vmul.f32 %v16714_v32, %v7067_v15  ;;  %v16745_v45 = vmul.f32 0.70710677, %v16645_v51  ;;  %v16780_v15 = vpop.f32.mrb[21].mxu0 }
 0x515   : > { %10005 = vst [vmem:[%s16725_s9 + $0x28] sm:$0xff] %v9858_v57  ;;  %v9856_v12 = vmul.f32 %v9709_v59, %v16596_v2  ;;  %v9269_v1 = vsub.f32 0.0, %v8975_v58  ;;  %v8979_v23 = vsub.f32 1.0, %v8832_v42  ;;  %v16752_v6 = vmul.f32 0.70710677, %v16670_v3 }
 0x516   : > { %vm9126_vm8 = vcmp.ge.f32.partialorder %v16551_v34, 0.0  ;;  %v7801_v31 = vmul.f32 %v16684_v0, %v7654_v44  ;;  %v7361_v9 = vadd.f32 1.4214138, %v7214_v17  ;;  %v6336_v49 = vand.u32 2147483647, %v16745_v45 }
 0x517   : > { %10003 = vst [vmem:[%s16725_s9 + $0x18] sm:$0xff] %v9856_v12  ;;  %v9416_v60 = vsel %vm9122_vm7, %v8975_v58, %v9269_v1  ;;  %v9273_v2 = vsub.f32 0.0, %v8979_v23  ;;  %13084 = vpow2.f32 %v8544_v41  ;;  %v6334_v16 = vand.u32 2147483647, %v16752_v6 }
 0x518   : > { %v9710_v27 = vadd.f32 1.0, %v9416_v60  ;;  %v7948_v62 = vadd.f32 0.2548296, %v7801_v31  ;;  %v7508_v34 = vmul.f32 %v16714_v32, %v7361_v9  ;;  %v6483_v35 = vmul.f32 0.3275911, %v6336_v49  ;;  %v16798_v60 = vpop.f32.mrb[22].mxu1 }
 0x519   : > { %v9420_v30 = vsel %vm9126_vm8, %v8979_v23, %v9273_v2  ;;  %v9567_v46 = vmul.f32 0.5, %v16543_v43  ;;  %v6481_v22 = vmul.f32 0.3275911, %v6334_v16  ;;  %v16767_v5 = vadd.f32 %v16540_v14, %v16496_v13 }
 0x51a   : > { %v13083_v8 = vpop.eup %13082  ;;  %v9857_v28 = vmul.f32 %v9710_v27, %v16635_v56  ;;  %v9714_v29 = vadd.f32 1.0, %v9420_v30  ;;  %v8095_v39 = vmul.f32 %v16684_v0, %v7948_v62  ;;  %v7655_v36 = vadd.f32 -0.28449672, %v7508_v34  ;;  %v11512_v62 = vpop.f32.mrb[23].mxu1 }
 0x51b   : > { %v6630_v19 = vadd.f32 1.0, %v6483_v35  ;;  %v6628_v63 = vadd.f32 1.0, %v6481_v22  ;;  %v8247_v37 = vsub.f32 0.0, %v6336_v49  ;;  %v16774_v10 = vmul.f32 0.70710677, %v16767_v5 }
 0x51c   : > { %10004 = vst [vmem:[%s16725_s9 + $0x20] sm:$0xff] %v9857_v28  ;;  %v9861_v7 = vmul.f32 %v9714_v29, %v9567_v46  ;;  %v8830_v54 = vmul.f32 %v13083_v8, %v8095_v39  ;;  %v7802_v43 = vmul.f32 %v16714_v32, %v7655_v36  ;;  %v8245_v56 = vsub.f32 0.0, %v6334_v16 }
 0x51d   : > { %13086 = vrcp.f32 %v6630_v19  ;;  %v6335_v0 = vand.u32 2147483647, %v16774_v10  ;;  %v11978_v55 = vadd.f32 %v16548_v47, %v16492_v25  ;;  %v9565_v57 = vmul.f32 0.5, %v16566_v48 }
 0x51e   : > { %10008 = vst [vmem:[%s16725_s9 + $0x40] sm:$0xff] %v9861_v7  ;;  %v8977_v14 = vsub.f32 1.0, %v8830_v54  ;;  %v7949_v38 = vadd.f32 0.2548296, %v7802_v43  ;;  %13088 = vrcp.f32 %v6628_v63  ;;  %v11884_v58 = vadd.f32 %v16553_v61, %v16494_v26 }
 0x51f   : > { %vm9124_vm9 = vcmp.ge.f32.partialorder %v16583_v50, 0.0  ;;  %v8394_v44 = vmul.f32 %v8247_v37, %v6336_v49  ;;  %v6482_v17 = vmul.f32 0.3275911, %v6335_v0  ;;  %v16787_v12 = vmul.f32 0.70710677, %v11978_v55 }
 0x520   : > { %v9271_v41 = vsub.f32 0.0, %v8977_v14  ;;  %v8096_v59 = vmul.f32 %v16714_v32, %v7949_v38  ;;  %v8392_v47 = vmul.f32 %v8245_v56, %v6334_v16  ;;  %v16789_v11 = vmul.f32 0.70710677, %v11884_v58 }
 0x521   : > { %v13085_v42 = vpop.eup %13084  ;;  %vm9125_vm10 = vcmp.ge.f32.partialorder %v16610_v4, 0.0  ;;  %v6629_v48 = vadd.f32 1.0, %v6482_v17  ;;  %v6339_v32 = vand.u32 2147483647, %v16787_v12  ;;  %v9566_v9 = vmul.f32 0.5, %v16587_v24  ;;  %v16837_v17 = vpop.f32.mrb[22].mxu0 }
 0x522   : > { %v9418_v1 = vsel %vm9124_vm9, %v8977_v14, %v9271_v41  ;;  %v8831_v23 = vmul.f32 %v13085_v42, %v8096_v59  ;;  %v16795_v50 = vmul.f32 0.5, %v16645_v51  ;;  %v6337_v49 = vand.u32 2147483647, %v16789_v11 }
 0x523   : > { %v9712_v31 = vadd.f32 1.0, %v9418_v1  ;;  %v8552_v16 = vmul.f32 1.442695, %v8394_v44  ;;  %13090 = vrcp.f32 %v6629_v48  ;;  %v6486_v27 = vmul.f32 0.3275911, %v6339_v32 }
 0x524   : > { %v8978_v61 = vsub.f32 1.0, %v8831_v23  ;;  %v8548_v35 = vmul.f32 1.442695, %v8392_v47  ;;  %v16801_v30 = vmul.f32 0.5, %v16670_v3  ;;  %v6484_v46 = vmul.f32 0.3275911, %v6337_v49 }
 0x525   : > { %v9859_v2 = vmul.f32 %v9712_v31, %v9565_v57  ;;  %v8246_v24 = vsub.f32 0.0, %v6335_v0  ;;  %v6633_v51 = vadd.f32 1.0, %v6486_v27  ;;  %v8250_v8 = vsub.f32 0.0, %v6339_v32  ;;  %v20977_v47 = vld [vmem:[#allocation31_spill] sm:$0xff] }
 0x526   : > { %v9272_v34 = vsub.f32 0.0, %v8978_v61  ;;  %v16808_v28 = vadd.f32 %v16559_v20, %v16496_v13  ;;  %v6631_v3 = vadd.f32 1.0, %v6484_v46  ;;  %v8248_v19 = vsub.f32 0.0, %v6337_v49 }
 0x527   : > { %v16803_v22 = vpop.eup %13086  ;;  %10006 = vst [vmem:[%s16725_s9 + $0x30] sm:$0xff] %v9859_v2  ;;  %13092 = vrcp.f32 %v6633_v51  ;;  %v16818_v54 = vadd.f32 %v16568_v40, %v16492_v25  ;;  %v16821_v43 = vmul.f32 0.5, %v16767_v5  ;;  %v8393_v38 = vmul.f32 %v8246_v24, %v6335_v0 }
 0x528   : > { %v16810_v29 = vpop.eup %13088  ;;  %v9419_v39 = vsel %vm9125_vm10, %v8978_v61, %v9272_v34  ;;  %v6924_v36 = vmul.f32 1.0614054, %v16803_v22  ;;  %13094 = vrcp.f32 %v6631_v3  ;;  %v16824_v4 = vmul.f32 0.70710677, %v16808_v28  ;;  %v16855_v3 = vpop.f32.mrb[23].mxu0 }
 0x529   : > { %v9713_v63 = vadd.f32 1.0, %v9419_v39  ;;  %v6922_v7 = vmul.f32 1.0614054, %v16810_v29  ;;  %13096 = vpow2.f32 %v8552_v16  ;;  %v8397_v41 = vmul.f32 %v8250_v8, %v6339_v32 }
 0x52a   : > { %v7071_v20 = vadd.f32 -1.4531521, %v6924_v36  ;;  %v16827_v57 = vmul.f32 0.5, %v11978_v55  ;;  %v6338_v40 = vand.u32 2147483647, %v16824_v4  ;;  %v8395_v5 = vmul.f32 %v8248_v19, %v6337_v49 }
 0x52b   : > { %v9860_v37 = vmul.f32 %v9713_v63, %v9566_v9  ;;  %v7069_v14 = vadd.f32 -1.4531521, %v6922_v7  ;;  %v16832_v42 = vmul.f32 0.5, %v11884_v58  ;;  %v16835_v44 = vmul.f32 0.70710677, %v16818_v54 }
 0x52c   : > { %v7218_v56 = vmul.f32 %v16803_v22, %v7071_v20  ;;  %v6485_v0 = vmul.f32 0.3275911, %v6338_v40  ;;  %v8249_v23 = vsub.f32 0.0, %v6338_v40  ;;  %v16841_v55 = vadd.f32 %v20977_v47, %v16494_v26 }
 0x52d   : > { %10007 = vst [vmem:[%s16725_s9 + $0x38] sm:$0xff] %v9860_v37  ;;  %v7216_v59 = vmul.f32 %v16810_v29, %v7069_v14  ;;  %v16843_v31 = vpop.eup %13090  ;;  %13098 = vpow2.f32 %v8548_v35  ;;  %v8550_v32 = vmul.f32 1.442695, %v8393_v38  ;;  %v6342_v58 = vand.u32 2147483647, %v16835_v44 }
 0x52e   : > { %v7365_v1 = vadd.f32 1.4214138, %v7218_v56  ;;  %v6923_v9 = vmul.f32 1.0614054, %v16843_v31  ;;  %v8558_v49 = vmul.f32 1.442695, %v8397_v41  ;;  %v8396_v27 = vmul.f32 %v8249_v23, %v6338_v40 }
 0x52f   : > { %v7363_v48 = vadd.f32 1.4214138, %v7216_v59  ;;  %v6632_v2 = vadd.f32 1.0, %v6485_v0  ;;  %v6489_v62 = vmul.f32 0.3275911, %v6342_v58  ;;  %v8253_v37 = vsub.f32 0.0, %v6342_v58 }
 0x530   : > { %v7512_v61 = vmul.f32 %v16803_v22, %v7365_v1  ;;  %v16850_v34 = vmul.f32 0.70710677, %v16841_v55  ;;  %v7070_v24 = vadd.f32 -1.4531521, %v6923_v9  ;;  %v8554_v51 = vmul.f32 1.442695, %v8395_v5 }
 0x531   : > { %v7510_v16 = vmul.f32 %v16810_v29, %v7363_v48  ;;  %13100 = vrcp.f32 %v6632_v2  ;;  %v16852_v35 = vpop.eup %13092  ;;  %v6636_v39 = vadd.f32 1.0, %v6489_v62  ;;  %v8556_v41 = vmul.f32 1.442695, %v8396_v27  ;;  %v20978_v27 = vld [vmem:[#allocation5_spill] sm:$0xff] }
 0x532   : > { %v7659_v46 = vadd.f32 -0.28449672, %v7512_v61  ;;  %13102 = vpow2.f32 %v8550_v32  ;;  %v6340_v36 = vand.u32 2147483647, %v16850_v34  ;;  %v16857_v19 = vpop.eup %13094  ;;  %v7217_v7 = vmul.f32 %v16843_v31, %v7070_v24 }
 0x533   : > { %v7657_v8 = vadd.f32 -0.28449672, %v7510_v16  ;;  %v6927_v20 = vmul.f32 1.0614054, %v16852_v35  ;;  %v13097_v14 = vpop.eup %13096  ;;  %v6925_v56 = vmul.f32 1.0614054, %v16857_v19  ;;  %13104 = vrcp.f32 %v6636_v39 }
 0x534   : > { %v7806_v63 = vmul.f32 %v16803_v22, %v7659_v46  ;;  %v7364_v59 = vadd.f32 1.4214138, %v7217_v7  ;;  %13106 = vpow2.f32 %v8558_v49  ;;  %vm9129_vm11 = vcmp.ge.f32.partialorder %v16745_v45, 0.0 }
 0x535   : > { %v7804_v38 = vmul.f32 %v16810_v29, %v7657_v8  ;;  %v7074_v5 = vadd.f32 -1.4531521, %v6927_v20  ;;  %v7072_v0 = vadd.f32 -1.4531521, %v6925_v56  ;;  %13108 = vpow2.f32 %v8554_v51 }
 0x536   : > { %v7953_v40 = vadd.f32 0.2548296, %v7806_v63  ;;  %v6487_v23 = vmul.f32 0.3275911, %v6340_v36  ;;  %vm9127_vm12 = vcmp.ge.f32.partialorder %v16752_v6, 0.0  ;;  %v7511_v48 = vmul.f32 %v16843_v31, %v7364_v59 }
 0x537   : > { %v7951_v1 = vadd.f32 0.2548296, %v7804_v38  ;;  %v7221_v32 = vmul.f32 %v16852_v35, %v7074_v5  ;;  %v8400_v61 = vmul.f32 %v8253_v37, %v6342_v58  ;;  %v13099_v9 = vpop.eup %13098  ;;  %v7219_v49 = vmul.f32 %v16857_v19, %v7072_v0  ;;  %v16879_v37 = vpop.f32.mrb[24].mxu1 }
 0x538   : > { %v8100_v47 = vmul.f32 %v16803_v22, %v7953_v40  ;;  %v6634_v16 = vadd.f32 1.0, %v6487_v23  ;;  %v16873_v62 = vadd.f32 %v20978_v27, %v16496_v13  ;;  %v7658_v24 = vadd.f32 -0.28449672, %v7511_v48  ;;  %v11515_v59 = vpop.f32.mrb[25].mxu1  ;;  %v20979_v23 = vld [vmem:[#allocation25_spill] sm:$0xff] }
 0x539   : > { %v8098_v2 = vmul.f32 %v16810_v29, %v7951_v1  ;;  %v7368_v22 = vadd.f32 1.4214138, %v7221_v32  ;;  %13110 = vpow2.f32 %v8556_v41  ;;  %v7366_v8 = vadd.f32 1.4214138, %v7219_v49 }
 0x53a   : > { %v8835_v46 = vmul.f32 %v13097_v14, %v8100_v47  ;;  %13112 = vrcp.f32 %v6634_v16  ;;  %v8251_v39 = vsub.f32 0.0, %v6340_v36  ;;  %v7805_v29 = vmul.f32 %v16843_v31, %v7658_v24 }
 0x53b   : > { %v8833_v51 = vmul.f32 %v13099_v9, %v8098_v2  ;;  %v16875_v63 = vpop.eup %13100  ;;  %v7515_v7 = vmul.f32 %v16852_v35, %v7368_v22  ;;  %v8564_v20 = vmul.f32 1.442695, %v8400_v61  ;;  %v7513_v14 = vmul.f32 %v16857_v19, %v7366_v8 }
 0x53c   : > { %v8982_v58 = vsub.f32 1.0, %v8835_v46  ;;  %v13103_v38 = vpop.eup %13102  ;;  %v6926_v41 = vmul.f32 1.0614054, %v16875_v63  ;;  %v16884_v40 = vmul.f32 0.70710677, %v16873_v62  ;;  %v16888_v47 = vadd.f32 %v20979_v23, %v16492_v25 }
 0x53d   : > { %v8980_v56 = vsub.f32 1.0, %v8833_v51  ;;  %v7952_v1 = vadd.f32 0.2548296, %v7805_v29  ;;  %v7662_v0 = vadd.f32 -0.28449672, %v7515_v7  ;;  %v16890_v48 = vpop.eup %13104  ;;  %vm9128_vm13 = vcmp.ge.f32.partialorder %v16774_v10, 0.0 }
 0x53e   : > { %v9276_v5 = vsub.f32 0.0, %v8982_v58  ;;  %v7660_v61 = vadd.f32 -0.28449672, %v7513_v14  ;;  %v7073_v9 = vadd.f32 -1.4531521, %v6926_v41  ;;  %v8398_v2 = vmul.f32 %v8251_v39, %v6340_v36  ;;  %v13107_v49 = vpop.eup %13106 }
 0x53f   : > { %v9274_v32 = vsub.f32 0.0, %v8980_v56  ;;  %v8099_v27 = vmul.f32 %v16843_v31, %v7952_v1  ;;  %v7809_v46 = vmul.f32 %v16852_v35, %v7662_v0  ;;  %v6930_v24 = vmul.f32 1.0614054, %v16890_v48  ;;  %v13109_v22 = vpop.eup %13108 }
 0x540   : > { %v9423_v16 = vsel %vm9129_vm11, %v8982_v58, %v9276_v5  ;;  %v7807_v29 = vmul.f32 %v16857_v19, %v7660_v61  ;;  %v7220_v7 = vmul.f32 %v16875_v63, %v7073_v9  ;;  %vm9132_vm14 = vcmp.ge.f32.partialorder %v16787_v12, 0.0 }
 0x541   : > { %v9717_v51 = vadd.f32 1.0, %v9423_v16  ;;  %v9421_v8 = vsel %vm9127_vm12, %v8980_v56, %v9274_v32  ;;  %v8834_v39 = vmul.f32 %v13103_v38, %v8099_v27  ;;  %v7956_v45 = vadd.f32 0.2548296, %v7809_v46  ;;  %v16908_v38 = vpop.f32.mrb[24].mxu0 }
 0x542   : > { %v9715_v36 = vadd.f32 1.0, %v9421_v8  ;;  %v7077_v58 = vadd.f32 -1.4531521, %v6930_v24  ;;  %v7954_v14 = vadd.f32 0.2548296, %v7807_v29  ;;  %13114 = vpow2.f32 %v8564_v20 }
 0x543   : > { %v9864_v31 = vmul.f32 %v9717_v51, %v16795_v50  ;;  %v7367_v41 = vadd.f32 1.4214138, %v7220_v7  ;;  %v6341_v59 = vand.u32 2147483647, %v16884_v40  ;;  %v13111_v6 = vpop.eup %13110  ;;  %v8981_v5 = vsub.f32 1.0, %v8834_v39 }
 0x544   : > { %v9862_v56 = vmul.f32 %v9715_v36, %v16801_v30  ;;  %v8103_v1 = vmul.f32 %v16852_v35, %v7956_v45  ;;  %v7224_v0 = vmul.f32 %v16890_v48, %v7077_v58  ;;  %v16910_v23 = vpop.eup %13112  ;;  %v8101_v50 = vmul.f32 %v16857_v19, %v7954_v14 }
 0x545   : > { %10011 = vst [vmem:[%s16725_s9 + $0x58] sm:$0xff] %v9864_v31  ;;  %v7514_v32 = vmul.f32 %v16875_v63, %v7367_v41  ;;  %v6488_v61 = vmul.f32 0.3275911, %v6341_v59  ;;  %v9275_v9 = vsub.f32 0.0, %v8981_v5  ;;  %v6928_v27 = vmul.f32 1.0614054, %v16910_v23 }
 0x546   : > { %10009 = vst [vmem:[%s16725_s9 + $0x48] sm:$0xff] %v9862_v56  ;;  %v8838_v16 = vmul.f32 %v13107_v49, %v8103_v1  ;;  %v7371_v30 = vadd.f32 1.4214138, %v7224_v0  ;;  %v8836_v35 = vmul.f32 %v13109_v22, %v8101_v50  ;;  %v8560_v24 = vmul.f32 1.442695, %v8398_v2  ;;  %v16921_v49 = vpop.f32.mrb[25].mxu0 }
 0x547   : > { %v7661_v46 = vadd.f32 -0.28449672, %v7514_v32  ;;  %v6635_v51 = vadd.f32 1.0, %v6488_v61  ;;  %v9422_v8 = vsel %vm9128_vm13, %v8981_v5, %v9275_v9  ;;  %v7075_v7 = vadd.f32 -1.4531521, %v6928_v27 }
 0x548   : > { %v8985_v29 = vsub.f32 1.0, %v8838_v16  ;;  %v7518_v19 = vmul.f32 %v16890_v48, %v7371_v30  ;;  %v9716_v36 = vadd.f32 1.0, %v9422_v8  ;;  %v8983_v20 = vsub.f32 1.0, %v8836_v35  ;;  %v16937_v35 = vpop.f32.mrb[26].mxu1 }
 0x549   : > { %v7808_v39 = vmul.f32 %v16875_v63, %v7661_v46  ;;  %13116 = vrcp.f32 %v6635_v51  ;;  %v7222_v2 = vmul.f32 %v16910_v23, %v7075_v7  ;;  %v8252_v58 = vsub.f32 0.0, %v6341_v59  ;;  %v20980_v51 = vld [vmem:[#allocation7_spill] sm:$0xff] }
 0x54a   : > { %v9279_v45 = vsub.f32 0.0, %v8985_v29  ;;  %v7665_v22 = vadd.f32 -0.28449672, %v7518_v19  ;;  %v9863_v10 = vmul.f32 %v9716_v36, %v16821_v43  ;;  %vm9130_vm15 = vcmp.ge.f32.partialorder %v16789_v11, 0.0 }
 0x54b   : > { %v9277_v31 = vsub.f32 0.0, %v8983_v20  ;;  %v7955_v14 = vadd.f32 0.2548296, %v7808_v39  ;;  %v7369_v5 = vadd.f32 1.4214138, %v7222_v2  ;;  %13118 = vpow2.f32 %v8560_v24 }
 0x54c   : > { %v9426_v41 = vsel %vm9132_vm14, %v8985_v29, %v9279_v45  ;;  %v7812_v56 = vmul.f32 %v16890_v48, %v7665_v22  ;;  %10010 = vst [vmem:[%s16725_s9 + $0x50] sm:$0xff] %v9863_v10  ;;  %v16932_v32 = vmul.f32 0.70710677, %v16888_v47  ;;  %v8399_v12 = vmul.f32 %v8252_v58, %v6341_v59  ;;  %v13115_v9 = vpop.eup %13114  ;;  %v11518_v29 = vpop.f32.mrb[27].mxu1 }
 0x54d   : > { %v9720_v1 = vadd.f32 1.0, %v9426_v41  ;;  %v9424_v0 = vsel %vm9130_vm15, %v8983_v20, %v9277_v31  ;;  %v8102_v50 = vmul.f32 %v16875_v63, %v7955_v14  ;;  %v7516_v61 = vmul.f32 %v16910_v23, %v7369_v5  ;;  %v16961_v58 = vpop.f32.mrb[26].mxu0 }
 0x54e   : > { %v9718_v43 = vadd.f32 1.0, %v9424_v0  ;;  %v7959_v11 = vadd.f32 0.2548296, %v7812_v56  ;;  %v6345_v27 = vand.u32 2147483647, %v16932_v32  ;;  %v16943_v8 = vadd.f32 %v20980_v51, %v16494_v26 }
 0x54f   : > { %v9867_v16 = vmul.f32 %v9720_v1, %v16827_v57  ;;  %v8837_v30 = vmul.f32 %v13111_v6, %v8102_v50  ;;  %v7663_v24 = vadd.f32 -0.28449672, %v7516_v61  ;;  %v20981_v57 = vld [vmem:[#allocation6_spill] sm:$0xff]  ;;  %v9572_v45 = vmul.f32 0.5, %v16808_v28  ;;  %v16969_v61 = vpop.f32.mrb[27].mxu0 }
 0x550   : > { %v9865_v63 = vmul.f32 %v9718_v43, %v16832_v42  ;;  %v8106_v46 = vmul.f32 %v16890_v48, %v7959_v11  ;;  %v6492_v19 = vmul.f32 0.3275911, %v6345_v27  ;;  %v16948_v6 = vadd.f32 %v20981_v57, %v16496_v13 }
 0x551   : > { %10014 = vst [vmem:[%s16725_s9 + $0x70] sm:$0xff] %v9867_v16  ;;  %v8984_v59 = vsub.f32 1.0, %v8837_v30  ;;  %v7810_v36 = vmul.f32 %v16910_v23, %v7663_v24  ;;  %v8562_v42 = vmul.f32 1.442695, %v8399_v12  ;;  %v16953_v48 = vmul.f32 0.70710677, %v16943_v8 }
 0x552   : > { %10012 = vst [vmem:[%s16725_s9 + $0x60] sm:$0xff] %v9865_v63  ;;  %v8841_v7 = vmul.f32 %v13115_v9, %v8106_v46  ;;  %v6639_v22 = vadd.f32 1.0, %v6492_v19  ;;  %v16959_v2 = vmul.f32 0.70710677, %v16948_v6  ;;  %vm9131_vm0 = vcmp.ge.f32.partialorder %v16824_v4, 0.0 }
 0x553   : > { %v16955_v20 = vpop.eup %13116  ;;  %v9278_v39 = vsub.f32 0.0, %v8984_v59  ;;  %v7957_v31 = vadd.f32 0.2548296, %v7810_v36  ;;  %v8256_v56 = vsub.f32 0.0, %v6345_v27  ;;  %v6343_v5 = vand.u32 2147483647, %v16953_v48 }
 0x554   : > { %v8988_v10 = vsub.f32 1.0, %v8841_v7  ;;  %v6929_v14 = vmul.f32 1.0614054, %v16955_v20  ;;  %13120 = vrcp.f32 %v6639_v22  ;;  %vm9135_vm1 = vcmp.ge.f32.partialorder %v16835_v44, 0.0 }
 0x555   : > { %v9425_v41 = vsel %vm9131_vm0, %v8984_v59, %v9278_v39  ;;  %v13119_v1 = vpop.eup %13118  ;;  %v8104_v50 = vmul.f32 %v16910_v23, %v7957_v31  ;;  %v6490_v11 = vmul.f32 0.3275911, %v6343_v5  ;;  %v6344_v4 = vand.u32 2147483647, %v16959_v2 }
 0x556   : > { %v9719_v0 = vadd.f32 1.0, %v9425_v41  ;;  %v9282_v28 = vsub.f32 0.0, %v8988_v10  ;;  %v7076_v43 = vadd.f32 -1.4531521, %v6929_v14  ;;  %v9576_v63 = vmul.f32 0.5, %v16818_v54  ;;  %v20982_v54 = vld [vmem:[#allocation8_spill] sm:$0xff] }
 0x557   : > { %v8839_v16 = vmul.f32 %v13119_v1, %v8104_v50  ;;  %v6637_v24 = vadd.f32 1.0, %v6490_v11  ;;  %v6491_v51 = vmul.f32 0.3275911, %v6344_v4  ;;  %13122 = vpow2.f32 %v8562_v42  ;;  %v20984_v50 = vld [vmem:[#allocation10_spill] sm:$0xff]  ;;  %v17000_v11 = vpop.f32.mrb[28].mxu1 }
 0x558   : > { %v9866_v12 = vmul.f32 %v9719_v0, %v9572_v45  ;;  %v9429_v9 = vsel %vm9135_vm1, %v8988_v10, %v9282_v28  ;;  %v7223_v30 = vmul.f32 %v16955_v20, %v7076_v43  ;;  %v8403_v44 = vmul.f32 %v8256_v56, %v6345_v27  ;;  %v20983_v45 = vld [vmem:[#allocation29_spill] sm:$0xff] }
 0x559   : > { %v9723_v46 = vadd.f32 1.0, %v9429_v9  ;;  %v8986_v23 = vsub.f32 1.0, %v8839_v16  ;;  %13124 = vrcp.f32 %v6637_v24  ;;  %v6638_v19 = vadd.f32 1.0, %v6491_v51 }
 0x55a   : > { %10013 = vst [vmem:[%s16725_s9 + $0x68] sm:$0xff] %v9866_v12  ;;  %v7370_v29 = vadd.f32 1.4214138, %v7223_v30  ;;  %v8254_v36 = vsub.f32 0.0, %v6343_v5  ;;  %vm9133_vm2 = vcmp.ge.f32.partialorder %v16850_v34, 0.0  ;;  %v16979_v39 = vadd.f32 %v20982_v54, %v16492_v25  ;;  %v11521_v30 = vpop.f32.mrb[29].mxu1 }
 0x55b   : > { %v9870_v59 = vmul.f32 %v9723_v46, %v9576_v63  ;;  %v9280_v57 = vsub.f32 0.0, %v8986_v23  ;;  %v16983_v22 = vadd.f32 %v20983_v45, %v16494_v26  ;;  %v8570_v10 = vmul.f32 1.442695, %v8403_v44 }
 0x55c   : > { %v7517_v7 = vmul.f32 %v16955_v20, %v7370_v29  ;;  %13126 = vrcp.f32 %v6638_v19  ;;  %v9574_v14 = vmul.f32 0.5, %v16841_v55  ;;  %v16989_v56 = vmul.f32 0.70710677, %v16979_v39 }
 0x55d   : > { %10017 = vst [vmem:[%s16725_s9 + $0x88] sm:$0xff] %v9870_v59  ;;  %v9427_v42 = vsel %vm9133_vm2, %v8986_v23, %v9280_v57  ;;  %v16992_v34 = vmul.f32 0.70710677, %v16983_v22  ;;  %v8401_v28 = vmul.f32 %v8254_v36, %v6343_v5  ;;  %v16998_v43 = vadd.f32 %v20984_v50, %v16496_v13 }
 0x55e   : > { %v7664_v27 = vadd.f32 -0.28449672, %v7517_v7  ;;  %v16985_v31 = vpop.eup %13120  ;;  %v9721_v41 = vadd.f32 1.0, %v9427_v42  ;;  %v8255_v12 = vsub.f32 0.0, %v6344_v4  ;;  %v6348_v9 = vand.u32 2147483647, %v16989_v56 }
 0x55f   : > { %v6933_v0 = vmul.f32 1.0614054, %v16985_v31  ;;  %v6346_v16 = vand.u32 2147483647, %v16992_v34  ;;  %v9575_v46 = vmul.f32 0.5, %v16873_v62  ;;  %v17006_v51 = vmul.f32 0.5, %v16888_v47 }
 0x560   : > { %v7811_v1 = vmul.f32 %v16955_v20, %v7664_v27  ;;  %v9868_v55 = vmul.f32 %v9721_v41, %v9574_v14  ;;  %vm9134_vm3 = vcmp.ge.f32.partialorder %v16884_v40, 0.0  ;;  %v17011_v5 = vmul.f32 0.5, %v16943_v8 }
 0x561   : > { %v7080_v24 = vadd.f32 -1.4531521, %v6933_v0  ;;  %v6495_v23 = vmul.f32 0.3275911, %v6348_v9  ;;  %v8259_v29 = vsub.f32 0.0, %v6348_v9  ;;  %v13123_v59 = vpop.eup %13122  ;;  %13128 = vpow2.f32 %v8570_v10  ;;  %v20985_v10 = vld [vmem:[#allocation9_spill] sm:$0xff] }
 0x562   : > { %v7958_v63 = vadd.f32 0.2548296, %v7811_v1  ;;  %10015 = vst [vmem:[%s16725_s9 + $0x78] sm:$0xff] %v9868_v55  ;;  %v6493_v44 = vmul.f32 0.3275911, %v6346_v16  ;;  %v8402_v36 = vmul.f32 %v8255_v12, %v6344_v4  ;;  %v8257_v41 = vsub.f32 0.0, %v6346_v16 }
 0x563   : > { %v7227_v57 = vmul.f32 %v16985_v31, %v7080_v24  ;;  %v17016_v62 = vmul.f32 0.70710677, %v16998_v43  ;;  %v17018_v47 = vpop.eup %13124  ;;  %v8566_v7 = vmul.f32 1.442695, %v8401_v28  ;;  %v6642_v54 = vadd.f32 1.0, %v6495_v23  ;;  %v17026_v0 = vpop.f32.mrb[28].mxu0 }
 0x564   : > { %v8105_v19 = vmul.f32 %v16955_v20, %v7958_v63  ;;  %v6640_v45 = vadd.f32 1.0, %v6493_v44  ;;  %v6931_v27 = vmul.f32 1.0614054, %v17018_v47  ;;  %v8406_v20 = vmul.f32 %v8259_v29, %v6348_v9  ;;  %20986 = vst [vmem:[#allocation14_spill] sm:$0xff] %v17026_v0 }
 0x565   : > { %v7374_v42 = vadd.f32 1.4214138, %v7227_v57  ;;  %v6347_v14 = vand.u32 2147483647, %v17016_v62  ;;  %13130 = vrcp.f32 %v6642_v54  ;;  %v17024_v1 = vadd.f32 %v20985_v10, %v16492_v25 }
 0x566   : > { %v8840_v8 = vmul.f32 %v13123_v59, %v8105_v19  ;;  %v17028_v50 = vpop.eup %13126  ;;  %v7078_v55 = vadd.f32 -1.4531521, %v6931_v27  ;;  %13132 = vrcp.f32 %v6640_v45  ;;  %v17033_v30 = vmul.f32 0.5, %v16948_v6 }
 0x567   : > { %v7521_v28 = vmul.f32 %v16985_v31, %v7374_v42  ;;  %13134 = vpow2.f32 %v8566_v7  ;;  %v6932_v12 = vmul.f32 1.0614054, %v17028_v50  ;;  %v6494_v9 = vmul.f32 0.3275911, %v6347_v14 }
 0x568   : > { %v8987_v4 = vsub.f32 1.0, %v8840_v8  ;;  %v7225_v23 = vmul.f32 %v17018_v47, %v7078_v55  ;;  %v8568_v29 = vmul.f32 1.442695, %v8402_v36  ;;  %v8404_v59 = vmul.f32 %v8257_v41, %v6346_v16  ;;  %v20987_v55 = vld [vmem:[#allocation11_spill] sm:$0xff] }
 0x569   : > { %v7668_v24 = vadd.f32 -0.28449672, %v7521_v28  ;;  %v7079_v44 = vadd.f32 -1.4531521, %v6932_v12  ;;  %v6641_v19 = vadd.f32 1.0, %v6494_v9  ;;  %v8258_v27 = vsub.f32 0.0, %v6347_v14 }
 0x56a   : > { %v9281_v63 = vsub.f32 0.0, %v8987_v4  ;;  %v17037_v57 = vmul.f32 0.70710677, %v17024_v1  ;;  %v7372_v45 = vadd.f32 1.4214138, %v7225_v23  ;;  %v17045_v41 = vmul.f32 0.5, %v16979_v39 }
 0x56b   : > { %v7815_v54 = vmul.f32 %v16985_v31, %v7668_v24  ;;  %v8576_v6 = vmul.f32 1.442695, %v8406_v20  ;;  %v7226_v42 = vmul.f32 %v17028_v50, %v7079_v44  ;;  %13136 = vrcp.f32 %v6641_v19  ;;  %v13129_v36 = vpop.eup %13128 }
 0x56c   : > { %v9428_v7 = vsel %vm9134_vm3, %v8987_v4, %v9281_v63  ;;  %v7519_v16 = vmul.f32 %v17018_v47, %v7372_v45  ;;  %v6351_v40 = vand.u32 2147483647, %v17037_v57  ;;  %vm9138_vm4 = vcmp.ge.f32.partialorder %v16932_v32, 0.0  ;;  %v17086_v32 = vpop.f32.mrb[30].mxu1 }
 0x56d   : > { %v9722_v8 = vadd.f32 1.0, %v9428_v7  ;;  %v7962_v10 = vadd.f32 0.2548296, %v7815_v54  ;;  %v7373_v28 = vadd.f32 1.4214138, %v7226_v42  ;;  %v17051_v12 = vadd.f32 %v20987_v55, %v16494_v26 }
 0x56e   : > { %v8572_v20 = vmul.f32 1.442695, %v8404_v59  ;;  %v7666_v63 = vadd.f32 -0.28449672, %v7519_v16  ;;  %13138 = vpow2.f32 %v8568_v29  ;;  %v6498_v24 = vmul.f32 0.3275911, %v6351_v40 }
 0x56f   : > { %v9869_v4 = vmul.f32 %v9722_v8, %v9575_v46  ;;  %v8109_v9 = vmul.f32 %v16985_v31, %v7962_v10  ;;  %v17054_v23 = vpop.eup %13130  ;;  %v7520_v39 = vmul.f32 %v17028_v50, %v7373_v28  ;;  %13140 = vpow2.f32 %v8576_v6  ;;  %v17061_v59 = vpop.f32.mrb[29].mxu0 }
 0x570   : > { %v8405_v46 = vmul.f32 %v8258_v27, %v6347_v14  ;;  %v17059_v44 = vmul.f32 0.70710677, %v17051_v12  ;;  %20988 = vst [vmem:[#allocation13_spill] sm:$0xff] %v17061_v59  ;;  %v17063_v19 = vpop.eup %13132  ;;  %v7813_v31 = vmul.f32 %v17018_v47, %v7666_v63  ;;  %v6936_v29 = vmul.f32 1.0614054, %v17054_v23 }
 0x571   : > { %10016 = vst [vmem:[%s16725_s9 + $0x80] sm:$0xff] %v9869_v4  ;;  %v8844_v7 = vmul.f32 %v13129_v36, %v8109_v9  ;;  %v6645_v54 = vadd.f32 1.0, %v6498_v24  ;;  %v13135_v45 = vpop.eup %13134  ;;  %v7667_v8 = vadd.f32 -0.28449672, %v7520_v39  ;;  %v6934_v42 = vmul.f32 1.0614054, %v17063_v19 }
 0x572   : > { %13142 = vpow2.f32 %v8572_v20  ;;  %v6349_v14 = vand.u32 2147483647, %v17059_v44  ;;  %v7960_v27 = vadd.f32 0.2548296, %v7813_v31  ;;  %v7083_v10 = vadd.f32 -1.4531521, %v6936_v29 }
 0x573   : > { %v8991_v6 = vsub.f32 1.0, %v8844_v7  ;;  %13144 = vrcp.f32 %v6645_v54  ;;  %vm9136_vm5 = vcmp.ge.f32.partialorder %v16953_v48, 0.0  ;;  %v7814_v36 = vmul.f32 %v17028_v50, %v7667_v8  ;;  %v20989_v29 = vld [vmem:[#allocation30_spill] sm:$0xff] }
 0x574   : > { %v7081_v16 = vadd.f32 -1.4531521, %v6934_v42  ;;  %v8574_v4 = vmul.f32 1.442695, %v8405_v46  ;;  %v6496_v28 = vmul.f32 0.3275911, %v6349_v14  ;;  %v8107_v9 = vmul.f32 %v17018_v47, %v7960_v27 }
 0x575   : > { %v9285_v55 = vsub.f32 0.0, %v8991_v6  ;;  %v7230_v63 = vmul.f32 %v17054_v23, %v7083_v10  ;;  %v8262_v24 = vsub.f32 0.0, %v6351_v40  ;;  %v17073_v20 = vpop.eup %13136  ;;  %v7961_v39 = vadd.f32 0.2548296, %v7814_v36 }
 0x576   : > { %v7228_v7 = vmul.f32 %v17063_v19, %v7081_v16  ;;  %v6643_v31 = vadd.f32 1.0, %v6496_v28  ;;  %v17078_v54 = vadd.f32 %v20989_v29, %v16496_v13  ;;  %v8842_v8 = vmul.f32 %v13135_v45, %v8107_v9 }
 0x577   : > { %v9432_v46 = vsel %vm9138_vm4, %v8991_v6, %v9285_v55  ;;  %vm9137_vm6 = vcmp.ge.f32.partialorder %v16959_v2, 0.0  ;;  %v7377_v47 = vadd.f32 1.4214138, %v7230_v63  ;;  %v6935_v42 = vmul.f32 1.0614054, %v17073_v20 }
 0x578   : > { %v9726_v27 = vadd.f32 1.0, %v9432_v46  ;;  %v8108_v10 = vmul.f32 %v17028_v50, %v7961_v39  ;;  %v7375_v36 = vadd.f32 1.4214138, %v7228_v7  ;;  %13146 = vrcp.f32 %v6643_v31  ;;  %v13139_v16 = vpop.eup %13138  ;;  %v11524_v50 = vpop.f32.mrb[31].mxu1 }
 0x579   : > { %v8989_v28 = vsub.f32 1.0, %v8842_v8  ;;  %v7524_v29 = vmul.f32 %v17054_v23, %v7377_v47  ;;  %v7082_v59 = vadd.f32 -1.4531521, %v6935_v42  ;;  %v8409_v0 = vmul.f32 %v8262_v24, %v6351_v40  ;;  %v13141_v45 = vpop.eup %13140 }
 0x57a   : > { %v9873_v6 = vmul.f32 %v9726_v27, %v17006_v51  ;;  %v8843_v55 = vmul.f32 %v13139_v16, %v8108_v10  ;;  %v7522_v9 = vmul.f32 %v17063_v19, %v7375_v36  ;;  %v17091_v63 = vmul.f32 0.5, %v16983_v22  ;;  %v17103_v36 = vpop.f32.mrb[30].mxu0 }
 0x57b   : > { %v9283_v39 = vsub.f32 0.0, %v8989_v28  ;;  %v7671_v7 = vadd.f32 -0.28449672, %v7524_v29  ;;  %v7229_v31 = vmul.f32 %v17073_v20, %v7082_v59  ;;  %v8260_v46 = vsub.f32 0.0, %v6349_v14 }
 0x57c   : > { %v13143_v8 = vpop.eup %13142  ;;  %10020 = vst [vmem:[%s16725_s9 + $0xa0] sm:$0xff] %v9873_v6  ;;  %v8990_v40 = vsub.f32 1.0, %v8843_v55  ;;  %v7669_v24 = vadd.f32 -0.28449672, %v7522_v9  ;;  %13148 = vpow2.f32 %v8574_v4  ;;  %v17096_v47 = vmul.f32 0.70710677, %v17078_v54 }
 0x57d   : > { %v17098_v51 = vpop.eup %13144  ;;  %v9430_v22 = vsel %vm9136_vm5, %v8989_v28, %v9283_v39  ;;  %v7818_v42 = vmul.f32 %v17054_v23, %v7671_v7  ;;  %v7376_v27 = vadd.f32 1.4214138, %v7229_v31  ;;  %v8582_v10 = vmul.f32 1.442695, %v8409_v0 }
 0x57e   : > { %v9724_v59 = vadd.f32 1.0, %v9430_v22  ;;  %v9284_v16 = vsub.f32 0.0, %v8990_v40  ;;  %v7816_v29 = vmul.f32 %v17063_v19, %v7669_v24  ;;  %v6939_v4 = vmul.f32 1.0614054, %v17098_v51 }
 0x57f   : > { %v7965_v6 = vadd.f32 0.2548296, %v7818_v42  ;;  %v7523_v55 = vmul.f32 %v17073_v20, %v7376_v27  ;;  %v8407_v9 = vmul.f32 %v8260_v46, %v6349_v14  ;;  %v17109_v48 = vand.u32 2147483647, %v17096_v47 }
 0x580   : > { %v9871_v28 = vmul.f32 %v9724_v59, %v17011_v5  ;;  %v9431_v0 = vsel %vm9137_vm6, %v8990_v40, %v9284_v16  ;;  %v7963_v50 = vadd.f32 0.2548296, %v7816_v29  ;;  %v7086_v39 = vadd.f32 -1.4531521, %v6939_v4 }
 0x581   : > { %v9725_v7 = vadd.f32 1.0, %v9431_v0  ;;  %v8112_v31 = vmul.f32 %v17054_v23, %v7965_v6  ;;  %v7670_v24 = vadd.f32 -0.28449672, %v7523_v55  ;;  %v6497_v22 = vmul.f32 0.3275911, %v17109_v48  ;;  %v17129_v6 = vpop.f32.mrb[31].mxu0 }
 0x582   : > { %v17116_v42 = vpop.eup %13146  ;;  %10018 = vst [vmem:[%s16725_s9 + $0x90] sm:$0xff] %v9871_v28  ;;  %vm9141_vm7 = vcmp.ge.f32.partialorder %v16989_v56, 0.0  ;;  %v8110_v14 = vmul.f32 %v17063_v19, %v7963_v50  ;;  %v7233_v5 = vmul.f32 %v17098_v51, %v7086_v39  ;;  %v17124_v2 = vadd.f32 %v16678_v18, %v16492_v25  ;;  %v17151_v56 = vpop.f32.mrb[32].mxu1 }
 0x583   : > { %v9872_v46 = vmul.f32 %v9725_v7, %v17033_v30  ;;  %v8847_v23 = vmul.f32 %v13141_v45, %v8112_v31  ;;  %v7817_v40 = vmul.f32 %v17073_v20, %v7670_v24  ;;  %v6937_v27 = vmul.f32 1.0614054, %v17116_v42 }
 0x584   : > { %v8845_v59 = vmul.f32 %v13143_v8, %v8110_v14  ;;  %v7380_v16 = vadd.f32 1.4214138, %v7233_v5  ;;  %v8578_v29 = vmul.f32 1.442695, %v8407_v9  ;;  %v6644_v4 = vadd.f32 1.0, %v6497_v22 }
 0x585   : > { %10019 = vst [vmem:[%s16725_s9 + $0x98] sm:$0xff] %v9872_v46  ;;  %v8994_v19 = vsub.f32 1.0, %v8847_v23  ;;  %v7964_v55 = vadd.f32 0.2548296, %v7817_v40  ;;  %13150 = vpow2.f32 %v8582_v10  ;;  %v7084_v28 = vadd.f32 -1.4531521, %v6937_v27 }
 0x586   : > { %v13149_v18 = vpop.eup %13148  ;;  %v8992_v0 = vsub.f32 1.0, %v8845_v59  ;;  %vm9139_vm8 = vcmp.ge.f32.partialorder %v16992_v34, 0.0  ;;  %v7527_v30 = vmul.f32 %v17098_v51, %v7380_v16  ;;  %13152 = vrcp.f32 %v6644_v4  ;;  %v11527_v34 = vpop.f32.mrb[33].mxu1 }
 0x587   : > { %v9288_v45 = vsub.f32 0.0, %v8994_v19  ;;  %v8111_v8 = vmul.f32 %v17073_v20, %v7964_v55  ;;  %v7231_v9 = vmul.f32 %v17116_v42, %v7084_v28  ;;  %v17137_v50 = vmul.f32 0.70710677, %v17124_v2 }
 0x588   : > { %v9286_v39 = vsub.f32 0.0, %v8992_v0  ;;  %v7674_v7 = vadd.f32 -0.28449672, %v7527_v30  ;;  %13154 = vpow2.f32 %v8578_v29  ;;  %v17141_v10 = vadd.f32 %v16696_v53, %v16494_v26 }
 0x589   : > { %v9435_v31 = vsel %vm9141_vm7, %v8994_v19, %v9288_v45  ;;  %v8846_v24 = vmul.f32 %v13149_v18, %v8111_v8  ;;  %v7378_v22 = vadd.f32 1.4214138, %v7231_v9  ;;  %v6354_v14 = vand.u32 2147483647, %v17137_v50  ;;  %v17164_v45 = vpop.f32.mrb[32].mxu0 }
 0x58a   : > { %v9729_v20 = vadd.f32 1.0, %v9435_v31  ;;  %v9433_v5 = vsel %vm9139_vm8, %v8992_v0, %v9286_v39  ;;  %v7821_v46 = vmul.f32 %v17098_v51, %v7674_v7  ;;  %v8261_v23 = vsub.f32 0.0, %v17109_v48 }
 0x58b   : > { %v9727_v40 = vadd.f32 1.0, %v9433_v5  ;;  %v8993_v27 = vsub.f32 1.0, %v8846_v24  ;;  %v7525_v53 = vmul.f32 %v17116_v42, %v7378_v22  ;;  %v6501_v59 = vmul.f32 0.3275911, %v6354_v14 }
 0x58c   : > { %v9876_v16 = vmul.f32 %v9729_v20, %v17045_v41  ;;  %v7968_v29 = vadd.f32 0.2548296, %v7821_v46  ;;  %v17155_v4 = vmul.f32 0.70710677, %v17141_v10  ;;  %vm9140_vm9 = vcmp.ge.f32.partialorder %v17016_v62, 0.0 }
 0x58d   : > { %v9874_v19 = vmul.f32 %v9727_v40, %v17091_v63  ;;  %v9287_v55 = vsub.f32 0.0, %v8993_v27  ;;  %v7672_v28 = vadd.f32 -0.28449672, %v7525_v53  ;;  %v6648_v18 = vadd.f32 1.0, %v6501_v59 }
 0x58e   : > { %10023 = vst [vmem:[%s16725_s9 + $0xb8] sm:$0xff] %v9876_v16  ;;  %v8115_v0 = vmul.f32 %v17098_v51, %v7968_v29  ;;  %v17162_v30 = vand.u32 2147483647, %v17155_v4  ;;  %v8408_v63 = vmul.f32 %v8261_v23, %v17109_v48  ;;  %v9581_v62 = vmul.f32 0.5, %v16998_v43 }
 0x58f   : > { %v13151_v41 = vpop.eup %13150  ;;  %10021 = vst [vmem:[%s16725_s9 + $0xa8] sm:$0xff] %v9874_v19  ;;  %v9434_v8 = vsel %vm9140_vm9, %v8993_v27, %v9287_v55  ;;  %v7819_v9 = vmul.f32 %v17116_v42, %v7672_v28  ;;  %13156 = vrcp.f32 %v6648_v18  ;;  %v17176_v20 = vadd.f32 %v16722_v52, %v16496_v13  ;;  %v17194_v18 = vpop.f32.mrb[33].mxu0 }
 0x590   : > { %v17169_v39 = vpop.eup %13152  ;;  %v9728_v7 = vadd.f32 1.0, %v9434_v8  ;;  %v8850_v51 = vmul.f32 %v13151_v41, %v8115_v0  ;;  %v6499_v31 = vmul.f32 0.3275911, %v17162_v30  ;;  %v8580_v53 = vmul.f32 1.442695, %v8408_v63 }
 0x591   : > { %v7966_v24 = vadd.f32 0.2548296, %v7819_v9  ;;  %v6938_v22 = vmul.f32 1.0614054, %v17169_v39  ;;  %v17180_v43 = vmul.f32 0.70710677, %v17176_v20  ;;  %v17185_v29 = vadd.f32 %v16747_v33, %v16492_v25 }
 0x592   : > { %v13155_v5 = vpop.eup %13154  ;;  %v9875_v46 = vmul.f32 %v9728_v7, %v9581_v62  ;;  %v8997_v48 = vsub.f32 1.0, %v8850_v51  ;;  %v6646_v23 = vadd.f32 1.0, %v6499_v31  ;;  %v8265_v16 = vsub.f32 0.0, %v6354_v14 }
 0x593   : > { %v8113_v40 = vmul.f32 %v17116_v42, %v7966_v24  ;;  %v7085_v27 = vadd.f32 -1.4531521, %v6938_v22  ;;  %vm9144_vm10 = vcmp.ge.f32.partialorder %v17037_v57, 0.0  ;;  %v6353_v42 = vand.u32 2147483647, %v17180_v43 }
 0x594   : > { %10022 = vst [vmem:[%s16725_s9 + $0xb0] sm:$0xff] %v9875_v46  ;;  %v9291_v59 = vsub.f32 0.0, %v8997_v48  ;;  %13158 = vrcp.f32 %v6646_v23  ;;  %v9585_v55 = vmul.f32 0.5, %v17024_v1  ;;  %v17192_v28 = vmul.f32 0.70710677, %v17185_v29 }
 0x595   : > { %v8848_v52 = vmul.f32 %v13155_v5, %v8113_v40  ;;  %v7232_v34 = vmul.f32 %v17169_v39, %v7085_v27  ;;  %13160 = vpow2.f32 %v8580_v53  ;;  %v8412_v8 = vmul.f32 %v8265_v16, %v6354_v14 }
 0x596   : > { %v9438_v19 = vsel %vm9144_vm10, %v8997_v48, %v9291_v59  ;;  %v8263_v57 = vsub.f32 0.0, %v17162_v30  ;;  %v6500_v9 = vmul.f32 0.3275911, %v6353_v42  ;;  %v6357_v63 = vand.u32 2147483647, %v17192_v28 }
 0x597   : > { %v9732_v0 = vadd.f32 1.0, %v9438_v19  ;;  %v8995_v41 = vsub.f32 1.0, %v8848_v52  ;;  %v7379_v33 = vadd.f32 1.4214138, %v7232_v34  ;;  %v17203_v31 = vadd.f32 %v16757_v21, %v16494_v26 }
 0x598   : > { %vm9142_vm11 = vcmp.ge.f32.partialorder %v17059_v44, 0.0  ;;  %v6647_v14 = vadd.f32 1.0, %v6500_v9  ;;  %v6504_v22 = vmul.f32 0.3275911, %v6357_v63  ;;  %v9583_v46 = vmul.f32 0.5, %v17051_v12 }
 0x599   : > { %v17198_v62 = vpop.eup %13156  ;;  %v9879_v7 = vmul.f32 %v9732_v0, %v9585_v55  ;;  %v9289_v1 = vsub.f32 0.0, %v8995_v41  ;;  %v7526_v51 = vmul.f32 %v17169_v39, %v7379_v33  ;;  %v17210_v23 = vmul.f32 0.70710677, %v17203_v31 }
 0x59a   : > { %v6942_v24 = vmul.f32 1.0614054, %v17198_v62  ;;  %v8588_v53 = vmul.f32 1.442695, %v8412_v8  ;;  %13162 = vrcp.f32 %v6647_v14  ;;  %v8410_v44 = vmul.f32 %v8263_v57, %v17162_v30 }
 0x59b   : > { %10026 = vst [vmem:[%s16725_s9 + $0xd0] sm:$0xff] %v9879_v7  ;;  %v9436_v5 = vsel %vm9142_vm11, %v8995_v41, %v9289_v1  ;;  %v7673_v48 = vadd.f32 -0.28449672, %v7526_v51  ;;  %v6651_v59 = vadd.f32 1.0, %v6504_v22  ;;  %v6355_v16 = vand.u32 2147483647, %v17210_v23 }
 0x59c   : > { %v9730_v40 = vadd.f32 1.0, %v9436_v5  ;;  %v7089_v27 = vadd.f32 -1.4531521, %v6942_v24  ;;  %v17218_v12 = vmul.f32 0.5, %v17078_v54  ;;  %v8264_v55 = vsub.f32 0.0, %v6353_v42 }
 0x59d   : > { %v7820_v21 = vmul.f32 %v17169_v39, %v7673_v48  ;;  %v17222_v41 = vmul.f32 0.5, %v17124_v2  ;;  %13164 = vrcp.f32 %v6651_v59  ;;  %vm9143_vm12 = vcmp.ge.f32.partialorder %v17096_v47, 0.0  ;;  %v17232_v2 = vpop.f32.mrb[34].mxu1 }
 0x59e   : > { %v17215_v52 = vpop.eup %13158  ;;  %v9877_v34 = vmul.f32 %v9730_v40, %v9583_v46  ;;  %v7236_v19 = vmul.f32 %v17198_v62, %v7089_v27  ;;  %13166 = vpow2.f32 %v8588_v53  ;;  %v8268_v8 = vsub.f32 0.0, %v6357_v63  ;;  %v11530_v46 = vpop.f32.mrb[35].mxu1 }
 0x59f   : > { %v7967_v0 = vadd.f32 0.2548296, %v7820_v21  ;;  %v6940_v33 = vmul.f32 1.0614054, %v17215_v52  ;;  %v6502_v57 = vmul.f32 0.3275911, %v6355_v16  ;;  %v13161_v9 = vpop.eup %13160  ;;  %v17230_v51 = vadd.f32 %v16780_v15, %v16496_v13 }
 0x5a0   : > { %10024 = vst [vmem:[%s16725_s9 + $0xc0] sm:$0xff] %v9877_v34  ;;  %v7383_v30 = vadd.f32 1.4214138, %v7236_v19  ;;  %v8584_v1 = vmul.f32 1.442695, %v8410_v44  ;;  %v8411_v14 = vmul.f32 %v8264_v55, %v6353_v42  ;;  %v17237_v5 = vadd.f32 %v16798_v60, %v16492_v25 }
 0x5a1   : > { %v8114_v54 = vmul.f32 %v17169_v39, %v7967_v0  ;;  %v7087_v7 = vadd.f32 -1.4531521, %v6940_v33  ;;  %v6649_v22 = vadd.f32 1.0, %v6502_v57  ;;  %v17241_v40 = vmul.f32 0.5, %v17141_v10  ;;  %v17256_v0 = vpop.f32.mrb[34].mxu0 }
 0x5a2   : > { %v7530_v24 = vmul.f32 %v17198_v62, %v7383_v30  ;;  %v17244_v15 = vmul.f32 0.70710677, %v17230_v51  ;;  %v8415_v53 = vmul.f32 %v8268_v8, %v6357_v63  ;;  %v17247_v42 = vmul.f32 0.70710677, %v17237_v5 }
 0x5a3   : > { %v8849_v48 = vmul.f32 %v13161_v9, %v8114_v54  ;;  %v7234_v39 = vmul.f32 %v17215_v52, %v7087_v7  ;;  %13168 = vrcp.f32 %v6649_v22  ;;  %v8586_v10 = vmul.f32 1.442695, %v8411_v14 }
 0x5a4   : > { %v7677_v27 = vadd.f32 -0.28449672, %v7530_v24  ;;  %13170 = vpow2.f32 %v8584_v1  ;;  %v6356_v60 = vand.u32 2147483647, %v17244_v15  ;;  %v17250_v59 = vpop.eup %13162  ;;  %v8266_v19 = vsub.f32 0.0, %v6355_v16 }
 0x5a5   : > { %v8996_v21 = vsub.f32 1.0, %v8849_v48  ;;  %v7381_v44 = vadd.f32 1.4214138, %v7234_v39  ;;  %v17254_v55 = vand.u32 2147483647, %v17247_v42  ;;  %vm9147_vm13 = vcmp.ge.f32.partialorder %v17137_v50, 0.0 }
 0x5a6   : > { %v7824_v34 = vmul.f32 %v17198_v62, %v7677_v27  ;;  %v6941_v30 = vmul.f32 1.0614054, %v17250_v59  ;;  %v6503_v8 = vmul.f32 0.3275911, %v6356_v60  ;;  %v8594_v9 = vmul.f32 1.442695, %v8415_v53 }
 0x5a7   : > { %v9290_v63 = vsub.f32 0.0, %v8996_v21  ;;  %v7528_v33 = vmul.f32 %v17215_v52, %v7381_v44  ;;  %v6507_v54 = vmul.f32 0.3275911, %v17254_v55  ;;  %v17261_v7 = vpop.eup %13164  ;;  %v8413_v53 = vmul.f32 %v8266_v19, %v6355_v16 }
 0x5a8   : > { %v7971_v57 = vadd.f32 0.2548296, %v7824_v34  ;;  %v7088_v14 = vadd.f32 -1.4531521, %v6941_v30  ;;  %v6650_v22 = vadd.f32 1.0, %v6503_v8  ;;  %v13167_v46 = vpop.eup %13166  ;;  %vm9145_vm14 = vcmp.ge.f32.partialorder %v17155_v4, 0.0 }
 0x5a9   : > { %v9437_v1 = vsel %vm9143_vm12, %v8996_v21, %v9290_v63  ;;  %v7675_v24 = vadd.f32 -0.28449672, %v7528_v33  ;;  %v6945_v27 = vmul.f32 1.0614054, %v17261_v7  ;;  %v6654_v47 = vadd.f32 1.0, %v6507_v54 }
 0x5aa   : > { %v9731_v48 = vadd.f32 1.0, %v9437_v1  ;;  %v8118_v39 = vmul.f32 %v17198_v62, %v7971_v57  ;;  %v7235_v34 = vmul.f32 %v17250_v59, %v7088_v14  ;;  %13172 = vrcp.f32 %v6650_v22  ;;  %v17271_v62 = vpop.f32.mrb[35].mxu0 }
 0x5ab   : > { %v7822_v44 = vmul.f32 %v17215_v52, %v7675_v24  ;;  %13174 = vpow2.f32 %v8586_v10  ;;  %v7092_v33 = vadd.f32 -1.4531521, %v6945_v27  ;;  %v8267_v1 = vsub.f32 0.0, %v6356_v60 }
 0x5ac   : > { %v9878_v21 = vmul.f32 %v9731_v48, %v17218_v12  ;;  %v8853_v63 = vmul.f32 %v13167_v46, %v8118_v39  ;;  %v7382_v8 = vadd.f32 1.4214138, %v7235_v34  ;;  %13176 = vrcp.f32 %v6654_v47 }
 0x5ad   : > { %v7969_v30 = vadd.f32 0.2548296, %v7822_v44  ;;  %v17273_v57 = vpop.eup %13168  ;;  %v17278_v19 = vmul.f32 0.5, %v17176_v20  ;;  %v7239_v12 = vmul.f32 %v17261_v7, %v7092_v33  ;;  %13178 = vpow2.f32 %v8594_v9 }
 0x5ae   : > { %10025 = vst [vmem:[%s16725_s9 + $0xc8] sm:$0xff] %v9878_v21  ;;  %v9000_v16 = vsub.f32 1.0, %v8853_v63  ;;  %v13171_v10 = vpop.eup %13170  ;;  %v7529_v24 = vmul.f32 %v17250_v59, %v7382_v8  ;;  %v6943_v14 = vmul.f32 1.0614054, %v17273_v57  ;;  %v8590_v22 = vmul.f32 1.442695, %v8413_v53 }
 0x5af   : > { %v8116_v54 = vmul.f32 %v17215_v52, %v7969_v30  ;;  %v7386_v48 = vadd.f32 1.4214138, %v7239_v12  ;;  %v8271_v39 = vsub.f32 0.0, %v17254_v55  ;;  %v17287_v27 = vadd.f32 %v16837_v17, %v16494_v26  ;;  %v17301_v8 = vpop.f32.mrb[36].mxu1 }
 0x5b0   : > { %v9294_v46 = vsub.f32 0.0, %v9000_v16  ;;  %v7676_v44 = vadd.f32 -0.28449672, %v7529_v24  ;;  %v7090_v34 = vadd.f32 -1.4531521, %v6943_v14  ;;  %v8414_v9 = vmul.f32 %v8267_v1, %v6356_v60  ;;  %v11533_v24 = vpop.f32.mrb[37].mxu1 }
 0x5b1   : > { %v8851_v20 = vmul.f32 %v13171_v10, %v8116_v54  ;;  %v7533_v47 = vmul.f32 %v17261_v7, %v7386_v48  ;;  %v17293_v21 = vmul.f32 0.70710677, %v17287_v27  ;;  %v17297_v53 = vadd.f32 %v16855_v3, %v16496_v13 }
 0x5b2   : > { %v9441_v52 = vsel %vm9147_vm13, %v9000_v16, %v9294_v46  ;;  %v7823_v17 = vmul.f32 %v17250_v59, %v7676_v44  ;;  %v7237_v30 = vmul.f32 %v17273_v57, %v7090_v34  ;;  %13180 = vpow2.f32 %v8590_v22 }
 0x5b3   : > { %v9735_v63 = vadd.f32 1.0, %v9441_v52  ;;  %v8998_v33 = vsub.f32 1.0, %v8851_v20  ;;  %v7680_v60 = vadd.f32 -0.28449672, %v7533_v47  ;;  %v8418_v50 = vmul.f32 %v8271_v39, %v17254_v55 }
 0x5b4   : > { %v17305_v1 = vand.u32 2147483647, %v17293_v21  ;;  %v17307_v16 = vpop.eup %13172  ;;  %v7970_v10 = vadd.f32 0.2548296, %v7823_v17  ;;  %v7384_v54 = vadd.f32 1.4214138, %v7237_v30 }
 0x5b5   : > { %v9882_v3 = vmul.f32 %v9735_v63, %v17222_v41  ;;  %v9292_v12 = vsub.f32 0.0, %v8998_v33  ;;  %v13175_v14 = vpop.eup %13174  ;;  %v7827_v46 = vmul.f32 %v17261_v7, %v7680_v60  ;;  %v6944_v48 = vmul.f32 1.0614054, %v17307_v16 }
 0x5b6   : > { %v8592_v20 = vmul.f32 1.442695, %v8414_v9  ;;  %v6505_v22 = vmul.f32 0.3275911, %v17305_v1  ;;  %v17313_v55 = vpop.eup %13176  ;;  %v8117_v41 = vmul.f32 %v17250_v59, %v7970_v10  ;;  %v7531_v44 = vmul.f32 %v17273_v57, %v7384_v54 }
 0x5b7   : > { %10029 = vst [vmem:[%s16725_s9 + $0xe8] sm:$0xff] %v9882_v3  ;;  %v9439_v39 = vsel %vm9145_vm14, %v8998_v33, %v9292_v12  ;;  %v17321_v34 = vmul.f32 0.70710677, %v17297_v53  ;;  %v13179_v52 = vpop.eup %13178  ;;  %v7974_v63 = vadd.f32 0.2548296, %v7827_v46  ;;  %vm9146_vm15 = vcmp.ge.f32.partialorder %v17180_v43, 0.0 }
 0x5b8   : > { %v9733_v47 = vadd.f32 1.0, %v9439_v39  ;;  %v7091_v9 = vadd.f32 -1.4531521, %v6944_v48  ;;  %v6652_v17 = vadd.f32 1.0, %v6505_v22  ;;  %v8852_v30 = vmul.f32 %v13175_v14, %v8117_v41 }
 0x5b9   : > { %v7678_v60 = vadd.f32 -0.28449672, %v7531_v44  ;;  %v6948_v3 = vmul.f32 1.0614054, %v17313_v55  ;;  %v8600_v24 = vmul.f32 1.442695, %v8418_v50  ;;  %v8121_v59 = vmul.f32 %v17261_v7, %v7974_v63 }
 0x5ba   : > { %v9880_v4 = vmul.f32 %v9733_v47, %v17241_v40  ;;  %v7238_v33 = vmul.f32 %v17307_v16, %v7091_v9  ;;  %13182 = vrcp.f32 %v6652_v17  ;;  %v8999_v12 = vsub.f32 1.0, %v8852_v30  ;;  %v17333_v50 = vpop.f32.mrb[36].mxu0 }
 0x5bb   : > { %v7825_v10 = vmul.f32 %v17273_v57, %v7678_v60  ;;  %v7095_v54 = vadd.f32 -1.4531521, %v6948_v3  ;;  %v8856_v46 = vmul.f32 %v13179_v52, %v8121_v59  ;;  %13184 = vpow2.f32 %v8592_v20 }
 0x5bc   : > { %10027 = vst [vmem:[%s16725_s9 + $0xd8] sm:$0xff] %v9880_v4  ;;  %v7385_v14 = vadd.f32 1.4214138, %v7238_v33  ;;  %v17331_v48 = vand.u32 2147483647, %v17321_v34  ;;  %v9293_v40 = vsub.f32 0.0, %v8999_v12  ;;  %13186 = vpow2.f32 %v8600_v24  ;;  %v13181_v39 = vpop.eup %13180 }
 0x5bd   : > { %v7972_v7 = vadd.f32 0.2548296, %v7825_v10  ;;  %v7242_v22 = vmul.f32 %v17313_v55, %v7095_v54  ;;  %v9003_v41 = vsub.f32 1.0, %v8856_v46  ;;  %v8269_v47 = vsub.f32 0.0, %v17305_v1  ;;  %v17351_v33 = vpop.f32.mrb[37].mxu0 }
 0x5be   : > { %v7532_v44 = vmul.f32 %v17307_v16, %v7385_v14  ;;  %v6506_v52 = vmul.f32 0.3275911, %v17331_v48  ;;  %v9440_v20 = vsel %vm9146_vm15, %v8999_v12, %v9293_v40  ;;  %v17344_v17 = vadd.f32 %v16879_v37, %v16492_v25 }
 0x5bf   : > { %v8119_v63 = vmul.f32 %v17273_v57, %v7972_v7  ;;  %v7389_v9 = vadd.f32 1.4214138, %v7242_v22  ;;  %v9734_v30 = vadd.f32 1.0, %v9440_v20  ;;  %v9297_v60 = vsub.f32 0.0, %v9003_v41 }
 0x5c0   : > { %v7679_v3 = vadd.f32 -0.28449672, %v7532_v44  ;;  %v6653_v24 = vadd.f32 1.0, %v6506_v52  ;;  %vm9150_vm0 = vcmp.ge.f32.partialorder %v17192_v28, 0.0  ;;  %v17349_v43 = vmul.f32 0.70710677, %v17344_v17 }
 0x5c1   : > { %v8854_v4 = vmul.f32 %v13181_v39, %v8119_v63  ;;  %v7536_v59 = vmul.f32 %v17313_v55, %v7389_v9  ;;  %v9881_v57 = vmul.f32 %v9734_v30, %v17278_v19  ;;  %v9444_v12 = vsel %vm9150_vm0, %v9003_v41, %v9297_v60 }
 0x5c2   : > { %v7826_v37 = vmul.f32 %v17307_v16, %v7679_v3  ;;  %13188 = vrcp.f32 %v6653_v24  ;;  %v9591_v10 = vmul.f32 0.5, %v17185_v29  ;;  %v9738_v54 = vadd.f32 1.0, %v9444_v12 }
 0x5c3   : > { %v9001_v46 = vsub.f32 1.0, %v8854_v4  ;;  %v7683_v14 = vadd.f32 -0.28449672, %v7536_v59  ;;  %10028 = vst [vmem:[%s16725_s9 + $0xe0] sm:$0xff] %v9881_v57  ;;  %vm9148_vm1 = vcmp.ge.f32.partialorder %v17210_v23, 0.0  ;;  %v8416_v7 = vmul.f32 %v8269_v47, %v17305_v1 }
 0x5c4   : > { %v17356_v28 = vpop.eup %13182  ;;  %v7973_v40 = vadd.f32 0.2548296, %v7826_v37  ;;  %v6363_v19 = vand.u32 2147483647, %v17349_v43  ;;  %v9885_v22 = vmul.f32 %v9738_v54, %v9591_v10  ;;  %v9589_v52 = vmul.f32 0.5, %v17203_v31 }
 0x5c5   : > { %v9295_v39 = vsub.f32 0.0, %v9001_v46  ;;  %v7830_v41 = vmul.f32 %v17313_v55, %v7683_v14  ;;  %v6946_v29 = vmul.f32 1.0614054, %v17356_v28  ;;  %v13185_v44 = vpop.eup %13184  ;;  %v8270_v63 = vsub.f32 0.0, %v17331_v48 }
 0x5c6   : > { %v8120_v20 = vmul.f32 %v17307_v16, %v7973_v40  ;;  %v6510_v9 = vmul.f32 0.3275911, %v6363_v19  ;;  %v13187_v23 = vpop.eup %13186  ;;  %10032 = vst [vmem:[%s16725_s9 + $0x100] sm:$0xff] %v9885_v22  ;;  %v17370_v60 = vadd.f32 %v16908_v38, %v16494_v26  ;;  %v8596_v4 = vmul.f32 1.442695, %v8416_v7  ;;  %v17390_v22 = vpop.f32.mrb[38].mxu1 }
 0x5c7   : > { %v9442_v30 = vsel %vm9148_vm1, %v9001_v46, %v9295_v39  ;;  %v7977_v1 = vadd.f32 0.2548296, %v7830_v41  ;;  %v7093_v47 = vadd.f32 -1.4531521, %v6946_v29  ;;  %v9590_v31 = vmul.f32 0.5, %v17230_v51 }
 0x5c8   : > { %v9736_v3 = vadd.f32 1.0, %v9442_v30  ;;  %v8855_v24 = vmul.f32 %v13185_v44, %v8120_v20  ;;  %v6657_v59 = vadd.f32 1.0, %v6510_v9  ;;  %v17376_v12 = vmul.f32 0.70710677, %v17370_v60  ;;  %v17395_v44 = vpop.f32.mrb[38].mxu0 }
 0x5c9   : > { %v8124_v16 = vmul.f32 %v17313_v55, %v7977_v1  ;;  %v7240_v57 = vmul.f32 %v17356_v28, %v7093_v47  ;;  %v8417_v54 = vmul.f32 %v8270_v63, %v17331_v48  ;;  %vm9149_vm2 = vcmp.ge.f32.partialorder %v17244_v15, 0.0  ;;  %v11536_v63 = vpop.f32.mrb[39].mxu1 }
 0x5ca   : > { %v9883_v37 = vmul.f32 %v9736_v3, %v9589_v52  ;;  %v9002_v10 = vsub.f32 1.0, %v8855_v24  ;;  %13190 = vrcp.f32 %v6657_v59  ;;  %v17381_v14 = vand.u32 2147483647, %v17376_v12 }
 0x5cb   : > { %v8859_v38 = vmul.f32 %v13187_v23, %v8124_v16  ;;  %v7387_v46 = vadd.f32 1.4214138, %v7240_v57  ;;  %13192 = vpow2.f32 %v8596_v4  ;;  %v8274_v40 = vsub.f32 0.0, %v6363_v19  ;;  %v17410_v57 = vpop.f32.mrb[39].mxu0 }
 0x5cc   : > { %v17383_v51 = vpop.eup %13188  ;;  %10030 = vst [vmem:[%s16725_s9 + $0xf0] sm:$0xff] %v9883_v37  ;;  %v9296_v55 = vsub.f32 0.0, %v9002_v10  ;;  %v17388_v7 = vadd.f32 %v16921_v49, %v16496_v13  ;;  %v6508_v29 = vmul.f32 0.3275911, %v17381_v14  ;;  %vm9153_vm3 = vcmp.ge.f32.partialorder %v17247_v42, 0.0 }
 0x5cd   : > { %v9006_v48 = vsub.f32 1.0, %v8859_v38  ;;  %v7534_v39 = vmul.f32 %v17356_v28, %v7387_v46  ;;  %v6947_v41 = vmul.f32 1.0614054, %v17383_v51  ;;  %v8598_v20 = vmul.f32 1.442695, %v8417_v54 }
 0x5ce   : > { %v9443_v52 = vsel %vm9149_vm2, %v9002_v10, %v9296_v55  ;;  %v17401_v49 = vmul.f32 0.70710677, %v17388_v7  ;;  %v8421_v47 = vmul.f32 %v8274_v40, %v6363_v19  ;;  %v6655_v3 = vadd.f32 1.0, %v6508_v29 }
 0x5cf   : > { %v9737_v9 = vadd.f32 1.0, %v9443_v52  ;;  %v9300_v23 = vsub.f32 0.0, %v9006_v48  ;;  %v7681_v30 = vadd.f32 -0.28449672, %v7534_v39  ;;  %v7094_v1 = vadd.f32 -1.4531521, %v6947_v41 }
 0x5d0   : > { %v6362_v24 = vand.u32 2147483647, %v17401_v49  ;;  %v17406_v15 = vadd.f32 %v16937_v35, %v16492_v25  ;;  %v9594_v37 = vmul.f32 0.5, %v17237_v5  ;;  %13194 = vrcp.f32 %v6655_v3 }
 0x5d1   : > { %v9884_v4 = vmul.f32 %v9737_v9, %v9590_v31  ;;  %v9447_v42 = vsel %vm9153_vm3, %v9006_v48, %v9300_v23  ;;  %v7828_v59 = vmul.f32 %v17356_v28, %v7681_v30  ;;  %v7241_v16 = vmul.f32 %v17383_v51, %v7094_v1 }
 0x5d2   : > { %v9741_v10 = vadd.f32 1.0, %v9447_v42  ;;  %v6509_v19 = vmul.f32 0.3275911, %v6362_v24  ;;  %13196 = vpow2.f32 %v8598_v20  ;;  %v17417_v55 = vmul.f32 0.70710677, %v17406_v15 }
 0x5d3   : > { %10031 = vst [vmem:[%s16725_s9 + $0xf8] sm:$0xff] %v9884_v4  ;;  %v7975_v54 = vadd.f32 0.2548296, %v7828_v59  ;;  %v7388_v38 = vadd.f32 1.4214138, %v7241_v16  ;;  %v8272_v29 = vsub.f32 0.0, %v17381_v14  ;;  %v17427_v20 = vadd.f32 %v16961_v58, %v16494_v26 }
 0x5d4   : > { %v17414_v46 = vpop.eup %13190  ;;  %v9888_v35 = vmul.f32 %v9741_v10, %v9594_v37  ;;  %v6656_v31 = vadd.f32 1.0, %v6509_v19  ;;  %v8606_v39 = vmul.f32 1.442695, %v8421_v47  ;;  %v6366_v52 = vand.u32 2147483647, %v17417_v55 }
 0x5d5   : > { %v8122_v40 = vmul.f32 %v17356_v28, %v7975_v54  ;;  %v7535_v48 = vmul.f32 %v17383_v51, %v7388_v38  ;;  %v6951_v5 = vmul.f32 1.0614054, %v17414_v46  ;;  %v13193_v41 = vpop.eup %13192  ;;  %v9592_v9 = vmul.f32 0.5, %v17287_v27 }
 0x5d6   : > { %10035 = vst [vmem:[%s16725_s9 + $0x118] sm:$0xff] %v9888_v35  ;;  %13198 = vrcp.f32 %v6656_v31  ;;  %vm9151_vm4 = vcmp.ge.f32.partialorder %v17293_v21, 0.0  ;;  %v8273_v30 = vsub.f32 0.0, %v6362_v24  ;;  %v6513_v1 = vmul.f32 0.3275911, %v6366_v52 }
 0x5d7   : > { %v8857_v63 = vmul.f32 %v13193_v41, %v8122_v40  ;;  %v7682_v28 = vadd.f32 -0.28449672, %v7535_v48  ;;  %v7098_v23 = vadd.f32 -1.4531521, %v6951_v5  ;;  %v17432_v47 = vmul.f32 0.70710677, %v17427_v20 }
 0x5d8   : > { %v17436_v42 = vmul.f32 0.5, %v17297_v53  ;;  %13200 = vpow2.f32 %v8606_v39  ;;  %v8419_v27 = vmul.f32 %v8272_v29, %v17381_v14  ;;  %v6660_v59 = vadd.f32 1.0, %v6513_v1  ;;  %v17452_v39 = vpop.f32.mrb[40].mxu1 }
 0x5d9   : > { %v9004_v3 = vsub.f32 1.0, %v8857_v63  ;;  %v7829_v4 = vmul.f32 %v17383_v51, %v7682_v28  ;;  %v7245_v58 = vmul.f32 %v17414_v46, %v7098_v23  ;;  %v6364_v16 = vand.u32 2147483647, %v17432_v47  ;;  %v11539_v63 = vpop.f32.mrb[41].mxu1 }
 0x5da   : > { %v17443_v54 = vadd.f32 %v16969_v61, %v16496_v13  ;;  %v17445_v38 = vpop.eup %13194  ;;  %v8420_v35 = vmul.f32 %v8273_v30, %v6362_v24  ;;  %13202 = vrcp.f32 %v6660_v59  ;;  %v8277_v53 = vsub.f32 0.0, %v6366_v52 }
 0x5db   : > { %v9298_v37 = vsub.f32 0.0, %v9004_v3  ;;  %v7976_v10 = vadd.f32 0.2548296, %v7829_v4  ;;  %v7392_v19 = vadd.f32 1.4214138, %v7245_v58  ;;  %vm9152_vm5 = vcmp.ge.f32.partialorder %v17321_v34, 0.0 }
 0x5dc   : > { %v6511_v31 = vmul.f32 0.3275911, %v6364_v16  ;;  %v6949_v5 = vmul.f32 1.0614054, %v17445_v38  ;;  %v13197_v41 = vpop.eup %13196  ;;  %v8602_v29 = vmul.f32 1.442695, %v8419_v27  ;;  %v8424_v4 = vmul.f32 %v8277_v53, %v6366_v52 }
 0x5dd   : > { %v9445_v40 = vsel %vm9151_vm4, %v9004_v3, %v9298_v37  ;;  %v8123_v14 = vmul.f32 %v17383_v51, %v7976_v10  ;;  %v7539_v48 = vmul.f32 %v17414_v46, %v7392_v19  ;;  %v17456_v30 = vmul.f32 0.70710677, %v17443_v54 }
 0x5de   : > { %v9739_v61 = vadd.f32 1.0, %v9445_v40  ;;  %v6658_v24 = vadd.f32 1.0, %v6511_v31  ;;  %v7096_v21 = vadd.f32 -1.4531521, %v6949_v5  ;;  %v8604_v3 = vmul.f32 1.442695, %v8420_v35 }
 0x5df   : > { %v8858_v28 = vmul.f32 %v13197_v41, %v8123_v14  ;;  %v7686_v23 = vadd.f32 -0.28449672, %v7539_v48  ;;  %v17465_v10 = vmul.f32 0.5, %v17344_v17  ;;  %v8275_v19 = vsub.f32 0.0, %v6364_v16 }
 0x5e0   : > { %v17458_v51 = vpop.eup %13198  ;;  %v9886_v1 = vmul.f32 %v9739_v61, %v9592_v9  ;;  %13204 = vrcp.f32 %v6658_v24  ;;  %v7243_v27 = vmul.f32 %v17445_v38, %v7096_v21  ;;  %v6365_v31 = vand.u32 2147483647, %v17456_v30 }
 0x5e1   : > { %v9005_v58 = vsub.f32 1.0, %v8858_v28  ;;  %v7833_v59 = vmul.f32 %v17414_v46, %v7686_v23  ;;  %v6950_v37 = vmul.f32 1.0614054, %v17458_v51  ;;  %v17470_v9 = vadd.f32 %v17000_v11, %v16492_v25 }
 0x5e2   : > { %10033 = vst [vmem:[%s16725_s9 + $0x108] sm:$0xff] %v9886_v1  ;;  %v7390_v53 = vadd.f32 1.4214138, %v7243_v27  ;;  %13206 = vpow2.f32 %v8602_v29  ;;  %v13201_v40 = vpop.eup %13200  ;;  %vm9156_vm6 = vcmp.ge.f32.partialorder %v17349_v43, 0.0  ;;  %v8612_v48 = vmul.f32 1.442695, %v8424_v4 }
 0x5e3   : > { %v9299_v52 = vsub.f32 0.0, %v9005_v58  ;;  %v7980_v35 = vadd.f32 0.2548296, %v7833_v59  ;;  %v7097_v14 = vadd.f32 -1.4531521, %v6950_v37  ;;  %13208 = vpow2.f32 %v8604_v3  ;;  %v17492_v27 = vpop.f32.mrb[40].mxu0 }
 0x5e4   : > { %v6512_v5 = vmul.f32 0.3275911, %v6365_v31  ;;  %v7537_v61 = vmul.f32 %v17445_v38, %v7390_v53  ;;  %v17478_v11 = vmul.f32 0.70710677, %v17470_v9  ;;  %v17480_v24 = vpop.eup %13202  ;;  %v8422_v28 = vmul.f32 %v8275_v19, %v6364_v16 }
 0x5e5   : > { %v9446_v17 = vsel %vm9152_vm5, %v9005_v58, %v9299_v52  ;;  %v8127_v41 = vmul.f32 %v17414_v46, %v7980_v35  ;;  %v7244_v63 = vmul.f32 %v17458_v51, %v7097_v14  ;;  %v6954_v34 = vmul.f32 1.0614054, %v17480_v24  ;;  %v20990_v58 = vld [vmem:[#allocation14_spill] sm:$0xff]  ;;  %v17496_v35 = vpop.f32.mrb[41].mxu0 }
 0x5e6   : > { %v9740_v29 = vadd.f32 1.0, %v9446_v17  ;;  %v6659_v23 = vadd.f32 1.0, %v6512_v5  ;;  %v7684_v1 = vadd.f32 -0.28449672, %v7537_v61  ;;  %v17485_v3 = vand.u32 2147483647, %v17478_v11 }
 0x5e7   : > { %v8862_v21 = vmul.f32 %v13201_v40, %v8127_v41  ;;  %v7391_v4 = vadd.f32 1.4214138, %v7244_v63  ;;  %v17490_v59 = vadd.f32 %v20990_v58, %v16494_v26  ;;  %v7101_v19 = vadd.f32 -1.4531521, %v6954_v34  ;;  %20991 = vst [vmem:[#allocation16_spill] sm:$0xff] %v17496_v35 }
 0x5e8   : > { %v9887_v46 = vmul.f32 %v9740_v29, %v17436_v42  ;;  %13210 = vrcp.f32 %v6659_v23  ;;  %v7831_v37 = vmul.f32 %v17445_v38, %v7684_v1  ;;  %v6516_v52 = vmul.f32 0.3275911, %v17485_v3 }
 0x5e9   : > { %v9009_v16 = vsub.f32 1.0, %v8862_v21  ;;  %v17502_v42 = vmul.f32 0.5, %v17370_v60  ;;  %v7538_v40 = vmul.f32 %v17458_v51, %v7391_v4  ;;  %v8608_v14 = vmul.f32 1.442695, %v8422_v28 }
 0x5ea   : > { %v17498_v53 = vpop.eup %13204  ;;  %10034 = vst [vmem:[%s16725_s9 + $0x110] sm:$0xff] %v9887_v46  ;;  %v8276_v5 = vsub.f32 0.0, %v6365_v31  ;;  %v7978_v41 = vadd.f32 0.2548296, %v7831_v37  ;;  %v7248_v61 = vmul.f32 %v17480_v24, %v7101_v19  ;;  %13212 = vpow2.f32 %v8612_v48 }
 0x5eb   : > { %v9303_v17 = vsub.f32 0.0, %v9009_v16  ;;  %v6952_v29 = vmul.f32 1.0614054, %v17498_v53  ;;  %v7685_v63 = vadd.f32 -0.28449672, %v7538_v40  ;;  %v6663_v23 = vadd.f32 1.0, %v6516_v52 }
 0x5ec   : > { %v17508_v21 = vmul.f32 0.70710677, %v17490_v59  ;;  %v13207_v1 = vpop.eup %13206  ;;  %v8125_v34 = vmul.f32 %v17445_v38, %v7978_v41  ;;  %v7395_v28 = vadd.f32 1.4214138, %v7248_v61  ;;  %v8423_v19 = vmul.f32 %v8276_v5, %v6365_v31 }
 0x5ed   : > { %v9450_v60 = vsel %vm9156_vm6, %v9009_v16, %v9303_v17  ;;  %v7099_v46 = vadd.f32 -1.4531521, %v6952_v29  ;;  %v13209_v4 = vpop.eup %13208  ;;  %v7832_v37 = vmul.f32 %v17458_v51, %v7685_v63  ;;  %13214 = vrcp.f32 %v6663_v23 }
 0x5ee   : > { %v9744_v58 = vadd.f32 1.0, %v9450_v60  ;;  %v8860_v48 = vmul.f32 %v13207_v1, %v8125_v34  ;;  %v7542_v52 = vmul.f32 %v17480_v24, %v7395_v28  ;;  %v6367_v35 = vand.u32 2147483647, %v17508_v21  ;;  %v17529_v1 = vpop.f32.mrb[42].mxu1 }
 0x5ef   : > { %v7246_v40 = vmul.f32 %v17498_v53, %v7099_v46  ;;  %vm9154_vm7 = vcmp.ge.f32.partialorder %v17376_v12, 0.0  ;;  %v7979_v38 = vadd.f32 0.2548296, %v7832_v37  ;;  %v9596_v16 = vmul.f32 0.5, %v17388_v7  ;;  %v11542_v28 = vpop.f32.mrb[43].mxu1 }
 0x5f0   : > { %v9891_v43 = vmul.f32 %v9744_v58, %v17465_v10  ;;  %v9007_v17 = vsub.f32 1.0, %v8860_v48  ;;  %vm9155_vm8 = vcmp.ge.f32.partialorder %v17401_v49, 0.0  ;;  %v7689_v31 = vadd.f32 -0.28449672, %v7542_v52  ;;  %v20992_v10 = vld [vmem:[#allocation13_spill] sm:$0xff] }
 0x5f1   : > { %v7393_v5 = vadd.f32 1.4214138, %v7246_v40  ;;  %13216 = vpow2.f32 %v8608_v14  ;;  %v8126_v61 = vmul.f32 %v17458_v51, %v7979_v38  ;;  %v8610_v29 = vmul.f32 1.442695, %v8423_v19 }
 0x5f2   : > { %v17521_v41 = vpop.eup %13210  ;;  %10038 = vst [vmem:[%s16725_s9 + $0x130] sm:$0xff] %v9891_v43  ;;  %v6514_v63 = vmul.f32 0.3275911, %v6367_v35  ;;  %v17527_v23 = vadd.f32 %v20992_v10, %v16496_v13  ;;  %v9301_v7 = vsub.f32 0.0, %v9007_v17  ;;  %v7836_v60 = vmul.f32 %v17480_v24, %v7689_v31 }
 0x5f3   : > { %v7540_v34 = vmul.f32 %v17498_v53, %v7393_v5  ;;  %v6953_v14 = vmul.f32 1.0614054, %v17521_v41  ;;  %v8861_v46 = vmul.f32 %v13209_v4, %v8126_v61  ;;  %v8280_v58 = vsub.f32 0.0, %v17485_v3 }
 0x5f4   : > { %v6661_v51 = vadd.f32 1.0, %v6514_v63  ;;  %v17536_v37 = vmul.f32 0.70710677, %v17527_v23  ;;  %v9448_v19 = vsel %vm9154_vm7, %v9007_v17, %v9301_v7  ;;  %v7983_v48 = vadd.f32 0.2548296, %v7836_v60  ;;  %v13213_v43 = vpop.eup %13212 }
 0x5f5   : > { %v7687_v52 = vadd.f32 -0.28449672, %v7540_v34  ;;  %v7100_v40 = vadd.f32 -1.4531521, %v6953_v14  ;;  %v9742_v38 = vadd.f32 1.0, %v9448_v19  ;;  %v9008_v31 = vsub.f32 1.0, %v8861_v46 }
 0x5f6   : > { %13218 = vrcp.f32 %v6661_v51  ;;  %v8278_v5 = vsub.f32 0.0, %v6367_v35  ;;  %v8130_v4 = vmul.f32 %v17480_v24, %v7983_v48  ;;  %v17544_v10 = vand.u32 2147483647, %v17536_v37  ;;  %v17551_v14 = vpop.f32.mrb[42].mxu0 }
 0x5f7   : > { %v7834_v61 = vmul.f32 %v17498_v53, %v7687_v52  ;;  %v7247_v63 = vmul.f32 %v17521_v41, %v7100_v40  ;;  %v17546_v12 = vpop.eup %13214  ;;  %v9889_v17 = vmul.f32 %v9742_v38, %v17502_v42  ;;  %v9302_v7 = vsub.f32 0.0, %v9008_v31 }
 0x5f8   : > { %v9600_v60 = vmul.f32 0.5, %v17406_v15  ;;  %v8427_v34 = vmul.f32 %v8280_v58, %v17485_v3  ;;  %v8865_v28 = vmul.f32 %v13213_v43, %v8130_v4  ;;  %v6957_v51 = vmul.f32 1.0614054, %v17546_v12  ;;  %v17560_v43 = vpop.f32.mrb[43].mxu0 }
 0x5f9   : > { %v7981_v24 = vadd.f32 0.2548296, %v7834_v61  ;;  %v7394_v46 = vadd.f32 1.4214138, %v7247_v63  ;;  %10036 = vst [vmem:[%s16725_s9 + $0x120] sm:$0xff] %v9889_v17  ;;  %v9449_v19 = vsel %vm9155_vm8, %v9008_v31, %v9302_v7  ;;  %13220 = vpow2.f32 %v8610_v29 }
 0x5fa   : > { %v8425_v48 = vmul.f32 %v8278_v5, %v6367_v35  ;;  %v6515_v42 = vmul.f32 0.3275911, %v17544_v10  ;;  %v9743_v40 = vadd.f32 1.0, %v9449_v19  ;;  %v9012_v15 = vsub.f32 1.0, %v8865_v28 }
 0x5fb   : > { %v13217_v52 = vpop.eup %13216  ;;  %v8128_v3 = vmul.f32 %v17498_v53, %v7981_v24  ;;  %v7541_v58 = vmul.f32 %v17521_v41, %v7394_v46  ;;  %v7104_v38 = vadd.f32 -1.4531521, %v6957_v51  ;;  %v8618_v4 = vmul.f32 1.442695, %v8427_v34 }
 0x5fc   : > { %v6662_v61 = vadd.f32 1.0, %v6515_v42  ;;  %v17564_v49 = vadd.f32 %v17086_v32, %v16492_v25  ;;  %v9890_v35 = vmul.f32 %v9743_v40, %v9596_v16  ;;  %v9306_v29 = vsub.f32 0.0, %v9012_v15 }
 0x5fd   : > { %v8863_v31 = vmul.f32 %v13217_v52, %v8128_v3  ;;  %v7688_v5 = vadd.f32 -0.28449672, %v7541_v58  ;;  %vm9159_vm9 = vcmp.ge.f32.partialorder %v17417_v55, 0.0  ;;  %v7251_v63 = vmul.f32 %v17546_v12, %v7104_v38 }
 0x5fe   : > { %13222 = vrcp.f32 %v6662_v61  ;;  %v17569_v53 = vmul.f32 0.70710677, %v17564_v49  ;;  %10037 = vst [vmem:[%s16725_s9 + $0x128] sm:$0xff] %v9890_v35  ;;  %v9453_v17 = vsel %vm9159_vm9, %v9012_v15, %v9306_v29  ;;  %v8614_v28 = vmul.f32 1.442695, %v8425_v48  ;;  %v17587_v29 = vpop.f32.mrb[44].mxu1 }
 0x5ff   : > { %v9010_v7 = vsub.f32 1.0, %v8863_v31  ;;  %v7835_v34 = vmul.f32 %v17521_v41, %v7688_v5  ;;  %v9747_v16 = vadd.f32 1.0, %v9453_v17  ;;  %vm9157_vm10 = vcmp.ge.f32.partialorder %v17432_v47, 0.0 }
 0x600   : > { %v17573_v32 = vpop.eup %13218  ;;  %v7398_v24 = vadd.f32 1.4214138, %v7251_v63  ;;  %v6372_v55 = vand.u32 2147483647, %v17569_v53  ;;  %13224 = vpow2.f32 %v8618_v4  ;;  %v8279_v40 = vsub.f32 0.0, %v17544_v10  ;;  %v11545_v63 = vpop.f32.mrb[45].mxu1 }
 0x601   : > { %v9304_v46 = vsub.f32 0.0, %v9010_v7  ;;  %v7982_v51 = vadd.f32 0.2548296, %v7835_v34  ;;  %v6955_v19 = vmul.f32 1.0614054, %v17573_v32  ;;  %v9894_v42 = vmul.f32 %v9747_v16, %v9600_v60 }
 0x602   : > { %v7545_v52 = vmul.f32 %v17546_v12, %v7398_v24  ;;  %v6519_v48 = vmul.f32 0.3275911, %v6372_v55  ;;  %v17583_v47 = vadd.f32 %v17103_v36, %v16494_v26  ;;  %v9598_v4 = vmul.f32 0.5, %v17427_v20 }
 0x603   : > { %v9451_v15 = vsel %vm9157_vm10, %v9010_v7, %v9304_v46  ;;  %v8129_v3 = vmul.f32 %v17521_v41, %v7982_v51  ;;  %v7102_v58 = vadd.f32 -1.4531521, %v6955_v19  ;;  %v13221_v38 = vpop.eup %13220  ;;  %10041 = vst [vmem:[%s16725_s9 + $0x148] sm:$0xff] %v9894_v42  ;;  %v8426_v7 = vmul.f32 %v8279_v40, %v17544_v10 }
 0x604   : > { %v9745_v61 = vadd.f32 1.0, %v9451_v15  ;;  %v7692_v35 = vadd.f32 -0.28449672, %v7545_v52  ;;  %v6666_v60 = vadd.f32 1.0, %v6519_v48  ;;  %v17591_v41 = vmul.f32 0.70710677, %v17583_v47 }
 0x605   : > { %v8864_v31 = vmul.f32 %v13221_v38, %v8129_v3  ;;  %v7249_v5 = vmul.f32 %v17573_v32, %v7102_v58  ;;  %v9599_v34 = vmul.f32 0.5, %v17443_v54  ;;  %v8283_v19 = vsub.f32 0.0, %v6372_v55  ;;  %v17604_v52 = vpop.f32.mrb[44].mxu0 }
 0x606   : > { %v9892_v17 = vmul.f32 %v9745_v61, %v9598_v4  ;;  %v7839_v36 = vmul.f32 %v17546_v12, %v7692_v35  ;;  %13226 = vrcp.f32 %v6666_v60  ;;  %v6370_v24 = vand.u32 2147483647, %v17591_v41 }
 0x607   : > { %v9011_v20 = vsub.f32 1.0, %v8864_v31  ;;  %v7396_v16 = vadd.f32 1.4214138, %v7249_v5  ;;  %13228 = vpow2.f32 %v8614_v28  ;;  %v17602_v42 = vadd.f32 %v17129_v6, %v16496_v13 }
 0x608   : > { %v17597_v46 = vpop.eup %13222  ;;  %10039 = vst [vmem:[%s16725_s9 + $0x138] sm:$0xff] %v9892_v17  ;;  %v7986_v51 = vadd.f32 0.2548296, %v7839_v36  ;;  %v6517_v48 = vmul.f32 0.3275911, %v6370_v24  ;;  %vm9158_vm11 = vcmp.ge.f32.partialorder %v17456_v30, 0.0  ;;  %v17616_v5 = vadd.f32 %v17151_v56, %v16492_v25 }
 0x609   : > { %v9305_v10 = vsub.f32 0.0, %v9011_v20  ;;  %v7543_v40 = vmul.f32 %v17573_v32, %v7396_v16  ;;  %v6956_v54 = vmul.f32 1.0614054, %v17597_v46  ;;  %v8616_v3 = vmul.f32 1.442695, %v8426_v7 }
 0x60a   : > { %v8133_v15 = vmul.f32 %v17546_v12, %v7986_v51  ;;  %v17611_v28 = vmul.f32 0.70710677, %v17602_v42  ;;  %v13225_v58 = vpop.eup %13224  ;;  %v6664_v61 = vadd.f32 1.0, %v6517_v48  ;;  %v8430_v63 = vmul.f32 %v8283_v19, %v6372_v55  ;;  %v17628_v55 = vpop.f32.mrb[45].mxu0 }
 0x60b   : > { %v9452_v38 = vsel %vm9158_vm11, %v9011_v20, %v9305_v10  ;;  %v7690_v6 = vadd.f32 -0.28449672, %v7543_v40  ;;  %v7103_v4 = vadd.f32 -1.4531521, %v6956_v54  ;;  %v8281_v7 = vsub.f32 0.0, %v6370_v24 }
 0x60c   : > { %v9746_v35 = vadd.f32 1.0, %v9452_v38  ;;  %v8868_v60 = vmul.f32 %v13225_v58, %v8133_v15  ;;  %v6371_v31 = vand.u32 2147483647, %v17611_v28  ;;  %13230 = vrcp.f32 %v6664_v61 }
 0x60d   : > { %v7837_v30 = vmul.f32 %v17573_v32, %v7690_v6  ;;  %v7250_v12 = vmul.f32 %v17597_v46, %v7103_v4  ;;  %vm9162_vm12 = vcmp.ge.f32.partialorder %v17478_v11, 0.0  ;;  %v9603_v16 = vmul.f32 0.5, %v17470_v9 }
 0x60e   : > { %v9893_v17 = vmul.f32 %v9746_v35, %v9599_v34  ;;  %v9015_v36 = vsub.f32 1.0, %v8868_v60  ;;  %v6518_v20 = vmul.f32 0.3275911, %v6371_v31  ;;  %13232 = vpow2.f32 %v8616_v3 }
 0x60f   : > { %v7984_v51 = vadd.f32 0.2548296, %v7837_v30  ;;  %v7397_v10 = vadd.f32 1.4214138, %v7250_v12  ;;  %v17626_v48 = vmul.f32 0.70710677, %v17616_v5  ;;  %v8428_v6 = vmul.f32 %v8281_v7, %v6370_v24 }
 0x610   : > { %v17622_v40 = vpop.eup %13226  ;;  %10040 = vst [vmem:[%s16725_s9 + $0x140] sm:$0xff] %v9893_v17  ;;  %v9309_v56 = vsub.f32 0.0, %v9015_v36  ;;  %v6665_v54 = vadd.f32 1.0, %v6518_v20  ;;  %v8624_v9 = vmul.f32 1.442695, %v8430_v63  ;;  %vm9160_vm13 = vcmp.ge.f32.partialorder %v17508_v21, 0.0 }
 0x611   : > { %v8131_v34 = vmul.f32 %v17573_v32, %v7984_v51  ;;  %v7544_v19 = vmul.f32 %v17597_v46, %v7397_v10  ;;  %v6960_v15 = vmul.f32 1.0614054, %v17622_v40  ;;  %v13229_v58 = vpop.eup %13228  ;;  %v6375_v3 = vand.u32 2147483647, %v17626_v48 }
 0x612   : > { %v9456_v38 = vsel %vm9162_vm12, %v9015_v36, %v9309_v56  ;;  %13234 = vrcp.f32 %v6665_v54  ;;  %v8282_v32 = vsub.f32 0.0, %v6371_v31  ;;  %v17639_v12 = vadd.f32 %v17164_v45, %v16494_v26 }
 0x613   : > { %v9750_v4 = vadd.f32 1.0, %v9456_v38  ;;  %v8866_v61 = vmul.f32 %v13229_v58, %v8131_v34  ;;  %v7691_v35 = vadd.f32 -0.28449672, %v7544_v19  ;;  %v7107_v60 = vadd.f32 -1.4531521, %v6960_v15 }
 0x614   : > { %v6522_v30 = vmul.f32 0.3275911, %v6375_v3  ;;  %v9601_v36 = vmul.f32 0.5, %v17490_v59  ;;  %v8620_v7 = vmul.f32 1.442695, %v8428_v6  ;;  %13236 = vpow2.f32 %v8624_v9 }
 0x615   : > { %v9897_v63 = vmul.f32 %v9750_v4, %v9603_v16  ;;  %v9013_v11 = vsub.f32 1.0, %v8866_v61  ;;  %v7838_v24 = vmul.f32 %v17597_v46, %v7691_v35  ;;  %v7254_v17 = vmul.f32 %v17622_v40, %v7107_v60 }
 0x616   : > { %v6669_v20 = vadd.f32 1.0, %v6522_v30  ;;  %v17645_v51 = vmul.f32 0.70710677, %v17639_v12  ;;  %v17647_v10 = vpop.eup %13230  ;;  %vm9161_vm14 = vcmp.ge.f32.partialorder %v17536_v37, 0.0  ;;  %v8429_v34 = vmul.f32 %v8282_v32, %v6371_v31  ;;  %v17665_v32 = vpop.f32.mrb[46].mxu1 }
 0x617   : > { %10044 = vst [vmem:[%s16725_s9 + $0x160] sm:$0xff] %v9897_v63  ;;  %v9307_v56 = vsub.f32 0.0, %v9013_v11  ;;  %v7985_v54 = vadd.f32 0.2548296, %v7838_v24  ;;  %v7401_v45 = vadd.f32 1.4214138, %v7254_v17  ;;  %v17663_v21 = vadd.f32 %v17194_v18, %v16496_v13 }
 0x618   : > { %v6958_v16 = vmul.f32 1.0614054, %v17647_v10  ;;  %13238 = vrcp.f32 %v6669_v20  ;;  %v17653_v59 = vand.u32 2147483647, %v17645_v51  ;;  %v9602_v58 = vmul.f32 0.5, %v17527_v23  ;;  %v13233_v6 = vpop.eup %13232  ;;  %v11548_v24 = vpop.f32.mrb[47].mxu1 }
 0x619   : > { %v9454_v19 = vsel %vm9160_vm13, %v9013_v11, %v9307_v56  ;;  %v8132_v15 = vmul.f32 %v17597_v46, %v7985_v54  ;;  %v7548_v38 = vmul.f32 %v17622_v40, %v7401_v45  ;;  %13240 = vpow2.f32 %v8620_v7 }
 0x61a   : > { %v9748_v9 = vadd.f32 1.0, %v9454_v19  ;;  %v7105_v4 = vadd.f32 -1.4531521, %v6958_v16  ;;  %v6520_v61 = vmul.f32 0.3275911, %v17653_v59  ;;  %v8286_v60 = vsub.f32 0.0, %v6375_v3 }
 0x61b   : > { %v8867_v31 = vmul.f32 %v13233_v6, %v8132_v15  ;;  %v7695_v35 = vadd.f32 -0.28449672, %v7548_v38  ;;  %v8622_v63 = vmul.f32 1.442695, %v8429_v34  ;;  %v17674_v56 = vadd.f32 %v17232_v2, %v16492_v25  ;;  %v17688_v38 = vpop.f32.mrb[46].mxu0 }
 0x61c   : > { %v17667_v46 = vpop.eup %13234  ;;  %v9895_v23 = vmul.f32 %v9748_v9, %v9601_v36  ;;  %v7252_v30 = vmul.f32 %v17647_v10, %v7105_v4  ;;  %v6667_v11 = vadd.f32 1.0, %v6520_v61  ;;  %v17678_v18 = vmul.f32 0.5, %v17564_v49 }
 0x61d   : > { %v9014_v17 = vsub.f32 1.0, %v8867_v31  ;;  %v7842_v7 = vmul.f32 %v17622_v40, %v7695_v35  ;;  %v6959_v20 = vmul.f32 1.0614054, %v17667_v46  ;;  %v17681_v36 = vmul.f32 0.70710677, %v17663_v21 }
 0x61e   : > { %10042 = vst [vmem:[%s16725_s9 + $0x150] sm:$0xff] %v9895_v23  ;;  %v7399_v54 = vadd.f32 1.4214138, %v7252_v30  ;;  %13242 = vrcp.f32 %v6667_v11  ;;  %v8433_v19 = vmul.f32 %v8286_v60, %v6375_v3  ;;  %vm9165_vm15 = vcmp.ge.f32.partialorder %v17569_v53, 0.0  ;;  %v13237_v49 = vpop.eup %13236 }
 0x61f   : > { %v9308_v45 = vsub.f32 0.0, %v9014_v17  ;;  %v7989_v16 = vadd.f32 0.2548296, %v7842_v7  ;;  %v7106_v34 = vadd.f32 -1.4531521, %v6959_v20  ;;  %13244 = vpow2.f32 %v8622_v63 }
 0x620   : > { %v7546_v15 = vmul.f32 %v17647_v10, %v7399_v54  ;;  %v17686_v2 = vand.u32 2147483647, %v17681_v36  ;;  %v17695_v3 = vmul.f32 0.70710677, %v17674_v56  ;;  %v8284_v60 = vsub.f32 0.0, %v17653_v59 }
 0x621   : > { %v9455_v6 = vsel %vm9161_vm14, %v9014_v17, %v9308_v45  ;;  %v8136_v9 = vmul.f32 %v17622_v40, %v7989_v16  ;;  %v7253_v4 = vmul.f32 %v17667_v46, %v7106_v34  ;;  %v8630_v11 = vmul.f32 1.442695, %v8433_v19 }
 0x622   : > { %v17697_v61 = vpop.eup %13238  ;;  %v9749_v31 = vadd.f32 1.0, %v9455_v6  ;;  %v7693_v35 = vadd.f32 -0.28449672, %v7546_v15  ;;  %v6521_v23 = vmul.f32 0.3275911, %v17686_v2  ;;  %v9604_v45 = vmul.f32 0.5, %v17583_v47 }
 0x623   : > { %v8871_v30 = vmul.f32 %v13237_v49, %v8136_v9  ;;  %v7400_v63 = vadd.f32 1.4214138, %v7253_v4  ;;  %v6963_v37 = vmul.f32 1.0614054, %v17697_v61  ;;  %v13241_v40 = vpop.eup %13240  ;;  %v17704_v20 = vand.u32 2147483647, %v17695_v3 }
 0x624   : > { %v9896_v24 = vmul.f32 %v9749_v31, %v9602_v58  ;;  %v7840_v17 = vmul.f32 %v17647_v10, %v7693_v35  ;;  %v6668_v7 = vadd.f32 1.0, %v6521_v23  ;;  %v8431_v49 = vmul.f32 %v8284_v60, %v17653_v59  ;;  %v17711_v58 = vpop.f32.mrb[47].mxu0 }
 0x625   : > { %v9018_v54 = vsub.f32 1.0, %v8871_v30  ;;  %v7547_v16 = vmul.f32 %v17667_v46, %v7400_v63  ;;  %v7110_v34 = vadd.f32 -1.4531521, %v6963_v37  ;;  %v6525_v19 = vmul.f32 0.3275911, %v17704_v20 }
 0x626   : > { %10043 = vst [vmem:[%s16725_s9 + $0x158] sm:$0xff] %v9896_v24  ;;  %v7987_v15 = vadd.f32 0.2548296, %v7840_v17  ;;  %13246 = vrcp.f32 %v6668_v7  ;;  %vm9163_vm0 = vcmp.ge.f32.partialorder %v17591_v41, 0.0  ;;  %v17719_v35 = vmul.f32 0.5, %v17602_v42 }
 0x627   : > { %v9312_v6 = vsub.f32 0.0, %v9018_v54  ;;  %v7694_v9 = vadd.f32 -0.28449672, %v7547_v16  ;;  %v7257_v4 = vmul.f32 %v17697_v61, %v7110_v34  ;;  %13248 = vpow2.f32 %v8630_v11 }
 0x628   : > { %v17715_v31 = vpop.eup %13242  ;;  %v8134_v47 = vmul.f32 %v17647_v10, %v7987_v15  ;;  %v6672_v59 = vadd.f32 1.0, %v6525_v19  ;;  %v8626_v7 = vmul.f32 1.442695, %v8431_v49  ;;  %v8285_v10 = vsub.f32 0.0, %v17686_v2 }
 0x629   : > { %v9459_v60 = vsel %vm9165_vm15, %v9018_v54, %v9312_v6  ;;  %v7841_v23 = vmul.f32 %v17667_v46, %v7694_v9  ;;  %v7404_v30 = vadd.f32 1.4214138, %v7257_v4  ;;  %v6961_v63 = vmul.f32 1.0614054, %v17715_v31  ;;  %v13245_v37 = vpop.eup %13244 }
 0x62a   : > { %v9753_v24 = vadd.f32 1.0, %v9459_v60  ;;  %v8869_v17 = vmul.f32 %v13241_v40, %v8134_v47  ;;  %13250 = vrcp.f32 %v6672_v59  ;;  %vm9164_vm1 = vcmp.ge.f32.partialorder %v17611_v28, 0.0 }
 0x62b   : > { %v7988_v16 = vadd.f32 0.2548296, %v7841_v23  ;;  %v7551_v42 = vmul.f32 %v17697_v61, %v7404_v30  ;;  %v7108_v11 = vadd.f32 -1.4531521, %v6961_v63  ;;  %v17731_v34 = vadd.f32 %v17256_v0, %v16494_v26 }
 0x62c   : > { %v9900_v53 = vmul.f32 %v9753_v24, %v17678_v18  ;;  %v9016_v54 = vsub.f32 1.0, %v8869_v17  ;;  %v17737_v19 = vadd.f32 %v17271_v62, %v16496_v13  ;;  %13252 = vpow2.f32 %v8626_v7 }
 0x62d   : > { %v8135_v15 = vmul.f32 %v17667_v46, %v7988_v16  ;;  %v7698_v40 = vadd.f32 -0.28449672, %v7551_v42  ;;  %v7255_v49 = vmul.f32 %v17715_v31, %v7108_v11  ;;  %v8432_v18 = vmul.f32 %v8285_v10, %v17686_v2 }
 0x62e   : > { %10047 = vst [vmem:[%s16725_s9 + $0x178] sm:$0xff] %v9900_v53  ;;  %v9310_v6 = vsub.f32 0.0, %v9016_v54  ;;  %v17742_v9 = vmul.f32 0.70710677, %v17731_v34  ;;  %v8289_v46 = vsub.f32 0.0, %v17704_v20  ;;  %v17756_v2 = vadd.f32 %v17301_v8, %v16492_v25 }
 0x62f   : > { %v8870_v4 = vmul.f32 %v13245_v37, %v8135_v15  ;;  %v7845_v0 = vmul.f32 %v17697_v61, %v7698_v40  ;;  %v7402_v47 = vadd.f32 1.4214138, %v7255_v49  ;;  %v17752_v23 = vmul.f32 0.70710677, %v17737_v19 }
 0x630   : > { %v17746_v59 = vpop.eup %13246  ;;  %v9457_v62 = vsel %vm9163_vm0, %v9016_v54, %v9310_v6  ;;  %v6376_v60 = vand.u32 2147483647, %v17742_v9  ;;  %v8628_v41 = vmul.f32 1.442695, %v8432_v18  ;;  %v17761_v54 = vpop.f32.mrb[48].mxu1  ;;  %v8436_v15 = vmul.f32 %v8289_v46, %v17704_v20 }
 0x631   : > { %v9751_v30 = vadd.f32 1.0, %v9457_v62  ;;  %v9017_v63 = vsub.f32 1.0, %v8870_v4  ;;  %v7992_v37 = vadd.f32 0.2548296, %v7845_v0  ;;  %v7549_v24 = vmul.f32 %v17715_v31, %v7402_v47  ;;  %v13249_v17 = vpop.eup %13248  ;;  %v17767_v6 = vpop.f32.mrb[48].mxu0 }
 0x632   : > { %v6962_v7 = vmul.f32 1.0614054, %v17746_v59  ;;  %v6523_v10 = vmul.f32 0.3275911, %v6376_v60  ;;  %v17765_v49 = vand.u32 2147483647, %v17752_v23 }
 0x633   : > { %v9898_v16 = vmul.f32 %v9751_v30, %v9604_v45  ;;  %v9311_v42 = vsub.f32 0.0, %v9017_v63  ;;  %v8139_v11 = vmul.f32 %v17697_v61, %v7992_v37  ;;  %v7696_v53 = vadd.f32 -0.28449672, %v7549_v24  ;;  %v11551_v47 = vpop.f32.mrb[49].mxu1 }
 0x634   : > { %v7109_v8 = vadd.f32 -1.4531521, %v6962_v7  ;;  %v6670_v40 = vadd.f32 1.0, %v6523_v10  ;;  %v17769_v4 = vpop.eup %13250  ;;  %v17776_v0 = vmul.f32 0.70710677, %v17756_v2  ;;  %vm9168_vm2 = vcmp.ge.f32.partialorder %v17626_v48, 0.0 }
 0x635   : > { %10045 = vst [vmem:[%s16725_s9 + $0x168] sm:$0xff] %v9898_v16  ;;  %v9458_v45 = vsel %vm9164_vm1, %v9017_v63, %v9311_v42  ;;  %v8874_v18 = vmul.f32 %v13249_v17, %v8139_v11  ;;  %v7843_v61 = vmul.f32 %v17715_v31, %v7696_v53  ;;  %v6966_v62 = vmul.f32 1.0614054, %v17769_v4  ;;  %v17784_v53 = vpop.f32.mrb[49].mxu0 }
 0x636   : > { %v9752_v20 = vadd.f32 1.0, %v9458_v45  ;;  %v7256_v46 = vmul.f32 %v17746_v59, %v7109_v8  ;;  %13254 = vrcp.f32 %v6670_v40  ;;  %v13253_v28 = vpop.eup %13252  ;;  %v6524_v7 = vmul.f32 0.3275911, %v17765_v49 }
 0x637   : > { %v9021_v30 = vsub.f32 1.0, %v8874_v18  ;;  %v7990_v37 = vadd.f32 0.2548296, %v7843_v61  ;;  %13256 = vpow2.f32 %v8628_v41  ;;  %v7113_v17 = vadd.f32 -1.4531521, %v6966_v62 }
 0x638   : > { %v9899_v63 = vmul.f32 %v9752_v20, %v17719_v35  ;;  %v7403_v24 = vadd.f32 1.4214138, %v7256_v46  ;;  %v8636_v42 = vmul.f32 1.442695, %v8436_v15  ;;  %v8287_v11 = vsub.f32 0.0, %v6376_v60 }
 0x639   : > { %v9315_v10 = vsub.f32 0.0, %v9021_v30  ;;  %v8137_v16 = vmul.f32 %v17715_v31, %v7990_v37  ;;  %v7260_v40 = vmul.f32 %v17769_v4, %v7113_v17  ;;  %v6671_v41 = vadd.f32 1.0, %v6524_v7 }
 0x63a   : > { %10046 = vst [vmem:[%s16725_s9 + $0x170] sm:$0xff] %v9899_v63  ;;  %v7550_v8 = vmul.f32 %v17746_v59, %v7403_v24  ;;  %v17790_v45 = vand.u32 2147483647, %v17776_v0  ;;  %v9609_v18 = vmul.f32 0.5, %v17616_v5  ;;  %v9607_v31 = vmul.f32 0.5, %v17639_v12 }
 0x63b   : > { %v9462_v35 = vsel %vm9168_vm2, %v9021_v30, %v9315_v10  ;;  %v8872_v61 = vmul.f32 %v13253_v28, %v8137_v16  ;;  %v7407_v20 = vadd.f32 1.4214138, %v7260_v40  ;;  %13258 = vrcp.f32 %v6671_v41 }
 0x63c   : > { %v9756_v15 = vadd.f32 1.0, %v9462_v35  ;;  %v7697_v47 = vadd.f32 -0.28449672, %v7550_v8  ;;  %13260 = vpow2.f32 %v8636_v42  ;;  %v8434_v62 = vmul.f32 %v8287_v11, %v6376_v60 }
 0x63d   : > { %v9019_v46 = vsub.f32 1.0, %v8872_v61  ;;  %v6528_v37 = vmul.f32 0.3275911, %v17790_v45  ;;  %vm9166_vm3 = vcmp.ge.f32.partialorder %v17645_v51, 0.0  ;;  %v7554_v5 = vmul.f32 %v17769_v4, %v7407_v20 }
 0x63e   : > { %v9903_v63 = vmul.f32 %v9756_v15, %v9609_v18  ;;  %v7844_v48 = vmul.f32 %v17746_v59, %v7697_v47  ;;  %v8288_v12 = vsub.f32 0.0, %v17765_v49  ;;  %v17803_v24 = vadd.f32 %v17333_v50, %v16494_v26 }
 0x63f   : > { %v9313_v30 = vsub.f32 0.0, %v9019_v46  ;;  %v6675_v28 = vadd.f32 1.0, %v6528_v37  ;;  %v9608_v7 = vmul.f32 0.5, %v17663_v21  ;;  %v7701_v10 = vadd.f32 -0.28449672, %v7554_v5  ;;  %v17819_v21 = vpop.f32.mrb[50].mxu1 }
 0x640   : > { %v17805_v17 = vpop.eup %13254  ;;  %10050 = vst [vmem:[%s16725_s9 + $0x190] sm:$0xff] %v9903_v63  ;;  %v7991_v60 = vadd.f32 0.2548296, %v7844_v48  ;;  %v17811_v51 = vadd.f32 %v17351_v33, %v16496_v13  ;;  %v8632_v8 = vmul.f32 1.442695, %v8434_v62  ;;  %v17822_v33 = vmul.f32 0.5, %v17674_v56 }
 0x641   : > { %v13257_v16 = vpop.eup %13256  ;;  %v9460_v42 = vsel %vm9166_vm3, %v9019_v46, %v9313_v30  ;;  %v6964_v11 = vmul.f32 1.0614054, %v17805_v17  ;;  %13262 = vrcp.f32 %v6675_v28  ;;  %v7848_v41 = vmul.f32 %v17769_v4, %v7701_v10  ;;  %v11554_v47 = vpop.f32.mrb[51].mxu1 }
 0x642   : > { %v9754_v40 = vadd.f32 1.0, %v9460_v42  ;;  %v8138_v50 = vmul.f32 %v17746_v59, %v7991_v60  ;;  %v17817_v35 = vmul.f32 0.70710677, %v17803_v24  ;;  %v8435_v61 = vmul.f32 %v8288_v12, %v17765_v49  ;;  %v17840_v30 = vpop.f32.mrb[50].mxu0 }
 0x643   : > { %v7111_v18 = vadd.f32 -1.4531521, %v6964_v11  ;;  %v17826_v15 = vmul.f32 0.70710677, %v17811_v51  ;;  %v7995_v46 = vadd.f32 0.2548296, %v7848_v41  ;;  %13264 = vpow2.f32 %v8632_v8 }
 0x644   : > { %v9901_v20 = vmul.f32 %v9754_v40, %v9607_v31  ;;  %v8873_v59 = vmul.f32 %v13257_v16, %v8138_v50  ;;  %v6379_v62 = vand.u32 2147483647, %v17817_v35  ;;  %vm9167_vm4 = vcmp.ge.f32.partialorder %v17681_v36, 0.0 }
 0x645   : > { %v7258_v37 = vmul.f32 %v17805_v17, %v7111_v18  ;;  %v8292_v63 = vsub.f32 0.0, %v17790_v45  ;;  %v17833_v56 = vand.u32 2147483647, %v17826_v15  ;;  %v17835_v48 = vpop.eup %13258  ;;  %v8142_v5 = vmul.f32 %v17769_v4, %v7995_v46 }
 0x646   : > { %10048 = vst [vmem:[%s16725_s9 + $0x180] sm:$0xff] %v9901_v20  ;;  %v9020_v49 = vsub.f32 1.0, %v8873_v59  ;;  %vm9171_vm5 = vcmp.ge.f32.partialorder %v17695_v3, 0.0  ;;  %v6526_v31 = vmul.f32 0.3275911, %v6379_v62  ;;  %v13261_v12 = vpop.eup %13260  ;;  %v17850_v8 = vadd.f32 %v17390_v22, %v16492_v25 }
 0x647   : > { %v7405_v28 = vadd.f32 1.4214138, %v7258_v37  ;;  %v6965_v60 = vmul.f32 1.0614054, %v17835_v48  ;;  %v6527_v10 = vmul.f32 0.3275911, %v17833_v56  ;;  %v8877_v42 = vmul.f32 %v13261_v12, %v8142_v5 }
 0x648   : > { %v9314_v16 = vsub.f32 0.0, %v9020_v49  ;;  %v8634_v11 = vmul.f32 1.442695, %v8435_v61  ;;  %v6673_v40 = vadd.f32 1.0, %v6526_v31  ;;  %v8439_v4 = vmul.f32 %v8292_v63, %v17790_v45 }
 0x649   : > { %v7552_v50 = vmul.f32 %v17805_v17, %v7405_v28  ;;  %v7112_v41 = vadd.f32 -1.4531521, %v6965_v60  ;;  %v6674_v18 = vadd.f32 1.0, %v6527_v10  ;;  %v9024_v20 = vsub.f32 1.0, %v8877_v42 }
 0x64a   : > { %v9461_v47 = vsel %vm9167_vm4, %v9020_v49, %v9314_v16  ;;  %13266 = vrcp.f32 %v6673_v40  ;;  %v17856_v45 = vmul.f32 0.5, %v17731_v34  ;;  %v8290_v63 = vsub.f32 0.0, %v6379_v62  ;;  %v17871_v40 = vpop.f32.mrb[51].mxu0 }
 0x64b   : > { %v17852_v59 = vpop.eup %13262  ;;  %v9755_v46 = vadd.f32 1.0, %v9461_v47  ;;  %v7699_v61 = vadd.f32 -0.28449672, %v7552_v50  ;;  %v7259_v37 = vmul.f32 %v17835_v48, %v7112_v41  ;;  %13268 = vrcp.f32 %v6674_v18 }
 0x64c   : > { %v9318_v5 = vsub.f32 0.0, %v9024_v20  ;;  %v6969_v36 = vmul.f32 1.0614054, %v17852_v59  ;;  %v17862_v12 = vadd.f32 %v17395_v44, %v16494_v26  ;;  %13270 = vpow2.f32 %v8634_v11 }
 0x64d   : > { %v9902_v49 = vmul.f32 %v9755_v46, %v9608_v7  ;;  %v7846_v31 = vmul.f32 %v17805_v17, %v7699_v61  ;;  %v7406_v22 = vadd.f32 1.4214138, %v7259_v37  ;;  %v17867_v10 = vmul.f32 0.70710677, %v17850_v8  ;;  %v13265_v41 = vpop.eup %13264 }
 0x64e   : > { %v9465_v28 = vsel %vm9171_vm5, %v9024_v20, %v9318_v5  ;;  %v7116_v60 = vadd.f32 -1.4531521, %v6969_v36  ;;  %v8642_v42 = vmul.f32 1.442695, %v8439_v4  ;;  %v8437_v50 = vmul.f32 %v8290_v63, %v6379_v62 }
 0x64f   : > { %10049 = vst [vmem:[%s16725_s9 + $0x188] sm:$0xff] %v9902_v49  ;;  %v9759_v34 = vadd.f32 1.0, %v9465_v28  ;;  %v7993_v16 = vadd.f32 0.2548296, %v7846_v31  ;;  %v7553_v7 = vmul.f32 %v17835_v48, %v7406_v22  ;;  %v8291_v3 = vsub.f32 0.0, %v17833_v56 }
 0x650   : > { %v7263_v44 = vmul.f32 %v17852_v59, %v7116_v60  ;;  %v17876_v11 = vand.u32 2147483647, %v17867_v10  ;;  %v17881_v46 = vmul.f32 0.70710677, %v17862_v12  ;;  %vm9169_vm6 = vcmp.ge.f32.partialorder %v17742_v9, 0.0 }
 0x651   : > { %v9906_v18 = vmul.f32 %v9759_v34, %v17822_v33  ;;  %v8140_v47 = vmul.f32 %v17805_v17, %v7993_v16  ;;  %v7700_v20 = vadd.f32 -0.28449672, %v7553_v7  ;;  %v17885_v4 = vmul.f32 0.5, %v17737_v19 }
 0x652   : > { %v7410_v62 = vadd.f32 1.4214138, %v7263_v44  ;;  %v6531_v61 = vmul.f32 0.3275911, %v17876_v11  ;;  %13272 = vpow2.f32 %v8642_v42  ;;  %v17891_v33 = vand.u32 2147483647, %v17881_v46 }
 0x653   : > { %10053 = vst [vmem:[%s16725_s9 + $0x1a8] sm:$0xff] %v9906_v18  ;;  %v8875_v37 = vmul.f32 %v13265_v41, %v8140_v47  ;;  %v7847_v5 = vmul.f32 %v17835_v48, %v7700_v20  ;;  %v8638_v63 = vmul.f32 1.442695, %v8437_v50  ;;  %v8438_v49 = vmul.f32 %v8291_v3, %v17833_v56 }
 0x654   : > { %v17893_v17 = vpop.eup %13266  ;;  %v7557_v36 = vmul.f32 %v17852_v59, %v7410_v62  ;;  %v6678_v19 = vadd.f32 1.0, %v6531_v61  ;;  %v17900_v60 = vmul.f32 0.5, %v17756_v2  ;;  %vm9170_vm7 = vcmp.ge.f32.partialorder %v17752_v23, 0.0  ;;  %v17911_v2 = vpop.f32.mrb[52].mxu1 }
 0x655   : > { %v17897_v31 = vpop.eup %13268  ;;  %v9022_v22 = vsub.f32 1.0, %v8875_v37  ;;  %v7994_v28 = vadd.f32 0.2548296, %v7847_v5  ;;  %v6967_v34 = vmul.f32 1.0614054, %v17893_v17  ;;  %v17907_v42 = vadd.f32 %v17410_v57, %v16496_v13  ;;  %v17914_v62 = vpop.f32.mrb[52].mxu0 }
 0x656   : > { %v7704_v16 = vadd.f32 -0.28449672, %v7557_v36  ;;  %v6968_v7 = vmul.f32 1.0614054, %v17897_v31  ;;  %13274 = vrcp.f32 %v6678_v19  ;;  %v6529_v3 = vmul.f32 0.3275911, %v17891_v33  ;;  %v13271_v41 = vpop.eup %13270 }
 0x657   : > { %v9316_v56 = vsub.f32 0.0, %v9022_v22  ;;  %v8141_v44 = vmul.f32 %v17835_v48, %v7994_v28  ;;  %v7114_v50 = vadd.f32 -1.4531521, %v6967_v34  ;;  %v8640_v20 = vmul.f32 1.442695, %v8438_v49  ;;  %v11557_v61 = vpop.f32.mrb[53].mxu1 }
 0x658   : > { %v7851_v18 = vmul.f32 %v17852_v59, %v7704_v16  ;;  %v7115_v47 = vadd.f32 -1.4531521, %v6968_v7  ;;  %v6676_v48 = vadd.f32 1.0, %v6529_v3  ;;  %v8295_v34 = vsub.f32 0.0, %v17876_v11 }
 0x659   : > { %v9463_v57 = vsel %vm9169_vm6, %v9022_v22, %v9316_v56  ;;  %v8876_v37 = vmul.f32 %v13271_v41, %v8141_v44  ;;  %v7261_v5 = vmul.f32 %v17893_v17, %v7114_v50  ;;  %vm9174_vm8 = vcmp.ge.f32.partialorder %v17776_v0, 0.0 }
 0x65a   : > { %v9757_v36 = vadd.f32 1.0, %v9463_v57  ;;  %v7998_v19 = vadd.f32 0.2548296, %v7851_v18  ;;  %v7262_v28 = vmul.f32 %v17897_v31, %v7115_v47  ;;  %13276 = vrcp.f32 %v6676_v48 }
 0x65b   : > { %v9023_v16 = vsub.f32 1.0, %v8876_v37  ;;  %v7408_v49 = vadd.f32 1.4214138, %v7261_v5  ;;  %v17923_v7 = vmul.f32 0.70710677, %v17907_v42  ;;  %13278 = vpow2.f32 %v8638_v63 }
 0x65c   : > { %v9904_v9 = vmul.f32 %v9757_v36, %v17856_v45  ;;  %v8145_v22 = vmul.f32 %v17852_v59, %v7998_v19  ;;  %v7409_v56 = vadd.f32 1.4214138, %v7262_v28  ;;  %v13273_v44 = vpop.eup %13272  ;;  %13280 = vpow2.f32 %v8640_v20 }
 0x65d   : > { %v9317_v50 = vsub.f32 0.0, %v9023_v16  ;;  %v7555_v3 = vmul.f32 %v17893_v17, %v7408_v49  ;;  %v17929_v41 = vand.u32 2147483647, %v17923_v7  ;;  %v8442_v61 = vmul.f32 %v8295_v34, %v17876_v11 }
 0x65e   : > { %10051 = vst [vmem:[%s16725_s9 + $0x198] sm:$0xff] %v9904_v9  ;;  %v8880_v18 = vmul.f32 %v13273_v44, %v8145_v22  ;;  %v7556_v47 = vmul.f32 %v17897_v31, %v7409_v56  ;;  %v17936_v45 = vadd.f32 %v17452_v39, %v16492_v25  ;;  %v8293_v57 = vsub.f32 0.0, %v17891_v33  ;;  %v17955_v22 = vpop.f32.mrb[53].mxu0 }
 0x65f   : > { %v9464_v59 = vsel %vm9170_vm7, %v9023_v16, %v9317_v50  ;;  %v7702_v63 = vadd.f32 -0.28449672, %v7555_v3  ;;  %v6530_v20 = vmul.f32 0.3275911, %v17929_v41  ;;  %v17949_v19 = vmul.f32 0.5, %v17803_v24 }
 0x660   : > { %v17942_v37 = vpop.eup %13274  ;;  %v9758_v5 = vadd.f32 1.0, %v9464_v59  ;;  %v9027_v48 = vsub.f32 1.0, %v8880_v18  ;;  %v7703_v36 = vadd.f32 -0.28449672, %v7556_v47  ;;  %v17945_v11 = vmul.f32 0.70710677, %v17936_v45 }
 0x661   : > { %v7849_v39 = vmul.f32 %v17893_v17, %v7702_v63  ;;  %v6972_v23 = vmul.f32 1.0614054, %v17942_v37  ;;  %v6677_v28 = vadd.f32 1.0, %v6530_v20  ;;  %v8648_v50 = vmul.f32 1.442695, %v8442_v61 }
 0x662   : > { %v9905_v34 = vmul.f32 %v9758_v5, %v17885_v4  ;;  %v9321_v16 = vsub.f32 0.0, %v9027_v48  ;;  %v7850_v49 = vmul.f32 %v17897_v31, %v7703_v36  ;;  %v6387_v9 = vand.u32 2147483647, %v17945_v11 }
 0x663   : > { %v7996_v56 = vadd.f32 0.2548296, %v7849_v39  ;;  %v7119_v44 = vadd.f32 -1.4531521, %v6972_v23  ;;  %13282 = vrcp.f32 %v6677_v28  ;;  %v8440_v18 = vmul.f32 %v8293_v57, %v17891_v33 }
 0x664   : > { %10052 = vst [vmem:[%s16725_s9 + $0x1a0] sm:$0xff] %v9905_v34  ;;  %v9468_v24 = vsel %vm9174_vm8, %v9027_v48, %v9321_v16  ;;  %v7997_v3 = vadd.f32 0.2548296, %v7850_v49  ;;  %v6534_v47 = vmul.f32 0.3275911, %v6387_v9  ;;  %v17961_v4 = vpop.eup %13276  ;;  %vm9172_vm9 = vcmp.ge.f32.partialorder %v17817_v35, 0.0 }
 0x665   : > { %v9762_v59 = vadd.f32 1.0, %v9468_v24  ;;  %v8143_v63 = vmul.f32 %v17893_v17, %v7996_v56  ;;  %v7266_v20 = vmul.f32 %v17942_v37, %v7119_v44  ;;  %v13279_v61 = vpop.eup %13278  ;;  %vm9173_vm10 = vcmp.ge.f32.partialorder %v17826_v15, 0.0  ;;  %v17970_v34 = vpop.f32.mrb[54].mxu1 }
 0x666   : > { %v8144_v5 = vmul.f32 %v17897_v31, %v7997_v3  ;;  %v6970_v0 = vmul.f32 1.0614054, %v17961_v4  ;;  %v6681_v48 = vadd.f32 1.0, %v6534_v47  ;;  %v13281_v33 = vpop.eup %13280  ;;  %13284 = vpow2.f32 %v8648_v50  ;;  %v20993_v3 = vld [vmem:[#allocation16_spill] sm:$0xff] }
 0x667   : > { %v9909_v57 = vmul.f32 %v9762_v59, %v17900_v60  ;;  %v8878_v36 = vmul.f32 %v13279_v61, %v8143_v63  ;;  %v7413_v39 = vadd.f32 1.4214138, %v7266_v20  ;;  %v8644_v28 = vmul.f32 1.442695, %v8440_v18  ;;  %v11560_v60 = vpop.f32.mrb[55].mxu1 }
 0x668   : > { %v8879_v17 = vmul.f32 %v13281_v33, %v8144_v5  ;;  %v7117_v23 = vadd.f32 -1.4531521, %v6970_v0  ;;  %13286 = vrcp.f32 %v6681_v48  ;;  %v8294_v49 = vsub.f32 0.0, %v17929_v41 }
 0x669   : > { %10056 = vst [vmem:[%s16725_s9 + $0x1c0] sm:$0xff] %v9909_v57  ;;  %v9025_v16 = vsub.f32 1.0, %v8878_v36  ;;  %v7560_v31 = vmul.f32 %v17942_v37, %v7413_v39  ;;  %v17977_v56 = vadd.f32 %v17492_v27, %v16494_v26  ;;  %v9614_v50 = vmul.f32 0.5, %v17811_v51 }
 0x66a   : > { %v9026_v44 = vsub.f32 1.0, %v8879_v17  ;;  %v7264_v24 = vmul.f32 %v17961_v4, %v7117_v23  ;;  %v17983_v18 = vadd.f32 %v20993_v3, %v16496_v13  ;;  %v8298_v63 = vsub.f32 0.0, %v6387_v9 }
 0x66b   : > { %v9319_v47 = vsub.f32 0.0, %v9025_v16  ;;  %v7707_v59 = vadd.f32 -0.28449672, %v7560_v31  ;;  %v17986_v20 = vmul.f32 0.70710677, %v17977_v56  ;;  %13288 = vpow2.f32 %v8644_v28 }
 0x66c   : > { %v9320_v61 = vsub.f32 0.0, %v9026_v44  ;;  %v7411_v5 = vadd.f32 1.4214138, %v7264_v24  ;;  %v17989_v27 = vmul.f32 0.70710677, %v17983_v18  ;;  %v8441_v33 = vmul.f32 %v8294_v49, %v17929_v41 }
 0x66d   : > { %v17991_v0 = vpop.eup %13282  ;;  %v9466_v51 = vsel %vm9172_vm9, %v9025_v16, %v9319_v47  ;;  %v7854_v48 = vmul.f32 %v17942_v37, %v7707_v59  ;;  %v6385_v57 = vand.u32 2147483647, %v17986_v20  ;;  %v8445_v60 = vmul.f32 %v8298_v63, %v6387_v9 }
 0x66e   : > { %v9760_v36 = vadd.f32 1.0, %v9466_v51  ;;  %v9467_v39 = vsel %vm9173_vm10, %v9026_v44, %v9320_v61  ;;  %v7558_v17 = vmul.f32 %v17961_v4, %v7411_v5  ;;  %v6971_v23 = vmul.f32 1.0614054, %v17991_v0 }
 0x66f   : > { %v9761_v28 = vadd.f32 1.0, %v9467_v39  ;;  %v8001_v31 = vadd.f32 0.2548296, %v7854_v48  ;;  %v6532_v35 = vmul.f32 0.3275911, %v6385_v57  ;;  %vm9177_vm11 = vcmp.ge.f32.partialorder %v17867_v10, 0.0 }
 0x670   : > { %v9907_v16 = vmul.f32 %v9760_v36, %v17949_v19  ;;  %v7705_v24 = vadd.f32 -0.28449672, %v7558_v17  ;;  %v7118_v41 = vadd.f32 -1.4531521, %v6971_v23  ;;  %v6386_v49 = vand.u32 2147483647, %v17989_v27  ;;  %v13285_v3 = vpop.eup %13284 }
 0x671   : > { %v9908_v47 = vmul.f32 %v9761_v28, %v9614_v50  ;;  %v8148_v15 = vmul.f32 %v17942_v37, %v8001_v31  ;;  %v8646_v44 = vmul.f32 1.442695, %v8441_v33  ;;  %v6679_v59 = vadd.f32 1.0, %v6532_v35  ;;  %v18012_v36 = vpop.f32.mrb[54].mxu0 }
 0x672   : > { %v18005_v61 = vpop.eup %13286  ;;  %10054 = vst [vmem:[%s16725_s9 + $0x1b0] sm:$0xff] %v9907_v16  ;;  %v7852_v5 = vmul.f32 %v17961_v4, %v7705_v24  ;;  %v7265_v9 = vmul.f32 %v17991_v0, %v7118_v41  ;;  %v6533_v63 = vmul.f32 0.3275911, %v6386_v49  ;;  %v8654_v48 = vmul.f32 1.442695, %v8445_v60 }
 0x673   : > { %10055 = vst [vmem:[%s16725_s9 + $0x1b8] sm:$0xff] %v9908_v47  ;;  %v8883_v19 = vmul.f32 %v13285_v3, %v8148_v15  ;;  %v6975_v51 = vmul.f32 1.0614054, %v18005_v61  ;;  %13290 = vrcp.f32 %v6679_v59  ;;  %v9618_v37 = vmul.f32 0.5, %v17850_v8  ;;  %v18027_v3 = vpop.f32.mrb[55].mxu0 }
 0x674   : > { %v7999_v50 = vadd.f32 0.2548296, %v7852_v5  ;;  %v7412_v33 = vadd.f32 1.4214138, %v7265_v9  ;;  %v6680_v39 = vadd.f32 1.0, %v6533_v63  ;;  %13292 = vpow2.f32 %v8646_v44 }
 0x675   : > { %v9030_v17 = vsub.f32 1.0, %v8883_v19  ;;  %v7122_v23 = vadd.f32 -1.4531521, %v6975_v51  ;;  %v13289_v28 = vpop.eup %13288  ;;  %v8296_v16 = vsub.f32 0.0, %v6385_v57  ;;  %v18021_v8 = vadd.f32 %v17529_v1, %v16492_v25 }
 0x676   : > { %v8146_v31 = vmul.f32 %v17961_v4, %v7999_v50  ;;  %v7559_v35 = vmul.f32 %v17991_v0, %v7412_v33  ;;  %13294 = vrcp.f32 %v6680_v39  ;;  %v18025_v41 = vadd.f32 %v17551_v14, %v16494_v26 }
 0x677   : > { %v9324_v60 = vsub.f32 0.0, %v9030_v17  ;;  %v7269_v24 = vmul.f32 %v18005_v61, %v7122_v23  ;;  %v9616_v4 = vmul.f32 0.5, %v17862_v12  ;;  %13296 = vpow2.f32 %v8654_v48 }
 0x678   : > { %v8881_v47 = vmul.f32 %v13289_v28, %v8146_v31  ;;  %v7706_v15 = vadd.f32 -0.28449672, %v7559_v35  ;;  %v8297_v5 = vsub.f32 0.0, %v6386_v49  ;;  %v18033_v9 = vmul.f32 0.70710677, %v18021_v8 }
 0x679   : > { %v9471_v44 = vsel %vm9177_vm11, %v9030_v17, %v9324_v60  ;;  %v7416_v59 = vadd.f32 1.4214138, %v7269_v24  ;;  %v18037_v19 = vmul.f32 0.70710677, %v18025_v41  ;;  %vm9175_vm12 = vcmp.ge.f32.partialorder %v17881_v46, 0.0 }
 0x67a   : > { %v9765_v1 = vadd.f32 1.0, %v9471_v44  ;;  %v9028_v63 = vsub.f32 1.0, %v8881_v47  ;;  %v7853_v14 = vmul.f32 %v17991_v0, %v7706_v15  ;;  %v8443_v51 = vmul.f32 %v8296_v16, %v6385_v57 }
 0x67b   : > { %v7563_v12 = vmul.f32 %v18005_v61, %v7416_v59  ;;  %v6390_v10 = vand.u32 2147483647, %v18033_v9  ;;  %v18043_v39 = vand.u32 2147483647, %v18037_v19  ;;  %vm9176_vm13 = vcmp.ge.f32.partialorder %v17923_v7, 0.0 }
 0x67c   : > { %v9912_v48 = vmul.f32 %v9765_v1, %v9618_v37  ;;  %v9322_v50 = vsub.f32 0.0, %v9028_v63  ;;  %v8000_v33 = vadd.f32 0.2548296, %v7853_v14  ;;  %v9617_v23 = vmul.f32 0.5, %v17907_v42 }
 0x67d   : > { %v18045_v17 = vpop.eup %13290  ;;  %v7710_v28 = vadd.f32 -0.28449672, %v7563_v12  ;;  %v8444_v31 = vmul.f32 %v8297_v5, %v6386_v49  ;;  %v6537_v46 = vmul.f32 0.3275911, %v6390_v10  ;;  %v6535_v16 = vmul.f32 0.3275911, %v18043_v39 }
 0x67e   : > { %10059 = vst [vmem:[%s16725_s9 + $0x1d8] sm:$0xff] %v9912_v48  ;;  %v9469_v35 = vsel %vm9175_vm12, %v9028_v63, %v9322_v50  ;;  %v8147_v57 = vmul.f32 %v17991_v0, %v8000_v33  ;;  %v6973_v37 = vmul.f32 1.0614054, %v18045_v17  ;;  %v13293_v60 = vpop.eup %13292  ;;  %v18056_v42 = vadd.f32 %v17560_v43, %v16496_v13 }
 0x67f   : > { %v9763_v24 = vadd.f32 1.0, %v9469_v35  ;;  %v7857_v47 = vmul.f32 %v18005_v61, %v7710_v28  ;;  %v6684_v15 = vadd.f32 1.0, %v6537_v46  ;;  %v8650_v5 = vmul.f32 1.442695, %v8443_v51 }
 0x680   : > { %v18058_v49 = vpop.eup %13294  ;;  %v8882_v44 = vmul.f32 %v13293_v60, %v8147_v57  ;;  %v7120_v59 = vadd.f32 -1.4531521, %v6973_v37  ;;  %v6682_v0 = vadd.f32 1.0, %v6535_v16  ;;  %v8652_v33 = vmul.f32 1.442695, %v8444_v31  ;;  %v18070_v37 = vpop.f32.mrb[56].mxu0 }
 0x681   : > { %v9910_v1 = vmul.f32 %v9763_v24, %v9616_v4  ;;  %v8004_v63 = vadd.f32 0.2548296, %v7857_v47  ;;  %v6974_v14 = vmul.f32 1.0614054, %v18058_v49  ;;  %13298 = vrcp.f32 %v6684_v15  ;;  %v13297_v12 = vpop.eup %13296  ;;  %v18068_v4 = vpop.f32.mrb[56].mxu1 }
 0x682   : > { %v9029_v48 = vsub.f32 1.0, %v8882_v44  ;;  %v7267_v50 = vmul.f32 %v18045_v17, %v7120_v59  ;;  %13300 = vrcp.f32 %v6682_v0  ;;  %vm9180_vm14 = vcmp.ge.f32.partialorder %v17945_v11, 0.0  ;;  %v11563_v16 = vpop.f32.mrb[57].mxu1 }
 0x683   : > { %10057 = vst [vmem:[%s16725_s9 + $0x1c8] sm:$0xff] %v9910_v1  ;;  %v8151_v43 = vmul.f32 %v18005_v61, %v8004_v63  ;;  %v7121_v28 = vadd.f32 -1.4531521, %v6974_v14  ;;  %v18066_v51 = vmul.f32 0.70710677, %v18056_v42  ;;  %v8301_v57 = vsub.f32 0.0, %v6390_v10 }
 0x684   : > { %v9323_v46 = vsub.f32 0.0, %v9029_v48  ;;  %v7414_v35 = vadd.f32 1.4214138, %v7267_v50  ;;  %13302 = vpow2.f32 %v8650_v5  ;;  %v8299_v15 = vsub.f32 0.0, %v18043_v39 }
 0x685   : > { %v8886_v60 = vmul.f32 %v13297_v12, %v8151_v43  ;;  %v7268_v31 = vmul.f32 %v18058_v49, %v7121_v28  ;;  %v6389_v61 = vand.u32 2147483647, %v18066_v51  ;;  %v18080_v44 = vadd.f32 %v17587_v29, %v16492_v25  ;;  %v18087_v28 = vpop.f32.mrb[57].mxu0 }
 0x686   : > { %v9470_v24 = vsel %vm9176_vm13, %v9029_v48, %v9323_v46  ;;  %v7561_v47 = vmul.f32 %v18045_v17, %v7414_v35  ;;  %v9621_v1 = vmul.f32 0.5, %v17936_v45  ;;  %13304 = vpow2.f32 %v8652_v33 }
 0x687   : > { %v9764_v59 = vadd.f32 1.0, %v9470_v24  ;;  %v9033_v0 = vsub.f32 1.0, %v8886_v60  ;;  %v7415_v5 = vadd.f32 1.4214138, %v7268_v31  ;;  %v8448_v14 = vmul.f32 %v8301_v57, %v6390_v10 }
 0x688   : > { %v7708_v63 = vadd.f32 -0.28449672, %v7561_v47  ;;  %v6536_v12 = vmul.f32 0.3275911, %v6389_v61  ;;  %v18085_v43 = vmul.f32 0.70710677, %v18080_v44  ;;  %v8446_v45 = vmul.f32 %v8299_v15, %v18043_v39 }
 0x689   : > { %v9911_v7 = vmul.f32 %v9764_v59, %v9617_v23  ;;  %v9327_v48 = vsub.f32 0.0, %v9033_v0  ;;  %v7562_v50 = vmul.f32 %v18058_v49, %v7415_v5  ;;  %v18091_v46 = vmul.f32 0.5, %v17977_v56 }
 0x68a   : > { %v7855_v29 = vmul.f32 %v18045_v17, %v7708_v63  ;;  %v6683_v35 = vadd.f32 1.0, %v6536_v12  ;;  %v6393_v57 = vand.u32 2147483647, %v18085_v43  ;;  %v18102_v16 = vadd.f32 %v17604_v52, %v16494_v26 }
 0x68b   : > { %v18094_v33 = vpop.eup %13298  ;;  %10058 = vst [vmem:[%s16725_s9 + $0x1d0] sm:$0xff] %v9911_v7  ;;  %v9474_v10 = vsel %vm9180_vm14, %v9033_v0, %v9327_v48  ;;  %v7709_v23 = vadd.f32 -0.28449672, %v7562_v50  ;;  %v8660_v47 = vmul.f32 1.442695, %v8448_v14  ;;  %v8300_v52 = vsub.f32 0.0, %v6389_v61 }
 0x68c   : > { %v18104_v60 = vpop.eup %13300  ;;  %v9768_v56 = vadd.f32 1.0, %v9474_v10  ;;  %v8002_v31 = vadd.f32 0.2548296, %v7855_v29  ;;  %v6978_v39 = vmul.f32 1.0614054, %v18094_v33  ;;  %13306 = vrcp.f32 %v6683_v35 }
 0x68d   : > { %v7856_v24 = vmul.f32 %v18058_v49, %v7709_v23  ;;  %v6976_v11 = vmul.f32 1.0614054, %v18104_v60  ;;  %v6540_v15 = vmul.f32 0.3275911, %v6393_v57  ;;  %v9620_v7 = vmul.f32 0.5, %v17983_v18  ;;  %v18119_v23 = vpop.f32.mrb[58].mxu1 }
 0x68e   : > { %v9915_v59 = vmul.f32 %v9768_v56, %v9621_v1  ;;  %v8149_v0 = vmul.f32 %v18045_v17, %v8002_v31  ;;  %v7125_v5 = vadd.f32 -1.4531521, %v6978_v39  ;;  %v13303_v63 = vpop.eup %13302  ;;  %v8656_v10 = vmul.f32 1.442695, %v8446_v45 }
 0x68f   : > { %v8003_v12 = vadd.f32 0.2548296, %v7856_v24  ;;  %v7123_v48 = vadd.f32 -1.4531521, %v6976_v11  ;;  %v6687_v50 = vadd.f32 1.0, %v6540_v15  ;;  %vm9178_vm15 = vcmp.ge.f32.partialorder %v17986_v20, 0.0 }
 0x690   : > { %10062 = vst [vmem:[%s16725_s9 + $0x1f0] sm:$0xff] %v9915_v59  ;;  %v8884_v29 = vmul.f32 %v13303_v63, %v8149_v0  ;;  %v7272_v35 = vmul.f32 %v18094_v33, %v7125_v5  ;;  %v18114_v14 = vmul.f32 0.70710677, %v18102_v16  ;;  %v13305_v18 = vpop.eup %13304  ;;  %v8447_v39 = vmul.f32 %v8300_v52, %v6389_v61 }
 0x691   : > { %v8150_v17 = vmul.f32 %v18058_v49, %v8003_v12  ;;  %v7270_v1 = vmul.f32 %v18104_v60, %v7123_v48  ;;  %13308 = vrcp.f32 %v6687_v50  ;;  %v18126_v15 = vadd.f32 %v17628_v55, %v16496_v13  ;;  %v11566_v49 = vpop.f32.mrb[59].mxu1 }
 0x692   : > { %v9031_v56 = vsub.f32 1.0, %v8884_v29  ;;  %v7419_v31 = vadd.f32 1.4214138, %v7272_v35  ;;  %13310 = vpow2.f32 %v8660_v47  ;;  %v18122_v45 = vand.u32 2147483647, %v18114_v14 }
 0x693   : > { %v8885_v24 = vmul.f32 %v13305_v18, %v8150_v17  ;;  %v7417_v11 = vadd.f32 1.4214138, %v7270_v1  ;;  %13312 = vpow2.f32 %v8656_v10  ;;  %v8304_v5 = vsub.f32 0.0, %v6393_v57 }
 0x694   : > { %v9325_v59 = vsub.f32 0.0, %v9031_v56  ;;  %v7566_v0 = vmul.f32 %v18094_v33, %v7419_v31  ;;  %vm9179_vm0 = vcmp.ge.f32.partialorder %v17989_v27, 0.0  ;;  %v6538_v47 = vmul.f32 0.3275911, %v18122_v45 }
 0x695   : > { %v9032_v63 = vsub.f32 1.0, %v8885_v24  ;;  %v7564_v61 = vmul.f32 %v18104_v60, %v7417_v11  ;;  %v8658_v48 = vmul.f32 1.442695, %v8447_v39  ;;  %v18137_v50 = vmul.f32 0.70710677, %v18126_v15 }
 0x696   : > { %v18132_v52 = vpop.eup %13306  ;;  %v9472_v12 = vsel %vm9178_vm15, %v9031_v56, %v9325_v59  ;;  %v7713_v55 = vadd.f32 -0.28449672, %v7566_v0  ;;  %v8451_v18 = vmul.f32 %v8304_v5, %v6393_v57  ;;  %v6685_v31 = vadd.f32 1.0, %v6538_v47  ;;  %v18152_v57 = vpop.f32.mrb[58].mxu0 }
 0x697   : > { %v9766_v29 = vadd.f32 1.0, %v9472_v12  ;;  %v9326_v35 = vsub.f32 0.0, %v9032_v63  ;;  %v7711_v10 = vadd.f32 -0.28449672, %v7564_v61  ;;  %v6977_v17 = vmul.f32 1.0614054, %v18132_v52 }
 0x698   : > { %v7860_v1 = vmul.f32 %v18094_v33, %v7713_v55  ;;  %v18142_v24 = vand.u32 2147483647, %v18137_v50  ;;  %13314 = vrcp.f32 %v6685_v31  ;;  %v18150_v0 = vadd.f32 %v17665_v32, %v16492_v25 }
 0x699   : > { %v9913_v20 = vmul.f32 %v9766_v29, %v18091_v46  ;;  %v9473_v56 = vsel %vm9179_vm0, %v9032_v63, %v9326_v35  ;;  %v7858_v39 = vmul.f32 %v18104_v60, %v7711_v10  ;;  %v7124_v11 = vadd.f32 -1.4531521, %v6977_v17 }
 0x69a   : > { %v9767_v49 = vadd.f32 1.0, %v9473_v56  ;;  %v8007_v59 = vadd.f32 0.2548296, %v7860_v1  ;;  %v9624_v46 = vmul.f32 0.5, %v18021_v8  ;;  %v6539_v61 = vmul.f32 0.3275911, %v18142_v24 }
 0x69b   : > { %v18154_v5 = vpop.eup %13308  ;;  %10060 = vst [vmem:[%s16725_s9 + $0x1e0] sm:$0xff] %v9913_v20  ;;  %v8005_v27 = vadd.f32 0.2548296, %v7858_v39  ;;  %v7271_v63 = vmul.f32 %v18132_v52, %v7124_v11  ;;  %vm9183_vm1 = vcmp.ge.f32.partialorder %v18033_v9, 0.0  ;;  %13316 = vpow2.f32 %v8658_v48 }
 0x69c   : > { %v13311_v47 = vpop.eup %13310  ;;  %v9914_v12 = vmul.f32 %v9767_v49, %v9620_v7  ;;  %v8154_v55 = vmul.f32 %v18094_v33, %v8007_v59  ;;  %v6981_v32 = vmul.f32 1.0614054, %v18154_v5  ;;  %v6686_v10 = vadd.f32 1.0, %v6539_v61 }
 0x69d   : > { %v8152_v29 = vmul.f32 %v18104_v60, %v8005_v27  ;;  %v7418_v35 = vadd.f32 1.4214138, %v7271_v63  ;;  %v13313_v17 = vpop.eup %13312  ;;  %v8666_v31 = vmul.f32 1.442695, %v8451_v18  ;;  %v18166_v20 = vmul.f32 0.70710677, %v18150_v0 }
 0x69e   : > { %10061 = vst [vmem:[%s16725_s9 + $0x1e8] sm:$0xff] %v9914_v12  ;;  %v8889_v8 = vmul.f32 %v13311_v47, %v8154_v55  ;;  %v7128_v1 = vadd.f32 -1.4531521, %v6981_v32  ;;  %v8302_v56 = vsub.f32 0.0, %v18122_v45  ;;  %13318 = vrcp.f32 %v6686_v10  ;;  %v18179_v27 = vpop.f32.mrb[59].mxu0 }
 0x69f   : > { %v8887_v7 = vmul.f32 %v13313_v17, %v8152_v29  ;;  %v7565_v33 = vmul.f32 %v18132_v52, %v7418_v35  ;;  %v9622_v60 = vmul.f32 0.5, %v18025_v41  ;;  %v18173_v11 = vand.u32 2147483647, %v18166_v20 }
 0x6a0   : > { %v9036_v39 = vsub.f32 1.0, %v8889_v8  ;;  %v7275_v48 = vmul.f32 %v18154_v5, %v7128_v1  ;;  %vm9181_vm2 = vcmp.ge.f32.partialorder %v18037_v19, 0.0  ;;  %v18177_v59 = vmul.f32 0.5, %v18056_v42 }
 0x6a1   : > { %v9034_v49 = vsub.f32 1.0, %v8887_v7  ;;  %v7712_v18 = vadd.f32 -0.28449672, %v7565_v33  ;;  %13320 = vpow2.f32 %v8666_v31  ;;  %v6543_v47 = vmul.f32 0.3275911, %v18173_v11  ;;  %v18197_v7 = vpop.f32.mrb[60].mxu1 }
 0x6a2   : > { %v9330_v63 = vsub.f32 0.0, %v9036_v39  ;;  %v7422_v61 = vadd.f32 1.4214138, %v7275_v48  ;;  %v8449_v55 = vmul.f32 %v8302_v56, %v18122_v45  ;;  %v18186_v32 = vadd.f32 %v17688_v38, %v16494_v26  ;;  %v18188_v29 = vpop.eup %13314  ;;  %v11569_v56 = vpop.f32.mrb[61].mxu1 }
 0x6a3   : > { %v9328_v41 = vsub.f32 0.0, %v9034_v49  ;;  %v7859_v12 = vmul.f32 %v18132_v52, %v7712_v18  ;;  %v8303_v10 = vsub.f32 0.0, %v18142_v24  ;;  %v6690_v17 = vadd.f32 1.0, %v6543_v47 }
 0x6a4   : > { %v9477_v42 = vsel %vm9183_vm1, %v9036_v39, %v9330_v63  ;;  %v7569_v35 = vmul.f32 %v18154_v5, %v7422_v61  ;;  %v6979_v45 = vmul.f32 1.0614054, %v18188_v29  ;;  %vm9182_vm3 = vcmp.ge.f32.partialorder %v18066_v51, 0.0 }
 0x6a5   : > { %v9771_v8 = vadd.f32 1.0, %v9477_v42  ;;  %v9475_v1 = vsel %vm9181_vm2, %v9034_v49, %v9328_v41  ;;  %v8006_v31 = vadd.f32 0.2548296, %v7859_v12  ;;  %13322 = vrcp.f32 %v6690_v17  ;;  %v13317_v39 = vpop.eup %13316 }
 0x6a6   : > { %v9769_v38 = vadd.f32 1.0, %v9475_v1  ;;  %v7716_v9 = vadd.f32 -0.28449672, %v7569_v35  ;;  %v18202_v33 = vadd.f32 %v17711_v58, %v16496_v13  ;;  %v7126_v49 = vadd.f32 -1.4531521, %v6979_v45 }
 0x6a7   : > { %v9918_v19 = vmul.f32 %v9771_v8, %v9624_v46  ;;  %v8153_v48 = vmul.f32 %v18132_v52, %v8006_v31  ;;  %v18206_v18 = vmul.f32 0.70710677, %v18186_v32  ;;  %v8662_v47 = vmul.f32 1.442695, %v8449_v55 }
 0x6a8   : > { %v9916_v63 = vmul.f32 %v9769_v38, %v9622_v60  ;;  %v7863_v61 = vmul.f32 %v18154_v5, %v7716_v9  ;;  %v8450_v41 = vmul.f32 %v8303_v10, %v18142_v24  ;;  %v18210_v12 = vpop.eup %13318  ;;  %v7273_v42 = vmul.f32 %v18188_v29, %v7126_v49  ;;  %v18229_v9 = vpop.f32.mrb[60].mxu0 }
 0x6a9   : > { %10065 = vst [vmem:[%s16725_s9 + $0x208] sm:$0xff] %v9918_v19  ;;  %v8888_v58 = vmul.f32 %v13317_v39, %v8153_v48  ;;  %v8307_v46 = vsub.f32 0.0, %v18173_v11  ;;  %v18216_v52 = vand.u32 2147483647, %v18206_v18  ;;  %v6980_v60 = vmul.f32 1.0614054, %v18210_v12 }
 0x6aa   : > { %10063 = vst [vmem:[%s16725_s9 + $0x1f8] sm:$0xff] %v9916_v63  ;;  %v8010_v35 = vadd.f32 0.2548296, %v7863_v61  ;;  %v18221_v17 = vmul.f32 0.70710677, %v18202_v33  ;;  %v9627_v24 = vmul.f32 0.5, %v18080_v44  ;;  %13324 = vpow2.f32 %v8662_v47 }
 0x6ab   : > { %v9035_v55 = vsub.f32 1.0, %v8888_v58  ;;  %v7420_v10 = vadd.f32 1.4214138, %v7273_v42  ;;  %v6541_v8 = vmul.f32 0.3275911, %v18216_v52  ;;  %v13321_v1 = vpop.eup %13320  ;;  %v8454_v63 = vmul.f32 %v8307_v46, %v18173_v11 }
 0x6ac   : > { %v8157_v31 = vmul.f32 %v18154_v5, %v8010_v35  ;;  %v7127_v45 = vadd.f32 -1.4531521, %v6980_v60  ;;  %v18227_v38 = vand.u32 2147483647, %v18221_v17  ;;  %v8664_v19 = vmul.f32 1.442695, %v8450_v41 }
 0x6ad   : > { %v9329_v56 = vsub.f32 0.0, %v9035_v55  ;;  %v7567_v39 = vmul.f32 %v18188_v29, %v7420_v10  ;;  %v6688_v48 = vadd.f32 1.0, %v6541_v8  ;;  %v18239_v58 = vadd.f32 %v17761_v54, %v16492_v25 }
 0x6ae   : > { %v8892_v49 = vmul.f32 %v13321_v1, %v8157_v31  ;;  %v7274_v44 = vmul.f32 %v18210_v12, %v7127_v45  ;;  %v6542_v61 = vmul.f32 0.3275911, %v18227_v38  ;;  %vm9186_vm4 = vcmp.ge.f32.partialorder %v18085_v43, 0.0 }
 0x6af   : > { %v9476_v5 = vsel %vm9182_vm3, %v9035_v55, %v9329_v56  ;;  %v7714_v47 = vadd.f32 -0.28449672, %v7567_v39  ;;  %13326 = vrcp.f32 %v6688_v48  ;;  %v18241_v42 = vpop.eup %13322  ;;  %v8672_v31 = vmul.f32 1.442695, %v8454_v63 }
 0x6b0   : > { %v9770_v41 = vadd.f32 1.0, %v9476_v5  ;;  %v9039_v35 = vsub.f32 1.0, %v8892_v49  ;;  %v7421_v60 = vadd.f32 1.4214138, %v7274_v44  ;;  %v6689_v10 = vadd.f32 1.0, %v6542_v61 }
 0x6b1   : > { %v7861_v11 = vmul.f32 %v18188_v29, %v7714_v47  ;;  %13328 = vpow2.f32 %v8664_v19  ;;  %v6984_v51 = vmul.f32 1.0614054, %v18241_v42  ;;  %v18250_v45 = vadd.f32 %v17767_v6, %v16494_v26  ;;  %v18264_v47 = vpop.f32.mrb[61].mxu0 }
 0x6b2   : > { %v9917_v46 = vmul.f32 %v9770_v41, %v18177_v59  ;;  %v9333_v55 = vsub.f32 0.0, %v9039_v35  ;;  %v7568_v54 = vmul.f32 %v18210_v12, %v7421_v60  ;;  %13330 = vrcp.f32 %v6689_v10 }
 0x6b3   : > { %v8008_v8 = vadd.f32 0.2548296, %v7861_v11  ;;  %v7131_v1 = vadd.f32 -1.4531521, %v6984_v51  ;;  %v8305_v39 = vsub.f32 0.0, %v18216_v52  ;;  %v9625_v49 = vmul.f32 0.5, %v18102_v16 }
 0x6b4   : > { %10064 = vst [vmem:[%s16725_s9 + $0x200] sm:$0xff] %v9917_v46  ;;  %v9480_v43 = vsel %vm9186_vm4, %v9039_v35, %v9333_v55  ;;  %v7715_v56 = vadd.f32 -0.28449672, %v7568_v54  ;;  %v18255_v19 = vmul.f32 0.70710677, %v18239_v58  ;;  %v13325_v63 = vpop.eup %13324  ;;  %vm9184_vm5 = vcmp.ge.f32.partialorder %v18114_v14, 0.0 }
 0x6b5   : > { %v9774_v59 = vadd.f32 1.0, %v9480_v43  ;;  %v8155_v48 = vmul.f32 %v18188_v29, %v8008_v8  ;;  %v7278_v44 = vmul.f32 %v18241_v42, %v7131_v1  ;;  %v8306_v61 = vsub.f32 0.0, %v18227_v38 }
 0x6b6   : > { %v7862_v6 = vmul.f32 %v18210_v12, %v7715_v56  ;;  %v6399_v5 = vand.u32 2147483647, %v18255_v19  ;;  %v18267_v29 = vmul.f32 0.70710677, %v18250_v45  ;;  %13332 = vpow2.f32 %v8672_v31 }
 0x6b7   : > { %v9921_v41 = vmul.f32 %v9774_v59, %v9627_v24  ;;  %v8890_v35 = vmul.f32 %v13325_v63, %v8155_v48  ;;  %v7425_v60 = vadd.f32 1.4214138, %v7278_v44  ;;  %v8452_v10 = vmul.f32 %v8305_v39, %v18216_v52  ;;  %v18281_v52 = vpop.f32.mrb[62].mxu1 }
 0x6b8   : > { %v8009_v16 = vadd.f32 0.2548296, %v7862_v6  ;;  %v6546_v11 = vmul.f32 0.3275911, %v6399_v5  ;;  %v9626_v55 = vmul.f32 0.5, %v18126_v15  ;;  %vm9185_vm6 = vcmp.ge.f32.partialorder %v18137_v50, 0.0 }
 0x6b9   : > { %v18270_v51 = vpop.eup %13326  ;;  %10068 = vst [vmem:[%s16725_s9 + $0x220] sm:$0xff] %v9921_v41  ;;  %v9037_v46 = vsub.f32 1.0, %v8890_v35  ;;  %v7572_v54 = vmul.f32 %v18241_v42, %v7425_v60  ;;  %v18276_v24 = vand.u32 2147483647, %v18267_v29  ;;  %20994 = vst [vmem:[#allocation35_spill] sm:$0xff] %v18281_v52  ;;  %v8453_v59 = vmul.f32 %v8306_v61, %v18227_v38 }
 0x6ba   : > { %v8156_v8 = vmul.f32 %v18210_v12, %v8009_v16  ;;  %v6982_v1 = vmul.f32 1.0614054, %v18270_v51  ;;  %v6693_v31 = vadd.f32 1.0, %v6546_v11  ;;  %v8668_v6 = vmul.f32 1.442695, %v8452_v10  ;;  %v11572_v12 = vpop.f32.mrb[63].mxu1 }
 0x6bb   : > { %v13329_v43 = vpop.eup %13328  ;;  %v9331_v56 = vsub.f32 0.0, %v9037_v46  ;;  %v7719_v39 = vadd.f32 -0.28449672, %v7572_v54  ;;  %v6544_v15 = vmul.f32 0.3275911, %v18276_v24  ;;  %v8310_v61 = vsub.f32 0.0, %v6399_v5 }
 0x6bc   : > { %v18285_v48 = vpop.eup %13330  ;;  %v8891_v44 = vmul.f32 %v13329_v43, %v8156_v8  ;;  %v7129_v63 = vadd.f32 -1.4531521, %v6982_v1  ;;  %13334 = vrcp.f32 %v6693_v31  ;;  %v8670_v1 = vmul.f32 1.442695, %v8453_v59 }
 0x6bd   : > { %v9478_v41 = vsel %vm9184_vm5, %v9037_v46, %v9331_v56  ;;  %v7866_v35 = vmul.f32 %v18241_v42, %v7719_v39  ;;  %v6983_v60 = vmul.f32 1.0614054, %v18285_v48  ;;  %v6691_v16 = vadd.f32 1.0, %v6544_v15 }
 0x6be   : > { %v9772_v11 = vadd.f32 1.0, %v9478_v41  ;;  %v9038_v54 = vsub.f32 1.0, %v8891_v44  ;;  %v7276_v38 = vmul.f32 %v18270_v51, %v7129_v63  ;;  %v18294_v14 = vadd.f32 %v17784_v53, %v16496_v13  ;;  %v18309_v63 = vpop.f32.mrb[62].mxu0 }
 0x6bf   : > { %v8013_v52 = vadd.f32 0.2548296, %v7866_v35  ;;  %v7130_v8 = vadd.f32 -1.4531521, %v6983_v60  ;;  %13336 = vrcp.f32 %v6691_v16  ;;  %v18300_v39 = vadd.f32 %v17819_v21, %v16492_v25 }
 0x6c0   : > { %v9919_v10 = vmul.f32 %v9772_v11, %v9625_v49  ;;  %v9332_v31 = vsub.f32 0.0, %v9038_v54  ;;  %v7423_v43 = vadd.f32 1.4214138, %v7276_v38  ;;  %13338 = vpow2.f32 %v8668_v6  ;;  %v13333_v15 = vpop.eup %13332 }
 0x6c1   : > { %v8160_v46 = vmul.f32 %v18241_v42, %v8013_v52  ;;  %v7277_v56 = vmul.f32 %v18285_v48, %v7130_v8  ;;  %v8457_v44 = vmul.f32 %v8310_v61, %v6399_v5  ;;  %v18307_v53 = vmul.f32 0.70710677, %v18294_v14 }
 0x6c2   : > { %10066 = vst [vmem:[%s16725_s9 + $0x210] sm:$0xff] %v9919_v10  ;;  %v9479_v49 = vsel %vm9185_vm6, %v9038_v54, %v9332_v31  ;;  %v7570_v59 = vmul.f32 %v18270_v51, %v7423_v43  ;;  %vm9189_vm7 = vcmp.ge.f32.partialorder %v18166_v20, 0.0  ;;  %13340 = vpow2.f32 %v8670_v1 }
 0x6c3   : > { %v9773_v42 = vadd.f32 1.0, %v9479_v49  ;;  %v8895_v52 = vmul.f32 %v13333_v15, %v8160_v46  ;;  %v7424_v21 = vadd.f32 1.4214138, %v7277_v56  ;;  %v8308_v12 = vsub.f32 0.0, %v18276_v24  ;;  %v18333_v15 = vpop.f32.mrb[63].mxu0 }
 0x6c4   : > { %v7717_v6 = vadd.f32 -0.28449672, %v7570_v59  ;;  %v18314_v50 = vand.u32 2147483647, %v18307_v53  ;;  %v18318_v60 = vmul.f32 0.70710677, %v18300_v39  ;;  %v18326_v61 = vadd.f32 %v17840_v30, %v16494_v26 }
 0x6c5   : > { %v9920_v41 = vmul.f32 %v9773_v42, %v9626_v55  ;;  %v9042_v5 = vsub.f32 1.0, %v8895_v52  ;;  %v7571_v35 = vmul.f32 %v18285_v48, %v7424_v21  ;;  %v8678_v54 = vmul.f32 1.442695, %v8457_v44 }
 0x6c6   : > { %v18320_v16 = vpop.eup %13334  ;;  %v7864_v11 = vmul.f32 %v18270_v51, %v7717_v6  ;;  %v6545_v38 = vmul.f32 0.3275911, %v18314_v50  ;;  %v9630_v55 = vmul.f32 0.5, %v18150_v0  ;;  %v8455_v43 = vmul.f32 %v8308_v12, %v18276_v24 }
 0x6c7   : > { %10067 = vst [vmem:[%s16725_s9 + $0x218] sm:$0xff] %v9920_v41  ;;  %v9336_v8 = vsub.f32 0.0, %v9042_v5  ;;  %v7718_v1 = vadd.f32 -0.28449672, %v7571_v35  ;;  %v6987_v10 = vmul.f32 1.0614054, %v18320_v16 }
 0x6c8   : > { %v8011_v31 = vadd.f32 0.2548296, %v7864_v11  ;;  %v6692_v46 = vadd.f32 1.0, %v6545_v38  ;;  %v6402_v56 = vand.u32 2147483647, %v18318_v60  ;;  %v9628_v6 = vmul.f32 0.5, %v18186_v32 }
 0x6c9   : > { %v18335_v49 = vpop.eup %13336  ;;  %v9483_v30 = vsel %vm9189_vm7, %v9042_v5, %v9336_v8  ;;  %v7865_v59 = vmul.f32 %v18285_v48, %v7718_v1  ;;  %v7134_v44 = vadd.f32 -1.4531521, %v6987_v10  ;;  %v18341_v0 = vmul.f32 0.70710677, %v18326_v61  ;;  %v18348_v10 = vpop.f32.mrb[64].mxu1 }
 0x6ca   : > { %v9777_v42 = vadd.f32 1.0, %v9483_v30  ;;  %v8158_v52 = vmul.f32 %v18270_v51, %v8011_v31  ;;  %v6985_v24 = vmul.f32 1.0614054, %v18335_v49  ;;  %13342 = vrcp.f32 %v6692_v46  ;;  %v13339_v21 = vpop.eup %13338 }
 0x6cb   : > { %v8012_v12 = vadd.f32 0.2548296, %v7865_v59  ;;  %v7281_v20 = vmul.f32 %v18320_v16, %v7134_v44  ;;  %v6549_v41 = vmul.f32 0.3275911, %v6402_v56  ;;  %13344 = vpow2.f32 %v8678_v54 }
 0x6cc   : > { %v9924_v5 = vmul.f32 %v9777_v42, %v9630_v55  ;;  %v8893_v35 = vmul.f32 %v13339_v21, %v8158_v52  ;;  %v7132_v11 = vadd.f32 -1.4531521, %v6985_v24  ;;  %v8674_v1 = vmul.f32 1.442695, %v8455_v43  ;;  %v13341_v31 = vpop.eup %13340  ;;  %v11575_v55 = vpop.f32.mrb[65].mxu1 }
 0x6cd   : > { %v8159_v38 = vmul.f32 %v18285_v48, %v8012_v12  ;;  %v7428_v8 = vadd.f32 1.4214138, %v7281_v20  ;;  %v6696_v51 = vadd.f32 1.0, %v6549_v41  ;;  %v8309_v30 = vsub.f32 0.0, %v18314_v50 }
 0x6ce   : > { %10071 = vst [vmem:[%s16725_s9 + $0x238] sm:$0xff] %v9924_v5  ;;  %v9040_v46 = vsub.f32 1.0, %v8893_v35  ;;  %v7279_v32 = vmul.f32 %v18335_v49, %v7132_v11  ;;  %v18354_v59 = vand.u32 2147483647, %v18341_v0  ;;  %vm9187_vm8 = vcmp.ge.f32.partialorder %v18206_v18, 0.0 }
 0x6cf   : > { %v8894_v54 = vmul.f32 %v13341_v31, %v8159_v38  ;;  %v7575_v48 = vmul.f32 %v18320_v16, %v7428_v8  ;;  %13346 = vrcp.f32 %v6696_v51  ;;  %vm9188_vm9 = vcmp.ge.f32.partialorder %v18221_v17, 0.0 }
 0x6d0   : > { %v9334_v43 = vsub.f32 0.0, %v9040_v46  ;;  %v7426_v44 = vadd.f32 1.4214138, %v7279_v32  ;;  %v8313_v42 = vsub.f32 0.0, %v6402_v56  ;;  %13348 = vpow2.f32 %v8674_v1 }
 0x6d1   : > { %v9041_v52 = vsub.f32 1.0, %v8894_v54  ;;  %v7722_v24 = vadd.f32 -0.28449672, %v7575_v48  ;;  %v6547_v21 = vmul.f32 0.3275911, %v18354_v59  ;;  %v9629_v20 = vmul.f32 0.5, %v18202_v33 }
 0x6d2   : > { %v9481_v12 = vsel %vm9187_vm8, %v9040_v46, %v9334_v43  ;;  %v7573_v41 = vmul.f32 %v18335_v49, %v7426_v44  ;;  %v8456_v18 = vmul.f32 %v8309_v30, %v18314_v50  ;;  %v8460_v31 = vmul.f32 %v8313_v42, %v6402_v56  ;;  %v18374_v46 = vpop.f32.mrb[64].mxu0 }
 0x6d3   : > { %v9775_v5 = vadd.f32 1.0, %v9481_v12  ;;  %v9335_v35 = vsub.f32 0.0, %v9041_v52  ;;  %v7869_v11 = vmul.f32 %v18320_v16, %v7722_v24  ;;  %v6694_v38 = vadd.f32 1.0, %v6547_v21  ;;  %v18388_v24 = vpop.f32.mrb[65].mxu0 }
 0x6d4   : > { %v18364_v8 = vpop.eup %13342  ;;  %v7720_v51 = vadd.f32 -0.28449672, %v7573_v41  ;;  %v18368_v1 = vadd.f32 %v17871_v40, %v16496_v13  ;;  %v18372_v33 = vadd.f32 %v17911_v2, %v16492_v25  ;;  %vm9192_vm10 = vcmp.ge.f32.partialorder %v18255_v19, 0.0 }
 0x6d5   : > { %v9922_v50 = vmul.f32 %v9775_v5, %v9628_v6  ;;  %v9482_v32 = vsel %vm9188_vm9, %v9041_v52, %v9335_v35  ;;  %v8016_v30 = vadd.f32 0.2548296, %v7869_v11  ;;  %v6986_v55 = vmul.f32 1.0614054, %v18364_v8  ;;  %v13345_v54 = vpop.eup %13344 }
 0x6d6   : > { %v9776_v48 = vadd.f32 1.0, %v9482_v32  ;;  %v7867_v56 = vmul.f32 %v18335_v49, %v7720_v51  ;;  %13350 = vrcp.f32 %v6694_v38  ;;  %v18381_v40 = vmul.f32 0.70710677, %v18368_v1 }
 0x6d7   : > { %10069 = vst [vmem:[%s16725_s9 + $0x228] sm:$0xff] %v9922_v50  ;;  %v8163_v2 = vmul.f32 %v18320_v16, %v8016_v30  ;;  %v7133_v6 = vadd.f32 -1.4531521, %v6986_v55  ;;  %v8676_v17 = vmul.f32 1.442695, %v8456_v18  ;;  %v9633_v44 = vmul.f32 0.5, %v18239_v58 }
 0x6d8   : > { %v9923_v43 = vmul.f32 %v9776_v48, %v9629_v20  ;;  %v8014_v42 = vadd.f32 0.2548296, %v7867_v56  ;;  %v6401_v52 = vand.u32 2147483647, %v18381_v40  ;;  %v8684_v5 = vmul.f32 1.442695, %v8460_v31 }
 0x6d9   : > { %v18390_v21 = vpop.eup %13346  ;;  %v8898_v12 = vmul.f32 %v13345_v54, %v8163_v2  ;;  %v7280_v41 = vmul.f32 %v18364_v8, %v7133_v6  ;;  %v18394_v16 = vmul.f32 0.70710677, %v18372_v33  ;;  %v9631_v20 = vmul.f32 0.5, %v18250_v45 }
 0x6da   : > { %10070 = vst [vmem:[%s16725_s9 + $0x230] sm:$0xff] %v9923_v43  ;;  %v8161_v18 = vmul.f32 %v18335_v49, %v8014_v42  ;;  %v6990_v58 = vmul.f32 1.0614054, %v18390_v21  ;;  %v6548_v35 = vmul.f32 0.3275911, %v6401_v52  ;;  %v13349_v11 = vpop.eup %13348  ;;  %13352 = vpow2.f32 %v8676_v17 }
 0x6db   : > { %v9045_v38 = vsub.f32 1.0, %v8898_v12  ;;  %v7427_v51 = vadd.f32 1.4214138, %v7280_v41  ;;  %v18401_v50 = vand.u32 2147483647, %v18394_v16  ;;  %v8311_v30 = vsub.f32 0.0, %v18354_v59 }
 0x6dc   : > { %v8896_v32 = vmul.f32 %v13349_v11, %v8161_v18  ;;  %v7137_v31 = vadd.f32 -1.4531521, %v6990_v58  ;;  %v6695_v55 = vadd.f32 1.0, %v6548_v35  ;;  %13354 = vpow2.f32 %v8684_v5 }
 0x6dd   : > { %v9339_v54 = vsub.f32 0.0, %v9045_v38  ;;  %v7574_v49 = vmul.f32 %v18364_v8, %v7427_v51  ;;  %v6552_v45 = vmul.f32 0.3275911, %v18401_v50  ;;  %vm9190_vm11 = vcmp.ge.f32.partialorder %v18267_v29, 0.0 }
 0x6de   : > { %v9043_v48 = vsub.f32 1.0, %v8896_v32  ;;  %v7284_v56 = vmul.f32 %v18390_v21, %v7137_v31  ;;  %13356 = vrcp.f32 %v6695_v55  ;;  %v8312_v17 = vsub.f32 0.0, %v6401_v52  ;;  %v18425_v31 = vpop.f32.mrb[66].mxu1 }
 0x6df   : > { %v9486_v2 = vsel %vm9192_vm10, %v9045_v38, %v9339_v54  ;;  %v7721_v6 = vadd.f32 -0.28449672, %v7574_v49  ;;  %v6699_v43 = vadd.f32 1.0, %v6552_v45  ;;  %v8458_v5 = vmul.f32 %v8311_v30, %v18354_v59  ;;  %v11578_v54 = vpop.f32.mrb[67].mxu1 }
 0x6e0   : > { %v18410_v42 = vpop.eup %13350  ;;  %v9780_v12 = vadd.f32 1.0, %v9486_v2  ;;  %v9337_v41 = vsub.f32 0.0, %v9043_v48  ;;  %v7431_v18 = vadd.f32 1.4214138, %v7284_v56  ;;  %v18415_v35 = vmul.f32 0.5, %v18294_v14 }
 0x6e1   : > { %v7868_v58 = vmul.f32 %v18364_v8, %v7721_v6  ;;  %v6988_v11 = vmul.f32 1.0614054, %v18410_v42  ;;  %13358 = vrcp.f32 %v6699_v43  ;;  %v18423_v32 = vadd.f32 %v17914_v62, %v16494_v26 }
 0x6e2   : > { %v9927_v19 = vmul.f32 %v9780_v12, %v9633_v44  ;;  %v9484_v38 = vsel %vm9190_vm11, %v9043_v48, %v9337_v41  ;;  %v7578_v51 = vmul.f32 %v18390_v21, %v7431_v18  ;;  %v8459_v14 = vmul.f32 %v8312_v17, %v6401_v52  ;;  %v18450_v12 = vpop.f32.mrb[66].mxu0 }
 0x6e3   : > { %v9778_v59 = vadd.f32 1.0, %v9484_v38  ;;  %v8015_v30 = vadd.f32 0.2548296, %v7868_v58  ;;  %v7135_v55 = vadd.f32 -1.4531521, %v6988_v11  ;;  %vm9191_vm12 = vcmp.ge.f32.partialorder %v18307_v53, 0.0 }
 0x6e4   : > { %10074 = vst [vmem:[%s16725_s9 + $0x250] sm:$0xff] %v9927_v19  ;;  %v7725_v44 = vadd.f32 -0.28449672, %v7578_v51  ;;  %v8680_v29 = vmul.f32 1.442695, %v8458_v5  ;;  %v18434_v62 = vadd.f32 %v17955_v22, %v16496_v13  ;;  %v13353_v45 = vpop.eup %13352  ;;  %v18440_v2 = vadd.f32 %v17970_v34, %v16492_v25 }
 0x6e5   : > { %v18430_v49 = vmul.f32 0.70710677, %v18423_v32  ;;  %v9925_v48 = vmul.f32 %v9778_v59, %v9631_v20  ;;  %v8162_v56 = vmul.f32 %v18364_v8, %v8015_v30  ;;  %v7282_v52 = vmul.f32 %v18410_v42, %v7135_v55 }
 0x6e6   : > { %v7872_v6 = vmul.f32 %v18390_v21, %v7725_v44  ;;  %v8316_v17 = vsub.f32 0.0, %v18401_v50  ;;  %v18448_v22 = vmul.f32 0.70710677, %v18434_v62  ;;  %v13355_v20 = vpop.eup %13354  ;;  %v9636_v41 = vmul.f32 0.5, %v18300_v39 }
 0x6e7   : > { %v18445_v43 = vand.u32 2147483647, %v18430_v49  ;;  %10072 = vst [vmem:[%s16725_s9 + $0x240] sm:$0xff] %v9925_v48  ;;  %v8897_v8 = vmul.f32 %v13353_v45, %v8162_v56  ;;  %v7429_v18 = vadd.f32 1.4214138, %v7282_v52  ;;  %13360 = vpow2.f32 %v8680_v29 }
 0x6e8   : > { %v8682_v34 = vmul.f32 1.442695, %v8459_v14  ;;  %v18454_v5 = vpop.eup %13356  ;;  %v8019_v58 = vadd.f32 0.2548296, %v7872_v6  ;;  %v18458_v19 = vmul.f32 0.70710677, %v18440_v2  ;;  %v8463_v55 = vmul.f32 %v8316_v17, %v18401_v50 }
 0x6e9   : > { %v6550_v11 = vmul.f32 0.3275911, %v18445_v43  ;;  %v9044_v38 = vsub.f32 1.0, %v8897_v8  ;;  %v7576_v51 = vmul.f32 %v18410_v42, %v7429_v18  ;;  %v6989_v59 = vmul.f32 1.0614054, %v18454_v5 }
 0x6ea   : > { %v18463_v30 = vand.u32 2147483647, %v18448_v22  ;;  %v8166_v39 = vmul.f32 %v18390_v21, %v8019_v58  ;;  %vm9195_vm13 = vcmp.ge.f32.partialorder %v18318_v60, 0.0  ;;  %13362 = vpow2.f32 %v8682_v34 }
 0x6eb   : > { %v6697_v14 = vadd.f32 1.0, %v6550_v11  ;;  %v18468_v54 = vpop.eup %13358  ;;  %v9338_v44 = vsub.f32 0.0, %v9044_v38  ;;  %v7723_v29 = vadd.f32 -0.28449672, %v7576_v51  ;;  %v7136_v45 = vadd.f32 -1.4531521, %v6989_v59 }
 0x6ec   : > { %v8901_v48 = vmul.f32 %v13355_v20, %v8166_v39  ;;  %v6993_v56 = vmul.f32 1.0614054, %v18468_v54  ;;  %v6408_v52 = vand.u32 2147483647, %v18458_v19  ;;  %v6551_v17 = vmul.f32 0.3275911, %v18463_v30 }
 0x6ed   : > { %13364 = vrcp.f32 %v6697_v14  ;;  %v9485_v21 = vsel %vm9191_vm12, %v9044_v38, %v9338_v44  ;;  %v7870_v6 = vmul.f32 %v18410_v42, %v7723_v29  ;;  %v7283_v50 = vmul.f32 %v18454_v5, %v7136_v45  ;;  %v18480_v44 = vpop.f32.mrb[67].mxu0 }
 0x6ee   : > { %v9779_v8 = vadd.f32 1.0, %v9485_v21  ;;  %v9048_v18 = vsub.f32 1.0, %v8901_v48  ;;  %v7140_v58 = vadd.f32 -1.4531521, %v6993_v56  ;;  %v8690_v34 = vmul.f32 1.442695, %v8463_v55 }
 0x6ef   : > { %v8017_v20 = vadd.f32 0.2548296, %v7870_v6  ;;  %v7430_v11 = vadd.f32 1.4214138, %v7283_v50  ;;  %v8314_v51 = vsub.f32 0.0, %v18445_v43  ;;  %v6698_v59 = vadd.f32 1.0, %v6551_v17 }
 0x6f0   : > { %v9926_v39 = vmul.f32 %v9779_v8, %v18415_v35  ;;  %v9342_v53 = vsub.f32 0.0, %v9048_v18  ;;  %v7287_v38 = vmul.f32 %v18468_v54, %v7140_v58  ;;  %v6555_v14 = vmul.f32 0.3275911, %v6408_v52 }
 0x6f1   : > { %v8164_v29 = vmul.f32 %v18410_v42, %v8017_v20  ;;  %vm9193_vm14 = vcmp.ge.f32.partialorder %v18341_v0, 0.0  ;;  %v7577_v45 = vmul.f32 %v18454_v5, %v7430_v11  ;;  %13366 = vrcp.f32 %v6698_v59  ;;  %v13361_v55 = vpop.eup %13360 }
 0x6f2   : > { %10073 = vst [vmem:[%s16725_s9 + $0x248] sm:$0xff] %v9926_v39  ;;  %v9489_v48 = vsel %vm9195_vm13, %v9048_v18, %v9342_v53  ;;  %v7434_v56 = vadd.f32 1.4214138, %v7287_v38  ;;  %13368 = vpow2.f32 %v8690_v34  ;;  %v6702_v35 = vadd.f32 1.0, %v6555_v14 }
 0x6f3   : > { %v9783_v21 = vadd.f32 1.0, %v9489_v48  ;;  %v8899_v6 = vmul.f32 %v13361_v55, %v8164_v29  ;;  %v7724_v50 = vadd.f32 -0.28449672, %v7577_v45  ;;  %v8315_v17 = vsub.f32 0.0, %v18463_v30 }
 0x6f4   : > { %v9634_v42 = vmul.f32 0.5, %v18326_v61  ;;  %v7581_v8 = vmul.f32 %v18468_v54, %v7434_v56  ;;  %v8461_v58 = vmul.f32 %v8314_v51, %v18445_v43  ;;  %13370 = vrcp.f32 %v6702_v35  ;;  %v13363_v20 = vpop.eup %13362 }
 0x6f5   : > { %v9930_v11 = vmul.f32 %v9783_v21, %v9636_v41  ;;  %v9046_v60 = vsub.f32 1.0, %v8899_v6  ;;  %v7871_v18 = vmul.f32 %v18454_v5, %v7724_v50  ;;  %v18494_v34 = vmul.f32 0.5, %v18368_v1 }
 0x6f6   : > { %v7728_v39 = vadd.f32 -0.28449672, %v7581_v8  ;;  %v8319_v53 = vsub.f32 0.0, %v6408_v52  ;;  %v18500_v61 = vadd.f32 %v18012_v36, %v16494_v26  ;;  %v18504_v43 = vadd.f32 %v18027_v3, %v16496_v13 }
 0x6f7   : > { %v18496_v59 = vpop.eup %13364  ;;  %10077 = vst [vmem:[%s16725_s9 + $0x268] sm:$0xff] %v9930_v11  ;;  %v9340_v41 = vsub.f32 0.0, %v9046_v60  ;;  %v8018_v51 = vadd.f32 0.2548296, %v7871_v18  ;;  %v8462_v1 = vmul.f32 %v8315_v17, %v18463_v30  ;;  %vm9194_vm15 = vcmp.ge.f32.partialorder %v18381_v40, 0.0 }
 0x6f8   : > { %v6991_v38 = vmul.f32 1.0614054, %v18496_v59  ;;  %v7875_v14 = vmul.f32 %v18468_v54, %v7728_v39  ;;  %v8686_v29 = vmul.f32 1.442695, %v8461_v58  ;;  %v18512_v45 = vmul.f32 0.70710677, %v18500_v61 }
 0x6f9   : > { %v9487_v36 = vsel %vm9193_vm14, %v9046_v60, %v9340_v41  ;;  %v8165_v3 = vmul.f32 %v18454_v5, %v8018_v51  ;;  %v18518_v48 = vmul.f32 0.70710677, %v18504_v43  ;;  %v8466_v30 = vmul.f32 %v8319_v53, %v6408_v52  ;;  %v18529_v52 = vpop.f32.mrb[68].mxu1 }
 0x6fa   : > { %v7138_v55 = vadd.f32 -1.4531521, %v6991_v38  ;;  %v9781_v56 = vadd.f32 1.0, %v9487_v36  ;;  %v8022_v35 = vadd.f32 0.2548296, %v7875_v14  ;;  %13372 = vpow2.f32 %v8686_v29  ;;  %v18541_v29 = vpop.f32.mrb[68].mxu0 }
 0x6fb   : > { %v6406_v21 = vand.u32 2147483647, %v18512_v45  ;;  %v18521_v6 = vpop.eup %13366  ;;  %v8900_v50 = vmul.f32 %v13363_v20, %v8165_v3  ;;  %v8688_v8 = vmul.f32 1.442695, %v8462_v1  ;;  %v18525_v0 = vand.u32 2147483647, %v18518_v48 }
 0x6fc   : > { %v7285_v17 = vmul.f32 %v18496_v59, %v7138_v55  ;;  %v13369_v5 = vpop.eup %13368  ;;  %v9928_v58 = vmul.f32 %v9781_v56, %v9634_v42  ;;  %v8169_v11 = vmul.f32 %v18468_v54, %v8022_v35  ;;  %v6992_v60 = vmul.f32 1.0614054, %v18521_v6  ;;  %v11581_v42 = vpop.f32.mrb[69].mxu1 }
 0x6fd   : > { %v6553_v18 = vmul.f32 0.3275911, %v6406_v21  ;;  %v9047_v39 = vsub.f32 1.0, %v8900_v50  ;;  %v6554_v20 = vmul.f32 0.3275911, %v18525_v0  ;;  %v18539_v55 = vadd.f32 %v18068_v4, %v16492_v25 }
 0x6fe   : > { %v7432_v53 = vadd.f32 1.4214138, %v7285_v17  ;;  %v18532_v41 = vpop.eup %13370  ;;  %10075 = vst [vmem:[%s16725_s9 + $0x258] sm:$0xff] %v9928_v58  ;;  %v8904_v51 = vmul.f32 %v13369_v5, %v8169_v11  ;;  %v7139_v38 = vadd.f32 -1.4531521, %v6992_v60  ;;  %v8317_v58 = vsub.f32 0.0, %v6406_v21 }
 0x6ff   : > { %v8696_v1 = vmul.f32 1.442695, %v8466_v30  ;;  %v6700_v14 = vadd.f32 1.0, %v6553_v18  ;;  %v9341_v36 = vsub.f32 0.0, %v9047_v39  ;;  %v6996_v3 = vmul.f32 1.0614054, %v18532_v41 }
 0x700   : > { %v7579_v54 = vmul.f32 %v18496_v59, %v7432_v53  ;;  %v9051_v56 = vsub.f32 1.0, %v8904_v51  ;;  %v7286_v35 = vmul.f32 %v18521_v6, %v7139_v38  ;;  %v6701_v50 = vadd.f32 1.0, %v6554_v20 }
 0x701   : > { %13374 = vrcp.f32 %v6700_v14  ;;  %v9488_v30 = vsel %vm9194_vm15, %v9047_v39, %v9341_v36  ;;  %v7143_v5 = vadd.f32 -1.4531521, %v6996_v3  ;;  %vm9198_vm0 = vcmp.ge.f32.partialorder %v18394_v16, 0.0 }
 0x702   : > { %v7726_v17 = vadd.f32 -0.28449672, %v7579_v54  ;;  %v9782_v11 = vadd.f32 1.0, %v9488_v30  ;;  %v9345_v60 = vsub.f32 0.0, %v9051_v56  ;;  %v7433_v18 = vadd.f32 1.4214138, %v7286_v35 }
 0x703   : > { %13376 = vrcp.f32 %v6701_v50  ;;  %v7290_v53 = vmul.f32 %v18532_v41, %v7143_v5  ;;  %v9639_v40 = vmul.f32 0.5, %v18372_v33  ;;  %v8464_v36 = vmul.f32 %v8317_v58, %v6406_v21  ;;  %v18562_v35 = vpop.f32.mrb[69].mxu0 }
 0x704   : > { %v7873_v4 = vmul.f32 %v18496_v59, %v7726_v17  ;;  %13378 = vpow2.f32 %v8688_v8  ;;  %v9929_v20 = vmul.f32 %v9782_v11, %v18494_v34  ;;  %v9492_v51 = vsel %vm9198_vm0, %v9051_v56, %v9345_v60  ;;  %v13373_v34 = vpop.eup %13372 }
 0x705   : > { %v7580_v39 = vmul.f32 %v18521_v6, %v7433_v18  ;;  %v9786_v38 = vadd.f32 1.0, %v9492_v51  ;;  %v7437_v42 = vadd.f32 1.4214138, %v7290_v53  ;;  %13380 = vpow2.f32 %v8696_v1  ;;  %v18584_v51 = vpop.f32.mrb[70].mxu1 }
 0x706   : > { %v8020_v14 = vadd.f32 0.2548296, %v7873_v4  ;;  %10076 = vst [vmem:[%s16725_s9 + $0x260] sm:$0xff] %v9929_v20  ;;  %v18554_v16 = vmul.f32 0.70710677, %v18539_v55  ;;  %v18558_v8 = vadd.f32 %v18070_v37, %v16494_v26  ;;  %v9637_v21 = vmul.f32 0.5, %v18423_v32 }
 0x707   : > { %v7727_v54 = vadd.f32 -0.28449672, %v7580_v39  ;;  %v9933_v3 = vmul.f32 %v9786_v38, %v9639_v40  ;;  %v7584_v56 = vmul.f32 %v18532_v41, %v7437_v42  ;;  %v8318_v1 = vsub.f32 0.0, %v18525_v0 }
 0x708   : > { %v8167_v33 = vmul.f32 %v18496_v59, %v8020_v14  ;;  %v18568_v30 = vand.u32 2147483647, %v18554_v16  ;;  %v8692_v5 = vmul.f32 1.442695, %v8464_v36  ;;  %v18572_v58 = vmul.f32 0.70710677, %v18558_v8 }
 0x709   : > { %v7874_v50 = vmul.f32 %v18521_v6, %v7727_v54  ;;  %10080 = vst [vmem:[%s16725_s9 + $0x280] sm:$0xff] %v9933_v3  ;;  %v7731_v17 = vadd.f32 -0.28449672, %v7584_v56  ;;  %vm9196_vm1 = vcmp.ge.f32.partialorder %v18430_v49, 0.0  ;;  %v9638_v32 = vmul.f32 0.5, %v18434_v62  ;;  %v11584_v14 = vpop.f32.mrb[71].mxu1 }
 0x70a   : > { %v8902_v37 = vmul.f32 %v13373_v34, %v8167_v33  ;;  %v6558_v60 = vmul.f32 0.3275911, %v18568_v30  ;;  %v18582_v20 = vand.u32 2147483647, %v18572_v58  ;;  %vm9197_vm2 = vcmp.ge.f32.partialorder %v18448_v22, 0.0 }
 0x70b   : > { %v18574_v59 = vpop.eup %13374  ;;  %v8021_v11 = vadd.f32 0.2548296, %v7874_v50  ;;  %v7878_v4 = vmul.f32 %v18532_v41, %v7731_v17  ;;  %v8465_v62 = vmul.f32 %v8318_v1, %v18525_v0  ;;  %13382 = vpow2.f32 %v8692_v5 }
 0x70c   : > { %v9049_v18 = vsub.f32 1.0, %v8902_v37  ;;  %v6994_v53 = vmul.f32 1.0614054, %v18574_v59  ;;  %v6705_v38 = vadd.f32 1.0, %v6558_v60  ;;  %v18594_v56 = vadd.f32 %v18087_v28, %v16496_v13 }
 0x70d   : > { %v18586_v40 = vpop.eup %13376  ;;  %v8168_v39 = vmul.f32 %v18521_v6, %v8021_v11  ;;  %v8025_v54 = vadd.f32 0.2548296, %v7878_v4  ;;  %v6556_v1 = vmul.f32 0.3275911, %v18582_v20  ;;  %v8694_v60 = vmul.f32 1.442695, %v8465_v62 }
 0x70e   : > { %v13379_v42 = vpop.eup %13378  ;;  %v9343_v36 = vsub.f32 0.0, %v9049_v18  ;;  %v7141_v34 = vadd.f32 -1.4531521, %v6994_v53  ;;  %v6995_v33 = vmul.f32 1.0614054, %v18586_v40  ;;  %13384 = vrcp.f32 %v6705_v38  ;;  %v18602_v38 = vpop.f32.mrb[70].mxu0 }
 0x70f   : > { %v8903_v3 = vmul.f32 %v13379_v42, %v8168_v39  ;;  %v8172_v0 = vmul.f32 %v18532_v41, %v8025_v54  ;;  %v13381_v37 = vpop.eup %13380  ;;  %v8322_v28 = vsub.f32 0.0, %v18568_v30  ;;  %v6703_v39 = vadd.f32 1.0, %v6556_v1 }
 0x710   : > { %v9490_v6 = vsel %vm9196_vm1, %v9049_v18, %v9343_v36  ;;  %v7288_v50 = vmul.f32 %v18574_v59, %v7141_v34  ;;  %v7142_v11 = vadd.f32 -1.4531521, %v6995_v33  ;;  %v18606_v14 = vmul.f32 0.70710677, %v18594_v56 }
 0x711   : > { %v9784_v17 = vadd.f32 1.0, %v9490_v6  ;;  %v9050_v5 = vsub.f32 1.0, %v8903_v3  ;;  %v8907_v4 = vmul.f32 %v13381_v37, %v8172_v0  ;;  %vm9201_vm3 = vcmp.ge.f32.partialorder %v18458_v19, 0.0 }
 0x712   : > { %v7435_v53 = vadd.f32 1.4214138, %v7288_v50  ;;  %v7289_v41 = vmul.f32 %v18586_v40, %v7142_v11  ;;  %13386 = vrcp.f32 %v6703_v39  ;;  %v9642_v54 = vmul.f32 0.5, %v18440_v2 }
 0x713   : > { %v9931_v49 = vmul.f32 %v9784_v17, %v9637_v21  ;;  %v9344_v18 = vsub.f32 0.0, %v9050_v5  ;;  %v9054_v42 = vsub.f32 1.0, %v8907_v4  ;;  %v18615_v21 = vand.u32 2147483647, %v18606_v14 }
 0x714   : > { %v7582_v36 = vmul.f32 %v18574_v59, %v7435_v53  ;;  %v7436_v34 = vadd.f32 1.4214138, %v7289_v41  ;;  %13388 = vpow2.f32 %v8694_v60  ;;  %v8469_v50 = vmul.f32 %v8322_v28, %v18568_v30  ;;  %v18640_v41 = vpop.f32.mrb[71].mxu0 }
 0x715   : > { %10078 = vst [vmem:[%s16725_s9 + $0x270] sm:$0xff] %v9931_v49  ;;  %v9491_v62 = vsel %vm9197_vm2, %v9050_v5, %v9344_v18  ;;  %v9348_v33 = vsub.f32 0.0, %v9054_v42  ;;  %v6557_v1 = vmul.f32 0.3275911, %v18615_v21  ;;  %v18622_v22 = vadd.f32 %v18119_v23, %v16492_v25  ;;  %v13383_v2 = vpop.eup %13382 }
 0x716   : > { %v9785_v3 = vadd.f32 1.0, %v9491_v62  ;;  %v7729_v6 = vadd.f32 -0.28449672, %v7582_v36  ;;  %v7583_v0 = vmul.f32 %v18586_v40, %v7436_v34  ;;  %v8320_v11 = vsub.f32 0.0, %v18582_v20 }
 0x717   : > { %v9495_v17 = vsel %vm9201_vm3, %v9054_v42, %v9348_v33  ;;  %v6704_v30 = vadd.f32 1.0, %v6557_v1  ;;  %v18632_v28 = vadd.f32 %v18152_v57, %v16494_v26  ;;  %v18637_v19 = vmul.f32 0.70710677, %v18622_v22 }
 0x718   : > { %v9932_v37 = vmul.f32 %v9785_v3, %v9638_v32  ;;  %v7876_v5 = vmul.f32 %v18574_v59, %v7729_v6  ;;  %v18628_v60 = vpop.eup %13384  ;;  %v9789_v4 = vadd.f32 1.0, %v9495_v17  ;;  %v7730_v53 = vadd.f32 -0.28449672, %v7583_v0 }
 0x719   : > { %v6999_v32 = vmul.f32 1.0614054, %v18628_v60  ;;  %v8702_v18 = vmul.f32 1.442695, %v8469_v50  ;;  %13390 = vrcp.f32 %v6704_v30  ;;  %v9640_v36 = vmul.f32 0.5, %v18500_v61 }
 0x71a   : > { %10079 = vst [vmem:[%s16725_s9 + $0x278] sm:$0xff] %v9932_v37  ;;  %v8023_v23 = vadd.f32 0.2548296, %v7876_v5  ;;  %v9936_v39 = vmul.f32 %v9789_v4, %v9642_v54  ;;  %v7877_v49 = vmul.f32 %v18586_v40, %v7730_v53  ;;  %v6414_v62 = vand.u32 2147483647, %v18637_v19 }
 0x71b   : > { %v7146_v57 = vadd.f32 -1.4531521, %v6999_v32  ;;  %vm9199_vm4 = vcmp.ge.f32.partialorder %v18512_v45, 0.0  ;;  %v8467_v3 = vmul.f32 %v8320_v11, %v18582_v20  ;;  %v18649_v54 = vmul.f32 0.70710677, %v18632_v28 }
 0x71c   : > { %v8170_v42 = vmul.f32 %v18574_v59, %v8023_v23  ;;  %10083 = vst [vmem:[%s16725_s9 + $0x298] sm:$0xff] %v9936_v39  ;;  %v8024_v34 = vadd.f32 0.2548296, %v7877_v49  ;;  %v18651_v33 = vpop.eup %13386  ;;  %vm9200_vm5 = vcmp.ge.f32.partialorder %v18518_v48, 0.0  ;;  %v6561_v61 = vmul.f32 0.3275911, %v6414_v62 }
 0x71d   : > { %v7293_v59 = vmul.f32 %v18628_v60, %v7146_v57  ;;  %13392 = vpow2.f32 %v8702_v18  ;;  %v6997_v50 = vmul.f32 1.0614054, %v18651_v33  ;;  %v18658_v1 = vand.u32 2147483647, %v18649_v54  ;;  %v18667_v39 = vpop.f32.mrb[72].mxu1 }
 0x71e   : > { %v8905_v6 = vmul.f32 %v13383_v2, %v8170_v42  ;;  %v8171_v0 = vmul.f32 %v18586_v40, %v8024_v34  ;;  %v13389_v20 = vpop.eup %13388  ;;  %v8321_v5 = vsub.f32 0.0, %v18615_v21  ;;  %v6708_v11 = vadd.f32 1.0, %v6561_v61  ;;  %v11587_v34 = vpop.f32.mrb[73].mxu1 }
 0x71f   : > { %v7440_v17 = vadd.f32 1.4214138, %v7293_v59  ;;  %v7144_v4 = vadd.f32 -1.4531521, %v6997_v50  ;;  %v8698_v53 = vmul.f32 1.442695, %v8467_v3  ;;  %v18665_v32 = vadd.f32 %v18179_v27, %v16496_v13 }
 0x720   : > { %v9052_v37 = vsub.f32 1.0, %v8905_v6  ;;  %v8906_v2 = vmul.f32 %v13389_v20, %v8171_v0  ;;  %v6559_v30 = vmul.f32 0.3275911, %v18658_v1  ;;  %13394 = vrcp.f32 %v6708_v11 }
 0x721   : > { %v7587_v40 = vmul.f32 %v18628_v60, %v7440_v17  ;;  %v9641_v18 = vmul.f32 0.5, %v18504_v43  ;;  %v7291_v42 = vmul.f32 %v18651_v33, %v7144_v4  ;;  %v8468_v59 = vmul.f32 %v8321_v5, %v18615_v21 }
 0x722   : > { %v9346_v23 = vsub.f32 0.0, %v9052_v37  ;;  %v9053_v49 = vsub.f32 1.0, %v8906_v2  ;;  %v6706_v57 = vadd.f32 1.0, %v6559_v30  ;;  %v8325_v61 = vsub.f32 0.0, %v6414_v62 }
 0x723   : > { %v7734_v6 = vadd.f32 -0.28449672, %v7587_v40  ;;  %v18674_v0 = vpop.eup %13390  ;;  %v7438_v20 = vadd.f32 1.4214138, %v7291_v42  ;;  %v18679_v11 = vmul.f32 0.70710677, %v18665_v32  ;;  %v18692_v48 = vadd.f32 %v18197_v7, %v16492_v25 }
 0x724   : > { %v9493_v3 = vsel %vm9199_vm4, %v9052_v37, %v9346_v23  ;;  %v9347_v50 = vsub.f32 0.0, %v9053_v49  ;;  %13396 = vrcp.f32 %v6706_v57  ;;  %v6998_v17 = vmul.f32 1.0614054, %v18674_v0 }
 0x725   : > { %v9787_v27 = vadd.f32 1.0, %v9493_v3  ;;  %v7881_v43 = vmul.f32 %v18628_v60, %v7734_v6  ;;  %13398 = vpow2.f32 %v8698_v53  ;;  %v18684_v37 = vmul.f32 0.5, %v18539_v55 }
 0x726   : > { %v9494_v21 = vsel %vm9200_vm5, %v9053_v49, %v9347_v50  ;;  %v7585_v5 = vmul.f32 %v18651_v33, %v7438_v20  ;;  %v7145_v30 = vadd.f32 -1.4531521, %v6998_v17  ;;  %v8472_v23 = vmul.f32 %v8325_v61, %v6414_v62  ;;  %v18705_v61 = vpop.f32.mrb[72].mxu0 }
 0x727   : > { %v9934_v45 = vmul.f32 %v9787_v27, %v9640_v36  ;;  %v9788_v2 = vadd.f32 1.0, %v9494_v21  ;;  %v8028_v4 = vadd.f32 0.2548296, %v7881_v43  ;;  %v13393_v40 = vpop.eup %13392  ;;  %vm9204_vm6 = vcmp.ge.f32.partialorder %v18554_v16, 0.0 }
 0x728   : > { %v7732_v53 = vadd.f32 -0.28449672, %v7585_v5  ;;  %v8700_v42 = vmul.f32 1.442695, %v8468_v59  ;;  %v6413_v36 = vand.u32 2147483647, %v18679_v11  ;;  %v7292_v57 = vmul.f32 %v18674_v0, %v7145_v30 }
 0x729   : > { %10081 = vst [vmem:[%s16725_s9 + $0x288] sm:$0xff] %v9934_v45  ;;  %v9935_v55 = vmul.f32 %v9788_v2, %v9641_v18  ;;  %v8175_v49 = vmul.f32 %v18628_v60, %v8028_v4  ;;  %v8323_v62 = vsub.f32 0.0, %v18658_v1  ;;  %v18699_v6 = vmul.f32 0.70710677, %v18692_v48 }
 0x72a   : > { %v7879_v34 = vmul.f32 %v18651_v33, %v7732_v53  ;;  %v6560_v3 = vmul.f32 0.3275911, %v6413_v36  ;;  %v18703_v59 = vadd.f32 %v18229_v9, %v16494_v26  ;;  %v18707_v7 = vpop.eup %13394  ;;  %v9643_v18 = vmul.f32 0.5, %v18558_v8 }
 0x72b   : > { %10082 = vst [vmem:[%s16725_s9 + $0x290] sm:$0xff] %v9935_v55  ;;  %v8910_v60 = vmul.f32 %v13393_v40, %v8175_v49  ;;  %v7439_v27 = vadd.f32 1.4214138, %v7292_v57  ;;  %v8708_v50 = vmul.f32 1.442695, %v8472_v23  ;;  %13400 = vpow2.f32 %v8700_v42  ;;  %v18721_v23 = vpop.f32.mrb[73].mxu0 }
 0x72c   : > { %v8026_v20 = vadd.f32 0.2548296, %v7879_v34  ;;  %v7002_v43 = vmul.f32 1.0614054, %v18707_v7  ;;  %v6707_v17 = vadd.f32 1.0, %v6560_v3  ;;  %v8470_v9 = vmul.f32 %v8323_v62, %v18658_v1  ;;  %20995 = vst [vmem:[#allocation18_spill] sm:$0xff] %v18721_v23 }
 0x72d   : > { %v9057_v45 = vsub.f32 1.0, %v8910_v60  ;;  %v7586_v21 = vmul.f32 %v18674_v0, %v7439_v27  ;;  %v6417_v5 = vand.u32 2147483647, %v18699_v6  ;;  %v18719_v8 = vmul.f32 0.70710677, %v18703_v59 }
 0x72e   : > { %v18715_v2 = vpop.eup %13396  ;;  %v8173_v4 = vmul.f32 %v18651_v33, %v8026_v20  ;;  %v7149_v30 = vadd.f32 -1.4531521, %v7002_v43  ;;  %13402 = vrcp.f32 %v6707_v17  ;;  %v8324_v49 = vsub.f32 0.0, %v6413_v36 }
 0x72f   : > { %v13399_v40 = vpop.eup %13398  ;;  %v9351_v53 = vsub.f32 0.0, %v9057_v45  ;;  %v7733_v42 = vadd.f32 -0.28449672, %v7586_v21  ;;  %v7000_v55 = vmul.f32 1.0614054, %v18715_v2  ;;  %13404 = vpow2.f32 %v8708_v50 }
 0x730   : > { %v8908_v1 = vmul.f32 %v13399_v40, %v8173_v4  ;;  %v7296_v57 = vmul.f32 %v18707_v7, %v7149_v30  ;;  %v6564_v62 = vmul.f32 0.3275911, %v6417_v5  ;;  %v8704_v60 = vmul.f32 1.442695, %v8470_v9 }
 0x731   : > { %v9498_v33 = vsel %vm9204_vm6, %v9057_v45, %v9351_v53  ;;  %v7880_v34 = vmul.f32 %v18674_v0, %v7733_v42  ;;  %v7147_v3 = vadd.f32 -1.4531521, %v7000_v55  ;;  %v8471_v4 = vmul.f32 %v8324_v49, %v6413_v36 }
 0x732   : > { %v9792_v27 = vadd.f32 1.0, %v9498_v33  ;;  %v9055_v20 = vsub.f32 1.0, %v8908_v1  ;;  %v7443_v43 = vadd.f32 1.4214138, %v7296_v57  ;;  %v6711_v17 = vadd.f32 1.0, %v6564_v62  ;;  %v18739_v33 = vpop.f32.mrb[74].mxu1 }
 0x733   : > { %v8027_v21 = vadd.f32 0.2548296, %v7880_v34  ;;  %v7294_v23 = vmul.f32 %v18715_v2, %v7147_v3  ;;  %v18730_v30 = vand.u32 2147483647, %v18719_v8  ;;  %vm9202_vm7 = vcmp.ge.f32.partialorder %v18572_v58, 0.0  ;;  %v11590_v3 = vpop.f32.mrb[75].mxu1 }
 0x734   : > { %v9939_v50 = vmul.f32 %v9792_v27, %v18684_v37  ;;  %v9349_v16 = vsub.f32 0.0, %v9055_v20  ;;  %v7590_v45 = vmul.f32 %v18707_v7, %v7443_v43  ;;  %13406 = vrcp.f32 %v6711_v17 }
 0x735   : > { %v8174_v9 = vmul.f32 %v18674_v0, %v8027_v21  ;;  %v7441_v40 = vadd.f32 1.4214138, %v7294_v23  ;;  %v6562_v53 = vmul.f32 0.3275911, %v18730_v30  ;;  %v13401_v42 = vpop.eup %13400  ;;  %13408 = vpow2.f32 %v8704_v60 }
 0x736   : > { %10086 = vst [vmem:[%s16725_s9 + $0x2b0] sm:$0xff] %v9939_v50  ;;  %v9496_v55 = vsel %vm9202_vm7, %v9055_v20, %v9349_v16  ;;  %v7737_v36 = vadd.f32 -0.28449672, %v7590_v45  ;;  %v8328_v49 = vsub.f32 0.0, %v6417_v5  ;;  %v8706_v23 = vmul.f32 1.442695, %v8471_v4 }
 0x737   : > { %v9790_v1 = vadd.f32 1.0, %v9496_v55  ;;  %v8909_v57 = vmul.f32 %v13401_v42, %v8174_v9  ;;  %v7588_v37 = vmul.f32 %v18715_v2, %v7441_v40  ;;  %v6709_v62 = vadd.f32 1.0, %v6562_v53  ;;  %v18755_v40 = vpop.f32.mrb[74].mxu0 }
 0x738   : > { %v18741_v58 = vpop.eup %13402  ;;  %v7884_v0 = vmul.f32 %v18707_v7, %v7737_v36  ;;  %v18746_v34 = vadd.f32 %v18264_v47, %v16496_v13  ;;  %v8475_v50 = vmul.f32 %v8328_v49, %v6417_v5  ;;  %v9644_v4 = vmul.f32 0.5, %v18594_v56  ;;  %v20996_v36 = vld [vmem:[#allocation35_spill] sm:$0xff] }
 0x739   : > { %v9937_v60 = vmul.f32 %v9790_v1, %v9643_v18  ;;  %v9056_v27 = vsub.f32 1.0, %v8909_v57  ;;  %v7735_v20 = vadd.f32 -0.28449672, %v7588_v37  ;;  %v7001_v43 = vmul.f32 1.0614054, %v18741_v58  ;;  %v13405_v17 = vpop.eup %13404 }
 0x73a   : > { %v8031_v21 = vadd.f32 0.2548296, %v7884_v0  ;;  %13410 = vrcp.f32 %v6709_v62  ;;  %v18750_v16 = vmul.f32 0.70710677, %v18746_v34  ;;  %vm9203_vm8 = vcmp.ge.f32.partialorder %v18606_v14, 0.0 }
 0x73b   : > { %10084 = vst [vmem:[%s16725_s9 + $0x2a0] sm:$0xff] %v9937_v60  ;;  %v9350_v45 = vsub.f32 0.0, %v9056_v27  ;;  %v7882_v47 = vmul.f32 %v18715_v2, %v7735_v20  ;;  %v7148_v9 = vadd.f32 -1.4531521, %v7001_v43  ;;  %13412 = vpow2.f32 %v8706_v23 }
 0x73c   : > { %v8178_v18 = vmul.f32 %v18707_v7, %v8031_v21  ;;  %v18760_v5 = vand.u32 2147483647, %v18750_v16  ;;  %v18765_v56 = vadd.f32 %v20996_v36, %v16492_v25  ;;  %v8714_v37 = vmul.f32 1.442695, %v8475_v50  ;;  %v18776_v21 = vpop.f32.mrb[75].mxu0 }
 0x73d   : > { %v9497_v53 = vsel %vm9203_vm8, %v9056_v27, %v9350_v45  ;;  %v8029_v42 = vadd.f32 0.2548296, %v7882_v47  ;;  %v7295_v55 = vmul.f32 %v18741_v58, %v7148_v9  ;;  %v8326_v20 = vsub.f32 0.0, %v18730_v30 }
 0x73e   : > { %v18767_v49 = vpop.eup %13406  ;;  %v9791_v1 = vadd.f32 1.0, %v9497_v53  ;;  %v8913_v57 = vmul.f32 %v13405_v17, %v8178_v18  ;;  %v6563_v14 = vmul.f32 0.3275911, %v18760_v5  ;;  %v18773_v23 = vmul.f32 0.70710677, %v18765_v56 }
 0x73f   : > { %v8176_v7 = vmul.f32 %v18715_v2, %v8029_v42  ;;  %v7442_v62 = vadd.f32 1.4214138, %v7295_v55  ;;  %v7005_v0 = vmul.f32 1.0614054, %v18767_v49  ;;  %v13409_v3 = vpop.eup %13408  ;;  %vm9207_vm9 = vcmp.ge.f32.partialorder %v18637_v19, 0.0 }
 0x740   : > { %v9938_v60 = vmul.f32 %v9791_v1, %v9644_v4  ;;  %v9060_v27 = vsub.f32 1.0, %v8913_v57  ;;  %v6710_v43 = vadd.f32 1.0, %v6563_v14  ;;  %v18780_v2 = vand.u32 2147483647, %v18773_v23 }
 0x741   : > { %v8911_v17 = vmul.f32 %v13409_v3, %v8176_v7  ;;  %v7589_v50 = vmul.f32 %v18741_v58, %v7442_v62  ;;  %v7152_v45 = vadd.f32 -1.4531521, %v7005_v0  ;;  %v9648_v9 = vmul.f32 0.5, %v18622_v22 }
 0x742   : > { %10085 = vst [vmem:[%s16725_s9 + $0x2a8] sm:$0xff] %v9938_v60  ;;  %v9354_v47 = vsub.f32 0.0, %v9060_v27  ;;  %13414 = vrcp.f32 %v6710_v43  ;;  %v6567_v42 = vmul.f32 0.3275911, %v18780_v2  ;;  %vm9205_vm10 = vcmp.ge.f32.partialorder %v18649_v54, 0.0  ;;  %v18798_v54 = vpop.f32.mrb[76].mxu1 }
 0x743   : > { %v9058_v4 = vsub.f32 1.0, %v8911_v17  ;;  %v7736_v18 = vadd.f32 -0.28449672, %v7589_v50  ;;  %v7299_v53 = vmul.f32 %v18767_v49, %v7152_v45  ;;  %13416 = vpow2.f32 %v8714_v37  ;;  %v11593_v43 = vpop.f32.mrb[77].mxu1 }
 0x744   : > { %v18787_v55 = vpop.eup %13410  ;;  %v9501_v36 = vsel %vm9207_vm9, %v9060_v27, %v9354_v47  ;;  %v8473_v1 = vmul.f32 %v8326_v20, %v18730_v30  ;;  %v8327_v0 = vsub.f32 0.0, %v18760_v5  ;;  %v6714_v3 = vadd.f32 1.0, %v6567_v42 }
 0x745   : > { %v9795_v57 = vadd.f32 1.0, %v9501_v36  ;;  %v9352_v19 = vsub.f32 0.0, %v9058_v4  ;;  %v7883_v14 = vmul.f32 %v18741_v58, %v7736_v18  ;;  %v7446_v22 = vadd.f32 1.4214138, %v7299_v53  ;;  %v13413_v7 = vpop.eup %13412 }
 0x746   : > { %v7003_v62 = vmul.f32 1.0614054, %v18787_v55  ;;  %v18796_v60 = vadd.f32 %v18309_v63, %v16494_v26  ;;  %v9646_v17 = vmul.f32 0.5, %v18632_v28  ;;  %13418 = vrcp.f32 %v6714_v3 }
 0x747   : > { %v9942_v37 = vmul.f32 %v9795_v57, %v9648_v9  ;;  %v9499_v30 = vsel %vm9205_vm10, %v9058_v4, %v9352_v19  ;;  %v8030_v27 = vadd.f32 0.2548296, %v7883_v14  ;;  %v7593_v20 = vmul.f32 %v18767_v49, %v7446_v22 }
 0x748   : > { %v9793_v50 = vadd.f32 1.0, %v9499_v30  ;;  %v7150_v45 = vadd.f32 -1.4531521, %v7003_v62  ;;  %v8710_v63 = vmul.f32 1.442695, %v8473_v1  ;;  %v9647_v4 = vmul.f32 0.5, %v18665_v32 }
 0x749   : > { %10089 = vst [vmem:[%s16725_s9 + $0x2c8] sm:$0xff] %v9942_v37  ;;  %v8177_v47 = vmul.f32 %v18741_v58, %v8030_v27  ;;  %v7740_v18 = vadd.f32 -0.28449672, %v7593_v20  ;;  %v18805_v53 = vmul.f32 0.70710677, %v18796_v60  ;;  %v18811_v28 = vadd.f32 %v18333_v15, %v16496_v13 }
 0x74a   : > { %v9940_v9 = vmul.f32 %v9793_v50, %v9646_v17  ;;  %v7297_v42 = vmul.f32 %v18787_v55, %v7150_v45  ;;  %v8474_v19 = vmul.f32 %v8327_v0, %v18760_v5  ;;  %vm9206_vm11 = vcmp.ge.f32.partialorder %v18679_v11, 0.0 }
 0x74b   : > { %v8912_v36 = vmul.f32 %v13413_v7, %v8177_v47  ;;  %v7887_v57 = vmul.f32 %v18767_v49, %v7740_v18  ;;  %v18816_v58 = vand.u32 2147483647, %v18805_v53  ;;  %v8331_v14 = vsub.f32 0.0, %v18780_v2 }
 0x74c   : > { %v18818_v1 = vpop.eup %13414  ;;  %10087 = vst [vmem:[%s16725_s9 + $0x2b8] sm:$0xff] %v9940_v9  ;;  %v7444_v32 = vadd.f32 1.4214138, %v7297_v42  ;;  %v18824_v22 = vmul.f32 0.70710677, %v18811_v28  ;;  %13420 = vpow2.f32 %v8710_v63  ;;  %v9651_v0 = vmul.f32 0.5, %v18692_v48 }
 0x74d   : > { %v9059_v15 = vsub.f32 1.0, %v8912_v36  ;;  %v8034_v7 = vadd.f32 0.2548296, %v7887_v57  ;;  %v7004_v62 = vmul.f32 1.0614054, %v18818_v1  ;;  %v13417_v5 = vpop.eup %13416  ;;  %v8478_v45 = vmul.f32 %v8331_v14, %v18780_v2  ;;  %v18840_v36 = vpop.f32.mrb[76].mxu0 }
 0x74e   : > { %v7591_v3 = vmul.f32 %v18787_v55, %v7444_v32  ;;  %v6565_v37 = vmul.f32 0.3275911, %v18816_v58  ;;  %v6419_v30 = vand.u32 2147483647, %v18824_v22  ;;  %v8712_v17 = vmul.f32 1.442695, %v8474_v19 }
 0x74f   : > { %v9353_v27 = vsub.f32 0.0, %v9059_v15  ;;  %v8181_v20 = vmul.f32 %v18767_v49, %v8034_v7  ;;  %v7151_v43 = vadd.f32 -1.4531521, %v7004_v62  ;;  %v18838_v42 = vadd.f32 %v18348_v10, %v16492_v25  ;;  %v18846_v10 = vpop.f32.mrb[77].mxu0 }
 0x750   : > { %v7738_v50 = vadd.f32 -0.28449672, %v7591_v3  ;;  %v6712_v47 = vadd.f32 1.0, %v6565_v37  ;;  %v6566_v18 = vmul.f32 0.3275911, %v6419_v30  ;;  %v18842_v49 = vpop.eup %13418  ;;  %vm9210_vm12 = vcmp.ge.f32.partialorder %v18699_v6, 0.0 }
 0x751   : > { %v9500_v63 = vsel %vm9206_vm11, %v9059_v15, %v9353_v27  ;;  %v8916_v48 = vmul.f32 %v13417_v5, %v8181_v20  ;;  %v7298_v9 = vmul.f32 %v18818_v1, %v7151_v43  ;;  %v7008_v14 = vmul.f32 1.0614054, %v18842_v49 }
 0x752   : > { %v9794_v57 = vadd.f32 1.0, %v9500_v63  ;;  %v7885_v19 = vmul.f32 %v18787_v55, %v7738_v50  ;;  %13422 = vrcp.f32 %v6712_v47  ;;  %v6713_v2 = vadd.f32 1.0, %v6566_v18 }
 0x753   : > { %v9063_v32 = vsub.f32 1.0, %v8916_v48  ;;  %v7445_v11 = vadd.f32 1.4214138, %v7298_v9  ;;  %13424 = vpow2.f32 %v8712_v17  ;;  %v8720_v62 = vmul.f32 1.442695, %v8478_v45 }
 0x754   : > { %v9941_v15 = vmul.f32 %v9794_v57, %v9647_v4  ;;  %v8032_v7 = vadd.f32 0.2548296, %v7885_v19  ;;  %13426 = vrcp.f32 %v6713_v2  ;;  %v7155_v37 = vadd.f32 -1.4531521, %v7008_v14 }
 0x755   : > { %v9357_v5 = vsub.f32 0.0, %v9063_v32  ;;  %v7592_v3 = vmul.f32 %v18818_v1, %v7445_v11  ;;  %v18850_v27 = vmul.f32 0.70710677, %v18838_v42  ;;  %v8329_v43 = vsub.f32 0.0, %v18816_v58 }
 0x756   : > { %10088 = vst [vmem:[%s16725_s9 + $0x2c0] sm:$0xff] %v9941_v15  ;;  %v8179_v20 = vmul.f32 %v18787_v55, %v8032_v7  ;;  %v18858_v4 = vadd.f32 %v18374_v46, %v16494_v26  ;;  %v13421_v17 = vpop.eup %13420  ;;  %v7302_v47 = vmul.f32 %v18842_v49, %v7155_v37  ;;  %vm9208_vm13 = vcmp.ge.f32.partialorder %v18719_v8, 0.0 }
 0x757   : > { %v9504_v50 = vsel %vm9210_vm12, %v9063_v32, %v9357_v5  ;;  %v7739_v45 = vadd.f32 -0.28449672, %v7592_v3  ;;  %v18862_v18 = vand.u32 2147483647, %v18850_v27  ;;  %v8330_v6 = vsub.f32 0.0, %v6419_v30 }
 0x758   : > { %v9798_v63 = vadd.f32 1.0, %v9504_v50  ;;  %v8914_v48 = vmul.f32 %v13421_v17, %v8179_v20  ;;  %v7449_v9 = vadd.f32 1.4214138, %v7302_v47  ;;  %13428 = vpow2.f32 %v8720_v62 }
 0x759   : > { %v7886_v55 = vmul.f32 %v18818_v1, %v7739_v45  ;;  %v6570_v46 = vmul.f32 0.3275911, %v18862_v18  ;;  %v8476_v2 = vmul.f32 %v8329_v43, %v18816_v58  ;;  %v18869_v32 = vmul.f32 0.70710677, %v18858_v4 }
 0x75a   : > { %v9945_v57 = vmul.f32 %v9798_v63, %v9651_v0  ;;  %v9061_v19 = vsub.f32 1.0, %v8914_v48  ;;  %v9649_v11 = vmul.f32 0.5, %v18703_v59  ;;  %v7596_v15 = vmul.f32 %v18842_v49, %v7449_v9 }
 0x75b   : > { %v8033_v14 = vadd.f32 0.2548296, %v7886_v55  ;;  %v6717_v7 = vadd.f32 1.0, %v6570_v46  ;;  %v9650_v62 = vmul.f32 0.5, %v18746_v34  ;;  %v8477_v37 = vmul.f32 %v8330_v6, %v6419_v30 }
 0x75c   : > { %v18873_v5 = vpop.eup %13422  ;;  %10092 = vst [vmem:[%s16725_s9 + $0x2e0] sm:$0xff] %v9945_v57  ;;  %v9355_v3 = vsub.f32 0.0, %v9061_v19  ;;  %v6421_v0 = vand.u32 2147483647, %v18869_v32  ;;  %v7743_v43 = vadd.f32 -0.28449672, %v7596_v15  ;;  %v18886_v34 = vadd.f32 %v18388_v24, %v16496_v13 }
 0x75d   : > { %v13425_v20 = vpop.eup %13424  ;;  %v8180_v58 = vmul.f32 %v18818_v1, %v8033_v14  ;;  %v7006_v17 = vmul.f32 1.0614054, %v18873_v5  ;;  %13430 = vrcp.f32 %v6717_v7  ;;  %v8716_v45 = vmul.f32 1.442695, %v8476_v2 }
 0x75e   : > { %v18880_v59 = vpop.eup %13426  ;;  %v9502_v50 = vsel %vm9208_vm13, %v9061_v19, %v9355_v3  ;;  %v6568_v47 = vmul.f32 0.3275911, %v6421_v0  ;;  %v7890_v48 = vmul.f32 %v18842_v49, %v7743_v43  ;;  %vm9209_vm14 = vcmp.ge.f32.partialorder %v18750_v16, 0.0 }
 0x75f   : > { %v9796_v30 = vadd.f32 1.0, %v9502_v50  ;;  %v8915_v63 = vmul.f32 %v13425_v20, %v8180_v58  ;;  %v7153_v1 = vadd.f32 -1.4531521, %v7006_v17  ;;  %v7007_v6 = vmul.f32 1.0614054, %v18880_v59  ;;  %v18900_v20 = vpop.f32.mrb[78].mxu1 }
 0x760   : > { %v8718_v55 = vmul.f32 1.442695, %v8477_v37  ;;  %v6715_v9 = vadd.f32 1.0, %v6568_v47  ;;  %v8037_v57 = vadd.f32 0.2548296, %v7890_v48  ;;  %vm9213_vm15 = vcmp.ge.f32.partialorder %v18773_v23, 0.0 }
 0x761   : > { %v9943_v8 = vmul.f32 %v9796_v30, %v9649_v11  ;;  %v9062_v46 = vsub.f32 1.0, %v8915_v63  ;;  %v7300_v19 = vmul.f32 %v18873_v5, %v7153_v1  ;;  %v7154_v24 = vadd.f32 -1.4531521, %v7007_v6  ;;  %v18902_v58 = vpop.f32.mrb[78].mxu0  ;;  %v11596_v47 = vpop.f32.mrb[79].mxu1 }
 0x762   : > { %v8334_v2 = vsub.f32 0.0, %v18862_v18  ;;  %13432 = vrcp.f32 %v6715_v9  ;;  %v18895_v14 = vmul.f32 0.70710677, %v18886_v34  ;;  %v13429_v15 = vpop.eup %13428  ;;  %v8184_v3 = vmul.f32 %v18842_v49, %v8037_v57 }
 0x763   : > { %10090 = vst [vmem:[%s16725_s9 + $0x2d0] sm:$0xff] %v9943_v8  ;;  %v9356_v7 = vsub.f32 0.0, %v9062_v46  ;;  %v9654_v11 = vmul.f32 0.5, %v18765_v56  ;;  %v7447_v37 = vadd.f32 1.4214138, %v7300_v19  ;;  %13434 = vpow2.f32 %v8716_v45 }
 0x764   : > { %v7301_v43 = vmul.f32 %v18880_v59, %v7154_v24  ;;  %v8332_v17 = vsub.f32 0.0, %v6421_v0  ;;  %v18906_v50 = vand.u32 2147483647, %v18895_v14  ;;  %v8919_v63 = vmul.f32 %v13429_v15, %v8184_v3 }
 0x765   : > { %v9503_v30 = vsel %vm9209_vm14, %v9062_v46, %v9356_v7  ;;  %v7594_v49 = vmul.f32 %v18873_v5, %v7447_v37  ;;  %v18913_v56 = vadd.f32 %v18425_v31, %v16492_v25  ;;  %v8481_v45 = vmul.f32 %v8334_v2, %v18862_v18 }
 0x766   : > { %v9797_v48 = vadd.f32 1.0, %v9503_v30  ;;  %v7448_v1 = vadd.f32 1.4214138, %v7301_v43  ;;  %v6569_v6 = vmul.f32 0.3275911, %v18906_v50  ;;  %v9066_v8 = vsub.f32 1.0, %v8919_v63 }
 0x767   : > { %v18917_v9 = vpop.eup %13430  ;;  %v7741_v57 = vadd.f32 -0.28449672, %v7594_v49  ;;  %13436 = vpow2.f32 %v8718_v55  ;;  %v18920_v16 = vmul.f32 0.70710677, %v18913_v56  ;;  %v8479_v18 = vmul.f32 %v8332_v17, %v6421_v0 }
 0x768   : > { %v9944_v46 = vmul.f32 %v9797_v48, %v9650_v62  ;;  %v7595_v19 = vmul.f32 %v18880_v59, %v7448_v1  ;;  %v7011_v31 = vmul.f32 1.0614054, %v18917_v9  ;;  %v6716_v24 = vadd.f32 1.0, %v6569_v6 }
 0x769   : > { %v9360_v15 = vsub.f32 0.0, %v9066_v8  ;;  %v7888_v7 = vmul.f32 %v18873_v5, %v7741_v57  ;;  %v18926_v2 = vand.u32 2147483647, %v18920_v16  ;;  %v8726_v55 = vmul.f32 1.442695, %v8481_v45 }
 0x76a   : > { %10091 = vst [vmem:[%s16725_s9 + $0x2d8] sm:$0xff] %v9944_v46  ;;  %v7742_v3 = vadd.f32 -0.28449672, %v7595_v19  ;;  %v7158_v37 = vadd.f32 -1.4531521, %v7011_v31  ;;  %13438 = vrcp.f32 %v6716_v24  ;;  %v9652_v47 = vmul.f32 0.5, %v18796_v60 }
 0x76b   : > { %v9507_v62 = vsel %vm9213_vm15, %v9066_v8, %v9360_v15  ;;  %v8035_v43 = vadd.f32 0.2548296, %v7888_v7  ;;  %v6573_v30 = vmul.f32 0.3275911, %v18926_v2  ;;  %vm9211_vm0 = vcmp.ge.f32.partialorder %v18805_v53, 0.0  ;;  %v18943_v19 = vpop.f32.mrb[79].mxu0 }
 0x76c   : > { %v18933_v63 = vpop.eup %13432  ;;  %v9801_v49 = vadd.f32 1.0, %v9507_v62  ;;  %v7889_v0 = vmul.f32 %v18880_v59, %v7742_v3  ;;  %v18938_v17 = vmul.f32 0.5, %v18811_v28  ;;  %v7305_v48 = vmul.f32 %v18917_v9, %v7158_v37 }
 0x76d   : > { %v8182_v23 = vmul.f32 %v18873_v5, %v8035_v43  ;;  %v7009_v1 = vmul.f32 1.0614054, %v18933_v63  ;;  %v8722_v60 = vmul.f32 1.442695, %v8479_v18  ;;  %v6720_v45 = vadd.f32 1.0, %v6573_v30  ;;  %v13435_v6 = vpop.eup %13434  ;;  %v18968_v30 = vpop.f32.mrb[80].mxu1 }
 0x76e   : > { %v9948_v8 = vmul.f32 %v9801_v49, %v9654_v11  ;;  %v8036_v57 = vadd.f32 0.2548296, %v7889_v0  ;;  %v7452_v46 = vadd.f32 1.4214138, %v7305_v48  ;;  %13440 = vpow2.f32 %v8726_v55 }
 0x76f   : > { %v8917_v31 = vmul.f32 %v13435_v6, %v8182_v23  ;;  %v7156_v24 = vadd.f32 -1.4531521, %v7009_v1  ;;  %13442 = vrcp.f32 %v6720_v45  ;;  %v18947_v28 = vadd.f32 %v18450_v12, %v16494_v26  ;;  %v11599_v6 = vpop.f32.mrb[81].mxu1 }
 0x770   : > { %10095 = vst [vmem:[%s16725_s9 + $0x2f8] sm:$0xff] %v9948_v8  ;;  %v8183_v5 = vmul.f32 %v18880_v59, %v8036_v57  ;;  %v7599_v15 = vmul.f32 %v18917_v9, %v7452_v46  ;;  %v8333_v7 = vsub.f32 0.0, %v18906_v50  ;;  %v18955_v11 = vadd.f32 %v18480_v44, %v16496_v13 }
 0x771   : > { %v13437_v18 = vpop.eup %13436  ;;  %v9064_v3 = vsub.f32 1.0, %v8917_v31  ;;  %vm9212_vm1 = vcmp.ge.f32.partialorder %v18824_v22, 0.0  ;;  %v7303_v37 = vmul.f32 %v18933_v63, %v7156_v24  ;;  %v18960_v12 = vmul.f32 0.70710677, %v18947_v28 }
 0x772   : > { %v8918_v55 = vmul.f32 %v13437_v18, %v8183_v5  ;;  %v7746_v62 = vadd.f32 -0.28449672, %v7599_v15  ;;  %v18963_v59 = vmul.f32 0.5, %v18838_v42  ;;  %v18966_v43 = vmul.f32 0.70710677, %v18955_v11 }
 0x773   : > { %v9358_v44 = vsub.f32 0.0, %v9064_v3  ;;  %v7450_v49 = vadd.f32 1.4214138, %v7303_v37  ;;  %v8337_v0 = vsub.f32 0.0, %v18926_v2  ;;  %v18972_v48 = vand.u32 2147483647, %v18960_v12 }
 0x774   : > { %v18974_v23 = vpop.eup %13438  ;;  %v9065_v1 = vsub.f32 1.0, %v8918_v55  ;;  %v7893_v45 = vmul.f32 %v18917_v9, %v7746_v62  ;;  %13444 = vpow2.f32 %v8722_v60  ;;  %v8480_v42 = vmul.f32 %v8333_v7, %v18906_v50 }
 0x775   : > { %v9505_v8 = vsel %vm9211_vm0, %v9064_v3, %v9358_v44  ;;  %v7597_v57 = vmul.f32 %v18933_v63, %v7450_v49  ;;  %v7010_v46 = vmul.f32 1.0614054, %v18974_v23  ;;  %v6571_v31 = vmul.f32 0.3275911, %v18972_v48  ;;  %v18991_v49 = vpop.f32.mrb[80].mxu0 }
 0x776   : > { %v9799_v24 = vadd.f32 1.0, %v9505_v8  ;;  %v9359_v5 = vsub.f32 0.0, %v9065_v1  ;;  %v8040_v15 = vadd.f32 0.2548296, %v7893_v45  ;;  %v18984_v18 = vand.u32 2147483647, %v18966_v43 }
 0x777   : > { %vm9216_vm2 = vcmp.ge.f32.partialorder %v18850_v27, 0.0  ;;  %v7744_v50 = vadd.f32 -0.28449672, %v7597_v57  ;;  %v7157_v60 = vadd.f32 -1.4531521, %v7010_v46  ;;  %v8484_v53 = vmul.f32 %v8337_v0, %v18926_v2 }
 0x778   : > { %v6718_v7 = vadd.f32 1.0, %v6571_v31  ;;  %v13441_v3 = vpop.eup %13440  ;;  %v9946_v37 = vmul.f32 %v9799_v24, %v9652_v47  ;;  %v9506_v55 = vsel %vm9212_vm1, %v9065_v1, %v9359_v5  ;;  %v8187_v62 = vmul.f32 %v18917_v9, %v8040_v15 }
 0x779   : > { %v8724_v44 = vmul.f32 1.442695, %v8480_v42  ;;  %v18993_v45 = vpop.eup %13442  ;;  %v9800_v6 = vadd.f32 1.0, %v9506_v55  ;;  %v7891_v8 = vmul.f32 %v18933_v63, %v7744_v50  ;;  %v7304_v57 = vmul.f32 %v18974_v23, %v7157_v60 }
 0x77a   : > { %13446 = vrcp.f32 %v6718_v7  ;;  %10093 = vst [vmem:[%s16725_s9 + $0x2e8] sm:$0xff] %v9946_v37  ;;  %v8922_v2 = vmul.f32 %v13441_v3, %v8187_v62  ;;  %v18999_v47 = vmul.f32 0.5, %v18858_v4  ;;  %v7014_v22 = vmul.f32 1.0614054, %v18993_v45 }
 0x77b   : > { %v6572_v9 = vmul.f32 0.3275911, %v18984_v18  ;;  %v9947_v0 = vmul.f32 %v9800_v6, %v18938_v17  ;;  %v8038_v1 = vadd.f32 0.2548296, %v7891_v8  ;;  %v7451_v42 = vadd.f32 1.4214138, %v7304_v57 }
 0x77c   : > { %v8732_v46 = vmul.f32 1.442695, %v8484_v53  ;;  %v9069_v31 = vsub.f32 1.0, %v8922_v2  ;;  %13448 = vpow2.f32 %v8724_v44  ;;  %v7161_v24 = vadd.f32 -1.4531521, %v7014_v22  ;;  %v19024_v8 = vpop.f32.mrb[81].mxu0 }
 0x77d   : > { %v6719_v5 = vadd.f32 1.0, %v6572_v9  ;;  %10094 = vst [vmem:[%s16725_s9 + $0x2f0] sm:$0xff] %v9947_v0  ;;  %v8185_v15 = vmul.f32 %v18933_v63, %v8038_v1  ;;  %vm9214_vm3 = vcmp.ge.f32.partialorder %v18869_v32, 0.0  ;;  %v7598_v4 = vmul.f32 %v18974_v23, %v7451_v42 }
 0x77e   : > { %v8335_v50 = vsub.f32 0.0, %v18972_v48  ;;  %v13445_v60 = vpop.eup %13444  ;;  %v9363_v7 = vsub.f32 0.0, %v9069_v31  ;;  %v7308_v17 = vmul.f32 %v18993_v45, %v7161_v24  ;;  %v19012_v53 = vadd.f32 %v18529_v52, %v16492_v25 }
 0x77f   : > { %13450 = vrcp.f32 %v6719_v5  ;;  %v8920_v3 = vmul.f32 %v13445_v60, %v8185_v15  ;;  %v7745_v37 = vadd.f32 -0.28449672, %v7598_v4  ;;  %v19016_v63 = vadd.f32 %v18541_v29, %v16494_v26 }
 0x780   : > { %13452 = vpow2.f32 %v8732_v46  ;;  %v9510_v55 = vsel %vm9216_vm2, %v9069_v31, %v9363_v7  ;;  %v7455_v62 = vadd.f32 1.4214138, %v7308_v17  ;;  %v8336_v44 = vsub.f32 0.0, %v18984_v18 }
 0x781   : > { %v19022_v6 = vmul.f32 0.70710677, %v19012_v53  ;;  %v9804_v52 = vadd.f32 1.0, %v9510_v55  ;;  %v9067_v57 = vsub.f32 1.0, %v8920_v3  ;;  %v7892_v2 = vmul.f32 %v18974_v23, %v7745_v37  ;;  %v19053_v55 = vpop.f32.mrb[82].mxu1 }
 0x782   : > { %v19028_v22 = vmul.f32 0.70710677, %v19016_v63  ;;  %v19031_v29 = vmul.f32 0.5, %v18886_v34  ;;  %v7602_v27 = vmul.f32 %v18993_v45, %v7455_v62  ;;  %v8482_v9 = vmul.f32 %v8335_v50, %v18972_v48 }
 0x783   : > { %v19036_v0 = vand.u32 2147483647, %v19022_v6  ;;  %v9951_v42 = vmul.f32 %v9804_v52, %v18963_v59  ;;  %v9361_v46 = vsub.f32 0.0, %v9067_v57  ;;  %v8039_v31 = vadd.f32 0.2548296, %v7892_v2 }
 0x784   : > { %v19038_v1 = vpop.eup %13446  ;;  %v19042_v24 = vand.u32 2147483647, %v19028_v22  ;;  %v7749_v5 = vadd.f32 -0.28449672, %v7602_v27  ;;  %v8483_v50 = vmul.f32 %v8336_v44, %v18984_v18  ;;  %v8728_v52 = vmul.f32 1.442695, %v8482_v9 }
 0x785   : > { %v7012_v34 = vmul.f32 1.0614054, %v19038_v1  ;;  %v6576_v15 = vmul.f32 0.3275911, %v19036_v0  ;;  %10098 = vst [vmem:[%s16725_s9 + $0x310] sm:$0xff] %v9951_v42  ;;  %v9508_v48 = vsel %vm9214_vm3, %v9067_v57, %v9361_v46  ;;  %v8186_v4 = vmul.f32 %v18974_v23, %v8039_v31  ;;  %v11602_v23 = vpop.f32.mrb[83].mxu1 }
 0x786   : > { %v6574_v59 = vmul.f32 0.3275911, %v19042_v24  ;;  %v13449_v60 = vpop.eup %13448  ;;  %v9802_v7 = vadd.f32 1.0, %v9508_v48  ;;  %v7896_v17 = vmul.f32 %v18993_v45, %v7749_v5  ;;  %v19057_v32 = vadd.f32 %v18562_v35, %v16496_v13  ;;  %v19065_v31 = vpop.f32.mrb[82].mxu0 }
 0x787   : > { %v7159_v3 = vadd.f32 -1.4531521, %v7012_v34  ;;  %v6723_v37 = vadd.f32 1.0, %v6576_v15  ;;  %v8921_v62 = vmul.f32 %v13449_v60, %v8186_v4  ;;  %vm9215_vm4 = vcmp.ge.f32.partialorder %v18895_v14, 0.0 }
 0x788   : > { %v6721_v2 = vadd.f32 1.0, %v6574_v59  ;;  %v9949_v44 = vmul.f32 %v9802_v7, %v18999_v47  ;;  %v8043_v57 = vadd.f32 0.2548296, %v7896_v17  ;;  %v9660_v5 = vmul.f32 0.5, %v18913_v56 }
 0x789   : > { %v19059_v18 = vpop.eup %13450  ;;  %v7306_v27 = vmul.f32 %v19038_v1, %v7159_v3  ;;  %13454 = vrcp.f32 %v6723_v37  ;;  %v9068_v46 = vsub.f32 1.0, %v8921_v62  ;;  %v8730_v47 = vmul.f32 1.442695, %v8483_v50 }
 0x78a   : > { %v13453_v42 = vpop.eup %13452  ;;  %v7013_v9 = vmul.f32 1.0614054, %v19059_v18  ;;  %13456 = vrcp.f32 %v6721_v2  ;;  %10096 = vst [vmem:[%s16725_s9 + $0x300] sm:$0xff] %v9949_v44  ;;  %v8190_v35 = vmul.f32 %v18993_v45, %v8043_v57  ;;  %v19071_v4 = vmul.f32 0.70710677, %v19057_v32 }
 0x78b   : > { %v7453_v34 = vadd.f32 1.4214138, %v7306_v27  ;;  %v9362_v15 = vsub.f32 0.0, %v9068_v46  ;;  %13458 = vpow2.f32 %v8728_v52  ;;  %vm9219_vm5 = vcmp.ge.f32.partialorder %v18920_v16, 0.0 }
 0x78c   : > { %v7160_v48 = vadd.f32 -1.4531521, %v7013_v9  ;;  %v8925_v59 = vmul.f32 %v13453_v42, %v8190_v35  ;;  %v19076_v7 = vmul.f32 0.5, %v18947_v28  ;;  %v8340_v50 = vsub.f32 0.0, %v19036_v0 }
 0x78d   : > { %v7600_v60 = vmul.f32 %v19038_v1, %v7453_v34  ;;  %v9509_v45 = vsel %vm9215_vm4, %v9068_v46, %v9362_v15  ;;  %v19083_v17 = vand.u32 2147483647, %v19071_v4  ;;  %v8338_v52 = vsub.f32 0.0, %v19042_v24  ;;  %v19111_v15 = vpop.f32.mrb[83].mxu0 }
 0x78e   : > { %v7307_v56 = vmul.f32 %v19059_v18, %v7160_v48  ;;  %v9803_v3 = vadd.f32 1.0, %v9509_v45  ;;  %v9072_v37 = vsub.f32 1.0, %v8925_v59  ;;  %13460 = vpow2.f32 %v8730_v47 }
 0x78f   : > { %v7747_v62 = vadd.f32 -0.28449672, %v7600_v60  ;;  %v6575_v28 = vmul.f32 0.3275911, %v19083_v17  ;;  %v19089_v14 = vadd.f32 %v18584_v51, %v16492_v25  ;;  %v19095_v27 = vadd.f32 %v18602_v38, %v16494_v26 }
 0x790   : > { %v7454_v2 = vadd.f32 1.4214138, %v7307_v56  ;;  %v9950_v23 = vmul.f32 %v9803_v3, %v19031_v29  ;;  %v9366_v44 = vsub.f32 0.0, %v9072_v37  ;;  %v8487_v46 = vmul.f32 %v8340_v50, %v19036_v0 }
 0x791   : > { %v7894_v57 = vmul.f32 %v19038_v1, %v7747_v62  ;;  %v6722_v9 = vadd.f32 1.0, %v6575_v28  ;;  %v19100_v35 = vmul.f32 0.70710677, %v19089_v14  ;;  %v8485_v47 = vmul.f32 %v8338_v52, %v19042_v24 }
 0x792   : > { %v7601_v42 = vmul.f32 %v19059_v18, %v7454_v2  ;;  %10097 = vst [vmem:[%s16725_s9 + $0x308] sm:$0xff] %v9950_v23  ;;  %v9513_v51 = vsel %vm9219_vm5, %v9072_v37, %v9366_v44  ;;  %v19109_v38 = vmul.f32 0.70710677, %v19095_v27  ;;  %vm9217_vm6 = vcmp.ge.f32.partialorder %v18960_v12, 0.0 }
 0x793   : > { %v19102_v34 = vpop.eup %13454  ;;  %v8041_v29 = vadd.f32 0.2548296, %v7894_v57  ;;  %v9807_v0 = vadd.f32 1.0, %v9513_v51  ;;  %13462 = vrcp.f32 %v6722_v9  ;;  %v6432_v24 = vand.u32 2147483647, %v19100_v35 }
 0x794   : > { %v19113_v48 = vpop.eup %13456  ;;  %v7748_v59 = vadd.f32 -0.28449672, %v7601_v42  ;;  %v7017_v60 = vmul.f32 1.0614054, %v19102_v34  ;;  %v8738_v62 = vmul.f32 1.442695, %v8487_v46 }
 0x795   : > { %v8188_v45 = vmul.f32 %v19038_v1, %v8041_v29  ;;  %v7015_v16 = vmul.f32 1.0614054, %v19113_v48  ;;  %v13459_v56 = vpop.eup %13458  ;;  %v9954_v50 = vmul.f32 %v9807_v0, %v9660_v5  ;;  %v19122_v2 = vmul.f32 0.5, %v18955_v11 }
 0x796   : > { %v7895_v3 = vmul.f32 %v19059_v18, %v7748_v59  ;;  %v7164_v37 = vadd.f32 -1.4531521, %v7017_v60  ;;  %v6579_v23 = vmul.f32 0.3275911, %v6432_v24  ;;  %v8734_v57 = vmul.f32 1.442695, %v8485_v47 }
 0x797   : > { %v8923_v52 = vmul.f32 %v13459_v56, %v8188_v45  ;;  %v7162_v28 = vadd.f32 -1.4531521, %v7015_v16  ;;  %10101 = vst [vmem:[%s16725_s9 + $0x328] sm:$0xff] %v9954_v50  ;;  %v19127_v42 = vand.u32 2147483647, %v19109_v38  ;;  %vm9218_vm7 = vcmp.ge.f32.partialorder %v18966_v43, 0.0 }
 0x798   : > { %v8042_v1 = vadd.f32 0.2548296, %v7895_v3  ;;  %v7311_v44 = vmul.f32 %v19102_v34, %v7164_v37  ;;  %v8339_v46 = vsub.f32 0.0, %v19083_v17  ;;  %v6726_v51 = vadd.f32 1.0, %v6579_v23  ;;  %v13461_v11 = vpop.eup %13460  ;;  %v19134_v60 = vpop.f32.mrb[84].mxu1 }
 0x799   : > { %v9070_v9 = vsub.f32 1.0, %v8923_v52  ;;  %v7309_v5 = vmul.f32 %v19113_v48, %v7162_v28  ;;  %13464 = vpow2.f32 %v8738_v62  ;;  %v6577_v59 = vmul.f32 0.3275911, %v19127_v42  ;;  %v11605_v56 = vpop.f32.mrb[85].mxu1 }
 0x79a   : > { %v8189_v29 = vmul.f32 %v19059_v18, %v8042_v1  ;;  %v7458_v0 = vadd.f32 1.4214138, %v7311_v44  ;;  %13466 = vrcp.f32 %v6726_v51  ;;  %v8343_v16 = vsub.f32 0.0, %v6432_v24 }
 0x79b   : > { %v9364_v47 = vsub.f32 0.0, %v9070_v9  ;;  %v7456_v45 = vadd.f32 1.4214138, %v7309_v5  ;;  %13468 = vpow2.f32 %v8734_v57  ;;  %v6724_v37 = vadd.f32 1.0, %v6577_v59 }
 0x79c   : > { %v8924_v50 = vmul.f32 %v13461_v11, %v8189_v29  ;;  %v7605_v3 = vmul.f32 %v19102_v34, %v7458_v0  ;;  %v19140_v18 = vmul.f32 0.5, %v19012_v53  ;;  %v8486_v28 = vmul.f32 %v8339_v46, %v19083_v17 }
 0x79d   : > { %v9511_v52 = vsel %vm9217_vm6, %v9070_v9, %v9364_v47  ;;  %v7603_v62 = vmul.f32 %v19113_v48, %v7456_v45  ;;  %v19144_v23 = vpop.eup %13462  ;;  %v19147_v51 = vmul.f32 0.5, %v19016_v63  ;;  %v8490_v9 = vmul.f32 %v8343_v16, %v6432_v24 }
 0x79e   : > { %v9805_v1 = vadd.f32 1.0, %v9511_v52  ;;  %v9071_v44 = vsub.f32 1.0, %v8924_v50  ;;  %v7752_v5 = vadd.f32 -0.28449672, %v7605_v3  ;;  %v7016_v12 = vmul.f32 1.0614054, %v19144_v23 }
 0x79f   : > { %v7750_v57 = vadd.f32 -0.28449672, %v7603_v62  ;;  %13470 = vrcp.f32 %v6724_v37  ;;  %v19154_v17 = vadd.f32 %v18640_v41, %v16496_v13  ;;  %v8736_v59 = vmul.f32 1.442695, %v8486_v28  ;;  %v19168_v41 = vpop.f32.mrb[84].mxu0 }
 0x7a0   : > { %v9952_v53 = vmul.f32 %v9805_v1, %v19076_v7  ;;  %v9365_v11 = vsub.f32 0.0, %v9071_v44  ;;  %v7899_v29 = vmul.f32 %v19102_v34, %v7752_v5  ;;  %v7163_v0 = vadd.f32 -1.4531521, %v7016_v12 }
 0x7a1   : > { %v7897_v46 = vmul.f32 %v19113_v48, %v7750_v57  ;;  %v19159_v63 = vadd.f32 %v18667_v39, %v16492_v25  ;;  %v8341_v47 = vsub.f32 0.0, %v19127_v42  ;;  %v19166_v45 = vmul.f32 0.70710677, %v19154_v17 }
 0x7a2   : > { %10099 = vst [vmem:[%s16725_s9 + $0x318] sm:$0xff] %v9952_v53  ;;  %v9512_v24 = vsel %vm9218_vm7, %v9071_v44, %v9365_v11  ;;  %v8046_v7 = vadd.f32 0.2548296, %v7899_v29  ;;  %vm9222_vm8 = vcmp.ge.f32.partialorder %v19022_v6, 0.0  ;;  %v7310_v50 = vmul.f32 %v19144_v23, %v7163_v0 }
 0x7a3   : > { %v9806_v16 = vadd.f32 1.0, %v9512_v24  ;;  %v8044_v56 = vadd.f32 0.2548296, %v7897_v46  ;;  %v19173_v39 = vmul.f32 0.70710677, %v19159_v63  ;;  %v13465_v43 = vpop.eup %13464  ;;  %vm9220_vm9 = vcmp.ge.f32.partialorder %v19028_v22, 0.0 }
 0x7a4   : > { %v8193_v3 = vmul.f32 %v19102_v34, %v8046_v7  ;;  %v8744_v37 = vmul.f32 1.442695, %v8490_v9  ;;  %v6431_v52 = vand.u32 2147483647, %v19166_v45  ;;  %v19178_v62 = vpop.eup %13466  ;;  %v7457_v44 = vadd.f32 1.4214138, %v7310_v50 }
 0x7a5   : > { %v9953_v28 = vmul.f32 %v9806_v16, %v19122_v2  ;;  %v8191_v1 = vmul.f32 %v19113_v48, %v8044_v56  ;;  %v6435_v5 = vand.u32 2147483647, %v19173_v39  ;;  %v13469_v57 = vpop.eup %13468  ;;  %13472 = vpow2.f32 %v8736_v59  ;;  %v19189_v50 = vpop.f32.mrb[85].mxu0 }
 0x7a6   : > { %v8928_v12 = vmul.f32 %v13465_v43, %v8193_v3  ;;  %v7020_v53 = vmul.f32 1.0614054, %v19178_v62  ;;  %v6578_v34 = vmul.f32 0.3275911, %v6431_v52  ;;  %v7604_v9 = vmul.f32 %v19144_v23, %v7457_v44 }
 0x7a7   : > { %10100 = vst [vmem:[%s16725_s9 + $0x320] sm:$0xff] %v9953_v28  ;;  %v8926_v11 = vmul.f32 %v13469_v57, %v8191_v1  ;;  %v8488_v29 = vmul.f32 %v8341_v47, %v19127_v42  ;;  %v6582_v46 = vmul.f32 0.3275911, %v6435_v5  ;;  %13474 = vpow2.f32 %v8744_v37 }
 0x7a8   : > { %v9075_v0 = vsub.f32 1.0, %v8928_v12  ;;  %v7167_v2 = vadd.f32 -1.4531521, %v7020_v53  ;;  %v6725_v48 = vadd.f32 1.0, %v6578_v34  ;;  %v7751_v16 = vadd.f32 -0.28449672, %v7604_v9 }
 0x7a9   : > { %v19187_v24 = vpop.eup %13470  ;;  %v9073_v7 = vsub.f32 1.0, %v8926_v11  ;;  %v8342_v56 = vsub.f32 0.0, %v6431_v52  ;;  %v6729_v59 = vadd.f32 1.0, %v6582_v46  ;;  %v8346_v37 = vsub.f32 0.0, %v6435_v5 }
 0x7aa   : > { %v9369_v43 = vsub.f32 0.0, %v9075_v0  ;;  %v7314_v3 = vmul.f32 %v19178_v62, %v7167_v2  ;;  %v7018_v28 = vmul.f32 1.0614054, %v19187_v24  ;;  %13476 = vrcp.f32 %v6725_v48 }
 0x7ab   : > { %v9367_v42 = vsub.f32 0.0, %v9073_v7  ;;  %v7898_v47 = vmul.f32 %v19144_v23, %v7751_v16  ;;  %13478 = vrcp.f32 %v6729_v59  ;;  %v8740_v12 = vmul.f32 1.442695, %v8488_v29  ;;  %v19201_v59 = vpop.f32.mrb[86].mxu1 }
 0x7ac   : > { %v9516_v1 = vsel %vm9222_vm8, %v9075_v0, %v9369_v43  ;;  %v7461_v44 = vadd.f32 1.4214138, %v7314_v3  ;;  %v7165_v57 = vadd.f32 -1.4531521, %v7018_v28  ;;  %v8489_v9 = vmul.f32 %v8342_v56, %v6431_v52  ;;  %v11608_v52 = vpop.f32.mrb[87].mxu1  ;;  %v20997_v3 = vld [vmem:[#allocation18_spill] sm:$0xff] }
 0x7ad   : > { %v9810_v53 = vadd.f32 1.0, %v9516_v1  ;;  %v9514_v34 = vsel %vm9220_vm9, %v9073_v7, %v9367_v42  ;;  %v8045_v11 = vadd.f32 0.2548296, %v7898_v47  ;;  %v9662_v2 = vmul.f32 0.5, %v19057_v32  ;;  %v19239_v52 = vpop.f32.mrb[86].mxu0 }
 0x7ae   : > { %v9808_v46 = vadd.f32 1.0, %v9514_v34  ;;  %v7608_v48 = vmul.f32 %v19178_v62, %v7461_v44  ;;  %v7312_v16 = vmul.f32 %v19187_v24, %v7165_v57  ;;  %v8493_v0 = vmul.f32 %v8346_v37, %v6435_v5  ;;  %20998 = vst [vmem:[#allocation17_spill] sm:$0xff] %v19239_v52 }
 0x7af   : > { %v9957_v6 = vmul.f32 %v9810_v53, %v19140_v18  ;;  %v8192_v29 = vmul.f32 %v19144_v23, %v8045_v11  ;;  %v19207_v22 = vadd.f32 %v18705_v61, %v16494_v26  ;;  %v13473_v7 = vpop.eup %13472  ;;  %v19212_v28 = vadd.f32 %v20997_v3, %v16496_v13 }
 0x7b0   : > { %v9955_v32 = vmul.f32 %v9808_v46, %v19147_v51  ;;  %v7755_v56 = vadd.f32 -0.28449672, %v7608_v48  ;;  %v7459_v43 = vadd.f32 1.4214138, %v7312_v16  ;;  %13480 = vpow2.f32 %v8740_v12 }
 0x7b1   : > { %10104 = vst [vmem:[%s16725_s9 + $0x340] sm:$0xff] %v9957_v6  ;;  %v8927_v18 = vmul.f32 %v13473_v7, %v8192_v29  ;;  %v8742_v42 = vmul.f32 1.442695, %v8489_v9  ;;  %v19216_v23 = vmul.f32 0.70710677, %v19207_v22  ;;  %v13475_v5 = vpop.eup %13474  ;;  %vm9221_vm10 = vcmp.ge.f32.partialorder %v19071_v4, 0.0 }
 0x7b2   : > { %10102 = vst [vmem:[%s16725_s9 + $0x330] sm:$0xff] %v9955_v32  ;;  %v7902_v61 = vmul.f32 %v19178_v62, %v7755_v56  ;;  %v7606_v51 = vmul.f32 %v19187_v24, %v7459_v43  ;;  %v19223_v47 = vmul.f32 0.70710677, %v19212_v28  ;;  %v8750_v1 = vmul.f32 1.442695, %v8493_v0 }
 0x7b3   : > { %v9074_v37 = vsub.f32 1.0, %v8927_v18  ;;  %v6433_v44 = vand.u32 2147483647, %v19216_v23  ;;  %v19228_v57 = vadd.f32 %v18739_v33, %v16492_v25  ;;  %13482 = vpow2.f32 %v8742_v42 }
 0x7b4   : > { %v19230_v12 = vpop.eup %13476  ;;  %v8049_v53 = vadd.f32 0.2548296, %v7902_v61  ;;  %v7753_v34 = vadd.f32 -0.28449672, %v7606_v51  ;;  %v6434_v11 = vand.u32 2147483647, %v19223_v47 }
 0x7b5   : > { %v19233_v9 = vpop.eup %13478  ;;  %v9368_v46 = vsub.f32 0.0, %v9074_v37  ;;  %v7019_v48 = vmul.f32 1.0614054, %v19230_v12  ;;  %v6580_v16 = vmul.f32 0.3275911, %v6433_v44  ;;  %v8344_v51 = vsub.f32 0.0, %v6433_v44 }
 0x7b6   : > { %v8196_v6 = vmul.f32 %v19178_v62, %v8049_v53  ;;  %v7900_v29 = vmul.f32 %v19187_v24, %v7753_v34  ;;  %v7023_v33 = vmul.f32 1.0614054, %v19233_v9  ;;  %v6581_v0 = vmul.f32 0.3275911, %v6434_v11 }
 0x7b7   : > { %v9515_v7 = vsel %vm9221_vm10, %v9074_v37, %v9368_v46  ;;  %v7166_v32 = vadd.f32 -1.4531521, %v7019_v48  ;;  %v6727_v56 = vadd.f32 1.0, %v6580_v16  ;;  %v19244_v43 = vmul.f32 0.70710677, %v19228_v57  ;;  %v19251_v16 = vpop.f32.mrb[87].mxu0 }
 0x7b8   : > { %v9809_v3 = vadd.f32 1.0, %v9515_v7  ;;  %v8931_v18 = vmul.f32 %v13475_v5, %v8196_v6  ;;  %v8047_v42 = vadd.f32 0.2548296, %v7900_v29  ;;  %v7170_v62 = vadd.f32 -1.4531521, %v7023_v33 }
 0x7b9   : > { %v7313_v61 = vmul.f32 %v19230_v12, %v7166_v32  ;;  %13484 = vrcp.f32 %v6727_v56  ;;  %v6728_v53 = vadd.f32 1.0, %v6581_v0  ;;  %vm9225_vm11 = vcmp.ge.f32.partialorder %v19100_v35, 0.0 }
 0x7ba   : > { %v9956_v34 = vmul.f32 %v9809_v3, %v9662_v2  ;;  %v9078_v52 = vsub.f32 1.0, %v8931_v18  ;;  %v8194_v4 = vmul.f32 %v19187_v24, %v8047_v42  ;;  %v7317_v37 = vmul.f32 %v19233_v9, %v7170_v62  ;;  %v13481_v46 = vpop.eup %13480 }
 0x7bb   : > { %v9666_v48 = vmul.f32 0.5, %v19089_v14  ;;  %v7460_v5 = vadd.f32 1.4214138, %v7313_v61  ;;  %13486 = vpow2.f32 %v8750_v1  ;;  %v8491_v0 = vmul.f32 %v8344_v51, %v6433_v44 }
 0x7bc   : > { %10103 = vst [vmem:[%s16725_s9 + $0x338] sm:$0xff] %v9956_v34  ;;  %v9372_v6 = vsub.f32 0.0, %v9078_v52  ;;  %v8929_v29 = vmul.f32 %v13481_v46, %v8194_v4  ;;  %v7464_v33 = vadd.f32 1.4214138, %v7317_v37  ;;  %13488 = vrcp.f32 %v6728_v53 }
 0x7bd   : > { %v7607_v2 = vmul.f32 %v19230_v12, %v7460_v5  ;;  %v8345_v24 = vsub.f32 0.0, %v6434_v11  ;;  %v6438_v7 = vand.u32 2147483647, %v19244_v43  ;;  %v19259_v14 = vadd.f32 %v18755_v40, %v16494_v26  ;;  %v13483_v1 = vpop.eup %13482 }
 0x7be   : > { %v9519_v32 = vsel %vm9225_vm11, %v9078_v52, %v9372_v6  ;;  %v9076_v56 = vsub.f32 1.0, %v8929_v29  ;;  %v7611_v35 = vmul.f32 %v19233_v9, %v7464_v33  ;;  %vm9223_vm12 = vcmp.ge.f32.partialorder %v19109_v38, 0.0  ;;  %v19278_v29 = vpop.f32.mrb[88].mxu1 }
 0x7bf   : > { %v9813_v3 = vadd.f32 1.0, %v9519_v32  ;;  %v9664_v18 = vmul.f32 0.5, %v19095_v27  ;;  %v7754_v42 = vadd.f32 -0.28449672, %v7607_v2  ;;  %v19264_v62 = vmul.f32 0.5, %v19154_v17 }
 0x7c0   : > { %v9370_v44 = vsub.f32 0.0, %v9076_v56  ;;  %v7758_v52 = vadd.f32 -0.28449672, %v7611_v35  ;;  %v6585_v61 = vmul.f32 0.3275911, %v6438_v7  ;;  %v8492_v40 = vmul.f32 %v8345_v24, %v6434_v11  ;;  %v11611_v35 = vpop.f32.mrb[89].mxu1 }
 0x7c1   : > { %v9960_v51 = vmul.f32 %v9813_v3, %v9666_v48  ;;  %v7901_v53 = vmul.f32 %v19230_v12, %v7754_v42  ;;  %v8746_v34 = vmul.f32 1.442695, %v8491_v0  ;;  %v19269_v38 = vmul.f32 0.70710677, %v19259_v14 }
 0x7c2   : > { %v9517_v4 = vsel %vm9223_vm12, %v9076_v56, %v9370_v44  ;;  %v7905_v37 = vmul.f32 %v19233_v9, %v7758_v52  ;;  %v6732_v46 = vadd.f32 1.0, %v6585_v61  ;;  %v8349_v6 = vsub.f32 0.0, %v6438_v7 }
 0x7c3   : > { %v19271_v27 = vpop.eup %13484  ;;  %10107 = vst [vmem:[%s16725_s9 + $0x358] sm:$0xff] %v9960_v51  ;;  %v9811_v5 = vadd.f32 1.0, %v9517_v4  ;;  %v8048_v17 = vadd.f32 0.2548296, %v7901_v53  ;;  %v19276_v48 = vadd.f32 %v18776_v21, %v16496_v13  ;;  %v6436_v2 = vand.u32 2147483647, %v19269_v38 }
 0x7c4   : > { %v8052_v11 = vadd.f32 0.2548296, %v7905_v37  ;;  %v7021_v33 = vmul.f32 1.0614054, %v19271_v27  ;;  %13490 = vrcp.f32 %v6732_v46  ;;  %vm9224_vm13 = vcmp.ge.f32.partialorder %v19166_v45, 0.0 }
 0x7c5   : > { %v13487_v0 = vpop.eup %13486  ;;  %v9958_v24 = vmul.f32 %v9811_v5, %v9664_v18  ;;  %v8195_v32 = vmul.f32 %v19230_v12, %v8048_v17  ;;  %v8748_v56 = vmul.f32 1.442695, %v8492_v40  ;;  %v9669_v42 = vmul.f32 0.5, %v19159_v63  ;;  %v19293_v12 = vpop.f32.mrb[88].mxu0 }
 0x7c6   : > { %v19284_v3 = vpop.eup %13488  ;;  %v8199_v21 = vmul.f32 %v19233_v9, %v8052_v11  ;;  %v7168_v44 = vadd.f32 -1.4531521, %v7021_v33  ;;  %v6583_v52 = vmul.f32 0.3275911, %v6436_v2  ;;  %v8496_v53 = vmul.f32 %v8349_v6, %v6438_v7 }
 0x7c7   : > { %10105 = vst [vmem:[%s16725_s9 + $0x348] sm:$0xff] %v9958_v24  ;;  %v8930_v61 = vmul.f32 %v13483_v1, %v8195_v32  ;;  %v7022_v51 = vmul.f32 1.0614054, %v19284_v3  ;;  %v19291_v18 = vmul.f32 0.70710677, %v19276_v48  ;;  %13492 = vpow2.f32 %v8746_v34 }
 0x7c8   : > { %v8934_v40 = vmul.f32 %v13487_v0, %v8199_v21  ;;  %v7315_v4 = vmul.f32 %v19271_v27, %v7168_v44  ;;  %v6730_v37 = vadd.f32 1.0, %v6583_v52  ;;  %13494 = vpow2.f32 %v8748_v56 }
 0x7c9   : > { %v9077_v9 = vsub.f32 1.0, %v8930_v61  ;;  %v7169_v46 = vadd.f32 -1.4531521, %v7022_v51  ;;  %v6437_v63 = vand.u32 2147483647, %v19291_v18  ;;  %vm9228_vm14 = vcmp.ge.f32.partialorder %v19173_v39, 0.0 }
 0x7ca   : > { %v9081_v5 = vsub.f32 1.0, %v8934_v40  ;;  %v7462_v1 = vadd.f32 1.4214138, %v7315_v4  ;;  %13496 = vrcp.f32 %v6730_v37  ;;  %v8756_v6 = vmul.f32 1.442695, %v8496_v53  ;;  %v19315_v4 = vpop.f32.mrb[89].mxu0 }
 0x7cb   : > { %v9371_v7 = vsub.f32 0.0, %v9077_v9  ;;  %v7316_v17 = vmul.f32 %v19284_v3, %v7169_v46  ;;  %v6584_v11 = vmul.f32 0.3275911, %v6437_v63  ;;  %v8347_v34 = vsub.f32 0.0, %v6436_v2 }
 0x7cc   : > { %v9375_v33 = vsub.f32 0.0, %v9081_v5  ;;  %v7609_v0 = vmul.f32 %v19271_v27, %v7462_v1  ;;  %v19302_v24 = vadd.f32 %v18798_v54, %v16492_v25  ;;  %v8348_v21 = vsub.f32 0.0, %v6437_v63 }
 0x7cd   : > { %v9518_v32 = vsel %vm9224_vm13, %v9077_v9, %v9371_v7  ;;  %v7463_v56 = vadd.f32 1.4214138, %v7316_v17  ;;  %v6731_v35 = vadd.f32 1.0, %v6584_v11  ;;  %v8494_v39 = vmul.f32 %v8347_v34, %v6436_v2 }
 0x7ce   : > { %v19306_v44 = vpop.eup %13490  ;;  %v9812_v52 = vadd.f32 1.0, %v9518_v32  ;;  %v9522_v61 = vsel %vm9228_vm14, %v9081_v5, %v9375_v33  ;;  %v7756_v51 = vadd.f32 -0.28449672, %v7609_v0  ;;  %v19311_v53 = vmul.f32 0.70710677, %v19302_v24 }
 0x7cf   : > { %v9816_v40 = vadd.f32 1.0, %v9522_v61  ;;  %v7610_v54 = vmul.f32 %v19284_v3, %v7463_v56  ;;  %v7026_v45 = vmul.f32 1.0614054, %v19306_v44  ;;  %13498 = vrcp.f32 %v6731_v35 }
 0x7d0   : > { %v9959_v37 = vmul.f32 %v9812_v52, %v19264_v62  ;;  %v7903_v9 = vmul.f32 %v19271_v27, %v7756_v51  ;;  %v6441_v46 = vand.u32 2147483647, %v19311_v53  ;;  %v9667_v33 = vmul.f32 0.5, %v19207_v22 }
 0x7d1   : > { %v9963_v5 = vmul.f32 %v9816_v40, %v9669_v42  ;;  %v7757_v1 = vadd.f32 -0.28449672, %v7610_v54  ;;  %v7173_v7 = vadd.f32 -1.4531521, %v7026_v45  ;;  %v13493_v17 = vpop.eup %13492  ;;  %v8495_v0 = vmul.f32 %v8348_v21, %v6437_v63  ;;  %v19343_v45 = vpop.f32.mrb[90].mxu1 }
 0x7d2   : > { %10106 = vst [vmem:[%s16725_s9 + $0x350] sm:$0xff] %v9959_v37  ;;  %v8050_v11 = vadd.f32 0.2548296, %v7903_v9  ;;  %v6588_v32 = vmul.f32 0.3275911, %v6441_v46  ;;  %v13495_v56 = vpop.eup %13494  ;;  %v19325_v62 = vmul.f32 0.5, %v19212_v28  ;;  %v19330_v42 = vadd.f32 %v18840_v36, %v16494_v26 }
 0x7d3   : > { %10110 = vst [vmem:[%s16725_s9 + $0x370] sm:$0xff] %v9963_v5  ;;  %v7904_v35 = vmul.f32 %v19284_v3, %v7757_v1  ;;  %v7320_v2 = vmul.f32 %v19306_v44, %v7173_v7  ;;  %13500 = vpow2.f32 %v8756_v6  ;;  %v8752_v22 = vmul.f32 1.442695, %v8494_v39  ;;  %v11614_v9 = vpop.f32.mrb[91].mxu1 }
 0x7d4   : > { %v19332_v34 = vpop.eup %13496  ;;  %v8197_v52 = vmul.f32 %v19271_v27, %v8050_v11  ;;  %v6735_v63 = vadd.f32 1.0, %v6588_v32  ;;  %v19338_v28 = vadd.f32 %v18846_v10, %v16496_v13  ;;  %v8754_v54 = vmul.f32 1.442695, %v8495_v0 }
 0x7d5   : > { %v8051_v21 = vadd.f32 0.2548296, %v7904_v35  ;;  %v7467_v61 = vadd.f32 1.4214138, %v7320_v2  ;;  %v7024_v51 = vmul.f32 1.0614054, %v19332_v34 }
 0x7d6   : > { %v8932_v40 = vmul.f32 %v13493_v17, %v8197_v52  ;;  %13502 = vrcp.f32 %v6735_v63  ;;  %v19341_v36 = vmul.f32 0.70710677, %v19330_v42  ;;  %vm9226_vm15 = vcmp.ge.f32.partialorder %v19216_v23, 0.0 }
 0x7d7   : > { %v8198_v27 = vmul.f32 %v19284_v3, %v8051_v21  ;;  %v7614_v6 = vmul.f32 %v19306_v44, %v7467_v61  ;;  %v7171_v37 = vadd.f32 -1.4531521, %v7024_v51  ;;  %13504 = vpow2.f32 %v8752_v22 }
 0x7d8   : > { %v9079_v39 = vsub.f32 1.0, %v8932_v40  ;;  %v8352_v10 = vsub.f32 0.0, %v6441_v46  ;;  %v19349_v5 = vand.u32 2147483647, %v19341_v36  ;;  %v19355_v0 = vmul.f32 0.70710677, %v19338_v28 }
 0x7d9   : > { %v19351_v1 = vpop.eup %13498  ;;  %v8933_v7 = vmul.f32 %v13495_v56, %v8198_v27  ;;  %v7761_v17 = vadd.f32 -0.28449672, %v7614_v6  ;;  %v7318_v11 = vmul.f32 %v19332_v34, %v7171_v37  ;;  %13506 = vpow2.f32 %v8754_v54 }
 0x7da   : > { %v9373_v3 = vsub.f32 0.0, %v9079_v39  ;;  %v7025_v32 = vmul.f32 1.0614054, %v19351_v1  ;;  %v6586_v35 = vmul.f32 0.3275911, %v19349_v5  ;;  %v8499_v61 = vmul.f32 %v8352_v10, %v6441_v46 }
 0x7db   : > { %v9080_v2 = vsub.f32 1.0, %v8933_v7  ;;  %v7908_v52 = vmul.f32 %v19306_v44, %v7761_v17  ;;  %v7465_v22 = vadd.f32 1.4214138, %v7318_v11  ;;  %v19361_v63 = vand.u32 2147483647, %v19355_v0 }
 0x7dc   : > { %v9520_v56 = vsel %vm9226_vm15, %v9079_v39, %v9373_v3  ;;  %v7172_v21 = vadd.f32 -1.4531521, %v7025_v32  ;;  %v6733_v51 = vadd.f32 1.0, %v6586_v35  ;;  %vm9227_vm0 = vcmp.ge.f32.partialorder %v19223_v47, 0.0  ;;  %v19376_v47 = vpop.f32.mrb[90].mxu0 }
 0x7dd   : > { %v9814_v40 = vadd.f32 1.0, %v9520_v56  ;;  %v9374_v27 = vsub.f32 0.0, %v9080_v2  ;;  %v8055_v6 = vadd.f32 0.2548296, %v7908_v52  ;;  %v7612_v54 = vmul.f32 %v19332_v34, %v7465_v22  ;;  %v13501_v37 = vpop.eup %13500 }
 0x7de   : > { %v7319_v9 = vmul.f32 %v19351_v1, %v7172_v21  ;;  %13508 = vrcp.f32 %v6733_v51  ;;  %v6587_v7 = vmul.f32 0.3275911, %v19361_v63  ;;  %v19374_v35 = vadd.f32 %v18900_v20, %v16492_v25 }
 0x7df   : > { %v9961_v17 = vmul.f32 %v9814_v40, %v9667_v33  ;;  %v9521_v23 = vsel %vm9227_vm0, %v9080_v2, %v9374_v27  ;;  %v8202_v39 = vmul.f32 %v19306_v44, %v8055_v6  ;;  %v7759_v46 = vadd.f32 -0.28449672, %v7612_v54 }
 0x7e0   : > { %v19370_v10 = vpop.eup %13502  ;;  %v9815_v11 = vadd.f32 1.0, %v9521_v23  ;;  %v7466_v3 = vadd.f32 1.4214138, %v7319_v9  ;;  %v6734_v32 = vadd.f32 1.0, %v6587_v7  ;;  %v8762_v44 = vmul.f32 1.442695, %v8499_v61 }
 0x7e1   : > { %10108 = vst [vmem:[%s16725_s9 + $0x360] sm:$0xff] %v9961_v17  ;;  %v8937_v52 = vmul.f32 %v13501_v37, %v8202_v39  ;;  %v7906_v33 = vmul.f32 %v19332_v34, %v7759_v46  ;;  %v7029_v2 = vmul.f32 1.0614054, %v19370_v10  ;;  %v13505_v22 = vpop.eup %13504  ;;  %v8350_v51 = vsub.f32 0.0, %v19349_v5  ;;  %v19394_v23 = vpop.f32.mrb[91].mxu0 }
 0x7e2   : > { %v9962_v56 = vmul.f32 %v9815_v11, %v19325_v62  ;;  %v7613_v21 = vmul.f32 %v19351_v1, %v7466_v3  ;;  %13510 = vrcp.f32 %v6734_v32  ;;  %vm9231_vm1 = vcmp.ge.f32.partialorder %v19244_v43, 0.0 }
 0x7e3   : > { %v9084_v20 = vsub.f32 1.0, %v8937_v52  ;;  %v8053_v40 = vadd.f32 0.2548296, %v7906_v33  ;;  %v7176_v27 = vadd.f32 -1.4531521, %v7029_v2  ;;  %v13507_v6 = vpop.eup %13506  ;;  %v9672_v54 = vmul.f32 0.5, %v19228_v57 }
 0x7e4   : > { %10109 = vst [vmem:[%s16725_s9 + $0x368] sm:$0xff] %v9962_v56  ;;  %v9670_v37 = vmul.f32 0.5, %v19259_v14  ;;  %v7760_v61 = vadd.f32 -0.28449672, %v7613_v21  ;;  %v19389_v9 = vmul.f32 0.70710677, %v19374_v35  ;;  %v8497_v46 = vmul.f32 %v8350_v51, %v19349_v5 }
 0x7e5   : > { %v9378_v62 = vsub.f32 0.0, %v9084_v20  ;;  %v8200_v7 = vmul.f32 %v19332_v34, %v8053_v40  ;;  %vm9229_vm2 = vcmp.ge.f32.partialorder %v19269_v38, 0.0  ;;  %v7323_v17 = vmul.f32 %v19370_v10, %v7176_v27 }
 0x7e6   : > { %v7907_v39 = vmul.f32 %v19351_v1, %v7760_v61  ;;  %v19399_v57 = vand.u32 2147483647, %v19389_v9  ;;  %v19403_v14 = vadd.f32 %v18902_v58, %v16494_v26  ;;  %13512 = vpow2.f32 %v8762_v44 }
 0x7e7   : > { %v9525_v34 = vsel %vm9231_vm1, %v9084_v20, %v9378_v62  ;;  %v8935_v11 = vmul.f32 %v13505_v22, %v8200_v7  ;;  %v7470_v3 = vadd.f32 1.4214138, %v7323_v17  ;;  %v8351_v5 = vsub.f32 0.0, %v19361_v63 }
 0x7e8   : > { %v19407_v32 = vpop.eup %13508  ;;  %v9819_v52 = vadd.f32 1.0, %v9525_v34  ;;  %v8054_v33 = vadd.f32 0.2548296, %v7907_v39  ;;  %v6591_v2 = vmul.f32 0.3275911, %v19399_v57  ;;  %v9671_v27 = vmul.f32 0.5, %v19276_v48 }
 0x7e9   : > { %v9082_v56 = vsub.f32 1.0, %v8935_v11  ;;  %v7617_v21 = vmul.f32 %v19370_v10, %v7470_v3  ;;  %v7027_v58 = vmul.f32 1.0614054, %v19407_v32  ;;  %v19414_v43 = vmul.f32 0.70710677, %v19403_v14 }
 0x7ea   : > { %v9966_v22 = vmul.f32 %v9819_v52, %v9672_v54  ;;  %v8201_v44 = vmul.f32 %v19351_v1, %v8054_v33  ;;  %v8758_v51 = vmul.f32 1.442695, %v8497_v46  ;;  %v6738_v20 = vadd.f32 1.0, %v6591_v2 }
 0x7eb   : > { %v9376_v40 = vsub.f32 0.0, %v9082_v56  ;;  %v7764_v61 = vadd.f32 -0.28449672, %v7617_v21  ;;  %v7174_v62 = vadd.f32 -1.4531521, %v7027_v58  ;;  %v8498_v39 = vmul.f32 %v8351_v5, %v19361_v63  ;;  %v19435_v58 = vpop.f32.mrb[92].mxu1 }
 0x7ec   : > { %v19418_v7 = vpop.eup %13510  ;;  %10113 = vst [vmem:[%s16725_s9 + $0x388] sm:$0xff] %v9966_v22  ;;  %v8936_v17 = vmul.f32 %v13507_v6, %v8201_v44  ;;  %13514 = vrcp.f32 %v6738_v20  ;;  %v19423_v34 = vand.u32 2147483647, %v19414_v43  ;;  %v19433_v5 = vadd.f32 %v18943_v19, %v16496_v13 }
 0x7ed   : > { %v9523_v1 = vsel %vm9229_vm2, %v9082_v56, %v9376_v40  ;;  %v7911_v54 = vmul.f32 %v19370_v10, %v7764_v61  ;;  %v7321_v46 = vmul.f32 %v19407_v32, %v7174_v62  ;;  %v7028_v48 = vmul.f32 1.0614054, %v19418_v7  ;;  %v11617_v40 = vpop.f32.mrb[93].mxu1 }
 0x7ee   : > { %v9817_v11 = vadd.f32 1.0, %v9523_v1  ;;  %v9083_v3 = vsub.f32 1.0, %v8936_v17  ;;  %13516 = vpow2.f32 %v8758_v51  ;;  %v6589_v6 = vmul.f32 0.3275911, %v19423_v34 }
 0x7ef   : > { %v8058_v63 = vadd.f32 0.2548296, %v7911_v54  ;;  %v7468_v52 = vadd.f32 1.4214138, %v7321_v46  ;;  %v7175_v33 = vadd.f32 -1.4531521, %v7028_v48 }
 0x7f0   : > { %v9964_v38 = vmul.f32 %v9817_v11, %v9670_v37  ;;  %v9377_v2 = vsub.f32 0.0, %v9083_v3  ;;  %v8760_v56 = vmul.f32 1.442695, %v8498_v39  ;;  %v6736_v21 = vadd.f32 1.0, %v6589_v6  ;;  %v13513_v22 = vpop.eup %13512  ;;  %v19450_v11 = vpop.f32.mrb[92].mxu0 }
 0x7f1   : > { %vm9230_vm3 = vcmp.ge.f32.partialorder %v19291_v18, 0.0  ;;  %v8205_v44 = vmul.f32 %v19370_v10, %v8058_v63  ;;  %v7615_v51 = vmul.f32 %v19407_v32, %v7468_v52  ;;  %v7322_v20 = vmul.f32 %v19418_v7, %v7175_v33 }
 0x7f2   : > { %10111 = vst [vmem:[%s16725_s9 + $0x378] sm:$0xff] %v9964_v38  ;;  %v9524_v61 = vsel %vm9230_vm3, %v9083_v3, %v9377_v2  ;;  %v8355_v19 = vsub.f32 0.0, %v19399_v57  ;;  %13518 = vrcp.f32 %v6736_v21  ;;  %v19444_v37 = vmul.f32 0.70710677, %v19433_v5 }
 0x7f3   : > { %v9818_v62 = vadd.f32 1.0, %v9524_v61  ;;  %v8940_v17 = vmul.f32 %v13513_v22, %v8205_v44  ;;  %v7762_v39 = vadd.f32 -0.28449672, %v7615_v51  ;;  %v7469_v18 = vadd.f32 1.4214138, %v7322_v20  ;;  %v19475_v61 = vpop.f32.mrb[93].mxu0 }
 0x7f4   : > { %vm9234_vm4 = vcmp.ge.f32.partialorder %v19311_v53, 0.0  ;;  %13520 = vpow2.f32 %v8760_v56  ;;  %v6443_v10 = vand.u32 2147483647, %v19444_v37  ;;  %v9675_v6 = vmul.f32 0.5, %v19302_v24 }
 0x7f5   : > { %v9965_v1 = vmul.f32 %v9818_v62, %v9671_v27  ;;  %v9087_v54 = vsub.f32 1.0, %v8940_v17  ;;  %v7909_v46 = vmul.f32 %v19407_v32, %v7762_v39  ;;  %v7616_v48 = vmul.f32 %v19418_v7, %v7469_v18 }
 0x7f6   : > { %v19452_v3 = vpop.eup %13514  ;;  %v8502_v63 = vmul.f32 %v8355_v19, %v19399_v57  ;;  %v6590_v52 = vmul.f32 0.3275911, %v6443_v10  ;;  %v19458_v33 = vadd.f32 %v18968_v30, %v16492_v25  ;;  %v8353_v56 = vsub.f32 0.0, %v19423_v34 }
 0x7f7   : > { %10112 = vst [vmem:[%s16725_s9 + $0x380] sm:$0xff] %v9965_v1  ;;  %v9381_v27 = vsub.f32 0.0, %v9087_v54  ;;  %v8056_v38 = vadd.f32 0.2548296, %v7909_v46  ;;  %v7763_v2 = vadd.f32 -0.28449672, %v7616_v48  ;;  %v19468_v24 = vadd.f32 %v18991_v49, %v16494_v26 }
 0x7f8   : > { %v13517_v21 = vpop.eup %13516  ;;  %v7032_v22 = vmul.f32 1.0614054, %v19452_v3  ;;  %v6737_v44 = vadd.f32 1.0, %v6590_v52  ;;  %v19464_v51 = vmul.f32 0.70710677, %v19458_v33  ;;  %v9673_v20 = vmul.f32 0.5, %v19330_v42 }
 0x7f9   : > { %v9528_v30 = vsel %vm9234_vm4, %v9087_v54, %v9381_v27  ;;  %v8203_v57 = vmul.f32 %v19407_v32, %v8056_v38  ;;  %v7910_v40 = vmul.f32 %v19418_v7, %v7763_v2  ;;  %v8768_v17 = vmul.f32 1.442695, %v8502_v63 }
 0x7fa   : > { %v9822_v19 = vadd.f32 1.0, %v9528_v30  ;;  %v7179_v62 = vadd.f32 -1.4531521, %v7032_v22  ;;  %13522 = vrcp.f32 %v6737_v44  ;;  %v8500_v49 = vmul.f32 %v8353_v56, %v19423_v34 }
 0x7fb   : > { %v8938_v39 = vmul.f32 %v13517_v21, %v8203_v57  ;;  %v8057_v18 = vadd.f32 0.2548296, %v7910_v40  ;;  %v6447_v53 = vand.u32 2147483647, %v19464_v51  ;;  %v8354_v54 = vsub.f32 0.0, %v6443_v10 }
 0x7fc   : > { %v19479_v1 = vpop.eup %13518  ;;  %v9969_v32 = vmul.f32 %v9822_v19, %v9675_v6  ;;  %v7326_v42 = vmul.f32 %v19452_v3, %v7179_v62  ;;  %v19483_v46 = vmul.f32 0.70710677, %v19468_v24  ;;  %vm9232_vm5 = vcmp.ge.f32.partialorder %v19341_v36, 0.0 }
 0x7fd   : > { %v9085_v48 = vsub.f32 1.0, %v8938_v39  ;;  %v8204_v63 = vmul.f32 %v19418_v7, %v8057_v18  ;;  %v7030_v52 = vmul.f32 1.0614054, %v19479_v1  ;;  %v6594_v27 = vmul.f32 0.3275911, %v6447_v53 }
 0x7fe   : > { %v13521_v38 = vpop.eup %13520  ;;  %10116 = vst [vmem:[%s16725_s9 + $0x3a0] sm:$0xff] %v9969_v32  ;;  %v7473_v34 = vadd.f32 1.4214138, %v7326_v42  ;;  %13524 = vpow2.f32 %v8768_v17  ;;  %v19490_v6 = vand.u32 2147483647, %v19483_v46  ;;  %v8501_v7 = vmul.f32 %v8354_v54, %v6443_v10 }
 0x7ff   : > { %v9379_v2 = vsub.f32 0.0, %v9085_v48  ;;  %v8939_v56 = vmul.f32 %v13521_v38, %v8204_v63  ;;  %v7177_v21 = vadd.f32 -1.4531521, %v7030_v52  ;;  %v6741_v22 = vadd.f32 1.0, %v6594_v27 }
 0x800   : > { %v7620_v44 = vmul.f32 %v19452_v3, %v7473_v34  ;;  %v8764_v30 = vmul.f32 1.442695, %v8500_v49  ;;  %v6592_v57 = vmul.f32 0.3275911, %v19490_v6  ;;  %v8358_v39 = vsub.f32 0.0, %v6447_v53  ;;  %v19497_v49 = vpop.f32.mrb[94].mxu1 }
 0x801   : > { %v9526_v40 = vsel %vm9232_vm5, %v9085_v48, %v9379_v2  ;;  %v9086_v19 = vsub.f32 1.0, %v8939_v56  ;;  %v7324_v62 = vmul.f32 %v19479_v1, %v7177_v21  ;;  %13526 = vrcp.f32 %v6741_v22  ;;  %v11620_v27 = vpop.f32.mrb[95].mxu1 }
 0x802   : > { %v9820_v36 = vadd.f32 1.0, %v9526_v40  ;;  %v7767_v17 = vadd.f32 -0.28449672, %v7620_v44  ;;  %v6739_v18 = vadd.f32 1.0, %v6592_v57  ;;  %vm9233_vm6 = vcmp.ge.f32.partialorder %v19355_v0, 0.0 }
 0x803   : > { %v9380_v32 = vsub.f32 0.0, %v9086_v19  ;;  %v9674_v42 = vmul.f32 0.5, %v19338_v28  ;;  %v7471_v63 = vadd.f32 1.4214138, %v7324_v62  ;;  %13528 = vpow2.f32 %v8764_v30  ;;  %v19518_v62 = vpop.f32.mrb[94].mxu0 }
 0x804   : > { %v19499_v10 = vpop.eup %13522  ;;  %v9967_v54 = vmul.f32 %v9820_v36, %v9673_v20  ;;  %v7914_v48 = vmul.f32 %v19452_v3, %v7767_v17  ;;  %v19504_v52 = vadd.f32 %v19024_v8, %v16496_v13  ;;  %13530 = vrcp.f32 %v6739_v18 }
 0x805   : > { %v9527_v38 = vsel %vm9233_vm6, %v9086_v19, %v9380_v32  ;;  %v7618_v0 = vmul.f32 %v19479_v1, %v7471_v63  ;;  %v7031_v34 = vmul.f32 1.0614054, %v19499_v10  ;;  %v8766_v56 = vmul.f32 1.442695, %v8501_v7 }
 0x806   : > { %10114 = vst [vmem:[%s16725_s9 + $0x390] sm:$0xff] %v9967_v54  ;;  %v9821_v28 = vadd.f32 1.0, %v9527_v38  ;;  %v8061_v2 = vadd.f32 0.2548296, %v7914_v48  ;;  %v8505_v20 = vmul.f32 %v8358_v39, %v6447_v53  ;;  %v19510_v44 = vmul.f32 0.70710677, %v19504_v52 }
 0x807   : > { %v7765_v21 = vadd.f32 -0.28449672, %v7618_v0  ;;  %v7178_v22 = vadd.f32 -1.4531521, %v7031_v34  ;;  %v19514_v8 = vadd.f32 %v19053_v55, %v16492_v25  ;;  %v9678_v19 = vmul.f32 0.5, %v19374_v35 }
 0x808   : > { %v13525_v30 = vpop.eup %13524  ;;  %v9968_v57 = vmul.f32 %v9821_v28, %v9674_v42  ;;  %v8208_v40 = vmul.f32 %v19452_v3, %v8061_v2  ;;  %v8356_v36 = vsub.f32 0.0, %v19490_v6  ;;  %v19524_v17 = vand.u32 2147483647, %v19510_v44 }
 0x809   : > { %v7912_v7 = vmul.f32 %v19479_v1, %v7765_v21  ;;  %v7325_v53 = vmul.f32 %v19499_v10, %v7178_v22  ;;  %vm9237_vm7 = vcmp.ge.f32.partialorder %v19389_v9, 0.0  ;;  %v8774_v39 = vmul.f32 1.442695, %v8505_v20 }
 0x80a   : > { %10115 = vst [vmem:[%s16725_s9 + $0x398] sm:$0xff] %v9968_v57  ;;  %v8943_v55 = vmul.f32 %v13525_v30, %v8208_v40  ;;  %v19529_v3 = vmul.f32 0.70710677, %v19514_v8  ;;  %13532 = vpow2.f32 %v8766_v56  ;;  %v6593_v42 = vmul.f32 0.3275911, %v19524_v17 }
 0x80b   : > { %v19531_v35 = vpop.eup %13526  ;;  %v8059_v18 = vadd.f32 0.2548296, %v7912_v7  ;;  %v7472_v32 = vadd.f32 1.4214138, %v7325_v53  ;;  %v19540_v27 = vadd.f32 %v19065_v31, %v16494_v26  ;;  %v8503_v34 = vmul.f32 %v8356_v36, %v19490_v6  ;;  %v19556_v7 = vpop.f32.mrb[95].mxu0 }
 0x80c   : > { %v9090_v63 = vsub.f32 1.0, %v8943_v55  ;;  %v7035_v54 = vmul.f32 1.0614054, %v19531_v35  ;;  %v19536_v48 = vand.u32 2147483647, %v19529_v3  ;;  %v6740_v28 = vadd.f32 1.0, %v6593_v42 }
 0x80d   : > { %v8206_v38 = vmul.f32 %v19479_v1, %v8059_v18  ;;  %v7619_v0 = vmul.f32 %v19499_v10, %v7472_v32  ;;  %v13529_v2 = vpop.eup %13528  ;;  %13534 = vpow2.f32 %v8774_v39  ;;  %vm9235_vm8 = vcmp.ge.f32.partialorder %v19414_v43, 0.0 }
 0x80e   : > { %v9384_v56 = vsub.f32 0.0, %v9090_v63  ;;  %v7182_v20 = vadd.f32 -1.4531521, %v7035_v54  ;;  %v6597_v21 = vmul.f32 0.3275911, %v19536_v48  ;;  %v19546_v22 = vpop.eup %13530  ;;  %13536 = vrcp.f32 %v6740_v28 }
 0x80f   : > { %v8941_v30 = vmul.f32 %v13529_v2, %v8206_v38  ;;  %v7766_v31 = vadd.f32 -0.28449672, %v7619_v0  ;;  %v7033_v6 = vmul.f32 1.0614054, %v19546_v22  ;;  %v19554_v40 = vmul.f32 0.70710677, %v19540_v27 }
 0x810   : > { %v9531_v1 = vsel %vm9237_vm7, %v9090_v63, %v9384_v56  ;;  %v7329_v57 = vmul.f32 %v19531_v35, %v7182_v20  ;;  %v6744_v39 = vadd.f32 1.0, %v6597_v21  ;;  %v8770_v42 = vmul.f32 1.442695, %v8503_v34  ;;  %v19569_v20 = vpop.f32.mrb[96].mxu1 }
 0x811   : > { %v9825_v53 = vadd.f32 1.0, %v9531_v1  ;;  %v9088_v36 = vsub.f32 1.0, %v8941_v30  ;;  %v7913_v55 = vmul.f32 %v19499_v10, %v7766_v31  ;;  %v7180_v32 = vadd.f32 -1.4531521, %v7033_v6  ;;  %v11623_v21 = vpop.f32.mrb[97].mxu1 }
 0x812   : > { %v7476_v18 = vadd.f32 1.4214138, %v7329_v57  ;;  %v19561_v9 = vadd.f32 %v19111_v15, %v16496_v13  ;;  %13538 = vrcp.f32 %v6744_v39  ;;  %v9676_v0 = vmul.f32 0.5, %v19403_v14 }
 0x813   : > { %v9972_v63 = vmul.f32 %v9825_v53, %v9678_v19  ;;  %v9382_v54 = vsub.f32 0.0, %v9088_v36  ;;  %v8060_v38 = vadd.f32 0.2548296, %v7913_v55  ;;  %v7327_v2 = vmul.f32 %v19546_v22, %v7180_v32 }
 0x814   : > { %v7623_v28 = vmul.f32 %v19531_v35, %v7476_v18  ;;  %v19567_v56 = vand.u32 2147483647, %v19554_v40  ;;  %v13533_v34 = vpop.eup %13532  ;;  %vm9236_vm9 = vcmp.ge.f32.partialorder %v19444_v37, 0.0  ;;  %v8357_v14 = vsub.f32 0.0, %v19524_v17 }
 0x815   : > { %10119 = vst [vmem:[%s16725_s9 + $0x3b8] sm:$0xff] %v9972_v63  ;;  %v9529_v15 = vsel %vm9235_vm8, %v9088_v36, %v9382_v54  ;;  %v8207_v19 = vmul.f32 %v19499_v10, %v8060_v38  ;;  %v7474_v1 = vadd.f32 1.4214138, %v7327_v2  ;;  %v8361_v57 = vsub.f32 0.0, %v19536_v48 }
 0x816   : > { %v9823_v30 = vadd.f32 1.0, %v9529_v15  ;;  %v7770_v31 = vadd.f32 -0.28449672, %v7623_v28  ;;  %13540 = vpow2.f32 %v8770_v42  ;;  %v6595_v53 = vmul.f32 0.3275911, %v19567_v56  ;;  %v19589_v28 = vpop.f32.mrb[96].mxu0 }
 0x817   : > { %v8942_v6 = vmul.f32 %v13533_v34, %v8207_v19  ;;  %v19580_v43 = vmul.f32 0.70710677, %v19561_v9  ;;  %v13535_v36 = vpop.eup %13534  ;;  %v9677_v55 = vmul.f32 0.5, %v19433_v5  ;;  %v7621_v18 = vmul.f32 %v19546_v22, %v7474_v1 }
 0x818   : > { %v9970_v10 = vmul.f32 %v9823_v30, %v9676_v0  ;;  %v7917_v39 = vmul.f32 %v19531_v35, %v7770_v31  ;;  %v19585_v32 = vpop.eup %13536  ;;  %v8504_v54 = vmul.f32 %v8357_v14, %v19524_v17  ;;  %v6742_v38 = vadd.f32 1.0, %v6595_v53 }
 0x819   : > { %v9089_v63 = vsub.f32 1.0, %v8942_v6  ;;  %v6449_v42 = vand.u32 2147483647, %v19580_v43  ;;  %v7768_v34 = vadd.f32 -0.28449672, %v7621_v18  ;;  %v8508_v5 = vmul.f32 %v8361_v57, %v19536_v48 }
 0x81a   : > { %10117 = vst [vmem:[%s16725_s9 + $0x3a8] sm:$0xff] %v9970_v10  ;;  %v8064_v2 = vadd.f32 0.2548296, %v7917_v39  ;;  %v7034_v0 = vmul.f32 1.0614054, %v19585_v32  ;;  %13542 = vrcp.f32 %v6742_v38  ;;  %v19596_v21 = vadd.f32 %v19134_v60, %v16492_v25 }
 0x81b   : > { %v9383_v15 = vsub.f32 0.0, %v9089_v63  ;;  %v6596_v19 = vmul.f32 0.3275911, %v6449_v42  ;;  %v9681_v14 = vmul.f32 0.5, %v19458_v33  ;;  %v7915_v30 = vmul.f32 %v19546_v22, %v7768_v34 }
 0x81c   : > { %v8211_v17 = vmul.f32 %v19531_v35, %v8064_v2  ;;  %v7181_v31 = vadd.f32 -1.4531521, %v7034_v0  ;;  %v19601_v1 = vpop.eup %13538  ;;  %vm9240_vm10 = vcmp.ge.f32.partialorder %v19464_v51, 0.0  ;;  %v8772_v48 = vmul.f32 1.442695, %v8504_v54 }
 0x81d   : > { %v9530_v6 = vsel %vm9236_vm9, %v9089_v63, %v9383_v15  ;;  %v6743_v57 = vadd.f32 1.0, %v6596_v19  ;;  %v8062_v60 = vadd.f32 0.2548296, %v7915_v30  ;;  %vm9238_vm11 = vcmp.ge.f32.partialorder %v19483_v46, 0.0 }
 0x81e   : > { %v9824_v53 = vadd.f32 1.0, %v9530_v6  ;;  %v8946_v10 = vmul.f32 %v13535_v36, %v8211_v17  ;;  %v7328_v35 = vmul.f32 %v19585_v32, %v7181_v31  ;;  %v7038_v33 = vmul.f32 1.0614054, %v19601_v1 }
 0x81f   : > { %v8780_v39 = vmul.f32 1.442695, %v8508_v5  ;;  %13544 = vrcp.f32 %v6743_v57  ;;  %v19610_v18 = vmul.f32 0.70710677, %v19596_v21  ;;  %v8209_v54 = vmul.f32 %v19546_v22, %v8062_v60 }
 0x820   : > { %v9971_v37 = vmul.f32 %v9824_v53, %v9677_v55  ;;  %v9093_v63 = vsub.f32 1.0, %v8946_v10  ;;  %v7475_v38 = vadd.f32 1.4214138, %v7328_v35  ;;  %v13541_v2 = vpop.eup %13540  ;;  %13546 = vpow2.f32 %v8772_v48 }
 0x821   : > { %v7185_v36 = vadd.f32 -1.4531521, %v7038_v33  ;;  %v8359_v34 = vsub.f32 0.0, %v19567_v56  ;;  %v19615_v0 = vand.u32 2147483647, %v19610_v18  ;;  %v8944_v5 = vmul.f32 %v13541_v2, %v8209_v54 }
 0x822   : > { %10118 = vst [vmem:[%s16725_s9 + $0x3b0] sm:$0xff] %v9971_v37  ;;  %v9387_v15 = vsub.f32 0.0, %v9093_v63  ;;  %v7622_v19 = vmul.f32 %v19585_v32, %v7475_v38  ;;  %v19621_v55 = vadd.f32 %v19168_v41, %v16494_v26  ;;  %v9679_v22 = vmul.f32 0.5, %v19468_v24  ;;  %v19637_v38 = vpop.f32.mrb[97].mxu0 }
 0x823   : > { %v7332_v17 = vmul.f32 %v19601_v1, %v7185_v36  ;;  %v8360_v30 = vsub.f32 0.0, %v6449_v42  ;;  %v6600_v31 = vmul.f32 0.3275911, %v19615_v0  ;;  %v9091_v48 = vsub.f32 1.0, %v8944_v5 }
 0x824   : > { %v9534_v6 = vsel %vm9240_vm10, %v9093_v63, %v9387_v15  ;;  %v7769_v57 = vadd.f32 -0.28449672, %v7622_v19  ;;  %13548 = vpow2.f32 %v8780_v39  ;;  %v19628_v53 = vpop.eup %13542  ;;  %v8506_v41 = vmul.f32 %v8359_v34, %v19567_v56 }
 0x825   : > { %v9828_v10 = vadd.f32 1.0, %v9534_v6  ;;  %v7479_v60 = vadd.f32 1.4214138, %v7332_v17  ;;  %v6747_v35 = vadd.f32 1.0, %v6600_v31  ;;  %v9385_v24 = vsub.f32 0.0, %v9091_v48 }
 0x826   : > { %v7916_v33 = vmul.f32 %v19585_v32, %v7769_v57  ;;  %v7036_v37 = vmul.f32 1.0614054, %v19628_v53  ;;  %v19634_v54 = vmul.f32 0.70710677, %v19621_v55  ;;  %v8507_v39 = vmul.f32 %v8360_v30, %v6449_v42 }
 0x827   : > { %v9975_v51 = vmul.f32 %v9828_v10, %v9681_v14  ;;  %v7626_v63 = vmul.f32 %v19601_v1, %v7479_v60  ;;  %13550 = vrcp.f32 %v6747_v35  ;;  %v9532_v56 = vsel %vm9238_vm11, %v9091_v48, %v9385_v24 }
 0x828   : > { %v8063_v2 = vadd.f32 0.2548296, %v7916_v33  ;;  %v7183_v36 = vadd.f32 -1.4531521, %v7036_v37  ;;  %v6451_v34 = vand.u32 2147483647, %v19634_v54 }
 0x829   : > { %v19642_v15 = vpop.eup %13544  ;;  %10122 = vst [vmem:[%s16725_s9 + $0x3d0] sm:$0xff] %v9975_v51  ;;  %v9826_v5 = vadd.f32 1.0, %v9532_v56  ;;  %v9680_v19 = vmul.f32 0.5, %v19504_v52  ;;  %v7773_v14 = vadd.f32 -0.28449672, %v7626_v63  ;;  %v8364_v60 = vsub.f32 0.0, %v19615_v0 }
 0x82a   : > { %v8776_v17 = vmul.f32 1.442695, %v8506_v41  ;;  %v8210_v42 = vmul.f32 %v19585_v32, %v8063_v2  ;;  %v7330_v30 = vmul.f32 %v19628_v53, %v7183_v36  ;;  %v7037_v46 = vmul.f32 1.0614054, %v19642_v15  ;;  %v13547_v6 = vpop.eup %13546 }
 0x82b   : > { %v6598_v31 = vmul.f32 0.3275911, %v6451_v34  ;;  %v9973_v48 = vmul.f32 %v9826_v5, %v9679_v22  ;;  %v7920_v57 = vmul.f32 %v19601_v1, %v7773_v14  ;;  %v8778_v10 = vmul.f32 1.442695, %v8507_v39 }
 0x82c   : > { %v8945_v35 = vmul.f32 %v13547_v6, %v8210_v42  ;;  %v7477_v24 = vadd.f32 1.4214138, %v7330_v30  ;;  %v7184_v52 = vadd.f32 -1.4531521, %v7037_v46  ;;  %vm9239_vm12 = vcmp.ge.f32.partialorder %v19510_v44, 0.0 }
 0x82d   : > { %v6745_v33 = vadd.f32 1.0, %v6598_v31  ;;  %10120 = vst [vmem:[%s16725_s9 + $0x3c0] sm:$0xff] %v9973_v48  ;;  %v8067_v32 = vadd.f32 0.2548296, %v7920_v57  ;;  %13552 = vpow2.f32 %v8776_v17  ;;  %v19655_v41 = vadd.f32 %v19189_v50, %v16496_v13 }
 0x82e   : > { %v13549_v37 = vpop.eup %13548  ;;  %v9092_v22 = vsub.f32 1.0, %v8945_v35  ;;  %v7624_v51 = vmul.f32 %v19628_v53, %v7477_v24  ;;  %v7331_v63 = vmul.f32 %v19642_v15, %v7184_v52  ;;  %vm9243_vm13 = vcmp.ge.f32.partialorder %v19529_v3, 0.0 }
 0x82f   : > { %13554 = vrcp.f32 %v6745_v33  ;;  %v8214_v39 = vmul.f32 %v19601_v1, %v8067_v32  ;;  %v8511_v56 = vmul.f32 %v8364_v60, %v19615_v0  ;;  %v19663_v2 = vmul.f32 0.70710677, %v19655_v41 }
 0x830   : > { %v9386_v36 = vsub.f32 0.0, %v9092_v22  ;;  %v7771_v5 = vadd.f32 -0.28449672, %v7624_v51  ;;  %v7478_v50 = vadd.f32 1.4214138, %v7331_v63  ;;  %13556 = vpow2.f32 %v8778_v10 }
 0x831   : > { %v19665_v14 = vpop.eup %13550  ;;  %v8949_v17 = vmul.f32 %v13549_v37, %v8214_v39  ;;  %v8362_v42 = vsub.f32 0.0, %v6451_v34  ;;  %v19668_v30 = vand.u32 2147483647, %v19663_v2  ;;  %v19672_v1 = vadd.f32 %v19201_v59, %v16492_v25  ;;  %v20999_v59 = vld [vmem:[#allocation17_spill] sm:$0xff] }
 0x832   : > { %v9533_v0 = vsel %vm9239_vm12, %v9092_v22, %v9386_v36  ;;  %v7918_v46 = vmul.f32 %v19628_v53, %v7771_v5  ;;  %v7625_v31 = vmul.f32 %v19642_v15, %v7478_v50  ;;  %v7041_v6 = vmul.f32 1.0614054, %v19665_v14 }
 0x833   : > { %v9827_v48 = vadd.f32 1.0, %v9533_v0  ;;  %v9096_v57 = vsub.f32 1.0, %v8949_v17  ;;  %v8786_v10 = vmul.f32 1.442695, %v8511_v56  ;;  %v6599_v60 = vmul.f32 0.3275911, %v19668_v30 }
 0x834   : > { %v8065_v35 = vadd.f32 0.2548296, %v7918_v46  ;;  %v7772_v24 = vadd.f32 -0.28449672, %v7625_v31  ;;  %v7188_v52 = vadd.f32 -1.4531521, %v7041_v6  ;;  %v19682_v33 = vadd.f32 %v20999_v59, %v16494_v26 }
 0x835   : > { %v9974_v44 = vmul.f32 %v9827_v48, %v9680_v19  ;;  %v9390_v32 = vsub.f32 0.0, %v9096_v57  ;;  %v8509_v37 = vmul.f32 %v8362_v42, %v6451_v34  ;;  %v6746_v22 = vadd.f32 1.0, %v6599_v60 }
 0x836   : > { %v8212_v51 = vmul.f32 %v19628_v53, %v8065_v35  ;;  %v7919_v63 = vmul.f32 %v19642_v15, %v7772_v24  ;;  %v7335_v39 = vmul.f32 %v19665_v14, %v7188_v52  ;;  %v19688_v56 = vmul.f32 0.70710677, %v19672_v1 }
 0x837   : > { %v13553_v36 = vpop.eup %13552  ;;  %10121 = vst [vmem:[%s16725_s9 + $0x3c8] sm:$0xff] %v9974_v44  ;;  %v9537_v5 = vsel %vm9243_vm13, %v9096_v57, %v9390_v32  ;;  %v9684_v50 = vmul.f32 0.5, %v19514_v8  ;;  %13558 = vrcp.f32 %v6746_v22  ;;  %v19695_v34 = vmul.f32 0.70710677, %v19682_v33 }
 0x838   : > { %v9831_v53 = vadd.f32 1.0, %v9537_v5  ;;  %v8947_v17 = vmul.f32 %v13553_v36, %v8212_v51  ;;  %v8066_v42 = vadd.f32 0.2548296, %v7919_v63  ;;  %v7482_v0 = vadd.f32 1.4214138, %v7335_v39 }
 0x839   : > { %v19697_v19 = vpop.eup %13554  ;;  %13560 = vpow2.f32 %v8786_v10  ;;  %v8782_v31 = vmul.f32 1.442695, %v8509_v37  ;;  %v6456_v3 = vand.u32 2147483647, %v19688_v56  ;;  %vm9241_vm14 = vcmp.ge.f32.partialorder %v19554_v40, 0.0 }
 0x83a   : > { %v7039_v46 = vmul.f32 1.0614054, %v19697_v19  ;;  %v13557_v6 = vpop.eup %13556  ;;  %v9978_v48 = vmul.f32 %v9831_v53, %v9684_v50  ;;  %v9094_v8 = vsub.f32 1.0, %v8947_v17  ;;  %v8213_v57 = vmul.f32 %v19642_v15, %v8066_v42 }
 0x83b   : > { %v7629_v60 = vmul.f32 %v19665_v14, %v7482_v0  ;;  %v8363_v24 = vsub.f32 0.0, %v19668_v30  ;;  %v6603_v52 = vmul.f32 0.3275911, %v6456_v3  ;;  %v6454_v32 = vand.u32 2147483647, %v19695_v34 }
 0x83c   : > { %v7186_v35 = vadd.f32 -1.4531521, %v7039_v46  ;;  %10125 = vst [vmem:[%s16725_s9 + $0x3e8] sm:$0xff] %v9978_v48  ;;  %v9388_v10 = vsub.f32 0.0, %v9094_v8  ;;  %v8948_v59 = vmul.f32 %v13557_v6, %v8213_v57  ;;  %v9682_v37 = vmul.f32 0.5, %v19540_v27 }
 0x83d   : > { %v7776_v44 = vadd.f32 -0.28449672, %v7629_v60  ;;  %13562 = vpow2.f32 %v8782_v31  ;;  %v6750_v15 = vadd.f32 1.0, %v6603_v52  ;;  %v6601_v39 = vmul.f32 0.3275911, %v6454_v32 }
 0x83e   : > { %v7333_v22 = vmul.f32 %v19697_v19, %v7186_v35  ;;  %v9535_v51 = vsel %vm9241_vm14, %v9094_v8, %v9388_v10  ;;  %v9095_v63 = vsub.f32 1.0, %v8948_v59  ;;  %v9683_v5 = vmul.f32 0.5, %v19561_v9 }
 0x83f   : > { %v7923_v40 = vmul.f32 %v19665_v14, %v7776_v44  ;;  %v9829_v36 = vadd.f32 1.0, %v9535_v51  ;;  %13564 = vrcp.f32 %v6750_v15  ;;  %v8510_v42 = vmul.f32 %v8363_v24, %v19668_v30 }
 0x840   : > { %v7480_v50 = vadd.f32 1.4214138, %v7333_v22  ;;  %v9389_v53 = vsub.f32 0.0, %v9095_v63  ;;  %v6748_v27 = vadd.f32 1.0, %v6601_v39  ;;  %vm9242_vm15 = vcmp.ge.f32.partialorder %v19580_v43, 0.0 }
 0x841   : > { %v8070_v17 = vadd.f32 0.2548296, %v7923_v40  ;;  %v19712_v0 = vpop.eup %13558  ;;  %v9976_v46 = vmul.f32 %v9829_v36, %v9682_v37  ;;  %v19718_v6 = vadd.f32 %v19251_v16, %v16496_v13  ;;  %v8367_v35 = vsub.f32 0.0, %v6456_v3 }
 0x842   : > { %v7627_v31 = vmul.f32 %v19697_v19, %v7480_v50  ;;  %v9536_v9 = vsel %vm9242_vm15, %v9095_v63, %v9389_v53  ;;  %v7040_v8 = vmul.f32 1.0614054, %v19712_v0  ;;  %13566 = vrcp.f32 %v6748_v27 }
 0x843   : > { %v8217_v48 = vmul.f32 %v19665_v14, %v8070_v17  ;;  %v13561_v57 = vpop.eup %13560  ;;  %10123 = vst [vmem:[%s16725_s9 + $0x3d8] sm:$0xff] %v9976_v46  ;;  %v9830_v30 = vadd.f32 1.0, %v9536_v9  ;;  %v19724_v43 = vmul.f32 0.70710677, %v19718_v6  ;;  %v8784_v10 = vmul.f32 1.442695, %v8510_v42 }
 0x844   : > { %v7774_v60 = vadd.f32 -0.28449672, %v7627_v31  ;;  %v7187_v52 = vadd.f32 -1.4531521, %v7040_v8  ;;  %v19728_v16 = vadd.f32 %v19278_v29, %v16492_v25  ;;  %v8365_v44 = vsub.f32 0.0, %v6454_v32 }
 0x845   : > { %v8952_v24 = vmul.f32 %v13561_v57, %v8217_v48  ;;  %v9977_v14 = vmul.f32 %v9830_v30, %v9683_v5  ;;  %v6455_v37 = vand.u32 2147483647, %v19724_v43  ;;  %vm9246_vm0 = vcmp.ge.f32.partialorder %v19610_v18, 0.0 }
 0x846   : > { %v7921_v59 = vmul.f32 %v19697_v19, %v7774_v60  ;;  %v7334_v15 = vmul.f32 %v19712_v0, %v7187_v52  ;;  %v19735_v51 = vmul.f32 0.70710677, %v19728_v16  ;;  %v9687_v40 = vmul.f32 0.5, %v19596_v21 }
 0x847   : > { %v9099_v22 = vsub.f32 1.0, %v8952_v24  ;;  %v13563_v63 = vpop.eup %13562  ;;  %10124 = vst [vmem:[%s16725_s9 + $0x3e0] sm:$0xff] %v9977_v14  ;;  %v8514_v39 = vmul.f32 %v8367_v35, %v6456_v3  ;;  %v6602_v36 = vmul.f32 0.3275911, %v6455_v37  ;;  %vm9244_vm1 = vcmp.ge.f32.partialorder %v19634_v54, 0.0 }
 0x848   : > { %v8068_v29 = vadd.f32 0.2548296, %v7921_v59  ;;  %v7481_v50 = vadd.f32 1.4214138, %v7334_v15  ;;  %v6459_v53 = vand.u32 2147483647, %v19735_v51  ;;  %13568 = vpow2.f32 %v8784_v10 }
 0x849   : > { %v9393_v5 = vsub.f32 0.0, %v9099_v22  ;;  %v19741_v17 = vpop.eup %13564  ;;  %v8512_v27 = vmul.f32 %v8365_v44, %v6454_v32  ;;  %v6749_v46 = vadd.f32 1.0, %v6602_v36  ;;  %v8792_v57 = vmul.f32 1.442695, %v8514_v39 }
 0x84a   : > { %v8215_v42 = vmul.f32 %v19697_v19, %v8068_v29  ;;  %v7628_v21 = vmul.f32 %v19712_v0, %v7481_v50  ;;  %v7044_v3 = vmul.f32 1.0614054, %v19741_v17  ;;  %v6606_v9 = vmul.f32 0.3275911, %v6459_v53 }
 0x84b   : > { %v9540_v31 = vsel %vm9246_vm0, %v9099_v22, %v9393_v5  ;;  %13570 = vrcp.f32 %v6749_v46  ;;  %v9685_v19 = vmul.f32 0.5, %v19621_v55  ;;  %v8366_v10 = vsub.f32 0.0, %v6455_v37 }
 0x84c   : > { %v9834_v48 = vadd.f32 1.0, %v9540_v31  ;;  %v8950_v8 = vmul.f32 %v13563_v63, %v8215_v42  ;;  %v19748_v30 = vpop.eup %13566  ;;  %v7775_v60 = vadd.f32 -0.28449672, %v7628_v21  ;;  %v7191_v32 = vadd.f32 -1.4531521, %v7044_v3 }
 0x84d   : > { %v6753_v35 = vadd.f32 1.0, %v6606_v9  ;;  %v7042_v52 = vmul.f32 1.0614054, %v19748_v30  ;;  %v8788_v44 = vmul.f32 1.442695, %v8512_v27  ;;  %v8370_v63 = vsub.f32 0.0, %v6459_v53 }
 0x84e   : > { %v9981_v24 = vmul.f32 %v9834_v48, %v9687_v40  ;;  %v9097_v18 = vsub.f32 1.0, %v8950_v8  ;;  %v7922_v14 = vmul.f32 %v19712_v0, %v7775_v60  ;;  %v7338_v59 = vmul.f32 %v19741_v17, %v7191_v32 }
 0x84f   : > { %13572 = vrcp.f32 %v6753_v35  ;;  %v7189_v15 = vadd.f32 -1.4531521, %v7042_v52  ;;  %v19757_v55 = vadd.f32 %v19293_v12, %v16494_v26  ;;  %v19761_v39 = vadd.f32 %v19315_v4, %v16496_v13 }
 0x850   : > { %10128 = vst [vmem:[%s16725_s9 + $0x400] sm:$0xff] %v9981_v24  ;;  %v9391_v22 = vsub.f32 0.0, %v9097_v18  ;;  %v8069_v29 = vadd.f32 0.2548296, %v7922_v14  ;;  %v7485_v40 = vadd.f32 1.4214138, %v7338_v59  ;;  %13574 = vpow2.f32 %v8792_v57 }
 0x851   : > { %v7336_v5 = vmul.f32 %v19748_v30, %v7189_v15  ;;  %v8513_v50 = vmul.f32 %v8366_v10, %v6455_v37  ;;  %v19767_v42 = vmul.f32 0.70710677, %v19757_v55  ;;  %v9686_v46 = vmul.f32 0.5, %v19655_v41 }
 0x852   : > { %v9538_v36 = vsel %vm9244_vm1, %v9097_v18, %v9391_v22  ;;  %v8216_v12 = vmul.f32 %v19712_v0, %v8069_v29  ;;  %v7632_v31 = vmul.f32 %v19741_v17, %v7485_v40  ;;  %v13569_v21 = vpop.eup %13568  ;;  %13576 = vpow2.f32 %v8788_v44 }
 0x853   : > { %v9832_v27 = vadd.f32 1.0, %v9538_v36  ;;  %v7483_v4 = vadd.f32 1.4214138, %v7336_v5  ;;  %v8517_v3 = vmul.f32 %v8370_v63, %v6459_v53  ;;  %v6457_v54 = vand.u32 2147483647, %v19767_v42 }
 0x854   : > { %v8951_v48 = vmul.f32 %v13569_v21, %v8216_v12  ;;  %v7779_v37 = vadd.f32 -0.28449672, %v7632_v31  ;;  %v19774_v8 = vmul.f32 0.70710677, %v19761_v39  ;;  %v8790_v41 = vmul.f32 1.442695, %v8513_v50 }
 0x855   : > { %v9979_v9 = vmul.f32 %v9832_v27, %v9685_v19  ;;  %v19776_v57 = vpop.eup %13570  ;;  %v7630_v0 = vmul.f32 %v19748_v30, %v7483_v4  ;;  %v6604_v60 = vmul.f32 0.3275911, %v6457_v54  ;;  %v19781_v32 = vadd.f32 %v19343_v45, %v16492_v25 }
 0x856   : > { %v9098_v53 = vsub.f32 1.0, %v8951_v48  ;;  %v7926_v35 = vmul.f32 %v19741_v17, %v7779_v37  ;;  %v7043_v19 = vmul.f32 1.0614054, %v19776_v57  ;;  %v19787_v24 = vand.u32 2147483647, %v19774_v8 }
 0x857   : > { %10126 = vst [vmem:[%s16725_s9 + $0x3f0] sm:$0xff] %v9979_v9  ;;  %v19790_v18 = vmul.f32 0.5, %v19672_v1  ;;  %v7777_v52 = vadd.f32 -0.28449672, %v7630_v0  ;;  %v8798_v10 = vmul.f32 1.442695, %v8517_v3 }
 0x858   : > { %v6751_v14 = vadd.f32 1.0, %v6604_v60  ;;  %vm9245_vm2 = vcmp.ge.f32.partialorder %v19663_v2, 0.0  ;;  %v9392_v45 = vsub.f32 0.0, %v9098_v53  ;;  %v8073_v44 = vadd.f32 0.2548296, %v7926_v35 }
 0x859   : > { %v19792_v59 = vpop.eup %13572  ;;  %v7190_v22 = vadd.f32 -1.4531521, %v7043_v19  ;;  %vm9249_vm3 = vcmp.ge.f32.partialorder %v19688_v56, 0.0  ;;  %v7924_v15 = vmul.f32 %v19748_v30, %v7777_v52  ;;  %v19799_v1 = vmul.f32 0.70710677, %v19781_v32 }
 0x85a   : > { %v7047_v63 = vmul.f32 1.0614054, %v19792_v59  ;;  %13578 = vrcp.f32 %v6751_v14  ;;  %v13575_v29 = vpop.eup %13574  ;;  %v9539_v40 = vsel %vm9245_vm2, %v9098_v53, %v9392_v45  ;;  %v8220_v36 = vmul.f32 %v19741_v17, %v8073_v44 }
 0x85b   : > { %v7337_v5 = vmul.f32 %v19776_v57, %v7190_v22  ;;  %v6605_v2 = vmul.f32 0.3275911, %v19787_v24  ;;  %v9833_v50 = vadd.f32 1.0, %v9539_v40  ;;  %v8071_v27 = vadd.f32 0.2548296, %v7924_v15 }
 0x85c   : > { %13580 = vpow2.f32 %v8790_v41  ;;  %v7194_v12 = vadd.f32 -1.4531521, %v7047_v63  ;;  %v8955_v31 = vmul.f32 %v13575_v29, %v8220_v36  ;;  %v8368_v4 = vsub.f32 0.0, %v6457_v54  ;;  %v13577_v9 = vpop.eup %13576 }
 0x85d   : > { %v7484_v21 = vadd.f32 1.4214138, %v7337_v5  ;;  %v6752_v3 = vadd.f32 1.0, %v6605_v2  ;;  %v9980_v48 = vmul.f32 %v9833_v50, %v9686_v46  ;;  %v8218_v37 = vmul.f32 %v19748_v30, %v8071_v27 }
 0x85e   : > { %v7341_v0 = vmul.f32 %v19792_v59, %v7194_v12  ;;  %v19807_v17 = vand.u32 2147483647, %v19799_v1  ;;  %v9102_v60 = vsub.f32 1.0, %v8955_v31  ;;  %vm9247_vm4 = vcmp.ge.f32.partialorder %v19695_v34, 0.0 }
 0x85f   : > { %v7631_v53 = vmul.f32 %v19776_v57, %v7484_v21  ;;  %13582 = vrcp.f32 %v6752_v3  ;;  %10127 = vst [vmem:[%s16725_s9 + $0x3f8] sm:$0xff] %v9980_v48  ;;  %v8953_v41 = vmul.f32 %v13577_v9, %v8218_v37  ;;  %v9688_v35 = vmul.f32 0.5, %v19682_v33 }
 0x860   : > { %v7488_v19 = vadd.f32 1.4214138, %v7341_v0  ;;  %v6609_v46 = vmul.f32 0.3275911, %v19807_v17  ;;  %v9396_v52 = vsub.f32 0.0, %v9102_v60  ;;  %v19815_v14 = vmul.f32 0.5, %v19718_v6 }
 0x861   : > { %v7778_v30 = vadd.f32 -0.28449672, %v7631_v53  ;;  %13584 = vpow2.f32 %v8798_v10  ;;  %v9100_v45 = vsub.f32 1.0, %v8953_v41  ;;  %v8515_v22 = vmul.f32 %v8368_v4, %v6457_v54 }
 0x862   : > { %v7635_v44 = vmul.f32 %v19792_v59, %v7488_v19  ;;  %v6756_v15 = vadd.f32 1.0, %v6609_v46  ;;  %v9543_v63 = vsel %vm9249_vm3, %v9102_v60, %v9396_v52  ;;  %v8369_v33 = vsub.f32 0.0, %v19787_v24 }
 0x863   : > { %v7925_v29 = vmul.f32 %v19776_v57, %v7778_v30  ;;  %v19824_v40 = vadd.f32 %v19376_v47, %v16494_v26  ;;  %v9837_v6 = vadd.f32 1.0, %v9543_v63  ;;  %v9394_v10 = vsub.f32 0.0, %v9100_v45 }
 0x864   : > { %v19826_v36 = vpop.eup %13578  ;;  %v7782_v5 = vadd.f32 -0.28449672, %v7635_v44  ;;  %13586 = vrcp.f32 %v6756_v15  ;;  %v19829_v2 = vmul.f32 0.5, %v19728_v16  ;;  %v19834_v50 = vadd.f32 %v19394_v23, %v16496_v13 }
 0x865   : > { %v8072_v54 = vadd.f32 0.2548296, %v7925_v29  ;;  %v7045_v56 = vmul.f32 1.0614054, %v19826_v36  ;;  %v9984_v47 = vmul.f32 %v9837_v6, %v19790_v18  ;;  %v9541_v12 = vsel %vm9247_vm4, %v9100_v45, %v9394_v10 }
 0x866   : > { %v13581_v27 = vpop.eup %13580  ;;  %vm9248_vm5 = vcmp.ge.f32.partialorder %v19724_v43, 0.0  ;;  %v7929_v31 = vmul.f32 %v19792_v59, %v7782_v5  ;;  %v19842_v21 = vmul.f32 0.70710677, %v19824_v40  ;;  %v9835_v16 = vadd.f32 1.0, %v9541_v12 }
 0x867   : > { %v8219_v4 = vmul.f32 %v19776_v57, %v8072_v54  ;;  %v7192_v3 = vadd.f32 -1.4531521, %v7045_v56  ;;  %v8794_v9 = vmul.f32 1.442695, %v8515_v22  ;;  %10131 = vst [vmem:[%s16725_s9 + $0x418] sm:$0xff] %v9984_v47  ;;  %v8516_v18 = vmul.f32 %v8369_v33, %v19787_v24 }
 0x868   : > { %v8076_v23 = vadd.f32 0.2548296, %v7929_v31  ;;  %v8373_v34 = vsub.f32 0.0, %v19807_v17  ;;  %v6460_v48 = vand.u32 2147483647, %v19842_v21  ;;  %v9982_v0 = vmul.f32 %v9835_v16, %v9688_v35 }
 0x869   : > { %v19849_v37 = vpop.eup %13582  ;;  %v8954_v60 = vmul.f32 %v13581_v27, %v8219_v4  ;;  %vm9252_vm6 = vcmp.ge.f32.partialorder %v19735_v51, 0.0  ;;  %v7339_v53 = vmul.f32 %v19826_v36, %v7192_v3  ;;  %v19854_v57 = vmul.f32 0.70710677, %v19834_v50 }
 0x86a   : > { %v8223_v41 = vmul.f32 %v19792_v59, %v8076_v23  ;;  %v19858_v19 = vmul.f32 0.5, %v19757_v55  ;;  %v7046_v24 = vmul.f32 1.0614054, %v19849_v37  ;;  %v6607_v46 = vmul.f32 0.3275911, %v6460_v48  ;;  %10129 = vst [vmem:[%s16725_s9 + $0x408] sm:$0xff] %v9982_v0 }
 0x86b   : > { %v13585_v52 = vpop.eup %13584  ;;  %v9101_v30 = vsub.f32 1.0, %v8954_v60  ;;  %v7486_v35 = vadd.f32 1.4214138, %v7339_v53  ;;  %13588 = vpow2.f32 %v8794_v9  ;;  %v6461_v45 = vand.u32 2147483647, %v19854_v57 }
 0x86c   : > { %v8958_v44 = vmul.f32 %v13585_v52, %v8223_v41  ;;  %v7193_v22 = vadd.f32 -1.4531521, %v7046_v24  ;;  %v8796_v15 = vmul.f32 1.442695, %v8516_v18  ;;  %v6754_v63 = vadd.f32 1.0, %v6607_v46 }
 0x86d   : > { %v9395_v29 = vsub.f32 0.0, %v9101_v30  ;;  %v7633_v59 = vmul.f32 %v19826_v36, %v7486_v35  ;;  %v8520_v55 = vmul.f32 %v8373_v34, %v19807_v17  ;;  %v6608_v33 = vmul.f32 0.3275911, %v6461_v45 }
 0x86e   : > { %v19865_v6 = vpop.eup %13586  ;;  %v9105_v10 = vsub.f32 1.0, %v8958_v44  ;;  %v7340_v5 = vmul.f32 %v19849_v37, %v7193_v22  ;;  %13590 = vrcp.f32 %v6754_v63  ;;  %v8371_v54 = vsub.f32 0.0, %v6460_v48 }
 0x86f   : > { %v9542_v56 = vsel %vm9248_vm5, %v9101_v30, %v9395_v29  ;;  %v7780_v27 = vadd.f32 -0.28449672, %v7633_v59  ;;  %v7050_v47 = vmul.f32 1.0614054, %v19865_v6  ;;  %v6755_v12 = vadd.f32 1.0, %v6608_v33 }
 0x870   : > { %v9836_v31 = vadd.f32 1.0, %v9542_v56  ;;  %v9399_v16 = vsub.f32 0.0, %v9105_v10  ;;  %v7487_v4 = vadd.f32 1.4214138, %v7340_v5  ;;  %13592 = vpow2.f32 %v8796_v15 }
 0x871   : > { %v7927_v17 = vmul.f32 %v19826_v36, %v7780_v27  ;;  %v7197_v3 = vadd.f32 -1.4531521, %v7050_v47  ;;  %v8804_v9 = vmul.f32 1.442695, %v8520_v55  ;;  %13594 = vrcp.f32 %v6755_v12 }
 0x872   : > { %v9983_v23 = vmul.f32 %v9836_v31, %v19815_v14  ;;  %v9546_v43 = vsel %vm9252_vm6, %v9105_v10, %v9399_v16  ;;  %v7634_v18 = vmul.f32 %v19849_v37, %v7487_v4  ;;  %v8372_v34 = vsub.f32 0.0, %v6461_v45 }
 0x873   : > { %v9840_v0 = vadd.f32 1.0, %v9546_v43  ;;  %v8074_v60 = vadd.f32 0.2548296, %v7927_v17  ;;  %v7344_v53 = vmul.f32 %v19865_v6, %v7197_v3  ;;  %v8518_v41 = vmul.f32 %v8371_v54, %v6460_v48 }
 0x874   : > { %10130 = vst [vmem:[%s16725_s9 + $0x410] sm:$0xff] %v9983_v23  ;;  %v7781_v24 = vadd.f32 -0.28449672, %v7634_v18  ;;  %v19880_v46 = vadd.f32 %v19435_v58, %v16492_v25  ;;  %v19884_v14 = vadd.f32 %v19450_v11, %v16494_v26  ;;  %v19888_v51 = vadd.f32 %v19475_v61, %v16496_v13 }
 0x875   : > { %v13589_v52 = vpop.eup %13588  ;;  %v9987_v30 = vmul.f32 %v9840_v0, %v19829_v2  ;;  %v8221_v35 = vmul.f32 %v19826_v36, %v8074_v60  ;;  %v7491_v48 = vadd.f32 1.4214138, %v7344_v53  ;;  %13596 = vpow2.f32 %v8804_v9 }
 0x876   : > { %v7928_v44 = vmul.f32 %v19849_v37, %v7781_v24  ;;  %v8519_v22 = vmul.f32 %v8372_v34, %v6461_v45  ;;  %v19894_v58 = vmul.f32 0.70710677, %v19880_v46  ;;  %v19897_v11 = vmul.f32 0.70710677, %v19884_v14 }
 0x877   : > { %10134 = vst [vmem:[%s16725_s9 + $0x430] sm:$0xff] %v9987_v30  ;;  %v8956_v15 = vmul.f32 %v13589_v52, %v8221_v35  ;;  %vm9250_vm7 = vcmp.ge.f32.partialorder %v19767_v42, 0.0  ;;  %v7638_v61 = vmul.f32 %v19865_v6, %v7491_v48  ;;  %v8800_v2 = vmul.f32 1.442695, %v8518_v41 }
 0x878   : > { %v19902_v63 = vpop.eup %13590  ;;  %v8075_v36 = vadd.f32 0.2548296, %v7928_v44  ;;  %v6465_v29 = vand.u32 2147483647, %v19894_v58  ;;  %v19906_v45 = vmul.f32 0.70710677, %v19888_v51 }
 0x879   : > { %v9103_v59 = vsub.f32 1.0, %v8956_v15  ;;  %v9692_v55 = vmul.f32 0.5, %v19761_v39  ;;  %v7785_v33 = vadd.f32 -0.28449672, %v7638_v61  ;;  %v7048_v10 = vmul.f32 1.0614054, %v19902_v63 }
 0x87a   : > { %v13593_v5 = vpop.eup %13592  ;;  %v8222_v54 = vmul.f32 %v19849_v37, %v8075_v36  ;;  %v8802_v56 = vmul.f32 1.442695, %v8519_v22  ;;  %v6612_v27 = vmul.f32 0.3275911, %v6465_v29  ;;  %v6463_v47 = vand.u32 2147483647, %v19897_v11 }
 0x87b   : > { %v19912_v12 = vpop.eup %13594  ;;  %v9397_v31 = vsub.f32 0.0, %v9103_v59  ;;  %v7932_v16 = vmul.f32 %v19865_v6, %v7785_v33  ;;  %v7195_v4 = vadd.f32 -1.4531521, %v7048_v10  ;;  %v8376_v17 = vsub.f32 0.0, %v6465_v29 }
 0x87c   : > { %v8957_v3 = vmul.f32 %v13593_v5, %v8222_v54  ;;  %v7049_v39 = vmul.f32 1.0614054, %v19912_v12  ;;  %v6759_v9 = vadd.f32 1.0, %v6612_v27  ;;  %v19917_v23 = vand.u32 2147483647, %v19906_v45 }
 0x87d   : > { %v9544_v37 = vsel %vm9250_vm7, %v9103_v59, %v9397_v31  ;;  %v8079_v43 = vadd.f32 0.2548296, %v7932_v16  ;;  %v7342_v18 = vmul.f32 %v19902_v63, %v7195_v4  ;;  %v6610_v34 = vmul.f32 0.3275911, %v6463_v47 }
 0x87e   : > { %v9838_v0 = vadd.f32 1.0, %v9544_v37  ;;  %v9104_v60 = vsub.f32 1.0, %v8957_v3  ;;  %v7196_v53 = vadd.f32 -1.4531521, %v7049_v39  ;;  %13598 = vrcp.f32 %v6759_v9 }
 0x87f   : > { %v13597_v41 = vpop.eup %13596  ;;  %vm9251_vm8 = vcmp.ge.f32.partialorder %v19774_v8, 0.0  ;;  %v8226_v24 = vmul.f32 %v19865_v6, %v8079_v43  ;;  %v7489_v52 = vadd.f32 1.4214138, %v7342_v18  ;;  %v6757_v30 = vadd.f32 1.0, %v6610_v34 }
 0x880   : > { %v9985_v35 = vmul.f32 %v9838_v0, %v19858_v19  ;;  %v9398_v42 = vsub.f32 0.0, %v9104_v60  ;;  %13600 = vpow2.f32 %v8800_v2  ;;  %v7343_v48 = vmul.f32 %v19912_v12, %v7196_v53 }
 0x881   : > { %v8961_v44 = vmul.f32 %v13597_v41, %v8226_v24  ;;  %v7636_v22 = vmul.f32 %v19902_v63, %v7489_v52  ;;  %13602 = vpow2.f32 %v8802_v56  ;;  %v6611_v15 = vmul.f32 0.3275911, %v19917_v23 }
 0x882   : > { %10132 = vst [vmem:[%s16725_s9 + $0x420] sm:$0xff] %v9985_v35  ;;  %v9545_v61 = vsel %vm9251_vm8, %v9104_v60, %v9398_v42  ;;  %v7490_v36 = vadd.f32 1.4214138, %v7343_v48  ;;  %v8523_v8 = vmul.f32 %v8376_v17, %v6465_v29  ;;  %13604 = vrcp.f32 %v6757_v30 }
 0x883   : > { %v9839_v6 = vadd.f32 1.0, %v9545_v61  ;;  %v9108_v59 = vsub.f32 1.0, %v8961_v44  ;;  %v7783_v33 = vadd.f32 -0.28449672, %v7636_v22  ;;  %v6758_v19 = vadd.f32 1.0, %v6611_v15 }
 0x884   : > { %v7637_v2 = vmul.f32 %v19912_v12, %v7490_v36  ;;  %v8374_v10 = vsub.f32 0.0, %v6463_v47  ;;  %vm9255_vm9 = vcmp.ge.f32.partialorder %v19799_v1, 0.0  ;;  %v9696_v56 = vmul.f32 0.5, %v19781_v32 }
 0x885   : > { %v9986_v5 = vmul.f32 %v9839_v6, %v9692_v55  ;;  %v9402_v54 = vsub.f32 0.0, %v9108_v59  ;;  %v7930_v27 = vmul.f32 %v19902_v63, %v7783_v33  ;;  %13606 = vrcp.f32 %v6758_v19 }
 0x886   : > { %v7784_v31 = vadd.f32 -0.28449672, %v7637_v2  ;;  %v19935_v29 = vadd.f32 %v19497_v49, %v16492_v25  ;;  %v8810_v17 = vmul.f32 1.442695, %v8523_v8  ;;  %v19940_v55 = vadd.f32 %v19518_v62, %v16494_v26 }
 0x887   : > { %10133 = vst [vmem:[%s16725_s9 + $0x428] sm:$0xff] %v9986_v5  ;;  %v9549_v16 = vsel %vm9255_vm9, %v9108_v59, %v9402_v54  ;;  %v8077_v4 = vadd.f32 0.2548296, %v7930_v27  ;;  %vm9253_vm10 = vcmp.ge.f32.partialorder %v19842_v21, 0.0  ;;  %v8521_v1 = vmul.f32 %v8374_v10, %v6463_v47 }
 0x888   : > { %v19942_v3 = vpop.eup %13598  ;;  %v9843_v39 = vadd.f32 1.0, %v9549_v16  ;;  %v7931_v32 = vmul.f32 %v19912_v12, %v7784_v31  ;;  %v19947_v9 = vmul.f32 0.70710677, %v19935_v29  ;;  %v9694_v37 = vmul.f32 0.5, %v19824_v40 }
 0x889   : > { %v8224_v49 = vmul.f32 %v19902_v63, %v8077_v4  ;;  %v7053_v43 = vmul.f32 1.0614054, %v19942_v3  ;;  %v19953_v62 = vmul.f32 0.70710677, %v19940_v55  ;;  %v8375_v60 = vsub.f32 0.0, %v19917_v23 }
 0x88a   : > { %v13601_v18 = vpop.eup %13600  ;;  %v9990_v34 = vmul.f32 %v9843_v39, %v9696_v56  ;;  %v8078_v0 = vadd.f32 0.2548296, %v7931_v32  ;;  %v6468_v47 = vand.u32 2147483647, %v19947_v9  ;;  %vm9254_vm11 = vcmp.ge.f32.partialorder %v19854_v57, 0.0 }
 0x88b   : > { %v13603_v53 = vpop.eup %13602  ;;  %v8959_v41 = vmul.f32 %v13601_v18, %v8224_v49  ;;  %v9695_v63 = vmul.f32 0.5, %v19834_v50  ;;  %v7200_v24 = vadd.f32 -1.4531521, %v7053_v43  ;;  %v6466_v40 = vand.u32 2147483647, %v19953_v62 }
 0x88c   : > { %v19960_v52 = vpop.eup %13604  ;;  %10137 = vst [vmem:[%s16725_s9 + $0x448] sm:$0xff] %v9990_v34  ;;  %v8225_v30 = vmul.f32 %v19912_v12, %v8078_v0  ;;  %13608 = vpow2.f32 %v8810_v17  ;;  %v8806_v35 = vmul.f32 1.442695, %v8521_v1  ;;  %v6615_v42 = vmul.f32 0.3275911, %v6468_v47 }
 0x88d   : > { %v9106_v48 = vsub.f32 1.0, %v8959_v41  ;;  %v7347_v44 = vmul.f32 %v19942_v3, %v7200_v24  ;;  %v7051_v22 = vmul.f32 1.0614054, %v19960_v52  ;;  %v6613_v15 = vmul.f32 0.3275911, %v6466_v40 }
 0x88e   : > { %v8960_v61 = vmul.f32 %v13603_v53, %v8225_v30  ;;  %v8522_v50 = vmul.f32 %v8375_v60, %v19917_v23  ;;  %v6762_v36 = vadd.f32 1.0, %v6615_v42  ;;  %v19969_v8 = vadd.f32 %v19556_v7, %v16496_v13 }
 0x88f   : > { %v19971_v6 = vpop.eup %13606  ;;  %v9400_v12 = vsub.f32 0.0, %v9106_v48  ;;  %v7494_v59 = vadd.f32 1.4214138, %v7347_v44  ;;  %v7198_v33 = vadd.f32 -1.4531521, %v7051_v22  ;;  %v6760_v19 = vadd.f32 1.0, %v6613_v15 }
 0x890   : > { %v9107_v2 = vsub.f32 1.0, %v8960_v61  ;;  %v7052_v10 = vmul.f32 1.0614054, %v19971_v6  ;;  %13610 = vrcp.f32 %v6762_v36  ;;  %v8379_v5 = vsub.f32 0.0, %v6468_v47 }
 0x891   : > { %v9547_v54 = vsel %vm9253_vm10, %v9106_v48, %v9400_v12  ;;  %v7641_v23 = vmul.f32 %v19942_v3, %v7494_v59  ;;  %v7345_v27 = vmul.f32 %v19960_v52, %v7198_v33  ;;  %13612 = vrcp.f32 %v6760_v19 }
 0x892   : > { %v9841_v7 = vadd.f32 1.0, %v9547_v54  ;;  %v9401_v56 = vsub.f32 0.0, %v9107_v2  ;;  %v7199_v31 = vadd.f32 -1.4531521, %v7052_v10  ;;  %v8808_v16 = vmul.f32 1.442695, %v8522_v50 }
 0x893   : > { %v7788_v4 = vadd.f32 -0.28449672, %v7641_v23  ;;  %v7492_v17 = vadd.f32 1.4214138, %v7345_v27  ;;  %13614 = vpow2.f32 %v8806_v35  ;;  %v8377_v39 = vsub.f32 0.0, %v6466_v40 }
 0x894   : > { %v9988_v32 = vmul.f32 %v9841_v7, %v9694_v37  ;;  %v9548_v1 = vsel %vm9254_vm11, %v9107_v2, %v9401_v56  ;;  %v7346_v21 = vmul.f32 %v19971_v6, %v7199_v31  ;;  %v19982_v49 = vmul.f32 0.70710677, %v19969_v8 }
 0x895   : > { %v9842_v43 = vadd.f32 1.0, %v9548_v1  ;;  %v7935_v18 = vmul.f32 %v19942_v3, %v7788_v4  ;;  %v7639_v34 = vmul.f32 %v19960_v52, %v7492_v17  ;;  %v8526_v0 = vmul.f32 %v8379_v5, %v6468_v47 }
 0x896   : > { %v13609_v60 = vpop.eup %13608  ;;  %10135 = vst [vmem:[%s16725_s9 + $0x438] sm:$0xff] %v9988_v32  ;;  %v7493_v53 = vadd.f32 1.4214138, %v7346_v21  ;;  %13616 = vpow2.f32 %v8808_v16  ;;  %v19988_v37 = vand.u32 2147483647, %v19982_v49  ;;  %v8524_v30 = vmul.f32 %v8377_v39, %v6466_v40 }
 0x897   : > { %v9989_v57 = vmul.f32 %v9842_v43, %v9695_v63  ;;  %v8082_v41 = vadd.f32 0.2548296, %v7935_v18  ;;  %v7786_v24 = vadd.f32 -0.28449672, %v7639_v34  ;;  %v9699_v35 = vmul.f32 0.5, %v19880_v46 }
 0x898   : > { %v7640_v42 = vmul.f32 %v19971_v6, %v7493_v53  ;;  %v6614_v48 = vmul.f32 0.3275911, %v19988_v37  ;;  %v19995_v47 = vadd.f32 %v19569_v20, %v16492_v25  ;;  %v20001_v63 = vmul.f32 0.5, %v19884_v14 }
 0x899   : > { %10136 = vst [vmem:[%s16725_s9 + $0x440] sm:$0xff] %v9989_v57  ;;  %v8229_v44 = vmul.f32 %v19942_v3, %v8082_v41  ;;  %v7933_v22 = vmul.f32 %v19960_v52, %v7786_v24  ;;  %v8816_v15 = vmul.f32 1.442695, %v8526_v0  ;;  %vm9258_vm12 = vcmp.ge.f32.partialorder %v19894_v58, 0.0 }
 0x89a   : > { %v20003_v40 = vpop.eup %13610  ;;  %v7787_v46 = vadd.f32 -0.28449672, %v7640_v42  ;;  %v6761_v61 = vadd.f32 1.0, %v6614_v48  ;;  %v20007_v50 = vmul.f32 0.70710677, %v19995_v47  ;;  %v20016_v33 = vadd.f32 %v19589_v28, %v16494_v26 }
 0x89b   : > { %v20009_v25 = vpop.eup %13612  ;;  %v8964_v20 = vmul.f32 %v13609_v60, %v8229_v44  ;;  %v8080_v36 = vadd.f32 0.2548296, %v7933_v22  ;;  %v7056_v3 = vmul.f32 1.0614054, %v20003_v40  ;;  %v8812_v12 = vmul.f32 1.442695, %v8524_v30 }
 0x89c   : > { %v7934_v14 = vmul.f32 %v19971_v6, %v7787_v46  ;;  %v7054_v59 = vmul.f32 1.0614054, %v20009_v25  ;;  %13618 = vrcp.f32 %v6761_v61  ;;  %v20020_v54 = vand.u32 2147483647, %v20007_v50 }
 0x89d   : > { %v13615_v19 = vpop.eup %13614  ;;  %v9111_v2 = vsub.f32 1.0, %v8964_v20  ;;  %v8227_v10 = vmul.f32 %v19960_v52, %v8080_v36  ;;  %v7203_v5 = vadd.f32 -1.4531521, %v7056_v3  ;;  %vm9256_vm13 = vcmp.ge.f32.partialorder %v19897_v11, 0.0 }
 0x89e   : > { %v8081_v23 = vadd.f32 0.2548296, %v7934_v14  ;;  %13620 = vpow2.f32 %v8816_v15  ;;  %v7201_v27 = vadd.f32 -1.4531521, %v7054_v59  ;;  %v6618_v26 = vmul.f32 0.3275911, %v20020_v54 }
 0x89f   : > { %v9405_v7 = vsub.f32 0.0, %v9111_v2  ;;  %v8962_v56 = vmul.f32 %v13615_v19, %v8227_v10  ;;  %v7350_v31 = vmul.f32 %v20003_v40, %v7203_v5  ;;  %13622 = vpow2.f32 %v8812_v12 }
 0x8a0   : > { %v13617_v28 = vpop.eup %13616  ;;  %v8228_v16 = vmul.f32 %v19971_v6, %v8081_v23  ;;  %v7348_v52 = vmul.f32 %v20009_v25, %v7201_v27  ;;  %v20028_v4 = vmul.f32 0.70710677, %v20016_v33  ;;  %v6765_v1 = vadd.f32 1.0, %v6618_v26 }
 0x8a1   : > { %v9552_v17 = vsel %vm9258_vm12, %v9111_v2, %v9405_v7  ;;  %v9109_v39 = vsub.f32 1.0, %v8962_v56  ;;  %v7497_v32 = vadd.f32 1.4214138, %v7350_v31  ;;  %v8378_v34 = vsub.f32 0.0, %v19988_v37 }
 0x8a2   : > { %v9846_v21 = vadd.f32 1.0, %v9552_v17  ;;  %v8963_v43 = vmul.f32 %v13617_v28, %v8228_v16  ;;  %v7495_v18 = vadd.f32 1.4214138, %v7348_v52  ;;  %13624 = vrcp.f32 %v6765_v1 }
 0x8a3   : > { %v9403_v0 = vsub.f32 0.0, %v9109_v39  ;;  %v7644_v6 = vmul.f32 %v20003_v40, %v7497_v32  ;;  %v20035_v60 = vand.u32 2147483647, %v20028_v4  ;;  %vm9257_vm14 = vcmp.ge.f32.partialorder %v19906_v45, 0.0 }
 0x8a4   : > { %v9993_v53 = vmul.f32 %v9846_v21, %v9699_v35  ;;  %v9110_v57 = vsub.f32 1.0, %v8963_v43  ;;  %v7642_v58 = vmul.f32 %v20009_v25, %v7495_v18  ;;  %v9698_v24 = vmul.f32 0.5, %v19888_v51 }
 0x8a5   : > { %v9550_v41 = vsel %vm9256_vm13, %v9109_v39, %v9403_v0  ;;  %v7791_v30 = vadd.f32 -0.28449672, %v7644_v6  ;;  %v6616_v42 = vmul.f32 0.3275911, %v20035_v60  ;;  %v8525_v35 = vmul.f32 %v8378_v34, %v19988_v37 }
 0x8a6   : > { %v20043_v48 = vpop.eup %13618  ;;  %10140 = vst [vmem:[%s16725_s9 + $0x460] sm:$0xff] %v9993_v53  ;;  %v9844_v44 = vadd.f32 1.0, %v9550_v41  ;;  %v9404_v22 = vsub.f32 0.0, %v9110_v57  ;;  %v7789_v15 = vadd.f32 -0.28449672, %v7642_v58  ;;  %v20051_v51 = vadd.f32 %v19637_v38, %v16496_v13 }
 0x8a7   : > { %v7938_v46 = vmul.f32 %v20003_v40, %v7791_v30  ;;  %v7055_v61 = vmul.f32 1.0614054, %v20043_v48  ;;  %v6763_v11 = vadd.f32 1.0, %v6616_v42  ;;  %v8382_v37 = vsub.f32 0.0, %v20020_v54 }
 0x8a8   : > { %v13621_v20 = vpop.eup %13620  ;;  %v9991_v36 = vmul.f32 %v9844_v44, %v20001_v63  ;;  %v9551_v3 = vsel %vm9257_vm14, %v9110_v57, %v9404_v22  ;;  %v7936_v12 = vmul.f32 %v20009_v25, %v7789_v15  ;;  %v8814_v13 = vmul.f32 1.442695, %v8525_v35 }
 0x8a9   : > { %v9845_v14 = vadd.f32 1.0, %v9551_v3  ;;  %v8085_v59 = vadd.f32 0.2548296, %v7938_v46  ;;  %v7202_v19 = vadd.f32 -1.4531521, %v7055_v61  ;;  %13626 = vrcp.f32 %v6763_v11  ;;  %v13623_v2 = vpop.eup %13622 }
 0x8aa   : > { %10138 = vst [vmem:[%s16725_s9 + $0x450] sm:$0xff] %v9991_v36  ;;  %v8083_v10 = vadd.f32 0.2548296, %v7936_v12  ;;  %v20062_v45 = vmul.f32 0.70710677, %v20051_v51  ;;  %v8529_v31 = vmul.f32 %v8382_v37, %v20020_v54  ;;  %13628 = vpow2.f32 %v8814_v13 }
 0x8ab   : > { %v9992_v38 = vmul.f32 %v9845_v14, %v9698_v24  ;;  %v8232_v5 = vmul.f32 %v20003_v40, %v8085_v59  ;;  %v7349_v63 = vmul.f32 %v20043_v48, %v7202_v19  ;;  %v8380_v17 = vsub.f32 0.0, %v20035_v60 }
 0x8ac   : > { %v8230_v23 = vmul.f32 %v20009_v25, %v8083_v10  ;;  %v13625_v27 = vpop.eup %13624  ;;  %v6470_v26 = vand.u32 2147483647, %v20062_v45  ;;  %v9702_v32 = vmul.f32 0.5, %v19935_v29  ;;  %v8822_v18 = vmul.f32 1.442695, %v8529_v31 }
 0x8ad   : > { %10139 = vst [vmem:[%s16725_s9 + $0x458] sm:$0xff] %v9992_v38  ;;  %v8967_v7 = vmul.f32 %v13621_v20, %v8232_v5  ;;  %v7496_v56 = vadd.f32 1.4214138, %v7349_v63  ;;  %v7059_v16 = vmul.f32 1.0614054, %v13625_v27  ;;  %vm9261_vm15 = vcmp.ge.f32.partialorder %v19947_v9, 0.0 }
 0x8ae   : > { %v8965_v28 = vmul.f32 %v13623_v2, %v8230_v23  ;;  %v6617_v39 = vmul.f32 0.3275911, %v6470_v26  ;;  %vm9259_vm0 = vcmp.ge.f32.partialorder %v19953_v62, 0.0  ;;  %v8527_v58 = vmul.f32 %v8380_v17, %v20035_v60 }
 0x8af   : > { %v9114_v52 = vsub.f32 1.0, %v8967_v7  ;;  %v7643_v40 = vmul.f32 %v20043_v48, %v7496_v56  ;;  %v7206_v1 = vadd.f32 -1.4531521, %v7059_v16  ;;  %v9700_v42 = vmul.f32 0.5, %v19940_v55 }
 0x8b0   : > { %v9112_v25 = vsub.f32 1.0, %v8965_v28  ;;  %v6764_v34 = vadd.f32 1.0, %v6617_v39  ;;  %v8818_v61 = vmul.f32 1.442695, %v8527_v58  ;;  %v8381_v3 = vsub.f32 0.0, %v6470_v26 }
 0x8b1   : > { %v9408_v21 = vsub.f32 0.0, %v9114_v52  ;;  %v7790_v43 = vadd.f32 -0.28449672, %v7643_v40  ;;  %v7353_v0 = vmul.f32 %v13625_v27, %v7206_v1  ;;  %vm9260_vm1 = vcmp.ge.f32.partialorder %v19982_v49, 0.0 }
 0x8b2   : > { %v9406_v54 = vsub.f32 0.0, %v9112_v25  ;;  %13630 = vrcp.f32 %v6764_v34  ;;  %v8528_v10 = vmul.f32 %v8381_v3, %v6470_v26  ;;  %v9701_v23 = vmul.f32 0.5, %v19969_v8 }
 0x8b3   : > { %v13627_v6 = vpop.eup %13626  ;;  %v9555_v53 = vsel %vm9261_vm15, %v9114_v52, %v9408_v21  ;;  %v7937_v57 = vmul.f32 %v20043_v48, %v7790_v43  ;;  %v7500_v24 = vadd.f32 1.4214138, %v7353_v0  ;;  %13632 = vpow2.f32 %v8822_v18 }
 0x8b4   : > { %v9849_v29 = vadd.f32 1.0, %v9555_v53  ;;  %v9553_v41 = vsel %vm9259_vm0, %v9112_v25, %v9406_v54  ;;  %v7057_v30 = vmul.f32 1.0614054, %v13627_v6  ;;  %v13629_v60 = vpop.eup %13628  ;;  %13634 = vpow2.f32 %v8818_v61 }
 0x8b5   : > { %v9847_v9 = vadd.f32 1.0, %v9553_v41  ;;  %v8084_v44 = vadd.f32 0.2548296, %v7937_v57  ;;  %v7647_v22 = vmul.f32 %v13625_v27, %v7500_v24  ;;  %v8820_v16 = vmul.f32 1.442695, %v8528_v10 }
 0x8b6   : > { %v9996_v62 = vmul.f32 %v9849_v29, %v9702_v32  ;;  %v7204_v15 = vadd.f32 -1.4531521, %v7057_v30  ;;  %vm9264_vm2 = vcmp.ge.f32.partialorder %v20007_v50, 0.0  ;;  %v9705_v21 = vmul.f32 0.5, %v19995_v47 }
 0x8b7   : > { %v9994_v35 = vmul.f32 %v9847_v9, %v9700_v42  ;;  %v8231_v46 = vmul.f32 %v20043_v48, %v8084_v44  ;;  %v7794_v11 = vadd.f32 -0.28449672, %v7647_v22  ;;  %13636 = vpow2.f32 %v8820_v16 }
 0x8b8   : > { %10143 = vst [vmem:[%s16725_s9 + $0x478] sm:$0xff] %v9996_v62  ;;  %v7351_v20 = vmul.f32 %v13627_v6, %v7204_v15  ;;  %vm9262_vm3 = vcmp.ge.f32.partialorder %v20028_v4, 0.0  ;;  %v9703_v57 = vmul.f32 0.5, %v20016_v33  ;;  %vm9263_vm4 = vcmp.ge.f32.partialorder %v20062_v45, 0.0 }
 0x8b9   : > { %10141 = vst [vmem:[%s16725_s9 + $0x468] sm:$0xff] %v9994_v35  ;;  %v8966_v36 = vmul.f32 %v13629_v60, %v8231_v46  ;;  %v7941_v12 = vmul.f32 %v13625_v27, %v7794_v11  ;;  %v9704_v9 = vmul.f32 0.5, %v20051_v51 }
 0x8ba   : > { %v7498_v37 = vadd.f32 1.4214138, %v7351_v20 }
 0x8bb   : > { %v9113_v55 = vsub.f32 1.0, %v8966_v36  ;;  %v8088_v14 = vadd.f32 0.2548296, %v7941_v12 }
 0x8bc   : > { %v7645_v59 = vmul.f32 %v13627_v6, %v7498_v37  ;;  %v13631_v19 = vpop.eup %13630 }
 0x8bd   : > { %v9407_v2 = vsub.f32 0.0, %v9113_v55  ;;  %v8235_v48 = vmul.f32 %v13625_v27, %v8088_v14  ;;  %v7058_v38 = vmul.f32 1.0614054, %v13631_v19  ;;  %v13633_v5 = vpop.eup %13632 }
 0x8be   : > { %v7792_v13 = vadd.f32 -0.28449672, %v7645_v59  ;;  %v13635_v32 = vpop.eup %13634 }
 0x8bf   : > { %v9554_v63 = vsel %vm9260_vm1, %v9113_v55, %v9407_v2  ;;  %v8970_v56 = vmul.f32 %v13633_v5, %v8235_v48  ;;  %v7205_v28 = vadd.f32 -1.4531521, %v7058_v38 }
 0x8c0   : > { %v9848_v7 = vadd.f32 1.0, %v9554_v63  ;;  %v7939_v31 = vmul.f32 %v13627_v6, %v7792_v13 }
 0x8c1   : > { %v9117_v40 = vsub.f32 1.0, %v8970_v56  ;;  %v7352_v39 = vmul.f32 %v13631_v19, %v7205_v28  ;;  %v13637_v47 = vpop.eup %13636 }
 0x8c2   : > { %v9995_v52 = vmul.f32 %v9848_v7, %v9701_v23  ;;  %v8086_v17 = vadd.f32 0.2548296, %v7939_v31 }
 0x8c3   : > { %v9411_v26 = vsub.f32 0.0, %v9117_v40  ;;  %v7499_v27 = vadd.f32 1.4214138, %v7352_v39 }
 0x8c4   : > { %10142 = vst [vmem:[%s16725_s9 + $0x470] sm:$0xff] %v9995_v52  ;;  %v8233_v49 = vmul.f32 %v13627_v6, %v8086_v17 }
 0x8c5   : > { %v9558_v25 = vsel %vm9264_vm2, %v9117_v40, %v9411_v26  ;;  %v7646_v1 = vmul.f32 %v13631_v19, %v7499_v27 }
 0x8c6   : > { %v8968_v8 = vmul.f32 %v13635_v32, %v8233_v49  ;;  %v9852_v43 = vadd.f32 1.0, %v9558_v25 }
 0x8c7   : > { %v7793_v34 = vadd.f32 -0.28449672, %v7646_v1 }
 0x8c8   : > { %v9115_v18 = vsub.f32 1.0, %v8968_v8  ;;  %v9999_v54 = vmul.f32 %v9852_v43, %v9705_v21 }
 0x8c9   : > { %v7940_v53 = vmul.f32 %v13631_v19, %v7793_v34 }
 0x8ca   : > { %v9409_v0 = vsub.f32 0.0, %v9115_v18  ;;  %10146 = vst [vmem:[%s16725_s9 + $0x490] sm:$0xff] %v9999_v54 }
 0x8cb   : > { %v8087_v50 = vadd.f32 0.2548296, %v7940_v53 }
 0x8cc   : > { %v9556_v6 = vsel %vm9262_vm3, %v9115_v18, %v9409_v0 }
 0x8cd   : > { %v9850_v58 = vadd.f32 1.0, %v9556_v6  ;;  %v8234_v29 = vmul.f32 %v13631_v19, %v8087_v50 }
 0x8cf   : > { %v9997_v41 = vmul.f32 %v9850_v58, %v9703_v57  ;;  %v8969_v24 = vmul.f32 %v13637_v47, %v8234_v29 }
 0x8d1   : > { %10144 = vst [vmem:[%s16725_s9 + $0x480] sm:$0xff] %v9997_v41  ;;  %v9116_v30 = vsub.f32 1.0, %v8969_v24 }
 0x8d3   : > { %v9410_v42 = vsub.f32 0.0, %v9116_v30 }
 0x8d5   : > { %v9557_v4 = vsel %vm9263_vm4, %v9116_v30, %v9410_v42 }
 0x8d6   : > { %v9851_v44 = vadd.f32 1.0, %v9557_v4 }
 0x8d8   : > { %v9998_v33 = vmul.f32 %v9851_v44, %v9704_v9 }
 0x8da   : > { %10145 = vst [vmem:[%s16725_s9 + $0x488] sm:$0xff] %v9998_v33 }
 0x8db   : > { %13651 = shalt.err (!%p13648_p3)
}
 0x8dc   : > { %s13652_s27 = scalar_lea.hbm %s20095_s19, 18816  ;;  %s13656_s4 = scalar_lea.hbm %s20146_s3, 150528 }
 0x8dd   : > { %p13653_p4 = scmp.ne.s32.totalorder %s20095_s19, %s13652_s27  ;;  %p13657_p9 = scmp.lt.u32.totalorder %s20095_s19, %s20146_s3 }
 0x8de   : > { %p13658_p10 = scmp.lt.u32.totalorder %s13656_s4, %s13652_s27  ;;  %p13660_p12 = scmp.lt.u32.totalorder %s13652_s27, %s20095_s19 }
 0x8df   : > { %p13654_p7 = pnand %p13653_p4, %p13766_p5 }
 0x8e0   : > { %p13659_p11 = por %p13658_p10, %p13657_p9 }
 0x8e1   : > { %p13655_p8 = pneg %p13654_p7 }
 0x8e2   : > { %p13661_p13 = por %p13660_p12, %p13659_p11 }
 0x8e4   : > { %p13662_p0 = pnand %p13661_p13, %p13655_p8 }
 0x8e6   : > { %13665 = shalt.err (!%p13662_p0)
}
 0x8e7   : > { %s13706_s7 = smov 384   ;;  %s13707_s8 = smov 24  }
 0x8e8   : > { %13005 = dma.vmem_to_hbm [thread:$0]  (%p13766_p5), %s20097_s10, 18816, %s20095_s19, %s20102_s16, %s13706_s7, %s13706_s7, %s13707_s8  }
 0x8e9 PF: > { %p13012_p1 = scmp.ge.s32.totalorder %s13700_s15, 2  ;;  %s10177_s9 = sand.u32 1, %s13688_s12  }
 0x8ea   : > { %s10178_s30 = scalar_lea.sflag [#allocation3], %s10177_s9 }
 0x8eb   : > { %p13008_p2 = pnand %p13012_p1, %p13770_p6 }
 0x8ed   : > { %13683 = dma.done.wait (!%p13008_p2), %s10178_s30, 18816  }
 0x8ee   : > { %13685 = vsyncadd (!%p13008_p2), %s10178_s30, 4294948480  ;;  %p13_p3 = scmp.ge.s32.totalorder %s13753_s18, 10   ;;  %s21000_s12 = smov %s13692_s13 }
 0x8ef   : > { %s21001_s13 = smov %s13696_s14  ;;  %s21002_s14 = smov %s13764_s21 }
 0x8f0   : > { %s21003_s15 = smov %s13753_s18  ;;  %15 = sbr.rel (!%p13_p3) target bundleno = 3 (0x3), region = 67 }
 0x8f7   :  { %10183 = vsyncpa [#allocation3], 1 }
 0x8f8   :  { %10185 = vsyncpa [#allocation3 + $0x1], 1 }

</bundles_post_ra>
